<compile_context>
chip_gen: v7x
topology: tpu7x:2x2x1
jax: 0.10.0
libtpu: 0.0.40
codegen_flags: <defaults>
</compile_context>

<pallas_src>
import math

import jax
import jax.numpy as jnp
from jax.experimental import pallas as pl
from jax.experimental.pallas import tpu as pltpu

ACT_DTYPE = jnp.bfloat16          # activations in HBM
WGT_DTYPE = jnp.bfloat16          # matmul weights
LANE = 128                        # TPU lane width (channel padding target)
VMEM_LIMIT_BYTES = 32 * 1024 * 1024   # explicit budget: fits v7x (64 MiB) and v5e/v6e (128 MiB)


def _round_up(x, m):
    return (x + m - 1) // m * m


def _pad_c(c):
    return _round_up(c, LANE)


def _compiler_params():
    return pltpu.CompilerParams(
        dimension_semantics=("parallel",),
        vmem_limit_bytes=VMEM_LIMIT_BYTES,
    )


# ----------------------------------------------------------------------------
# Pallas kernels
# ----------------------------------------------------------------------------
def _pw_relu6_kernel(x_ref, w_ref, b_ref, o_ref):
    # (TM, K) @ (K, N) + bias, ReLU6  (BN scale folded into W)
    y = jnp.dot(x_ref[...], w_ref[...], preferred_element_type=jnp.float32)
    o_ref[...] = jnp.clip(y + b_ref[...], 0.0, 6.0).astype(o_ref.dtype)


def _pw_linear_kernel(x_ref, w_ref, b_ref, o_ref):
    # projection conv: BN folded, no activation
    y = jnp.dot(x_ref[...], w_ref[...], preferred_element_type=jnp.float32)
    o_ref[...] = (y + b_ref[...]).astype(o_ref.dtype)


def _pw_linear_res_kernel(x_ref, w_ref, b_ref, r_ref, o_ref):
    # projection conv + fused residual add
    y = jnp.dot(x_ref[...], w_ref[...], preferred_element_type=jnp.float32)
    o_ref[...] = (y + b_ref[...] + r_ref[...].astype(jnp.float32)).astype(o_ref.dtype)


def _dw_s1_kernel(x_ref, w_ref, b_ref, o_ref):
    # Depthwise 3x3, stride 1.
    # x_ref: (1, Hp, Wp, C) padded input; w_ref: (9, C) (BN scale folded); b_ref: (1, C).
    # Taps are formed in-kernel from the VMEM block (no 9x HBM tap tensor).
    x = x_ref[0].astype(jnp.float32)
    ho, wo = o_ref.shape[1], o_ref.shape[2]
    acc = None
    for di in range(3):
        for dj in range(3):
            tap = x[di:di + ho, dj:dj + wo, :]
            term = tap * w_ref[3 * di + dj]
            acc = term if acc is None else acc + term
    o_ref[0] = jnp.clip(acc + b_ref[0], 0.0, 6.0).astype(o_ref.dtype)


def _dw_s2_kernel(x_ref, w_ref, b_ref, o_ref):
    # Depthwise 3x3, stride 2, on a phase-packed (space-to-depth) block.
    # x_ref: (1, ho+1, wo+1, 4*C); channel block p = 2*(row%2)+(col%2) holds that phase.
    x = x_ref[0].astype(jnp.float32)
    ho, wo, c = o_ref.shape[1], o_ref.shape[2], o_ref.shape[3]
    acc = None
    for di in range(3):
        for dj in range(3):
            p = 2 * (di % 2) + (dj % 2)
            oi, oj = di // 2, dj // 2
            tap = x[oi:oi + ho, oj:oj + wo, p * c:(p + 1) * c]
            term = tap * w_ref[3 * di + dj]
            acc = term if acc is None else acc + term
    o_ref[0] = jnp.clip(acc + b_ref[0], 0.0, 6.0).astype(o_ref.dtype)


# ----------------------------------------------------------------------------
# pallas_call wrappers
# ----------------------------------------------------------------------------
def pointwise_conv(x2d, w, bias, *, relu6, residual=None):
    """1x1 conv (or im2col'd conv) with folded BN (+ReLU6) (+fused residual).

    x2d: (M, K) bf16; w: (K, N) bf16 (scale folded); bias: (1, N) f32. N, K lane-dense.
    M is tiled with TM rows per grid step (software-pipelined, double-buffered).
    """
    m, k = x2d.shape
    n = w.shape[1]
    tm = 512 if m >= 512 else _round_up(max(m, 8), 8)
    m_pad = _round_up(m, tm)
    if m_pad != m:
        x2d = jnp.pad(x2d, ((0, m_pad - m), (0, 0)))
        if residual is not None:
            residual = jnp.pad(residual, ((0, m_pad - m), (0, 0)))
    grid = (m_pad // tm,)

    x_spec = pl.BlockSpec((tm, k), lambda i: (i, 0))
    w_spec = pl.BlockSpec((k, n), lambda i: (0, 0))     # resident across the grid
    b_spec = pl.BlockSpec((1, n), lambda i: (0, 0))
    o_spec = pl.BlockSpec((tm, n), lambda i: (i, 0))

    cost = pl.CostEstimate(
        flops=int(2 * m_pad * k * n),
        transcendentals=0,
        bytes_accessed=int(2 * (m_pad * k + k * n + m_pad * n) + 4 * n),
    )
    out_shape = jax.ShapeDtypeStruct((m_pad, n), ACT_DTYPE)

    if residual is not None:
        out = pl.pallas_call(
            _pw_linear_res_kernel,
            out_shape=out_shape,
            grid=grid,
            in_specs=[x_spec, w_spec, b_spec, pl.BlockSpec((tm, n), lambda i: (i, 0))],
            out_specs=o_spec,
            compiler_params=_compiler_params(),
            cost_estimate=cost,
        )(x2d, w, bias, residual)
    else:
        kern = _pw_relu6_kernel if relu6 else _pw_linear_kernel
        out = pl.pallas_call(
            kern,
            out_shape=out_shape,
            grid=grid,
            in_specs=[x_spec, w_spec, b_spec],
            out_specs=o_spec,
            compiler_params=_compiler_params(),
            cost_estimate=cost,
        )(x2d, w, bias)
    return out[:m] if m_pad != m else out


def _tf_same_pad_nhwc(x, k, s):
    """TF-'SAME' padding as in Conv2d_tf (extra pad goes bottom/right). x is NHWC."""
    _, h, w, _ = x.shape
    ho = -(-h // s)
    wo = -(-w // s)
    ph = max(0, (ho - 1) * s + k - h)
    pw = max(0, (wo - 1) * s + k - w)
    xp = jnp.pad(x, ((0, 0), (ph // 2, ph - ph // 2), (pw // 2, pw - pw // 2), (0, 0)))
    return xp, ho, wo


def depthwise_conv(x, w9, bias, stride):
    """Depthwise 3x3, TF-SAME pad, folded BN + ReLU6. x is NHWC (bf16, lane-padded C).

    Stride 1: the padded tensor streams straight into the kernel (taps sliced in VMEM).
    Stride 2: a 1x space-to-depth packs the 4 phases into channel blocks (no 9x tensor),
    then taps become plain shifted slices inside the kernel.
    """
    n, h, w, c = x.shape
    xp, ho, wo = _tf_same_pad_nhwc(x, 3, stride)
    if stride == 1:
        xin = xp
        kernel = _dw_s1_kernel
        in_block = (1, xp.shape[1], xp.shape[2], c)
    else:
        hp_t, wp_t = 2 * (ho + 1), 2 * (wo + 1)
        xp = jnp.pad(xp, ((0, 0), (0, hp_t - xp.shape[1]), (0, wp_t - xp.shape[2]), (0, 0)))
        xin = (xp.reshape(n, ho + 1, 2, wo + 1, 2, c)
                 .transpose(0, 1, 3, 2, 4, 5)
                 .reshape(n, ho + 1, wo + 1, 4 * c))
        kernel = _dw_s2_kernel
        in_block = (1, ho + 1, wo + 1, 4 * c)

    cost = pl.CostEstimate(
        flops=int(2 * 9 * n * ho * wo * c),
        transcendentals=0,
        bytes_accessed=int(2 * xin.size + 2 * n * ho * wo * c + 4 * 10 * c),
    )
    # TODO(synk): add spatial row tiling (halo blocks) for very large resolutions; at the
    #             sizes reached by this body a per-batch block fits comfortably in VMEM.
    return pl.pallas_call(
        kernel,
        out_shape=jax.ShapeDtypeStruct((n, ho, wo, c), x.dtype),
        grid=(n,),
        in_specs=[
            pl.BlockSpec(in_block, lambda i: (i, 0, 0, 0)),
            pl.BlockSpec(w9.shape, lambda i: (0, 0)),
            pl.BlockSpec(bias.shape, lambda i: (0, 0)),
        ],
        out_specs=pl.BlockSpec((1, ho, wo, c), lambda i: (i, 0, 0, 0)),
        compiler_params=_compiler_params(),
        cost_estimate=cost,
    )(xin, w9, bias)


def conv3x3_bn_relu6(x, w_mat, bias, stride):
    """Stem 3x3 conv via im2col + tiled Pallas matmul. x is NHWC bf16 (3 channels)."""
    n, h, w, c = x.shape
    xp, ho, wo = _tf_same_pad_nhwc(x, 3, stride)
    taps = [
        xp[:, di:di + stride * ho:stride, dj:dj + stride * wo:stride, :]
        for di in range(3) for dj in range(3)
    ]
    xt = jnp.stack(taps, axis=3)                     # (N, Ho, Wo, 9, Cin); tiny (Cin=3)
    x2d = xt.reshape(n * ho * wo, 9 * c)             # columns ordered (kh, kw, cin)
    k_pad = w_mat.shape[0]                           # K padded 27 -> 32
    if x2d.shape[1] != k_pad:
        x2d = jnp.pad(x2d, ((0, 0), (0, k_pad - x2d.shape[1])))
    o2d = pointwise_conv(x2d, w_mat, bias, relu6=True)
    return o2d.reshape(n, ho, wo, -1)


# ----------------------------------------------------------------------------
# Parameter construction (deterministic, synthetic; frozen/eval BN folded into weights)
# ----------------------------------------------------------------------------
class KeyGen:
    def __init__(self, key):
        self.key = key

    def __call__(self):
        self.key, sub = jax.random.split(self.key)
        return sub


def _make_bn(kg, c, eps=1e-5):
    gamma = 1.0 + 0.1 * jax.random.normal(kg(), (c,), jnp.float32)
    beta = 0.05 * jax.random.normal(kg(), (c,), jnp.float32)
    mean = 0.01 * jax.random.normal(kg(), (c,), jnp.float32)
    var = 1.0 + 0.1 * jnp.abs(jax.random.normal(kg(), (c,), jnp.float32))
    scale = gamma / jnp.sqrt(var + eps)
    bias = beta - mean * scale
    return scale.reshape(1, c), bias.reshape(1, c)


def _make_conv_layer(kg, inp, oup, k, stride):
    cp_out = _pad_c(oup)
    # PyTorch layout (oup, inp, k, k) -> matmul layout (k*k*inp, oup), columns (kh, kw, cin)
    w = jax.random.normal(kg(), (oup, inp, k, k), jnp.float32) / math.sqrt(inp * k * k)
    w_mat = jnp.transpose(w, (2, 3, 1, 0)).reshape(k * k * inp, oup)
    scale, bias = _make_bn(kg, oup)
    w_mat = w_mat * scale                                      # fold BN scale into weights
    k_pad = _round_up(k * k * inp, 8)                          # 27 -> 32
    w_mat = jnp.pad(w_mat, ((0, k_pad - k * k * inp), (0, cp_out - oup))).astype(WGT_DTYPE)
    bias = jnp.pad(bias, ((0, 0), (0, cp_out - oup)))
    return {"kind": "conv", "stride": stride, "w_mat": w_mat, "bias": bias,
            "out_c": oup, "cp_out": cp_out}


def _make_ir_layer(kg, inp, oup, stride, t):
    exp_c = inp * t
    cp_in, cp_exp, cp_out = _pad_c(inp), _pad_c(exp_c), _pad_c(oup)
    layer = {"kind": "ir", "stride": stride, "use_res": (stride == 1 and inp == oup),
             "cp_in": cp_in, "cp_exp": cp_exp, "cp_out": cp_out, "out_c": oup}
    if t > 1:
        we = jax.random.normal(kg(), (exp_c, inp), jnp.float32) / math.sqrt(inp)
        s, b = _make_bn(kg, exp_c)
        w = we.T * s                                           # (inp, exp_c), scale folded
        layer["expand_w"] = jnp.pad(w, ((0, cp_in - inp), (0, cp_exp - exp_c))).astype(WGT_DTYPE)
        layer["expand_b"] = jnp.pad(b, ((0, 0), (0, cp_exp - exp_c)))
    else:
        layer["expand_w"] = None
    wd = jax.random.normal(kg(), (exp_c, 1, 3, 3), jnp.float32) / 3.0
    s, b = _make_bn(kg, exp_c)
    w9 = wd.reshape(exp_c, 9).T * s                            # (9, exp_c) tap-major (kh*3+kw)
    layer["dw_w"] = jnp.pad(w9, ((0, 0), (0, cp_exp - exp_c)))  # f32 (VPU MAC runs in f32)
    layer["dw_b"] = jnp.pad(b, ((0, 0), (0, cp_exp - exp_c)))
    wp = jax.random.normal(kg(), (oup, exp_c), jnp.float32) / math.sqrt(exp_c)
    s, b = _make_bn(kg, oup)
    w = wp.T * s                                               # (exp_c, oup), scale folded
    layer["proj_w"] = jnp.pad(w, ((0, cp_exp - exp_c), (0, cp_out - oup))).astype(WGT_DTYPE)
    layer["proj_b"] = jnp.pad(b, ((0, 0), (0, cp_out - oup)))
    return layer


def init_params(kg):
    # V2_CONV_DEFS[:6]
    conv_defs = [
        ("conv", dict(kernel=3, stride=2, depth=32)),
        ("ir", dict(stride=1, depth=16, num=1, t=1)),
        ("ir", dict(stride=2, depth=24, num=2, t=6)),
        ("ir", dict(stride=2, depth=32, num=3, t=6)),
        ("ir", dict(stride=2, depth=64, num=4, t=6)),
        ("ir", dict(stride=1, depth=96, num=3, t=6)),
    ]
    layers = []
    in_ch = 3
    for kind, d in conv_defs:
        if kind == "conv":
            layers.append(_make_conv_layer(kg, in_ch, d["depth"], d["kernel"], d["stride"]))
            in_ch = d["depth"]
        else:
            for i in range(d["num"]):
                s = d["stride"] if i == 0 else 1
                layers.append(_make_ir_layer(kg, in_ch, d["depth"], s, d["t"]))
                in_ch = d["depth"]
    return layers


# ----------------------------------------------------------------------------
# Forward pass
# ----------------------------------------------------------------------------
def _ir_block(x, p):
    n, h, w, c = x.shape                    # c == cp_in (lane-padded, extra lanes are zero)
    x2d = x.reshape(-1, c)
    if p["expand_w"] is not None:
        h2d = pointwise_conv(x2d, p["expand_w"], p["expand_b"], relu6=True)
        ce = p["cp_exp"]
    else:
        h2d = x2d
        ce = c
    hbuf = depthwise_conv(h2d.reshape(n, h, w, ce), p["dw_w"], p["dw_b"], p["stride"])
    _, ho, wo, _ = hbuf.shape
    res = x2d if p["use_res"] else None
    o2d = pointwise_conv(hbuf.reshape(-1, ce), p["proj_w"], p["proj_b"],
                         relu6=False, residual=res)
    return o2d.reshape(n, ho, wo, p["cp_out"])


def mobilenet_v2_conv14_body(params, x_nchw):
    """Equivalent of MobileNet_v2_conv14_body.forward (NCHW in -> NCHW out, stride 16)."""
    x = jnp.transpose(x_nchw, (0, 2, 3, 1)).astype(ACT_DTYPE)   # NCHW -> NHWC, bf16
    p0 = params[0]
    x = conv3x3_bn_relu6(x, p0["w_mat"], p0["bias"], p0["stride"])
    for p in params[1:]:
        x = _ir_block(x, p)
    x = x[..., :params[-1]["out_c"]].astype(jnp.float32)        # strip lane padding
    return jnp.transpose(x, (0, 3, 1, 2))                       # NHWC -> NCHW


# ----------------------------------------------------------------------------
if __name__ == "__main__":
    kg = KeyGen(jax.random.PRNGKey(0))
    params = init_params(kg)

    # Small input consistent with the module: NCHW, 3 input channels, 16x16 spatial.
    x = jax.random.normal(kg(), (2, 3, 16, 16), jnp.float32)

    fwd = jax.jit(lambda xx: mobilenet_v2_conv14_body(params, xx))
    out = jax.block_until_ready(fwd(x))

    # total stride 16 -> 16/16 = 1 spatial, 96 output channels (dim_out)
    assert out.shape == (2, 96, 1, 1), out.shape
    assert bool(jnp.all(jnp.isfinite(out)))
    print("KERNEL_OK")
</pallas_src>

<mosaic_0001>
module attributes {stable_mosaic.version = 11 : i64} {
  func.func @_pw_relu6_kernel(%arg0: i32, %arg1: memref<128x32xbf16, #tpu.memory_space<vmem>>, %arg2: memref<32x128xbf16, #tpu.memory_space<vmem>>, %arg3: memref<1x128xf32, #tpu.memory_space<vmem>>, %arg4: memref<128x128xbf16, #tpu.memory_space<vmem>>) attributes {dimension_semantics = [#tpu.dimension_semantics<parallel>], iteration_bounds = array<i64: 1>, scalar_prefetch = 0 : i64, scratch_operands = 0 : i64, tpu.core_type = #tpu.core_type<tc>, window_params = [{transform_indices = @transform_0, window_bounds = array<i64: 128, 32>}, {pipeline_mode = #tpu.pipeline_mode<synchronous>, transform_indices = @transform_1, window_bounds = array<i64: 32, 128>}, {pipeline_mode = #tpu.pipeline_mode<synchronous>, transform_indices = @transform_2, window_bounds = array<i64: 1, 128>}, {transform_indices = @transform_3, window_bounds = array<i64: 128, 128>}]} {
    %c0 = arith.constant 0 : index
    %c0_0 = arith.constant 0 : index
    %0 = vector.load %arg1[%c0, %c0_0] : memref<128x32xbf16, #tpu.memory_space<vmem>>, vector<128x32xbf16>
    %c0_1 = arith.constant 0 : index
    %c0_2 = arith.constant 0 : index
    %1 = vector.load %arg2[%c0_1, %c0_2] : memref<32x128xbf16, #tpu.memory_space<vmem>>, vector<32x128xbf16>
    %cst = arith.constant dense<0.000000e+00> : vector<128x128xf32>
    %2 = tpu.matmul %0, %1, %cst {dimension_numbers = #tpu.dot_dimension_numbers<[1], [0], [0], [1], [0, 0, 1, 1], [], []>} : vector<128x32xbf16>, vector<32x128xbf16>, vector<128x128xf32> -> vector<128x128xf32>
    %c0_3 = arith.constant 0 : index
    %c0_4 = arith.constant 0 : index
    %3 = vector.load %arg3[%c0_3, %c0_4] : memref<1x128xf32, #tpu.memory_space<vmem>>, vector<1x128xf32>
    %4 = vector.broadcast %3 : vector<1x128xf32> to vector<128x128xf32>
    %5 = arith.addf %2, %4 : vector<128x128xf32>
    %cst_5 = arith.constant 0.000000e+00 : f32
    %cst_6 = arith.constant 6.000000e+00 : f32
    %6 = vector.broadcast %cst_5 : f32 to vector<128x128xf32>
    %7 = arith.maximumf %6, %5 : vector<128x128xf32>
    %8 = vector.broadcast %cst_6 : f32 to vector<128x128xf32>
    %9 = arith.minimumf %8, %7 : vector<128x128xf32>
    %10 = arith.truncf %9 : vector<128x128xf32> to vector<128x128xbf16>
    %c0_7 = arith.constant 0 : index
    %c0_8 = arith.constant 0 : index
    %11 = vector.load %arg4[%c0_7, %c0_8] : memref<128x128xbf16, #tpu.memory_space<vmem>>, vector<128x128xbf16>
    tpu.vector_store %arg4[%c0_7, %c0_8], %10 {strides = array<i32>} : memref<128x128xbf16, #tpu.memory_space<vmem>>, vector<128x128xbf16>,
    return
  }
  func.func @transform_0(%arg0: i32) -> (i32, i32) {
    %c0_i32 = arith.constant 0 : i32
    %c0_i32_0 = arith.constant 0 : i32
    return %arg0, %c0_i32 : i32, i32
  }
  func.func @transform_1(%arg0: i32) -> (i32, i32) {
    %c0_i32 = arith.constant 0 : i32
    %c0_i32_0 = arith.constant 0 : i32
    %c0_i32_1 = arith.constant 0 : i32
    return %c0_i32, %c0_i32_0 : i32, i32
  }
  func.func @transform_2(%arg0: i32) -> (i32, i32) {
    %c0_i32 = arith.constant 0 : i32
    %c0_i32_0 = arith.constant 0 : i32
    %c0_i32_1 = arith.constant 0 : i32
    return %c0_i32, %c0_i32_0 : i32, i32
  }
  func.func @transform_3(%arg0: i32) -> (i32, i32) {
    %c0_i32 = arith.constant 0 : i32
    %c0_i32_0 = arith.constant 0 : i32
    return %arg0, %c0_i32 : i32, i32
  }
}

module attributes {stable_mosaic.version = 11 : i64} {
  func.func @_dw_s1_kernel(%arg0: i32, %arg1: memref<1x10x10x128xbf16, #tpu.memory_space<vmem>>, %arg2: memref<9x128xf32, #tpu.memory_space<vmem>>, %arg3: memref<1x128xf32, #tpu.memory_space<vmem>>, %arg4: memref<1x8x8x128xbf16, #tpu.memory_space<vmem>>) attributes {dimension_semantics = [#tpu.dimension_semantics<parallel>], iteration_bounds = array<i64: 2>, scalar_prefetch = 0 : i64, scratch_operands = 0 : i64, tpu.core_type = #tpu.core_type<tc>, window_params = [{transform_indices = @transform_0, window_bounds = array<i64: 1, 10, 10, 128>}, {pipeline_mode = #tpu.pipeline_mode<synchronous>, transform_indices = @transform_1, window_bounds = array<i64: 9, 128>}, {pipeline_mode = #tpu.pipeline_mode<synchronous>, transform_indices = @transform_2, window_bounds = array<i64: 1, 128>}, {transform_indices = @transform_3, window_bounds = array<i64: 1, 8, 8, 128>}]} {
    %c0 = arith.constant 0 : index
    %c0_0 = arith.constant 0 : index
    %c0_1 = arith.constant 0 : index
    %c0_2 = arith.constant 0 : index
    %0 = vector.load %arg1[%c0, %c0_0, %c0_1, %c0_2] : memref<1x10x10x128xbf16, #tpu.memory_space<vmem>>, vector<1x10x10x128xbf16>
    %1 = vector.shape_cast %0 : vector<1x10x10x128xbf16> to vector<10x10x128xbf16>
    %2 = arith.extf %1 : vector<10x10x128xbf16> to vector<10x10x128xf32>
    %3 = vector.extract_strided_slice %2 {offsets = [0, 0, 0], sizes = [8, 8, 128], strides = [1, 1, 1]} : vector<10x10x128xf32> to vector<8x8x128xf32>
    %c0_3 = arith.constant 0 : index
    %c0_4 = arith.constant 0 : index
    %4 = vector.load %arg2[%c0_3, %c0_4] : memref<9x128xf32, #tpu.memory_space<vmem>>, vector<1x128xf32>
    %5 = vector.shape_cast %4 : vector<1x128xf32> to vector<128xf32>
    %6 = vector.shape_cast %5 : vector<128xf32> to vector<1x1x128xf32>
    %7 = vector.broadcast %6 : vector<1x1x128xf32> to vector<8x8x128xf32>
    %8 = arith.mulf %3, %7 : vector<8x8x128xf32>
    %9 = vector.extract_strided_slice %2 {offsets = [0, 1, 0], sizes = [8, 8, 128], strides = [1, 1, 1]} : vector<10x10x128xf32> to vector<8x8x128xf32>
    %c1 = arith.constant 1 : index
    %c0_5 = arith.constant 0 : index
    %10 = vector.load %arg2[%c1, %c0_5] : memref<9x128xf32, #tpu.memory_space<vmem>>, vector<1x128xf32>
    %11 = vector.shape_cast %10 : vector<1x128xf32> to vector<128xf32>
    %12 = vector.shape_cast %11 : vector<128xf32> to vector<1x1x128xf32>
    %13 = vector.broadcast %12 : vector<1x1x128xf32> to vector<8x8x128xf32>
    %14 = arith.mulf %9, %13 : vector<8x8x128xf32>
    %15 = arith.addf %8, %14 : vector<8x8x128xf32>
    %16 = vector.extract_strided_slice %2 {offsets = [0, 2, 0], sizes = [8, 8, 128], strides = [1, 1, 1]} : vector<10x10x128xf32> to vector<8x8x128xf32>
    %c2 = arith.constant 2 : index
    %c0_6 = arith.constant 0 : index
    %17 = vector.load %arg2[%c2, %c0_6] : memref<9x128xf32, #tpu.memory_space<vmem>>, vector<1x128xf32>
    %18 = vector.shape_cast %17 : vector<1x128xf32> to vector<128xf32>
    %19 = vector.shape_cast %18 : vector<128xf32> to vector<1x1x128xf32>
    %20 = vector.broadcast %19 : vector<1x1x128xf32> to vector<8x8x128xf32>
    %21 = arith.mulf %16, %20 : vector<8x8x128xf32>
    %22 = arith.addf %15, %21 : vector<8x8x128xf32>
    %23 = vector.extract_strided_slice %2 {offsets = [1, 0, 0], sizes = [8, 8, 128], strides = [1, 1, 1]} : vector<10x10x128xf32> to vector<8x8x128xf32>
    %c3 = arith.constant 3 : index
    %c0_7 = arith.constant 0 : index
    %24 = vector.load %arg2[%c3, %c0_7] : memref<9x128xf32, #tpu.memory_space<vmem>>, vector<1x128xf32>
    %25 = vector.shape_cast %24 : vector<1x128xf32> to vector<128xf32>
    %26 = vector.shape_cast %25 : vector<128xf32> to vector<1x1x128xf32>
    %27 = vector.broadcast %26 : vector<1x1x128xf32> to vector<8x8x128xf32>
    %28 = arith.mulf %23, %27 : vector<8x8x128xf32>
    %29 = arith.addf %22, %28 : vector<8x8x128xf32>
    %30 = vector.extract_strided_slice %2 {offsets = [1, 1, 0], sizes = [8, 8, 128], strides = [1, 1, 1]} : vector<10x10x128xf32> to vector<8x8x128xf32>
    %c4 = arith.constant 4 : index
    %c0_8 = arith.constant 0 : index
    %31 = vector.load %arg2[%c4, %c0_8] : memref<9x128xf32, #tpu.memory_space<vmem>>, vector<1x128xf32>
    %32 = vector.shape_cast %31 : vector<1x128xf32> to vector<128xf32>
    %33 = vector.shape_cast %32 : vector<128xf32> to vector<1x1x128xf32>
    %34 = vector.broadcast %33 : vector<1x1x128xf32> to vector<8x8x128xf32>
    %35 = arith.mulf %30, %34 : vector<8x8x128xf32>
    %36 = arith.addf %29, %35 : vector<8x8x128xf32>
    %37 = vector.extract_strided_slice %2 {offsets = [1, 2, 0], sizes = [8, 8, 128], strides = [1, 1, 1]} : vector<10x10x128xf32> to vector<8x8x128xf32>
    %c5 = arith.constant 5 : index
    %c0_9 = arith.constant 0 : index
    %38 = vector.load %arg2[%c5, %c0_9] : memref<9x128xf32, #tpu.memory_space<vmem>>, vector<1x128xf32>
    %39 = vector.shape_cast %38 : vector<1x128xf32> to vector<128xf32>
    %40 = vector.shape_cast %39 : vector<128xf32> to vector<1x1x128xf32>
    %41 = vector.broadcast %40 : vector<1x1x128xf32> to vector<8x8x128xf32>
    %42 = arith.mulf %37, %41 : vector<8x8x128xf32>
    %43 = arith.addf %36, %42 : vector<8x8x128xf32>
    %44 = vector.extract_strided_slice %2 {offsets = [2, 0, 0], sizes = [8, 8, 128], strides = [1, 1, 1]} : vector<10x10x128xf32> to vector<8x8x128xf32>
    %c6 = arith.constant 6 : index
    %c0_10 = arith.constant 0 : index
    %45 = vector.load %arg2[%c6, %c0_10] : memref<9x128xf32, #tpu.memory_space<vmem>>, vector<1x128xf32>
    %46 = vector.shape_cast %45 : vector<1x128xf32> to vector<128xf32>
    %47 = vector.shape_cast %46 : vector<128xf32> to vector<1x1x128xf32>
    %48 = vector.broadcast %47 : vector<1x1x128xf32> to vector<8x8x128xf32>
    %49 = arith.mulf %44, %48 : vector<8x8x128xf32>
    %50 = arith.addf %43, %49 : vector<8x8x128xf32>
    %51 = vector.extract_strided_slice %2 {offsets = [2, 1, 0], sizes = [8, 8, 128], strides = [1, 1, 1]} : vector<10x10x128xf32> to vector<8x8x128xf32>
    %c7 = arith.constant 7 : index
    %c0_11 = arith.constant 0 : index
    %52 = vector.load %arg2[%c7, %c0_11] : memref<9x128xf32, #tpu.memory_space<vmem>>, vector<1x128xf32>
    %53 = vector.shape_cast %52 : vector<1x128xf32> to vector<128xf32>
    %54 = vector.shape_cast %53 : vector<128xf32> to vector<1x1x128xf32>
    %55 = vector.broadcast %54 : vector<1x1x128xf32> to vector<8x8x128xf32>
    %56 = arith.mulf %51, %55 : vector<8x8x128xf32>
    %57 = arith.addf %50, %56 : vector<8x8x128xf32>
    %58 = vector.extract_strided_slice %2 {offsets = [2, 2, 0], sizes = [8, 8, 128], strides = [1, 1, 1]} : vector<10x10x128xf32> to vector<8x8x128xf32>
    %c8 = arith.constant 8 : index
    %c0_12 = arith.constant 0 : index
    %59 = vector.load %arg2[%c8, %c0_12] : memref<9x128xf32, #tpu.memory_space<vmem>>, vector<1x128xf32>
    %60 = vector.shape_cast %59 : vector<1x128xf32> to vector<128xf32>
    %61 = vector.shape_cast %60 : vector<128xf32> to vector<1x1x128xf32>
    %62 = vector.broadcast %61 : vector<1x1x128xf32> to vector<8x8x128xf32>
    %63 = arith.mulf %58, %62 : vector<8x8x128xf32>
    %64 = arith.addf %57, %63 : vector<8x8x128xf32>
    %c0_13 = arith.constant 0 : index
    %c0_14 = arith.constant 0 : index
    %65 = vector.load %arg3[%c0_13, %c0_14] : memref<1x128xf32, #tpu.memory_space<vmem>>, vector<1x128xf32>
    %66 = vector.shape_cast %65 : vector<1x128xf32> to vector<128xf32>
    %67 = vector.shape_cast %66 : vector<128xf32> to vector<1x1x128xf32>
    %68 = vector.broadcast %67 : vector<1x1x128xf32> to vector<8x8x128xf32>
    %69 = arith.addf %64, %68 : vector<8x8x128xf32>
    %cst = arith.constant 0.000000e+00 : f32
    %cst_15 = arith.constant 6.000000e+00 : f32
    %70 = vector.broadcast %cst : f32 to vector<8x8x128xf32>
    %71 = arith.maximumf %70, %69 : vector<8x8x128xf32>
    %72 = vector.broadcast %cst_15 : f32 to vector<8x8x128xf32>
    %73 = arith.minimumf %72, %71 : vector<8x8x128xf32>
    %74 = arith.truncf %73 : vector<8x8x128xf32> to vector<8x8x128xbf16>
    %c0_16 = arith.constant 0 : index
    %c0_17 = arith.constant 0 : index
    %c0_18 = arith.constant 0 : index
    %c0_19 = arith.constant 0 : index
    %75 = vector.load %arg4[%c0_16, %c0_17, %c0_18, %c0_19] : memref<1x8x8x128xbf16, #tpu.memory_space<vmem>>, vector<1x8x8x128xbf16>
    %76 = vector.shape_cast %75 : vector<1x8x8x128xbf16> to vector<8x8x128xbf16>
    %77 = vector.shape_cast %74 : vector<8x8x128xbf16> to vector<1x8x8x128xbf16>
    tpu.vector_store %arg4[%c0_16, %c0_17, %c0_18, %c0_19], %77 {strides = array<i32>} : memref<1x8x8x128xbf16, #tpu.memory_space<vmem>>, vector<1x8x8x128xbf16>,
    return
  }
  func.func @transform_0(%arg0: i32) -> (i32, i32, i32, i32) {
    %c0_i32 = arith.constant 0 : i32
    %c0_i32_0 = arith.constant 0 : i32
    %c0_i32_1 = arith.constant 0 : i32
    %c0_i32_2 = arith.constant 0 : i32
    return %arg0, %c0_i32, %c0_i32_0, %c0_i32_1 : i32, i32, i32, i32
  }
  func.func @transform_1(%arg0: i32) -> (i32, i32) {
    %c0_i32 = arith.constant 0 : i32
    %c0_i32_0 = arith.constant 0 : i32
    %c0_i32_1 = arith.constant 0 : i32
    return %c0_i32, %c0_i32_0 : i32, i32
  }
  func.func @transform_2(%arg0: i32) -> (i32, i32) {
    %c0_i32 = arith.constant 0 : i32
    %c0_i32_0 = arith.constant 0 : i32
    %c0_i32_1 = arith.constant 0 : i32
    return %c0_i32, %c0_i32_0 : i32, i32
  }
  func.func @transform_3(%arg0: i32) -> (i32, i32, i32, i32) {
    %c0_i32 = arith.constant 0 : i32
    %c0_i32_0 = arith.constant 0 : i32
    %c0_i32_1 = arith.constant 0 : i32
    %c0_i32_2 = arith.constant 0 : i32
    return %arg0, %c0_i32, %c0_i32_0, %c0_i32_1 : i32, i32, i32, i32
  }
}

module attributes {stable_mosaic.version = 11 : i64} {
  func.func @_pw_linear_kernel(%arg0: i32, %arg1: memref<128x128xbf16, #tpu.memory_space<vmem>>, %arg2: memref<128x128xbf16, #tpu.memory_space<vmem>>, %arg3: memref<1x128xf32, #tpu.memory_space<vmem>>, %arg4: memref<128x128xbf16, #tpu.memory_space<vmem>>) attributes {dimension_semantics = [#tpu.dimension_semantics<parallel>], iteration_bounds = array<i64: 1>, scalar_prefetch = 0 : i64, scratch_operands = 0 : i64, tpu.core_type = #tpu.core_type<tc>, window_params = [{transform_indices = @transform_0, window_bounds = array<i64: 128, 128>}, {pipeline_mode = #tpu.pipeline_mode<synchronous>, transform_indices = @transform_1, window_bounds = array<i64: 128, 128>}, {pipeline_mode = #tpu.pipeline_mode<synchronous>, transform_indices = @transform_2, window_bounds = array<i64: 1, 128>}, {transform_indices = @transform_3, window_bounds = array<i64: 128, 128>}]} {
    %c0 = arith.constant 0 : index
    %c0_0 = arith.constant 0 : index
    %0 = vector.load %arg1[%c0, %c0_0] : memref<128x128xbf16, #tpu.memory_space<vmem>>, vector<128x128xbf16>
    %c0_1 = arith.constant 0 : index
    %c0_2 = arith.constant 0 : index
    %1 = vector.load %arg2[%c0_1, %c0_2] : memref<128x128xbf16, #tpu.memory_space<vmem>>, vector<128x128xbf16>
    %cst = arith.constant dense<0.000000e+00> : vector<128x128xf32>
    %2 = tpu.matmul %0, %1, %cst {dimension_numbers = #tpu.dot_dimension_numbers<[1], [0], [0], [1], [0, 0, 1, 1], [], []>} : vector<128x128xbf16>, vector<128x128xbf16>, vector<128x128xf32> -> vector<128x128xf32>
    %c0_3 = arith.constant 0 : index
    %c0_4 = arith.constant 0 : index
    %3 = vector.load %arg3[%c0_3, %c0_4] : memref<1x128xf32, #tpu.memory_space<vmem>>, vector<1x128xf32>
    %4 = vector.broadcast %3 : vector<1x128xf32> to vector<128x128xf32>
    %5 = arith.addf %2, %4 : vector<128x128xf32>
    %6 = arith.truncf %5 : vector<128x128xf32> to vector<128x128xbf16>
    %c0_5 = arith.constant 0 : index
    %c0_6 = arith.constant 0 : index
    %7 = vector.load %arg4[%c0_5, %c0_6] : memref<128x128xbf16, #tpu.memory_space<vmem>>, vector<128x128xbf16>
    tpu.vector_store %arg4[%c0_5, %c0_6], %6 {strides = array<i32>} : memref<128x128xbf16, #tpu.memory_space<vmem>>, vector<128x128xbf16>,
    return
  }
  func.func @transform_0(%arg0: i32) -> (i32, i32) {
    %c0_i32 = arith.constant 0 : i32
    %c0_i32_0 = arith.constant 0 : i32
    return %arg0, %c0_i32 : i32, i32
  }
  func.func @transform_1(%arg0: i32) -> (i32, i32) {
    %c0_i32 = arith.constant 0 : i32
    %c0_i32_0 = arith.constant 0 : i32
    %c0_i32_1 = arith.constant 0 : i32
    return %c0_i32, %c0_i32_0 : i32, i32
  }
  func.func @transform_2(%arg0: i32) -> (i32, i32) {
    %c0_i32 = arith.constant 0 : i32
    %c0_i32_0 = arith.constant 0 : i32
    %c0_i32_1 = arith.constant 0 : i32
    return %c0_i32, %c0_i32_0 : i32, i32
  }
  func.func @transform_3(%arg0: i32) -> (i32, i32) {
    %c0_i32 = arith.constant 0 : i32
    %c0_i32_0 = arith.constant 0 : i32
    return %arg0, %c0_i32 : i32, i32
  }
}

module attributes {stable_mosaic.version = 11 : i64} {
  func.func @_pw_relu6_kernel(%arg0: i32, %arg1: memref<128x128xbf16, #tpu.memory_space<vmem>>, %arg2: memref<128x128xbf16, #tpu.memory_space<vmem>>, %arg3: memref<1x128xf32, #tpu.memory_space<vmem>>, %arg4: memref<128x128xbf16, #tpu.memory_space<vmem>>) attributes {dimension_semantics = [#tpu.dimension_semantics<parallel>], iteration_bounds = array<i64: 1>, scalar_prefetch = 0 : i64, scratch_operands = 0 : i64, tpu.core_type = #tpu.core_type<tc>, window_params = [{transform_indices = @transform_0, window_bounds = array<i64: 128, 128>}, {pipeline_mode = #tpu.pipeline_mode<synchronous>, transform_indices = @transform_1, window_bounds = array<i64: 128, 128>}, {pipeline_mode = #tpu.pipeline_mode<synchronous>, transform_indices = @transform_2, window_bounds = array<i64: 1, 128>}, {transform_indices = @transform_3, window_bounds = array<i64: 128, 128>}]} {
    %c0 = arith.constant 0 : index
    %c0_0 = arith.constant 0 : index
    %0 = vector.load %arg1[%c0, %c0_0] : memref<128x128xbf16, #tpu.memory_space<vmem>>, vector<128x128xbf16>
    %c0_1 = arith.constant 0 : index
    %c0_2 = arith.constant 0 : index
    %1 = vector.load %arg2[%c0_1, %c0_2] : memref<128x128xbf16, #tpu.memory_space<vmem>>, vector<128x128xbf16>
    %cst = arith.constant dense<0.000000e+00> : vector<128x128xf32>
    %2 = tpu.matmul %0, %1, %cst {dimension_numbers = #tpu.dot_dimension_numbers<[1], [0], [0], [1], [0, 0, 1, 1], [], []>} : vector<128x128xbf16>, vector<128x128xbf16>, vector<128x128xf32> -> vector<128x128xf32>
    %c0_3 = arith.constant 0 : index
    %c0_4 = arith.constant 0 : index
    %3 = vector.load %arg3[%c0_3, %c0_4] : memref<1x128xf32, #tpu.memory_space<vmem>>, vector<1x128xf32>
    %4 = vector.broadcast %3 : vector<1x128xf32> to vector<128x128xf32>
    %5 = arith.addf %2, %4 : vector<128x128xf32>
    %cst_5 = arith.constant 0.000000e+00 : f32
    %cst_6 = arith.constant 6.000000e+00 : f32
    %6 = vector.broadcast %cst_5 : f32 to vector<128x128xf32>
    %7 = arith.maximumf %6, %5 : vector<128x128xf32>
    %8 = vector.broadcast %cst_6 : f32 to vector<128x128xf32>
    %9 = arith.minimumf %8, %7 : vector<128x128xf32>
    %10 = arith.truncf %9 : vector<128x128xf32> to vector<128x128xbf16>
    %c0_7 = arith.constant 0 : index
    %c0_8 = arith.constant 0 : index
    %11 = vector.load %arg4[%c0_7, %c0_8] : memref<128x128xbf16, #tpu.memory_space<vmem>>, vector<128x128xbf16>
    tpu.vector_store %arg4[%c0_7, %c0_8], %10 {strides = array<i32>} : memref<128x128xbf16, #tpu.memory_space<vmem>>, vector<128x128xbf16>,
    return
  }
  func.func @transform_0(%arg0: i32) -> (i32, i32) {
    %c0_i32 = arith.constant 0 : i32
    %c0_i32_0 = arith.constant 0 : i32
    return %arg0, %c0_i32 : i32, i32
  }
  func.func @transform_1(%arg0: i32) -> (i32, i32) {
    %c0_i32 = arith.constant 0 : i32
    %c0_i32_0 = arith.constant 0 : i32
    %c0_i32_1 = arith.constant 0 : i32
    return %c0_i32, %c0_i32_0 : i32, i32
  }
  func.func @transform_2(%arg0: i32) -> (i32, i32) {
    %c0_i32 = arith.constant 0 : i32
    %c0_i32_0 = arith.constant 0 : i32
    %c0_i32_1 = arith.constant 0 : i32
    return %c0_i32, %c0_i32_0 : i32, i32
  }
  func.func @transform_3(%arg0: i32) -> (i32, i32) {
    %c0_i32 = arith.constant 0 : i32
    %c0_i32_0 = arith.constant 0 : i32
    return %arg0, %c0_i32 : i32, i32
  }
}

module attributes {stable_mosaic.version = 11 : i64} {
  func.func @_dw_s2_kernel(%arg0: i32, %arg1: memref<1x5x5x512xbf16, #tpu.memory_space<vmem>>, %arg2: memref<9x128xf32, #tpu.memory_space<vmem>>, %arg3: memref<1x128xf32, #tpu.memory_space<vmem>>, %arg4: memref<1x4x4x128xbf16, #tpu.memory_space<vmem>>) attributes {dimension_semantics = [#tpu.dimension_semantics<parallel>], iteration_bounds = array<i64: 2>, scalar_prefetch = 0 : i64, scratch_operands = 0 : i64, tpu.core_type = #tpu.core_type<tc>, window_params = [{transform_indices = @transform_0, window_bounds = array<i64: 1, 5, 5, 512>}, {pipeline_mode = #tpu.pipeline_mode<synchronous>, transform_indices = @transform_1, window_bounds = array<i64: 9, 128>}, {pipeline_mode = #tpu.pipeline_mode<synchronous>, transform_indices = @transform_2, window_bounds = array<i64: 1, 128>}, {transform_indices = @transform_3, window_bounds = array<i64: 1, 4, 4, 128>}]} {
    %c0 = arith.constant 0 : index
    %c0_0 = arith.constant 0 : index
    %c0_1 = arith.constant 0 : index
    %c0_2 = arith.constant 0 : index
    %0 = vector.load %arg1[%c0, %c0_0, %c0_1, %c0_2] : memref<1x5x5x512xbf16, #tpu.memory_space<vmem>>, vector<1x5x5x512xbf16>
    %1 = vector.shape_cast %0 : vector<1x5x5x512xbf16> to vector<5x5x512xbf16>
    %2 = arith.extf %1 : vector<5x5x512xbf16> to vector<5x5x512xf32>
    %3 = vector.extract_strided_slice %2 {offsets = [0, 0, 0], sizes = [4, 4, 128], strides = [1, 1, 1]} : vector<5x5x512xf32> to vector<4x4x128xf32>
    %c0_3 = arith.constant 0 : index
    %c0_4 = arith.constant 0 : index
    %4 = vector.load %arg2[%c0_3, %c0_4] : memref<9x128xf32, #tpu.memory_space<vmem>>, vector<1x128xf32>
    %5 = vector.shape_cast %4 : vector<1x128xf32> to vector<128xf32>
    %6 = vector.shape_cast %5 : vector<128xf32> to vector<1x1x128xf32>
    %7 = vector.broadcast %6 : vector<1x1x128xf32> to vector<4x4x128xf32>
    %8 = arith.mulf %3, %7 : vector<4x4x128xf32>
    %9 = vector.extract_strided_slice %2 {offsets = [0, 0, 128], sizes = [4, 4, 128], strides = [1, 1, 1]} : vector<5x5x512xf32> to vector<4x4x128xf32>
    %c1 = arith.constant 1 : index
    %c0_5 = arith.constant 0 : index
    %10 = vector.load %arg2[%c1, %c0_5] : memref<9x128xf32, #tpu.memory_space<vmem>>, vector<1x128xf32>
    %11 = vector.shape_cast %10 : vector<1x128xf32> to vector<128xf32>
    %12 = vector.shape_cast %11 : vector<128xf32> to vector<1x1x128xf32>
    %13 = vector.broadcast %12 : vector<1x1x128xf32> to vector<4x4x128xf32>
    %14 = arith.mulf %9, %13 : vector<4x4x128xf32>
    %15 = arith.addf %8, %14 : vector<4x4x128xf32>
    %16 = vector.extract_strided_slice %2 {offsets = [0, 1, 0], sizes = [4, 4, 128], strides = [1, 1, 1]} : vector<5x5x512xf32> to vector<4x4x128xf32>
    %c2 = arith.constant 2 : index
    %c0_6 = arith.constant 0 : index
    %17 = vector.load %arg2[%c2, %c0_6] : memref<9x128xf32, #tpu.memory_space<vmem>>, vector<1x128xf32>
    %18 = vector.shape_cast %17 : vector<1x128xf32> to vector<128xf32>
    %19 = vector.shape_cast %18 : vector<128xf32> to vector<1x1x128xf32>
    %20 = vector.broadcast %19 : vector<1x1x128xf32> to vector<4x4x128xf32>
    %21 = arith.mulf %16, %20 : vector<4x4x128xf32>
    %22 = arith.addf %15, %21 : vector<4x4x128xf32>
    %23 = vector.extract_strided_slice %2 {offsets = [0, 0, 256], sizes = [4, 4, 128], strides = [1, 1, 1]} : vector<5x5x512xf32> to vector<4x4x128xf32>
    %c3 = arith.constant 3 : index
    %c0_7 = arith.constant 0 : index
    %24 = vector.load %arg2[%c3, %c0_7] : memref<9x128xf32, #tpu.memory_space<vmem>>, vector<1x128xf32>
    %25 = vector.shape_cast %24 : vector<1x128xf32> to vector<128xf32>
    %26 = vector.shape_cast %25 : vector<128xf32> to vector<1x1x128xf32>
    %27 = vector.broadcast %26 : vector<1x1x128xf32> to vector<4x4x128xf32>
    %28 = arith.mulf %23, %27 : vector<4x4x128xf32>
    %29 = arith.addf %22, %28 : vector<4x4x128xf32>
    %30 = vector.extract_strided_slice %2 {offsets = [0, 0, 384], sizes = [4, 4, 128], strides = [1, 1, 1]} : vector<5x5x512xf32> to vector<4x4x128xf32>
    %c4 = arith.constant 4 : index
    %c0_8 = arith.constant 0 : index
    %31 = vector.load %arg2[%c4, %c0_8] : memref<9x128xf32, #tpu.memory_space<vmem>>, vector<1x128xf32>
    %32 = vector.shape_cast %31 : vector<1x128xf32> to vector<128xf32>
    %33 = vector.shape_cast %32 : vector<128xf32> to vector<1x1x128xf32>
    %34 = vector.broadcast %33 : vector<1x1x128xf32> to vector<4x4x128xf32>
    %35 = arith.mulf %30, %34 : vector<4x4x128xf32>
    %36 = arith.addf %29, %35 : vector<4x4x128xf32>
    %37 = vector.extract_strided_slice %2 {offsets = [0, 1, 256], sizes = [4, 4, 128], strides = [1, 1, 1]} : vector<5x5x512xf32> to vector<4x4x128xf32>
    %c5 = arith.constant 5 : index
    %c0_9 = arith.constant 0 : index
    %38 = vector.load %arg2[%c5, %c0_9] : memref<9x128xf32, #tpu.memory_space<vmem>>, vector<1x128xf32>
    %39 = vector.shape_cast %38 : vector<1x128xf32> to vector<128xf32>
    %40 = vector.shape_cast %39 : vector<128xf32> to vector<1x1x128xf32>
    %41 = vector.broadcast %40 : vector<1x1x128xf32> to vector<4x4x128xf32>
    %42 = arith.mulf %37, %41 : vector<4x4x128xf32>
    %43 = arith.addf %36, %42 : vector<4x4x128xf32>
    %44 = vector.extract_strided_slice %2 {offsets = [1, 0, 0], sizes = [4, 4, 128], strides = [1, 1, 1]} : vector<5x5x512xf32> to vector<4x4x128xf32>
    %c6 = arith.constant 6 : index
    %c0_10 = arith.constant 0 : index
    %45 = vector.load %arg2[%c6, %c0_10] : memref<9x128xf32, #tpu.memory_space<vmem>>, vector<1x128xf32>
    %46 = vector.shape_cast %45 : vector<1x128xf32> to vector<128xf32>
    %47 = vector.shape_cast %46 : vector<128xf32> to vector<1x1x128xf32>
    %48 = vector.broadcast %47 : vector<1x1x128xf32> to vector<4x4x128xf32>
    %49 = arith.mulf %44, %48 : vector<4x4x128xf32>
    %50 = arith.addf %43, %49 : vector<4x4x128xf32>
    %51 = vector.extract_strided_slice %2 {offsets = [1, 0, 128], sizes = [4, 4, 128], strides = [1, 1, 1]} : vector<5x5x512xf32> to vector<4x4x128xf32>
    %c7 = arith.constant 7 : index
    %c0_11 = arith.constant 0 : index
    %52 = vector.load %arg2[%c7, %c0_11] : memref<9x128xf32, #tpu.memory_space<vmem>>, vector<1x128xf32>
    %53 = vector.shape_cast %52 : vector<1x128xf32> to vector<128xf32>
    %54 = vector.shape_cast %53 : vector<128xf32> to vector<1x1x128xf32>
    %55 = vector.broadcast %54 : vector<1x1x128xf32> to vector<4x4x128xf32>
    %56 = arith.mulf %51, %55 : vector<4x4x128xf32>
    %57 = arith.addf %50, %56 : vector<4x4x128xf32>
    %58 = vector.extract_strided_slice %2 {offsets = [1, 1, 0], sizes = [4, 4, 128], strides = [1, 1, 1]} : vector<5x5x512xf32> to vector<4x4x128xf32>
    %c8 = arith.constant 8 : index
    %c0_12 = arith.constant 0 : index
    %59 = vector.load %arg2[%c8, %c0_12] : memref<9x128xf32, #tpu.memory_space<vmem>>, vector<1x128xf32>
    %60 = vector.shape_cast %59 : vector<1x128xf32> to vector<128xf32>
    %61 = vector.shape_cast %60 : vector<128xf32> to vector<1x1x128xf32>
    %62 = vector.broadcast %61 : vector<1x1x128xf32> to vector<4x4x128xf32>
    %63 = arith.mulf %58, %62 : vector<4x4x128xf32>
    %64 = arith.addf %57, %63 : vector<4x4x128xf32>
    %c0_13 = arith.constant 0 : index
    %c0_14 = arith.constant 0 : index
    %65 = vector.load %arg3[%c0_13, %c0_14] : memref<1x128xf32, #tpu.memory_space<vmem>>, vector<1x128xf32>
    %66 = vector.shape_cast %65 : vector<1x128xf32> to vector<128xf32>
    %67 = vector.shape_cast %66 : vector<128xf32> to vector<1x1x128xf32>
    %68 = vector.broadcast %67 : vector<1x1x128xf32> to vector<4x4x128xf32>
    %69 = arith.addf %64, %68 : vector<4x4x128xf32>
    %cst = arith.constant 0.000000e+00 : f32
    %cst_15 = arith.constant 6.000000e+00 : f32
    %70 = vector.broadcast %cst : f32 to vector<4x4x128xf32>
    %71 = arith.maximumf %70, %69 : vector<4x4x128xf32>
    %72 = vector.broadcast %cst_15 : f32 to vector<4x4x128xf32>
    %73 = arith.minimumf %72, %71 : vector<4x4x128xf32>
    %74 = arith.truncf %73 : vector<4x4x128xf32> to vector<4x4x128xbf16>
    %c0_16 = arith.constant 0 : index
    %c0_17 = arith.constant 0 : index
    %c0_18 = arith.constant 0 : index
    %c0_19 = arith.constant 0 : index
    %75 = vector.load %arg4[%c0_16, %c0_17, %c0_18, %c0_19] : memref<1x4x4x128xbf16, #tpu.memory_space<vmem>>, vector<1x4x4x128xbf16>
    %76 = vector.shape_cast %75 : vector<1x4x4x128xbf16> to vector<4x4x128xbf16>
    %77 = vector.shape_cast %74 : vector<4x4x128xbf16> to vector<1x4x4x128xbf16>
    tpu.vector_store %arg4[%c0_16, %c0_17, %c0_18, %c0_19], %77 {strides = array<i32>} : memref<1x4x4x128xbf16, #tpu.memory_space<vmem>>, vector<1x4x4x128xbf16>,
    return
  }
  func.func @transform_0(%arg0: i32) -> (i32, i32, i32, i32) {
    %c0_i32 = arith.constant 0 : i32
    %c0_i32_0 = arith.constant 0 : i32
    %c0_i32_1 = arith.constant 0 : i32
    %c0_i32_2 = arith.constant 0 : i32
    return %arg0, %c0_i32, %c0_i32_0, %c0_i32_1 : i32, i32, i32, i32
  }
  func.func @transform_1(%arg0: i32) -> (i32, i32) {
    %c0_i32 = arith.constant 0 : i32
    %c0_i32_0 = arith.constant 0 : i32
    %c0_i32_1 = arith.constant 0 : i32
    return %c0_i32, %c0_i32_0 : i32, i32
  }
  func.func @transform_2(%arg0: i32) -> (i32, i32) {
    %c0_i32 = arith.constant 0 : i32
    %c0_i32_0 = arith.constant 0 : i32
    %c0_i32_1 = arith.constant 0 : i32
    return %c0_i32, %c0_i32_0 : i32, i32
  }
  func.func @transform_3(%arg0: i32) -> (i32, i32, i32, i32) {
    %c0_i32 = arith.constant 0 : i32
    %c0_i32_0 = arith.constant 0 : i32
    %c0_i32_1 = arith.constant 0 : i32
    %c0_i32_2 = arith.constant 0 : i32
    return %arg0, %c0_i32, %c0_i32_0, %c0_i32_1 : i32, i32, i32, i32
  }
}

module attributes {stable_mosaic.version = 11 : i64} {
  func.func @_pw_linear_kernel(%arg0: i32, %arg1: memref<32x128xbf16, #tpu.memory_space<vmem>>, %arg2: memref<128x128xbf16, #tpu.memory_space<vmem>>, %arg3: memref<1x128xf32, #tpu.memory_space<vmem>>, %arg4: memref<32x128xbf16, #tpu.memory_space<vmem>>) attributes {dimension_semantics = [#tpu.dimension_semantics<parallel>], iteration_bounds = array<i64: 1>, scalar_prefetch = 0 : i64, scratch_operands = 0 : i64, tpu.core_type = #tpu.core_type<tc>, window_params = [{transform_indices = @transform_0, window_bounds = array<i64: 32, 128>}, {pipeline_mode = #tpu.pipeline_mode<synchronous>, transform_indices = @transform_1, window_bounds = array<i64: 128, 128>}, {pipeline_mode = #tpu.pipeline_mode<synchronous>, transform_indices = @transform_2, window_bounds = array<i64: 1, 128>}, {transform_indices = @transform_3, window_bounds = array<i64: 32, 128>}]} {
    %c0 = arith.constant 0 : index
    %c0_0 = arith.constant 0 : index
    %0 = vector.load %arg1[%c0, %c0_0] : memref<32x128xbf16, #tpu.memory_space<vmem>>, vector<32x128xbf16>
    %c0_1 = arith.constant 0 : index
    %c0_2 = arith.constant 0 : index
    %1 = vector.load %arg2[%c0_1, %c0_2] : memref<128x128xbf16, #tpu.memory_space<vmem>>, vector<128x128xbf16>
    %cst = arith.constant dense<0.000000e+00> : vector<32x128xf32>
    %2 = tpu.matmul %0, %1, %cst {dimension_numbers = #tpu.dot_dimension_numbers<[1], [0], [0], [1], [0, 0, 1, 1], [], []>} : vector<32x128xbf16>, vector<128x128xbf16>, vector<32x128xf32> -> vector<32x128xf32>
    %c0_3 = arith.constant 0 : index
    %c0_4 = arith.constant 0 : index
    %3 = vector.load %arg3[%c0_3, %c0_4] : memref<1x128xf32, #tpu.memory_space<vmem>>, vector<1x128xf32>
    %4 = vector.broadcast %3 : vector<1x128xf32> to vector<32x128xf32>
    %5 = arith.addf %2, %4 : vector<32x128xf32>
    %6 = arith.truncf %5 : vector<32x128xf32> to vector<32x128xbf16>
    %c0_5 = arith.constant 0 : index
    %c0_6 = arith.constant 0 : index
    %7 = vector.load %arg4[%c0_5, %c0_6] : memref<32x128xbf16, #tpu.memory_space<vmem>>, vector<32x128xbf16>
    tpu.vector_store %arg4[%c0_5, %c0_6], %6 {strides = array<i32>} : memref<32x128xbf16, #tpu.memory_space<vmem>>, vector<32x128xbf16>,
    return
  }
  func.func @transform_0(%arg0: i32) -> (i32, i32) {
    %c0_i32 = arith.constant 0 : i32
    %c0_i32_0 = arith.constant 0 : i32
    return %arg0, %c0_i32 : i32, i32
  }
  func.func @transform_1(%arg0: i32) -> (i32, i32) {
    %c0_i32 = arith.constant 0 : i32
    %c0_i32_0 = arith.constant 0 : i32
    %c0_i32_1 = arith.constant 0 : i32
    return %c0_i32, %c0_i32_0 : i32, i32
  }
  func.func @transform_2(%arg0: i32) -> (i32, i32) {
    %c0_i32 = arith.constant 0 : i32
    %c0_i32_0 = arith.constant 0 : i32
    %c0_i32_1 = arith.constant 0 : i32
    return %c0_i32, %c0_i32_0 : i32, i32
  }
  func.func @transform_3(%arg0: i32) -> (i32, i32) {
    %c0_i32 = arith.constant 0 : i32
    %c0_i32_0 = arith.constant 0 : i32
    return %arg0, %c0_i32 : i32, i32
  }
}

module attributes {stable_mosaic.version = 11 : i64} {
  func.func @_pw_relu6_kernel(%arg0: i32, %arg1: memref<32x128xbf16, #tpu.memory_space<vmem>>, %arg2: memref<128x256xbf16, #tpu.memory_space<vmem>>, %arg3: memref<1x256xf32, #tpu.memory_space<vmem>>, %arg4: memref<32x256xbf16, #tpu.memory_space<vmem>>) attributes {dimension_semantics = [#tpu.dimension_semantics<parallel>], iteration_bounds = array<i64: 1>, scalar_prefetch = 0 : i64, scratch_operands = 0 : i64, tpu.core_type = #tpu.core_type<tc>, window_params = [{transform_indices = @transform_0, window_bounds = array<i64: 32, 128>}, {pipeline_mode = #tpu.pipeline_mode<synchronous>, transform_indices = @transform_1, window_bounds = array<i64: 128, 256>}, {pipeline_mode = #tpu.pipeline_mode<synchronous>, transform_indices = @transform_2, window_bounds = array<i64: 1, 256>}, {transform_indices = @transform_3, window_bounds = array<i64: 32, 256>}]} {
    %c0 = arith.constant 0 : index
    %c0_0 = arith.constant 0 : index
    %0 = vector.load %arg1[%c0, %c0_0] : memref<32x128xbf16, #tpu.memory_space<vmem>>, vector<32x128xbf16>
    %c0_1 = arith.constant 0 : index
    %c0_2 = arith.constant 0 : index
    %1 = vector.load %arg2[%c0_1, %c0_2] : memref<128x256xbf16, #tpu.memory_space<vmem>>, vector<128x256xbf16>
    %cst = arith.constant dense<0.000000e+00> : vector<32x256xf32>
    %2 = tpu.matmul %0, %1, %cst {dimension_numbers = #tpu.dot_dimension_numbers<[1], [0], [0], [1], [0, 0, 1, 1], [], []>} : vector<32x128xbf16>, vector<128x256xbf16>, vector<32x256xf32> -> vector<32x256xf32>
    %c0_3 = arith.constant 0 : index
    %c0_4 = arith.constant 0 : index
    %3 = vector.load %arg3[%c0_3, %c0_4] : memref<1x256xf32, #tpu.memory_space<vmem>>, vector<1x256xf32>
    %4 = vector.broadcast %3 : vector<1x256xf32> to vector<32x256xf32>
    %5 = arith.addf %2, %4 : vector<32x256xf32>
    %cst_5 = arith.constant 0.000000e+00 : f32
    %cst_6 = arith.constant 6.000000e+00 : f32
    %6 = vector.broadcast %cst_5 : f32 to vector<32x256xf32>
    %7 = arith.maximumf %6, %5 : vector<32x256xf32>
    %8 = vector.broadcast %cst_6 : f32 to vector<32x256xf32>
    %9 = arith.minimumf %8, %7 : vector<32x256xf32>
    %10 = arith.truncf %9 : vector<32x256xf32> to vector<32x256xbf16>
    %c0_7 = arith.constant 0 : index
    %c0_8 = arith.constant 0 : index
    %11 = vector.load %arg4[%c0_7, %c0_8] : memref<32x256xbf16, #tpu.memory_space<vmem>>, vector<32x256xbf16>
    tpu.vector_store %arg4[%c0_7, %c0_8], %10 {strides = array<i32>} : memref<32x256xbf16, #tpu.memory_space<vmem>>, vector<32x256xbf16>,
    return
  }
  func.func @transform_0(%arg0: i32) -> (i32, i32) {
    %c0_i32 = arith.constant 0 : i32
    %c0_i32_0 = arith.constant 0 : i32
    return %arg0, %c0_i32 : i32, i32
  }
  func.func @transform_1(%arg0: i32) -> (i32, i32) {
    %c0_i32 = arith.constant 0 : i32
    %c0_i32_0 = arith.constant 0 : i32
    %c0_i32_1 = arith.constant 0 : i32
    return %c0_i32, %c0_i32_0 : i32, i32
  }
  func.func @transform_2(%arg0: i32) -> (i32, i32) {
    %c0_i32 = arith.constant 0 : i32
    %c0_i32_0 = arith.constant 0 : i32
    %c0_i32_1 = arith.constant 0 : i32
    return %c0_i32, %c0_i32_0 : i32, i32
  }
  func.func @transform_3(%arg0: i32) -> (i32, i32) {
    %c0_i32 = arith.constant 0 : i32
    %c0_i32_0 = arith.constant 0 : i32
    return %arg0, %c0_i32 : i32, i32
  }
}

module attributes {stable_mosaic.version = 11 : i64} {
  func.func @_dw_s1_kernel(%arg0: i32, %arg1: memref<1x6x6x256xbf16, #tpu.memory_space<vmem>>, %arg2: memref<9x256xf32, #tpu.memory_space<vmem>>, %arg3: memref<1x256xf32, #tpu.memory_space<vmem>>, %arg4: memref<1x4x4x256xbf16, #tpu.memory_space<vmem>>) attributes {dimension_semantics = [#tpu.dimension_semantics<parallel>], iteration_bounds = array<i64: 2>, scalar_prefetch = 0 : i64, scratch_operands = 0 : i64, tpu.core_type = #tpu.core_type<tc>, window_params = [{transform_indices = @transform_0, window_bounds = array<i64: 1, 6, 6, 256>}, {pipeline_mode = #tpu.pipeline_mode<synchronous>, transform_indices = @transform_1, window_bounds = array<i64: 9, 256>}, {pipeline_mode = #tpu.pipeline_mode<synchronous>, transform_indices = @transform_2, window_bounds = array<i64: 1, 256>}, {transform_indices = @transform_3, window_bounds = array<i64: 1, 4, 4, 256>}]} {
    %c0 = arith.constant 0 : index
    %c0_0 = arith.constant 0 : index
    %c0_1 = arith.constant 0 : index
    %c0_2 = arith.constant 0 : index
    %0 = vector.load %arg1[%c0, %c0_0, %c0_1, %c0_2] : memref<1x6x6x256xbf16, #tpu.memory_space<vmem>>, vector<1x6x6x256xbf16>
    %1 = vector.shape_cast %0 : vector<1x6x6x256xbf16> to vector<6x6x256xbf16>
    %2 = arith.extf %1 : vector<6x6x256xbf16> to vector<6x6x256xf32>
    %3 = vector.extract_strided_slice %2 {offsets = [0, 0, 0], sizes = [4, 4, 256], strides = [1, 1, 1]} : vector<6x6x256xf32> to vector<4x4x256xf32>
    %c0_3 = arith.constant 0 : index
    %c0_4 = arith.constant 0 : index
    %4 = vector.load %arg2[%c0_3, %c0_4] : memref<9x256xf32, #tpu.memory_space<vmem>>, vector<1x256xf32>
    %5 = vector.shape_cast %4 : vector<1x256xf32> to vector<256xf32>
    %6 = vector.shape_cast %5 : vector<256xf32> to vector<1x1x256xf32>
    %7 = vector.broadcast %6 : vector<1x1x256xf32> to vector<4x4x256xf32>
    %8 = arith.mulf %3, %7 : vector<4x4x256xf32>
    %9 = vector.extract_strided_slice %2 {offsets = [0, 1, 0], sizes = [4, 4, 256], strides = [1, 1, 1]} : vector<6x6x256xf32> to vector<4x4x256xf32>
    %c1 = arith.constant 1 : index
    %c0_5 = arith.constant 0 : index
    %10 = vector.load %arg2[%c1, %c0_5] : memref<9x256xf32, #tpu.memory_space<vmem>>, vector<1x256xf32>
    %11 = vector.shape_cast %10 : vector<1x256xf32> to vector<256xf32>
    %12 = vector.shape_cast %11 : vector<256xf32> to vector<1x1x256xf32>
    %13 = vector.broadcast %12 : vector<1x1x256xf32> to vector<4x4x256xf32>
    %14 = arith.mulf %9, %13 : vector<4x4x256xf32>
    %15 = arith.addf %8, %14 : vector<4x4x256xf32>
    %16 = vector.extract_strided_slice %2 {offsets = [0, 2, 0], sizes = [4, 4, 256], strides = [1, 1, 1]} : vector<6x6x256xf32> to vector<4x4x256xf32>
    %c2 = arith.constant 2 : index
    %c0_6 = arith.constant 0 : index
    %17 = vector.load %arg2[%c2, %c0_6] : memref<9x256xf32, #tpu.memory_space<vmem>>, vector<1x256xf32>
    %18 = vector.shape_cast %17 : vector<1x256xf32> to vector<256xf32>
    %19 = vector.shape_cast %18 : vector<256xf32> to vector<1x1x256xf32>
    %20 = vector.broadcast %19 : vector<1x1x256xf32> to vector<4x4x256xf32>
    %21 = arith.mulf %16, %20 : vector<4x4x256xf32>
    %22 = arith.addf %15, %21 : vector<4x4x256xf32>
    %23 = vector.extract_strided_slice %2 {offsets = [1, 0, 0], sizes = [4, 4, 256], strides = [1, 1, 1]} : vector<6x6x256xf32> to vector<4x4x256xf32>
    %c3 = arith.constant 3 : index
    %c0_7 = arith.constant 0 : index
    %24 = vector.load %arg2[%c3, %c0_7] : memref<9x256xf32, #tpu.memory_space<vmem>>, vector<1x256xf32>
    %25 = vector.shape_cast %24 : vector<1x256xf32> to vector<256xf32>
    %26 = vector.shape_cast %25 : vector<256xf32> to vector<1x1x256xf32>
    %27 = vector.broadcast %26 : vector<1x1x256xf32> to vector<4x4x256xf32>
    %28 = arith.mulf %23, %27 : vector<4x4x256xf32>
    %29 = arith.addf %22, %28 : vector<4x4x256xf32>
    %30 = vector.extract_strided_slice %2 {offsets = [1, 1, 0], sizes = [4, 4, 256], strides = [1, 1, 1]} : vector<6x6x256xf32> to vector<4x4x256xf32>
    %c4 = arith.constant 4 : index
    %c0_8 = arith.constant 0 : index
    %31 = vector.load %arg2[%c4, %c0_8] : memref<9x256xf32, #tpu.memory_space<vmem>>, vector<1x256xf32>
    %32 = vector.shape_cast %31 : vector<1x256xf32> to vector<256xf32>
    %33 = vector.shape_cast %32 : vector<256xf32> to vector<1x1x256xf32>
    %34 = vector.broadcast %33 : vector<1x1x256xf32> to vector<4x4x256xf32>
    %35 = arith.mulf %30, %34 : vector<4x4x256xf32>
    %36 = arith.addf %29, %35 : vector<4x4x256xf32>
    %37 = vector.extract_strided_slice %2 {offsets = [1, 2, 0], sizes = [4, 4, 256], strides = [1, 1, 1]} : vector<6x6x256xf32> to vector<4x4x256xf32>
    %c5 = arith.constant 5 : index
    %c0_9 = arith.constant 0 : index
    %38 = vector.load %arg2[%c5, %c0_9] : memref<9x256xf32, #tpu.memory_space<vmem>>, vector<1x256xf32>
    %39 = vector.shape_cast %38 : vector<1x256xf32> to vector<256xf32>
    %40 = vector.shape_cast %39 : vector<256xf32> to vector<1x1x256xf32>
    %41 = vector.broadcast %40 : vector<1x1x256xf32> to vector<4x4x256xf32>
    %42 = arith.mulf %37, %41 : vector<4x4x256xf32>
    %43 = arith.addf %36, %42 : vector<4x4x256xf32>
    %44 = vector.extract_strided_slice %2 {offsets = [2, 0, 0], sizes = [4, 4, 256], strides = [1, 1, 1]} : vector<6x6x256xf32> to vector<4x4x256xf32>
    %c6 = arith.constant 6 : index
    %c0_10 = arith.constant 0 : index
    %45 = vector.load %arg2[%c6, %c0_10] : memref<9x256xf32, #tpu.memory_space<vmem>>, vector<1x256xf32>
    %46 = vector.shape_cast %45 : vector<1x256xf32> to vector<256xf32>
    %47 = vector.shape_cast %46 : vector<256xf32> to vector<1x1x256xf32>
    %48 = vector.broadcast %47 : vector<1x1x256xf32> to vector<4x4x256xf32>
    %49 = arith.mulf %44, %48 : vector<4x4x256xf32>
    %50 = arith.addf %43, %49 : vector<4x4x256xf32>
    %51 = vector.extract_strided_slice %2 {offsets = [2, 1, 0], sizes = [4, 4, 256], strides = [1, 1, 1]} : vector<6x6x256xf32> to vector<4x4x256xf32>
    %c7 = arith.constant 7 : index
    %c0_11 = arith.constant 0 : index
    %52 = vector.load %arg2[%c7, %c0_11] : memref<9x256xf32, #tpu.memory_space<vmem>>, vector<1x256xf32>
    %53 = vector.shape_cast %52 : vector<1x256xf32> to vector<256xf32>
    %54 = vector.shape_cast %53 : vector<256xf32> to vector<1x1x256xf32>
    %55 = vector.broadcast %54 : vector<1x1x256xf32> to vector<4x4x256xf32>
    %56 = arith.mulf %51, %55 : vector<4x4x256xf32>
    %57 = arith.addf %50, %56 : vector<4x4x256xf32>
    %58 = vector.extract_strided_slice %2 {offsets = [2, 2, 0], sizes = [4, 4, 256], strides = [1, 1, 1]} : vector<6x6x256xf32> to vector<4x4x256xf32>
    %c8 = arith.constant 8 : index
    %c0_12 = arith.constant 0 : index
    %59 = vector.load %arg2[%c8, %c0_12] : memref<9x256xf32, #tpu.memory_space<vmem>>, vector<1x256xf32>
    %60 = vector.shape_cast %59 : vector<1x256xf32> to vector<256xf32>
    %61 = vector.shape_cast %60 : vector<256xf32> to vector<1x1x256xf32>
    %62 = vector.broadcast %61 : vector<1x1x256xf32> to vector<4x4x256xf32>
    %63 = arith.mulf %58, %62 : vector<4x4x256xf32>
    %64 = arith.addf %57, %63 : vector<4x4x256xf32>
    %c0_13 = arith.constant 0 : index
    %c0_14 = arith.constant 0 : index
    %65 = vector.load %arg3[%c0_13, %c0_14] : memref<1x256xf32, #tpu.memory_space<vmem>>, vector<1x256xf32>
    %66 = vector.shape_cast %65 : vector<1x256xf32> to vector<256xf32>
    %67 = vector.shape_cast %66 : vector<256xf32> to vector<1x1x256xf32>
    %68 = vector.broadcast %67 : vector<1x1x256xf32> to vector<4x4x256xf32>
    %69 = arith.addf %64, %68 : vector<4x4x256xf32>
    %cst = arith.constant 0.000000e+00 : f32
    %cst_15 = arith.constant 6.000000e+00 : f32
    %70 = vector.broadcast %cst : f32 to vector<4x4x256xf32>
    %71 = arith.maximumf %70, %69 : vector<4x4x256xf32>
    %72 = vector.broadcast %cst_15 : f32 to vector<4x4x256xf32>
    %73 = arith.minimumf %72, %71 : vector<4x4x256xf32>
    %74 = arith.truncf %73 : vector<4x4x256xf32> to vector<4x4x256xbf16>
    %c0_16 = arith.constant 0 : index
    %c0_17 = arith.constant 0 : index
    %c0_18 = arith.constant 0 : index
    %c0_19 = arith.constant 0 : index
    %75 = vector.load %arg4[%c0_16, %c0_17, %c0_18, %c0_19] : memref<1x4x4x256xbf16, #tpu.memory_space<vmem>>, vector<1x4x4x256xbf16>
    %76 = vector.shape_cast %75 : vector<1x4x4x256xbf16> to vector<4x4x256xbf16>
    %77 = vector.shape_cast %74 : vector<4x4x256xbf16> to vector<1x4x4x256xbf16>
    tpu.vector_store %arg4[%c0_16, %c0_17, %c0_18, %c0_19], %77 {strides = array<i32>} : memref<1x4x4x256xbf16, #tpu.memory_space<vmem>>, vector<1x4x4x256xbf16>,
    return
  }
  func.func @transform_0(%arg0: i32) -> (i32, i32, i32, i32) {
    %c0_i32 = arith.constant 0 : i32
    %c0_i32_0 = arith.constant 0 : i32
    %c0_i32_1 = arith.constant 0 : i32
    %c0_i32_2 = arith.constant 0 : i32
    return %arg0, %c0_i32, %c0_i32_0, %c0_i32_1 : i32, i32, i32, i32
  }
  func.func @transform_1(%arg0: i32) -> (i32, i32) {
    %c0_i32 = arith.constant 0 : i32
    %c0_i32_0 = arith.constant 0 : i32
    %c0_i32_1 = arith.constant 0 : i32
    return %c0_i32, %c0_i32_0 : i32, i32
  }
  func.func @transform_2(%arg0: i32) -> (i32, i32) {
    %c0_i32 = arith.constant 0 : i32
    %c0_i32_0 = arith.constant 0 : i32
    %c0_i32_1 = arith.constant 0 : i32
    return %c0_i32, %c0_i32_0 : i32, i32
  }
  func.func @transform_3(%arg0: i32) -> (i32, i32, i32, i32) {
    %c0_i32 = arith.constant 0 : i32
    %c0_i32_0 = arith.constant 0 : i32
    %c0_i32_1 = arith.constant 0 : i32
    %c0_i32_2 = arith.constant 0 : i32
    return %arg0, %c0_i32, %c0_i32_0, %c0_i32_1 : i32, i32, i32, i32
  }
}

module attributes {stable_mosaic.version = 11 : i64} {
  func.func @_pw_linear_res_kernel(%arg0: i32, %arg1: memref<32x256xbf16, #tpu.memory_space<vmem>>, %arg2: memref<256x128xbf16, #tpu.memory_space<vmem>>, %arg3: memref<1x128xf32, #tpu.memory_space<vmem>>, %arg4: memref<32x128xbf16, #tpu.memory_space<vmem>>, %arg5: memref<32x128xbf16, #tpu.memory_space<vmem>>) attributes {dimension_semantics = [#tpu.dimension_semantics<parallel>], iteration_bounds = array<i64: 1>, scalar_prefetch = 0 : i64, scratch_operands = 0 : i64, tpu.core_type = #tpu.core_type<tc>, window_params = [{transform_indices = @transform_0, window_bounds = array<i64: 32, 256>}, {pipeline_mode = #tpu.pipeline_mode<synchronous>, transform_indices = @transform_1, window_bounds = array<i64: 256, 128>}, {pipeline_mode = #tpu.pipeline_mode<synchronous>, transform_indices = @transform_2, window_bounds = array<i64: 1, 128>}, {transform_indices = @transform_3, window_bounds = array<i64: 32, 128>}, {transform_indices = @transform_4, window_bounds = array<i64: 32, 128>}]} {
    %c0 = arith.constant 0 : index
    %c0_0 = arith.constant 0 : index
    %0 = vector.load %arg1[%c0, %c0_0] : memref<32x256xbf16, #tpu.memory_space<vmem>>, vector<32x256xbf16>
    %c0_1 = arith.constant 0 : index
    %c0_2 = arith.constant 0 : index
    %1 = vector.load %arg2[%c0_1, %c0_2] : memref<256x128xbf16, #tpu.memory_space<vmem>>, vector<256x128xbf16>
    %cst = arith.constant dense<0.000000e+00> : vector<32x128xf32>
    %2 = tpu.matmul %0, %1, %cst {dimension_numbers = #tpu.dot_dimension_numbers<[1], [0], [0], [1], [0, 0, 1, 1], [], []>} : vector<32x256xbf16>, vector<256x128xbf16>, vector<32x128xf32> -> vector<32x128xf32>
    %c0_3 = arith.constant 0 : index
    %c0_4 = arith.constant 0 : index
    %3 = vector.load %arg3[%c0_3, %c0_4] : memref<1x128xf32, #tpu.memory_space<vmem>>, vector<1x128xf32>
    %4 = vector.broadcast %3 : vector<1x128xf32> to vector<32x128xf32>
    %5 = arith.addf %2, %4 : vector<32x128xf32>
    %c0_5 = arith.constant 0 : index
    %c0_6 = arith.constant 0 : index
    %6 = vector.load %arg4[%c0_5, %c0_6] : memref<32x128xbf16, #tpu.memory_space<vmem>>, vector<32x128xbf16>
    %7 = arith.extf %6 : vector<32x128xbf16> to vector<32x128xf32>
    %8 = arith.addf %5, %7 : vector<32x128xf32>
    %9 = arith.truncf %8 : vector<32x128xf32> to vector<32x128xbf16>
    %c0_7 = arith.constant 0 : index
    %c0_8 = arith.constant 0 : index
    %10 = vector.load %arg5[%c0_7, %c0_8] : memref<32x128xbf16, #tpu.memory_space<vmem>>, vector<32x128xbf16>
    tpu.vector_store %arg5[%c0_7, %c0_8], %9 {strides = array<i32>} : memref<32x128xbf16, #tpu.memory_space<vmem>>, vector<32x128xbf16>,
    return
  }
  func.func @transform_0(%arg0: i32) -> (i32, i32) {
    %c0_i32 = arith.constant 0 : i32
    %c0_i32_0 = arith.constant 0 : i32
    return %arg0, %c0_i32 : i32, i32
  }
  func.func @transform_1(%arg0: i32) -> (i32, i32) {
    %c0_i32 = arith.constant 0 : i32
    %c0_i32_0 = arith.constant 0 : i32
    %c0_i32_1 = arith.constant 0 : i32
    return %c0_i32, %c0_i32_0 : i32, i32
  }
  func.func @transform_2(%arg0: i32) -> (i32, i32) {
    %c0_i32 = arith.constant 0 : i32
    %c0_i32_0 = arith.constant 0 : i32
    %c0_i32_1 = arith.constant 0 : i32
    return %c0_i32, %c0_i32_0 : i32, i32
  }
  func.func @transform_3(%arg0: i32) -> (i32, i32) {
    %c0_i32 = arith.constant 0 : i32
    %c0_i32_0 = arith.constant 0 : i32
    return %arg0, %c0_i32 : i32, i32
  }
  func.func @transform_4(%arg0: i32) -> (i32, i32) {
    %c0_i32 = arith.constant 0 : i32
    %c0_i32_0 = arith.constant 0 : i32
    return %arg0, %c0_i32 : i32, i32
  }
}

module attributes {stable_mosaic.version = 11 : i64} {
  func.func @_dw_s2_kernel(%arg0: i32, %arg1: memref<1x3x3x1024xbf16, #tpu.memory_space<vmem>>, %arg2: memref<9x256xf32, #tpu.memory_space<vmem>>, %arg3: memref<1x256xf32, #tpu.memory_space<vmem>>, %arg4: memref<1x2x2x256xbf16, #tpu.memory_space<vmem>>) attributes {dimension_semantics = [#tpu.dimension_semantics<parallel>], iteration_bounds = array<i64: 2>, scalar_prefetch = 0 : i64, scratch_operands = 0 : i64, tpu.core_type = #tpu.core_type<tc>, window_params = [{transform_indices = @transform_0, window_bounds = array<i64: 1, 3, 3, 1024>}, {pipeline_mode = #tpu.pipeline_mode<synchronous>, transform_indices = @transform_1, window_bounds = array<i64: 9, 256>}, {pipeline_mode = #tpu.pipeline_mode<synchronous>, transform_indices = @transform_2, window_bounds = array<i64: 1, 256>}, {transform_indices = @transform_3, window_bounds = array<i64: 1, 2, 2, 256>}]} {
    %c0 = arith.constant 0 : index
    %c0_0 = arith.constant 0 : index
    %c0_1 = arith.constant 0 : index
    %c0_2 = arith.constant 0 : index
    %0 = vector.load %arg1[%c0, %c0_0, %c0_1, %c0_2] : memref<1x3x3x1024xbf16, #tpu.memory_space<vmem>>, vector<1x3x3x1024xbf16>
    %1 = vector.shape_cast %0 : vector<1x3x3x1024xbf16> to vector<3x3x1024xbf16>
    %2 = arith.extf %1 : vector<3x3x1024xbf16> to vector<3x3x1024xf32>
    %3 = vector.extract_strided_slice %2 {offsets = [0, 0, 0], sizes = [2, 2, 256], strides = [1, 1, 1]} : vector<3x3x1024xf32> to vector<2x2x256xf32>
    %c0_3 = arith.constant 0 : index
    %c0_4 = arith.constant 0 : index
    %4 = vector.load %arg2[%c0_3, %c0_4] : memref<9x256xf32, #tpu.memory_space<vmem>>, vector<1x256xf32>
    %5 = vector.shape_cast %4 : vector<1x256xf32> to vector<256xf32>
    %6 = vector.shape_cast %5 : vector<256xf32> to vector<1x1x256xf32>
    %7 = vector.broadcast %6 : vector<1x1x256xf32> to vector<2x2x256xf32>
    %8 = arith.mulf %3, %7 : vector<2x2x256xf32>
    %9 = vector.extract_strided_slice %2 {offsets = [0, 0, 256], sizes = [2, 2, 256], strides = [1, 1, 1]} : vector<3x3x1024xf32> to vector<2x2x256xf32>
    %c1 = arith.constant 1 : index
    %c0_5 = arith.constant 0 : index
    %10 = vector.load %arg2[%c1, %c0_5] : memref<9x256xf32, #tpu.memory_space<vmem>>, vector<1x256xf32>
    %11 = vector.shape_cast %10 : vector<1x256xf32> to vector<256xf32>
    %12 = vector.shape_cast %11 : vector<256xf32> to vector<1x1x256xf32>
    %13 = vector.broadcast %12 : vector<1x1x256xf32> to vector<2x2x256xf32>
    %14 = arith.mulf %9, %13 : vector<2x2x256xf32>
    %15 = arith.addf %8, %14 : vector<2x2x256xf32>
    %16 = vector.extract_strided_slice %2 {offsets = [0, 1, 0], sizes = [2, 2, 256], strides = [1, 1, 1]} : vector<3x3x1024xf32> to vector<2x2x256xf32>
    %c2 = arith.constant 2 : index
    %c0_6 = arith.constant 0 : index
    %17 = vector.load %arg2[%c2, %c0_6] : memref<9x256xf32, #tpu.memory_space<vmem>>, vector<1x256xf32>
    %18 = vector.shape_cast %17 : vector<1x256xf32> to vector<256xf32>
    %19 = vector.shape_cast %18 : vector<256xf32> to vector<1x1x256xf32>
    %20 = vector.broadcast %19 : vector<1x1x256xf32> to vector<2x2x256xf32>
    %21 = arith.mulf %16, %20 : vector<2x2x256xf32>
    %22 = arith.addf %15, %21 : vector<2x2x256xf32>
    %23 = vector.extract_strided_slice %2 {offsets = [0, 0, 512], sizes = [2, 2, 256], strides = [1, 1, 1]} : vector<3x3x1024xf32> to vector<2x2x256xf32>
    %c3 = arith.constant 3 : index
    %c0_7 = arith.constant 0 : index
    %24 = vector.load %arg2[%c3, %c0_7] : memref<9x256xf32, #tpu.memory_space<vmem>>, vector<1x256xf32>
    %25 = vector.shape_cast %24 : vector<1x256xf32> to vector<256xf32>
    %26 = vector.shape_cast %25 : vector<256xf32> to vector<1x1x256xf32>
    %27 = vector.broadcast %26 : vector<1x1x256xf32> to vector<2x2x256xf32>
    %28 = arith.mulf %23, %27 : vector<2x2x256xf32>
    %29 = arith.addf %22, %28 : vector<2x2x256xf32>
    %30 = vector.extract_strided_slice %2 {offsets = [0, 0, 768], sizes = [2, 2, 256], strides = [1, 1, 1]} : vector<3x3x1024xf32> to vector<2x2x256xf32>
    %c4 = arith.constant 4 : index
    %c0_8 = arith.constant 0 : index
    %31 = vector.load %arg2[%c4, %c0_8] : memref<9x256xf32, #tpu.memory_space<vmem>>, vector<1x256xf32>
    %32 = vector.shape_cast %31 : vector<1x256xf32> to vector<256xf32>
    %33 = vector.shape_cast %32 : vector<256xf32> to vector<1x1x256xf32>
    %34 = vector.broadcast %33 : vector<1x1x256xf32> to vector<2x2x256xf32>
    %35 = arith.mulf %30, %34 : vector<2x2x256xf32>
    %36 = arith.addf %29, %35 : vector<2x2x256xf32>
    %37 = vector.extract_strided_slice %2 {offsets = [0, 1, 512], sizes = [2, 2, 256], strides = [1, 1, 1]} : vector<3x3x1024xf32> to vector<2x2x256xf32>
    %c5 = arith.constant 5 : index
    %c0_9 = arith.constant 0 : index
    %38 = vector.load %arg2[%c5, %c0_9] : memref<9x256xf32, #tpu.memory_space<vmem>>, vector<1x256xf32>
    %39 = vector.shape_cast %38 : vector<1x256xf32> to vector<256xf32>
    %40 = vector.shape_cast %39 : vector<256xf32> to vector<1x1x256xf32>
    %41 = vector.broadcast %40 : vector<1x1x256xf32> to vector<2x2x256xf32>
    %42 = arith.mulf %37, %41 : vector<2x2x256xf32>
    %43 = arith.addf %36, %42 : vector<2x2x256xf32>
    %44 = vector.extract_strided_slice %2 {offsets = [1, 0, 0], sizes = [2, 2, 256], strides = [1, 1, 1]} : vector<3x3x1024xf32> to vector<2x2x256xf32>
    %c6 = arith.constant 6 : index
    %c0_10 = arith.constant 0 : index
    %45 = vector.load %arg2[%c6, %c0_10] : memref<9x256xf32, #tpu.memory_space<vmem>>, vector<1x256xf32>
    %46 = vector.shape_cast %45 : vector<1x256xf32> to vector<256xf32>
    %47 = vector.shape_cast %46 : vector<256xf32> to vector<1x1x256xf32>
    %48 = vector.broadcast %47 : vector<1x1x256xf32> to vector<2x2x256xf32>
    %49 = arith.mulf %44, %48 : vector<2x2x256xf32>
    %50 = arith.addf %43, %49 : vector<2x2x256xf32>
    %51 = vector.extract_strided_slice %2 {offsets = [1, 0, 256], sizes = [2, 2, 256], strides = [1, 1, 1]} : vector<3x3x1024xf32> to vector<2x2x256xf32>
    %c7 = arith.constant 7 : index
    %c0_11 = arith.constant 0 : index
    %52 = vector.load %arg2[%c7, %c0_11] : memref<9x256xf32, #tpu.memory_space<vmem>>, vector<1x256xf32>
    %53 = vector.shape_cast %52 : vector<1x256xf32> to vector<256xf32>
    %54 = vector.shape_cast %53 : vector<256xf32> to vector<1x1x256xf32>
    %55 = vector.broadcast %54 : vector<1x1x256xf32> to vector<2x2x256xf32>
    %56 = arith.mulf %51, %55 : vector<2x2x256xf32>
    %57 = arith.addf %50, %56 : vector<2x2x256xf32>
    %58 = vector.extract_strided_slice %2 {offsets = [1, 1, 0], sizes = [2, 2, 256], strides = [1, 1, 1]} : vector<3x3x1024xf32> to vector<2x2x256xf32>
    %c8 = arith.constant 8 : index
    %c0_12 = arith.constant 0 : index
    %59 = vector.load %arg2[%c8, %c0_12] : memref<9x256xf32, #tpu.memory_space<vmem>>, vector<1x256xf32>
    %60 = vector.shape_cast %59 : vector<1x256xf32> to vector<256xf32>
    %61 = vector.shape_cast %60 : vector<256xf32> to vector<1x1x256xf32>
    %62 = vector.broadcast %61 : vector<1x1x256xf32> to vector<2x2x256xf32>
    %63 = arith.mulf %58, %62 : vector<2x2x256xf32>
    %64 = arith.addf %57, %63 : vector<2x2x256xf32>
    %c0_13 = arith.constant 0 : index
    %c0_14 = arith.constant 0 : index
    %65 = vector.load %arg3[%c0_13, %c0_14] : memref<1x256xf32, #tpu.memory_space<vmem>>, vector<1x256xf32>
    %66 = vector.shape_cast %65 : vector<1x256xf32> to vector<256xf32>
    %67 = vector.shape_cast %66 : vector<256xf32> to vector<1x1x256xf32>
    %68 = vector.broadcast %67 : vector<1x1x256xf32> to vector<2x2x256xf32>
    %69 = arith.addf %64, %68 : vector<2x2x256xf32>
    %cst = arith.constant 0.000000e+00 : f32
    %cst_15 = arith.constant 6.000000e+00 : f32
    %70 = vector.broadcast %cst : f32 to vector<2x2x256xf32>
    %71 = arith.maximumf %70, %69 : vector<2x2x256xf32>
    %72 = vector.broadcast %cst_15 : f32 to vector<2x2x256xf32>
    %73 = arith.minimumf %72, %71 : vector<2x2x256xf32>
    %74 = arith.truncf %73 : vector<2x2x256xf32> to vector<2x2x256xbf16>
    %c0_16 = arith.constant 0 : index
    %c0_17 = arith.constant 0 : index
    %c0_18 = arith.constant 0 : index
    %c0_19 = arith.constant 0 : index
    %75 = vector.load %arg4[%c0_16, %c0_17, %c0_18, %c0_19] : memref<1x2x2x256xbf16, #tpu.memory_space<vmem>>, vector<1x2x2x256xbf16>
    %76 = vector.shape_cast %75 : vector<1x2x2x256xbf16> to vector<2x2x256xbf16>
    %77 = vector.shape_cast %74 : vector<2x2x256xbf16> to vector<1x2x2x256xbf16>
    tpu.vector_store %arg4[%c0_16, %c0_17, %c0_18, %c0_19], %77 {strides = array<i32>} : memref<1x2x2x256xbf16, #tpu.memory_space<vmem>>, vector<1x2x2x256xbf16>,
    return
  }
  func.func @transform_0(%arg0: i32) -> (i32, i32, i32, i32) {
    %c0_i32 = arith.constant 0 : i32
    %c0_i32_0 = arith.constant 0 : i32
    %c0_i32_1 = arith.constant 0 : i32
    %c0_i32_2 = arith.constant 0 : i32
    return %arg0, %c0_i32, %c0_i32_0, %c0_i32_1 : i32, i32, i32, i32
  }
  func.func @transform_1(%arg0: i32) -> (i32, i32) {
    %c0_i32 = arith.constant 0 : i32
    %c0_i32_0 = arith.constant 0 : i32
    %c0_i32_1 = arith.constant 0 : i32
    return %c0_i32, %c0_i32_0 : i32, i32
  }
  func.func @transform_2(%arg0: i32) -> (i32, i32) {
    %c0_i32 = arith.constant 0 : i32
    %c0_i32_0 = arith.constant 0 : i32
    %c0_i32_1 = arith.constant 0 : i32
    return %c0_i32, %c0_i32_0 : i32, i32
  }
  func.func @transform_3(%arg0: i32) -> (i32, i32, i32, i32) {
    %c0_i32 = arith.constant 0 : i32
    %c0_i32_0 = arith.constant 0 : i32
    %c0_i32_1 = arith.constant 0 : i32
    %c0_i32_2 = arith.constant 0 : i32
    return %arg0, %c0_i32, %c0_i32_0, %c0_i32_1 : i32, i32, i32, i32
  }
}

module attributes {stable_mosaic.version = 11 : i64} {
  func.func @_pw_relu6_kernel(%arg0: i32, %arg1: memref<8x128xbf16, #tpu.memory_space<vmem>>, %arg2: memref<128x256xbf16, #tpu.memory_space<vmem>>, %arg3: memref<1x256xf32, #tpu.memory_space<vmem>>, %arg4: memref<8x256xbf16, #tpu.memory_space<vmem>>) attributes {dimension_semantics = [#tpu.dimension_semantics<parallel>], iteration_bounds = array<i64: 1>, scalar_prefetch = 0 : i64, scratch_operands = 0 : i64, tpu.core_type = #tpu.core_type<tc>, window_params = [{transform_indices = @transform_0, window_bounds = array<i64: 8, 128>}, {pipeline_mode = #tpu.pipeline_mode<synchronous>, transform_indices = @transform_1, window_bounds = array<i64: 128, 256>}, {pipeline_mode = #tpu.pipeline_mode<synchronous>, transform_indices = @transform_2, window_bounds = array<i64: 1, 256>}, {transform_indices = @transform_3, window_bounds = array<i64: 8, 256>}]} {
    %c0 = arith.constant 0 : index
    %c0_0 = arith.constant 0 : index
    %0 = vector.load %arg1[%c0, %c0_0] : memref<8x128xbf16, #tpu.memory_space<vmem>>, vector<8x128xbf16>
    %c0_1 = arith.constant 0 : index
    %c0_2 = arith.constant 0 : index
    %1 = vector.load %arg2[%c0_1, %c0_2] : memref<128x256xbf16, #tpu.memory_space<vmem>>, vector<128x256xbf16>
    %cst = arith.constant dense<0.000000e+00> : vector<8x256xf32>
    %2 = tpu.matmul %0, %1, %cst {dimension_numbers = #tpu.dot_dimension_numbers<[1], [0], [0], [1], [0, 0, 1, 1], [], []>} : vector<8x128xbf16>, vector<128x256xbf16>, vector<8x256xf32> -> vector<8x256xf32>
    %c0_3 = arith.constant 0 : index
    %c0_4 = arith.constant 0 : index
    %3 = vector.load %arg3[%c0_3, %c0_4] : memref<1x256xf32, #tpu.memory_space<vmem>>, vector<1x256xf32>
    %4 = vector.broadcast %3 : vector<1x256xf32> to vector<8x256xf32>
    %5 = arith.addf %2, %4 : vector<8x256xf32>
    %cst_5 = arith.constant 0.000000e+00 : f32
    %cst_6 = arith.constant 6.000000e+00 : f32
    %6 = vector.broadcast %cst_5 : f32 to vector<8x256xf32>
    %7 = arith.maximumf %6, %5 : vector<8x256xf32>
    %8 = vector.broadcast %cst_6 : f32 to vector<8x256xf32>
    %9 = arith.minimumf %8, %7 : vector<8x256xf32>
    %10 = arith.truncf %9 : vector<8x256xf32> to vector<8x256xbf16>
    %c0_7 = arith.constant 0 : index
    %c0_8 = arith.constant 0 : index
    %11 = vector.load %arg4[%c0_7, %c0_8] : memref<8x256xbf16, #tpu.memory_space<vmem>>, vector<8x256xbf16>
    tpu.vector_store %arg4[%c0_7, %c0_8], %10 {strides = array<i32>} : memref<8x256xbf16, #tpu.memory_space<vmem>>, vector<8x256xbf16>,
    return
  }
  func.func @transform_0(%arg0: i32) -> (i32, i32) {
    %c0_i32 = arith.constant 0 : i32
    %c0_i32_0 = arith.constant 0 : i32
    return %arg0, %c0_i32 : i32, i32
  }
  func.func @transform_1(%arg0: i32) -> (i32, i32) {
    %c0_i32 = arith.constant 0 : i32
    %c0_i32_0 = arith.constant 0 : i32
    %c0_i32_1 = arith.constant 0 : i32
    return %c0_i32, %c0_i32_0 : i32, i32
  }
  func.func @transform_2(%arg0: i32) -> (i32, i32) {
    %c0_i32 = arith.constant 0 : i32
    %c0_i32_0 = arith.constant 0 : i32
    %c0_i32_1 = arith.constant 0 : i32
    return %c0_i32, %c0_i32_0 : i32, i32
  }
  func.func @transform_3(%arg0: i32) -> (i32, i32) {
    %c0_i32 = arith.constant 0 : i32
    %c0_i32_0 = arith.constant 0 : i32
    return %arg0, %c0_i32 : i32, i32
  }
}

module attributes {stable_mosaic.version = 11 : i64} {
  func.func @_pw_linear_kernel(%arg0: i32, %arg1: memref<8x256xbf16, #tpu.memory_space<vmem>>, %arg2: memref<256x128xbf16, #tpu.memory_space<vmem>>, %arg3: memref<1x128xf32, #tpu.memory_space<vmem>>, %arg4: memref<8x128xbf16, #tpu.memory_space<vmem>>) attributes {dimension_semantics = [#tpu.dimension_semantics<parallel>], iteration_bounds = array<i64: 1>, scalar_prefetch = 0 : i64, scratch_operands = 0 : i64, tpu.core_type = #tpu.core_type<tc>, window_params = [{transform_indices = @transform_0, window_bounds = array<i64: 8, 256>}, {pipeline_mode = #tpu.pipeline_mode<synchronous>, transform_indices = @transform_1, window_bounds = array<i64: 256, 128>}, {pipeline_mode = #tpu.pipeline_mode<synchronous>, transform_indices = @transform_2, window_bounds = array<i64: 1, 128>}, {transform_indices = @transform_3, window_bounds = array<i64: 8, 128>}]} {
    %c0 = arith.constant 0 : index
    %c0_0 = arith.constant 0 : index
    %0 = vector.load %arg1[%c0, %c0_0] : memref<8x256xbf16, #tpu.memory_space<vmem>>, vector<8x256xbf16>
    %c0_1 = arith.constant 0 : index
    %c0_2 = arith.constant 0 : index
    %1 = vector.load %arg2[%c0_1, %c0_2] : memref<256x128xbf16, #tpu.memory_space<vmem>>, vector<256x128xbf16>
    %cst = arith.constant dense<0.000000e+00> : vector<8x128xf32>
    %2 = tpu.matmul %0, %1, %cst {dimension_numbers = #tpu.dot_dimension_numbers<[1], [0], [0], [1], [0, 0, 1, 1], [], []>} : vector<8x256xbf16>, vector<256x128xbf16>, vector<8x128xf32> -> vector<8x128xf32>
    %c0_3 = arith.constant 0 : index
    %c0_4 = arith.constant 0 : index
    %3 = vector.load %arg3[%c0_3, %c0_4] : memref<1x128xf32, #tpu.memory_space<vmem>>, vector<1x128xf32>
    %4 = vector.broadcast %3 : vector<1x128xf32> to vector<8x128xf32>
    %5 = arith.addf %2, %4 : vector<8x128xf32>
    %6 = arith.truncf %5 : vector<8x128xf32> to vector<8x128xbf16>
    %c0_5 = arith.constant 0 : index
    %c0_6 = arith.constant 0 : index
    %7 = vector.load %arg4[%c0_5, %c0_6] : memref<8x128xbf16, #tpu.memory_space<vmem>>, vector<8x128xbf16>
    tpu.vector_store %arg4[%c0_5, %c0_6], %6 {strides = array<i32>} : memref<8x128xbf16, #tpu.memory_space<vmem>>, vector<8x128xbf16>,
    return
  }
  func.func @transform_0(%arg0: i32) -> (i32, i32) {
    %c0_i32 = arith.constant 0 : i32
    %c0_i32_0 = arith.constant 0 : i32
    return %arg0, %c0_i32 : i32, i32
  }
  func.func @transform_1(%arg0: i32) -> (i32, i32) {
    %c0_i32 = arith.constant 0 : i32
    %c0_i32_0 = arith.constant 0 : i32
    %c0_i32_1 = arith.constant 0 : i32
    return %c0_i32, %c0_i32_0 : i32, i32
  }
  func.func @transform_2(%arg0: i32) -> (i32, i32) {
    %c0_i32 = arith.constant 0 : i32
    %c0_i32_0 = arith.constant 0 : i32
    %c0_i32_1 = arith.constant 0 : i32
    return %c0_i32, %c0_i32_0 : i32, i32
  }
  func.func @transform_3(%arg0: i32) -> (i32, i32) {
    %c0_i32 = arith.constant 0 : i32
    %c0_i32_0 = arith.constant 0 : i32
    return %arg0, %c0_i32 : i32, i32
  }
}

module attributes {stable_mosaic.version = 11 : i64} {
  func.func @_dw_s1_kernel(%arg0: i32, %arg1: memref<1x4x4x256xbf16, #tpu.memory_space<vmem>>, %arg2: memref<9x256xf32, #tpu.memory_space<vmem>>, %arg3: memref<1x256xf32, #tpu.memory_space<vmem>>, %arg4: memref<1x2x2x256xbf16, #tpu.memory_space<vmem>>) attributes {dimension_semantics = [#tpu.dimension_semantics<parallel>], iteration_bounds = array<i64: 2>, scalar_prefetch = 0 : i64, scratch_operands = 0 : i64, tpu.core_type = #tpu.core_type<tc>, window_params = [{transform_indices = @transform_0, window_bounds = array<i64: 1, 4, 4, 256>}, {pipeline_mode = #tpu.pipeline_mode<synchronous>, transform_indices = @transform_1, window_bounds = array<i64: 9, 256>}, {pipeline_mode = #tpu.pipeline_mode<synchronous>, transform_indices = @transform_2, window_bounds = array<i64: 1, 256>}, {transform_indices = @transform_3, window_bounds = array<i64: 1, 2, 2, 256>}]} {
    %c0 = arith.constant 0 : index
    %c0_0 = arith.constant 0 : index
    %c0_1 = arith.constant 0 : index
    %c0_2 = arith.constant 0 : index
    %0 = vector.load %arg1[%c0, %c0_0, %c0_1, %c0_2] : memref<1x4x4x256xbf16, #tpu.memory_space<vmem>>, vector<1x4x4x256xbf16>
    %1 = vector.shape_cast %0 : vector<1x4x4x256xbf16> to vector<4x4x256xbf16>
    %2 = arith.extf %1 : vector<4x4x256xbf16> to vector<4x4x256xf32>
    %3 = vector.extract_strided_slice %2 {offsets = [0, 0, 0], sizes = [2, 2, 256], strides = [1, 1, 1]} : vector<4x4x256xf32> to vector<2x2x256xf32>
    %c0_3 = arith.constant 0 : index
    %c0_4 = arith.constant 0 : index
    %4 = vector.load %arg2[%c0_3, %c0_4] : memref<9x256xf32, #tpu.memory_space<vmem>>, vector<1x256xf32>
    %5 = vector.shape_cast %4 : vector<1x256xf32> to vector<256xf32>
    %6 = vector.shape_cast %5 : vector<256xf32> to vector<1x1x256xf32>
    %7 = vector.broadcast %6 : vector<1x1x256xf32> to vector<2x2x256xf32>
    %8 = arith.mulf %3, %7 : vector<2x2x256xf32>
    %9 = vector.extract_strided_slice %2 {offsets = [0, 1, 0], sizes = [2, 2, 256], strides = [1, 1, 1]} : vector<4x4x256xf32> to vector<2x2x256xf32>
    %c1 = arith.constant 1 : index
    %c0_5 = arith.constant 0 : index
    %10 = vector.load %arg2[%c1, %c0_5] : memref<9x256xf32, #tpu.memory_space<vmem>>, vector<1x256xf32>
    %11 = vector.shape_cast %10 : vector<1x256xf32> to vector<256xf32>
    %12 = vector.shape_cast %11 : vector<256xf32> to vector<1x1x256xf32>
    %13 = vector.broadcast %12 : vector<1x1x256xf32> to vector<2x2x256xf32>
    %14 = arith.mulf %9, %13 : vector<2x2x256xf32>
    %15 = arith.addf %8, %14 : vector<2x2x256xf32>
    %16 = vector.extract_strided_slice %2 {offsets = [0, 2, 0], sizes = [2, 2, 256], strides = [1, 1, 1]} : vector<4x4x256xf32> to vector<2x2x256xf32>
    %c2 = arith.constant 2 : index
    %c0_6 = arith.constant 0 : index
    %17 = vector.load %arg2[%c2, %c0_6] : memref<9x256xf32, #tpu.memory_space<vmem>>, vector<1x256xf32>
    %18 = vector.shape_cast %17 : vector<1x256xf32> to vector<256xf32>
    %19 = vector.shape_cast %18 : vector<256xf32> to vector<1x1x256xf32>
    %20 = vector.broadcast %19 : vector<1x1x256xf32> to vector<2x2x256xf32>
    %21 = arith.mulf %16, %20 : vector<2x2x256xf32>
    %22 = arith.addf %15, %21 : vector<2x2x256xf32>
    %23 = vector.extract_strided_slice %2 {offsets = [1, 0, 0], sizes = [2, 2, 256], strides = [1, 1, 1]} : vector<4x4x256xf32> to vector<2x2x256xf32>
    %c3 = arith.constant 3 : index
    %c0_7 = arith.constant 0 : index
    %24 = vector.load %arg2[%c3, %c0_7] : memref<9x256xf32, #tpu.memory_space<vmem>>, vector<1x256xf32>
    %25 = vector.shape_cast %24 : vector<1x256xf32> to vector<256xf32>
    %26 = vector.shape_cast %25 : vector<256xf32> to vector<1x1x256xf32>
    %27 = vector.broadcast %26 : vector<1x1x256xf32> to vector<2x2x256xf32>
    %28 = arith.mulf %23, %27 : vector<2x2x256xf32>
    %29 = arith.addf %22, %28 : vector<2x2x256xf32>
    %30 = vector.extract_strided_slice %2 {offsets = [1, 1, 0], sizes = [2, 2, 256], strides = [1, 1, 1]} : vector<4x4x256xf32> to vector<2x2x256xf32>
    %c4 = arith.constant 4 : index
    %c0_8 = arith.constant 0 : index
    %31 = vector.load %arg2[%c4, %c0_8] : memref<9x256xf32, #tpu.memory_space<vmem>>, vector<1x256xf32>
    %32 = vector.shape_cast %31 : vector<1x256xf32> to vector<256xf32>
    %33 = vector.shape_cast %32 : vector<256xf32> to vector<1x1x256xf32>
    %34 = vector.broadcast %33 : vector<1x1x256xf32> to vector<2x2x256xf32>
    %35 = arith.mulf %30, %34 : vector<2x2x256xf32>
    %36 = arith.addf %29, %35 : vector<2x2x256xf32>
    %37 = vector.extract_strided_slice %2 {offsets = [1, 2, 0], sizes = [2, 2, 256], strides = [1, 1, 1]} : vector<4x4x256xf32> to vector<2x2x256xf32>
    %c5 = arith.constant 5 : index
    %c0_9 = arith.constant 0 : index
    %38 = vector.load %arg2[%c5, %c0_9] : memref<9x256xf32, #tpu.memory_space<vmem>>, vector<1x256xf32>
    %39 = vector.shape_cast %38 : vector<1x256xf32> to vector<256xf32>
    %40 = vector.shape_cast %39 : vector<256xf32> to vector<1x1x256xf32>
    %41 = vector.broadcast %40 : vector<1x1x256xf32> to vector<2x2x256xf32>
    %42 = arith.mulf %37, %41 : vector<2x2x256xf32>
    %43 = arith.addf %36, %42 : vector<2x2x256xf32>
    %44 = vector.extract_strided_slice %2 {offsets = [2, 0, 0], sizes = [2, 2, 256], strides = [1, 1, 1]} : vector<4x4x256xf32> to vector<2x2x256xf32>
    %c6 = arith.constant 6 : index
    %c0_10 = arith.constant 0 : index
    %45 = vector.load %arg2[%c6, %c0_10] : memref<9x256xf32, #tpu.memory_space<vmem>>, vector<1x256xf32>
    %46 = vector.shape_cast %45 : vector<1x256xf32> to vector<256xf32>
    %47 = vector.shape_cast %46 : vector<256xf32> to vector<1x1x256xf32>
    %48 = vector.broadcast %47 : vector<1x1x256xf32> to vector<2x2x256xf32>
    %49 = arith.mulf %44, %48 : vector<2x2x256xf32>
    %50 = arith.addf %43, %49 : vector<2x2x256xf32>
    %51 = vector.extract_strided_slice %2 {offsets = [2, 1, 0], sizes = [2, 2, 256], strides = [1, 1, 1]} : vector<4x4x256xf32> to vector<2x2x256xf32>
    %c7 = arith.constant 7 : index
    %c0_11 = arith.constant 0 : index
    %52 = vector.load %arg2[%c7, %c0_11] : memref<9x256xf32, #tpu.memory_space<vmem>>, vector<1x256xf32>
    %53 = vector.shape_cast %52 : vector<1x256xf32> to vector<256xf32>
    %54 = vector.shape_cast %53 : vector<256xf32> to vector<1x1x256xf32>
    %55 = vector.broadcast %54 : vector<1x1x256xf32> to vector<2x2x256xf32>
    %56 = arith.mulf %51, %55 : vector<2x2x256xf32>
    %57 = arith.addf %50, %56 : vector<2x2x256xf32>
    %58 = vector.extract_strided_slice %2 {offsets = [2, 2, 0], sizes = [2, 2, 256], strides = [1, 1, 1]} : vector<4x4x256xf32> to vector<2x2x256xf32>
    %c8 = arith.constant 8 : index
    %c0_12 = arith.constant 0 : index
    %59 = vector.load %arg2[%c8, %c0_12] : memref<9x256xf32, #tpu.memory_space<vmem>>, vector<1x256xf32>
    %60 = vector.shape_cast %59 : vector<1x256xf32> to vector<256xf32>
    %61 = vector.shape_cast %60 : vector<256xf32> to vector<1x1x256xf32>
    %62 = vector.broadcast %61 : vector<1x1x256xf32> to vector<2x2x256xf32>
    %63 = arith.mulf %58, %62 : vector<2x2x256xf32>
    %64 = arith.addf %57, %63 : vector<2x2x256xf32>
    %c0_13 = arith.constant 0 : index
    %c0_14 = arith.constant 0 : index
    %65 = vector.load %arg3[%c0_13, %c0_14] : memref<1x256xf32, #tpu.memory_space<vmem>>, vector<1x256xf32>
    %66 = vector.shape_cast %65 : vector<1x256xf32> to vector<256xf32>
    %67 = vector.shape_cast %66 : vector<256xf32> to vector<1x1x256xf32>
    %68 = vector.broadcast %67 : vector<1x1x256xf32> to vector<2x2x256xf32>
    %69 = arith.addf %64, %68 : vector<2x2x256xf32>
    %cst = arith.constant 0.000000e+00 : f32
    %cst_15 = arith.constant 6.000000e+00 : f32
    %70 = vector.broadcast %cst : f32 to vector<2x2x256xf32>
    %71 = arith.maximumf %70, %69 : vector<2x2x256xf32>
    %72 = vector.broadcast %cst_15 : f32 to vector<2x2x256xf32>
    %73 = arith.minimumf %72, %71 : vector<2x2x256xf32>
    %74 = arith.truncf %73 : vector<2x2x256xf32> to vector<2x2x256xbf16>
    %c0_16 = arith.constant 0 : index
    %c0_17 = arith.constant 0 : index
    %c0_18 = arith.constant 0 : index
    %c0_19 = arith.constant 0 : index
    %75 = vector.load %arg4[%c0_16, %c0_17, %c0_18, %c0_19] : memref<1x2x2x256xbf16, #tpu.memory_space<vmem>>, vector<1x2x2x256xbf16>
    %76 = vector.shape_cast %75 : vector<1x2x2x256xbf16> to vector<2x2x256xbf16>
    %77 = vector.shape_cast %74 : vector<2x2x256xbf16> to vector<1x2x2x256xbf16>
    tpu.vector_store %arg4[%c0_16, %c0_17, %c0_18, %c0_19], %77 {strides = array<i32>} : memref<1x2x2x256xbf16, #tpu.memory_space<vmem>>, vector<1x2x2x256xbf16>,
    return
  }
  func.func @transform_0(%arg0: i32) -> (i32, i32, i32, i32) {
    %c0_i32 = arith.constant 0 : i32
    %c0_i32_0 = arith.constant 0 : i32
    %c0_i32_1 = arith.constant 0 : i32
    %c0_i32_2 = arith.constant 0 : i32
    return %arg0, %c0_i32, %c0_i32_0, %c0_i32_1 : i32, i32, i32, i32
  }
  func.func @transform_1(%arg0: i32) -> (i32, i32) {
    %c0_i32 = arith.constant 0 : i32
    %c0_i32_0 = arith.constant 0 : i32
    %c0_i32_1 = arith.constant 0 : i32
    return %c0_i32, %c0_i32_0 : i32, i32
  }
  func.func @transform_2(%arg0: i32) -> (i32, i32) {
    %c0_i32 = arith.constant 0 : i32
    %c0_i32_0 = arith.constant 0 : i32
    %c0_i32_1 = arith.constant 0 : i32
    return %c0_i32, %c0_i32_0 : i32, i32
  }
  func.func @transform_3(%arg0: i32) -> (i32, i32, i32, i32) {
    %c0_i32 = arith.constant 0 : i32
    %c0_i32_0 = arith.constant 0 : i32
    %c0_i32_1 = arith.constant 0 : i32
    %c0_i32_2 = arith.constant 0 : i32
    return %arg0, %c0_i32, %c0_i32_0, %c0_i32_1 : i32, i32, i32, i32
  }
}

module attributes {stable_mosaic.version = 11 : i64} {
  func.func @_pw_linear_res_kernel(%arg0: i32, %arg1: memref<8x256xbf16, #tpu.memory_space<vmem>>, %arg2: memref<256x128xbf16, #tpu.memory_space<vmem>>, %arg3: memref<1x128xf32, #tpu.memory_space<vmem>>, %arg4: memref<8x128xbf16, #tpu.memory_space<vmem>>, %arg5: memref<8x128xbf16, #tpu.memory_space<vmem>>) attributes {dimension_semantics = [#tpu.dimension_semantics<parallel>], iteration_bounds = array<i64: 1>, scalar_prefetch = 0 : i64, scratch_operands = 0 : i64, tpu.core_type = #tpu.core_type<tc>, window_params = [{transform_indices = @transform_0, window_bounds = array<i64: 8, 256>}, {pipeline_mode = #tpu.pipeline_mode<synchronous>, transform_indices = @transform_1, window_bounds = array<i64: 256, 128>}, {pipeline_mode = #tpu.pipeline_mode<synchronous>, transform_indices = @transform_2, window_bounds = array<i64: 1, 128>}, {transform_indices = @transform_3, window_bounds = array<i64: 8, 128>}, {transform_indices = @transform_4, window_bounds = array<i64: 8, 128>}]} {
    %c0 = arith.constant 0 : index
    %c0_0 = arith.constant 0 : index
    %0 = vector.load %arg1[%c0, %c0_0] : memref<8x256xbf16, #tpu.memory_space<vmem>>, vector<8x256xbf16>
    %c0_1 = arith.constant 0 : index
    %c0_2 = arith.constant 0 : index
    %1 = vector.load %arg2[%c0_1, %c0_2] : memref<256x128xbf16, #tpu.memory_space<vmem>>, vector<256x128xbf16>
    %cst = arith.constant dense<0.000000e+00> : vector<8x128xf32>
    %2 = tpu.matmul %0, %1, %cst {dimension_numbers = #tpu.dot_dimension_numbers<[1], [0], [0], [1], [0, 0, 1, 1], [], []>} : vector<8x256xbf16>, vector<256x128xbf16>, vector<8x128xf32> -> vector<8x128xf32>
    %c0_3 = arith.constant 0 : index
    %c0_4 = arith.constant 0 : index
    %3 = vector.load %arg3[%c0_3, %c0_4] : memref<1x128xf32, #tpu.memory_space<vmem>>, vector<1x128xf32>
    %4 = vector.broadcast %3 : vector<1x128xf32> to vector<8x128xf32>
    %5 = arith.addf %2, %4 : vector<8x128xf32>
    %c0_5 = arith.constant 0 : index
    %c0_6 = arith.constant 0 : index
    %6 = vector.load %arg4[%c0_5, %c0_6] : memref<8x128xbf16, #tpu.memory_space<vmem>>, vector<8x128xbf16>
    %7 = arith.extf %6 : vector<8x128xbf16> to vector<8x128xf32>
    %8 = arith.addf %5, %7 : vector<8x128xf32>
    %9 = arith.truncf %8 : vector<8x128xf32> to vector<8x128xbf16>
    %c0_7 = arith.constant 0 : index
    %c0_8 = arith.constant 0 : index
    %10 = vector.load %arg5[%c0_7, %c0_8] : memref<8x128xbf16, #tpu.memory_space<vmem>>, vector<8x128xbf16>
    tpu.vector_store %arg5[%c0_7, %c0_8], %9 {strides = array<i32>} : memref<8x128xbf16, #tpu.memory_space<vmem>>, vector<8x128xbf16>,
    return
  }
  func.func @transform_0(%arg0: i32) -> (i32, i32) {
    %c0_i32 = arith.constant 0 : i32
    %c0_i32_0 = arith.constant 0 : i32
    return %arg0, %c0_i32 : i32, i32
  }
  func.func @transform_1(%arg0: i32) -> (i32, i32) {
    %c0_i32 = arith.constant 0 : i32
    %c0_i32_0 = arith.constant 0 : i32
    %c0_i32_1 = arith.constant 0 : i32
    return %c0_i32, %c0_i32_0 : i32, i32
  }
  func.func @transform_2(%arg0: i32) -> (i32, i32) {
    %c0_i32 = arith.constant 0 : i32
    %c0_i32_0 = arith.constant 0 : i32
    %c0_i32_1 = arith.constant 0 : i32
    return %c0_i32, %c0_i32_0 : i32, i32
  }
  func.func @transform_3(%arg0: i32) -> (i32, i32) {
    %c0_i32 = arith.constant 0 : i32
    %c0_i32_0 = arith.constant 0 : i32
    return %arg0, %c0_i32 : i32, i32
  }
  func.func @transform_4(%arg0: i32) -> (i32, i32) {
    %c0_i32 = arith.constant 0 : i32
    %c0_i32_0 = arith.constant 0 : i32
    return %arg0, %c0_i32 : i32, i32
  }
}

module attributes {stable_mosaic.version = 11 : i64} {
  func.func @_dw_s2_kernel(%arg0: i32, %arg1: memref<1x2x2x1024xbf16, #tpu.memory_space<vmem>>, %arg2: memref<9x256xf32, #tpu.memory_space<vmem>>, %arg3: memref<1x256xf32, #tpu.memory_space<vmem>>, %arg4: memref<1x1x1x256xbf16, #tpu.memory_space<vmem>>) attributes {dimension_semantics = [#tpu.dimension_semantics<parallel>], iteration_bounds = array<i64: 2>, scalar_prefetch = 0 : i64, scratch_operands = 0 : i64, tpu.core_type = #tpu.core_type<tc>, window_params = [{transform_indices = @transform_0, window_bounds = array<i64: 1, 2, 2, 1024>}, {pipeline_mode = #tpu.pipeline_mode<synchronous>, transform_indices = @transform_1, window_bounds = array<i64: 9, 256>}, {pipeline_mode = #tpu.pipeline_mode<synchronous>, transform_indices = @transform_2, window_bounds = array<i64: 1, 256>}, {transform_indices = @transform_3, window_bounds = array<i64: 1, 1, 1, 256>}]} {
    %c0 = arith.constant 0 : index
    %c0_0 = arith.constant 0 : index
    %c0_1 = arith.constant 0 : index
    %c0_2 = arith.constant 0 : index
    %0 = vector.load %arg1[%c0, %c0_0, %c0_1, %c0_2] : memref<1x2x2x1024xbf16, #tpu.memory_space<vmem>>, vector<1x2x2x1024xbf16>
    %1 = vector.shape_cast %0 : vector<1x2x2x1024xbf16> to vector<2x2x1024xbf16>
    %2 = arith.extf %1 : vector<2x2x1024xbf16> to vector<2x2x1024xf32>
    %3 = vector.extract_strided_slice %2 {offsets = [0, 0, 0], sizes = [1, 1, 256], strides = [1, 1, 1]} : vector<2x2x1024xf32> to vector<1x1x256xf32>
    %c0_3 = arith.constant 0 : index
    %c0_4 = arith.constant 0 : index
    %4 = vector.load %arg2[%c0_3, %c0_4] : memref<9x256xf32, #tpu.memory_space<vmem>>, vector<1x256xf32>
    %5 = vector.shape_cast %4 : vector<1x256xf32> to vector<256xf32>
    %6 = vector.shape_cast %5 : vector<256xf32> to vector<1x1x256xf32>
    %7 = arith.mulf %3, %6 : vector<1x1x256xf32>
    %8 = vector.extract_strided_slice %2 {offsets = [0, 0, 256], sizes = [1, 1, 256], strides = [1, 1, 1]} : vector<2x2x1024xf32> to vector<1x1x256xf32>
    %c1 = arith.constant 1 : index
    %c0_5 = arith.constant 0 : index
    %9 = vector.load %arg2[%c1, %c0_5] : memref<9x256xf32, #tpu.memory_space<vmem>>, vector<1x256xf32>
    %10 = vector.shape_cast %9 : vector<1x256xf32> to vector<256xf32>
    %11 = vector.shape_cast %10 : vector<256xf32> to vector<1x1x256xf32>
    %12 = arith.mulf %8, %11 : vector<1x1x256xf32>
    %13 = arith.addf %7, %12 : vector<1x1x256xf32>
    %14 = vector.extract_strided_slice %2 {offsets = [0, 1, 0], sizes = [1, 1, 256], strides = [1, 1, 1]} : vector<2x2x1024xf32> to vector<1x1x256xf32>
    %c2 = arith.constant 2 : index
    %c0_6 = arith.constant 0 : index
    %15 = vector.load %arg2[%c2, %c0_6] : memref<9x256xf32, #tpu.memory_space<vmem>>, vector<1x256xf32>
    %16 = vector.shape_cast %15 : vector<1x256xf32> to vector<256xf32>
    %17 = vector.shape_cast %16 : vector<256xf32> to vector<1x1x256xf32>
    %18 = arith.mulf %14, %17 : vector<1x1x256xf32>
    %19 = arith.addf %13, %18 : vector<1x1x256xf32>
    %20 = vector.extract_strided_slice %2 {offsets = [0, 0, 512], sizes = [1, 1, 256], strides = [1, 1, 1]} : vector<2x2x1024xf32> to vector<1x1x256xf32>
    %c3 = arith.constant 3 : index
    %c0_7 = arith.constant 0 : index
    %21 = vector.load %arg2[%c3, %c0_7] : memref<9x256xf32, #tpu.memory_space<vmem>>, vector<1x256xf32>
    %22 = vector.shape_cast %21 : vector<1x256xf32> to vector<256xf32>
    %23 = vector.shape_cast %22 : vector<256xf32> to vector<1x1x256xf32>
    %24 = arith.mulf %20, %23 : vector<1x1x256xf32>
    %25 = arith.addf %19, %24 : vector<1x1x256xf32>
    %26 = vector.extract_strided_slice %2 {offsets = [0, 0, 768], sizes = [1, 1, 256], strides = [1, 1, 1]} : vector<2x2x1024xf32> to vector<1x1x256xf32>
    %c4 = arith.constant 4 : index
    %c0_8 = arith.constant 0 : index
    %27 = vector.load %arg2[%c4, %c0_8] : memref<9x256xf32, #tpu.memory_space<vmem>>, vector<1x256xf32>
    %28 = vector.shape_cast %27 : vector<1x256xf32> to vector<256xf32>
    %29 = vector.shape_cast %28 : vector<256xf32> to vector<1x1x256xf32>
    %30 = arith.mulf %26, %29 : vector<1x1x256xf32>
    %31 = arith.addf %25, %30 : vector<1x1x256xf32>
    %32 = vector.extract_strided_slice %2 {offsets = [0, 1, 512], sizes = [1, 1, 256], strides = [1, 1, 1]} : vector<2x2x1024xf32> to vector<1x1x256xf32>
    %c5 = arith.constant 5 : index
    %c0_9 = arith.constant 0 : index
    %33 = vector.load %arg2[%c5, %c0_9] : memref<9x256xf32, #tpu.memory_space<vmem>>, vector<1x256xf32>
    %34 = vector.shape_cast %33 : vector<1x256xf32> to vector<256xf32>
    %35 = vector.shape_cast %34 : vector<256xf32> to vector<1x1x256xf32>
    %36 = arith.mulf %32, %35 : vector<1x1x256xf32>
    %37 = arith.addf %31, %36 : vector<1x1x256xf32>
    %38 = vector.extract_strided_slice %2 {offsets = [1, 0, 0], sizes = [1, 1, 256], strides = [1, 1, 1]} : vector<2x2x1024xf32> to vector<1x1x256xf32>
    %c6 = arith.constant 6 : index
    %c0_10 = arith.constant 0 : index
    %39 = vector.load %arg2[%c6, %c0_10] : memref<9x256xf32, #tpu.memory_space<vmem>>, vector<1x256xf32>
    %40 = vector.shape_cast %39 : vector<1x256xf32> to vector<256xf32>
    %41 = vector.shape_cast %40 : vector<256xf32> to vector<1x1x256xf32>
    %42 = arith.mulf %38, %41 : vector<1x1x256xf32>
    %43 = arith.addf %37, %42 : vector<1x1x256xf32>
    %44 = vector.extract_strided_slice %2 {offsets = [1, 0, 256], sizes = [1, 1, 256], strides = [1, 1, 1]} : vector<2x2x1024xf32> to vector<1x1x256xf32>
    %c7 = arith.constant 7 : index
    %c0_11 = arith.constant 0 : index
    %45 = vector.load %arg2[%c7, %c0_11] : memref<9x256xf32, #tpu.memory_space<vmem>>, vector<1x256xf32>
    %46 = vector.shape_cast %45 : vector<1x256xf32> to vector<256xf32>
    %47 = vector.shape_cast %46 : vector<256xf32> to vector<1x1x256xf32>
    %48 = arith.mulf %44, %47 : vector<1x1x256xf32>
    %49 = arith.addf %43, %48 : vector<1x1x256xf32>
    %50 = vector.extract_strided_slice %2 {offsets = [1, 1, 0], sizes = [1, 1, 256], strides = [1, 1, 1]} : vector<2x2x1024xf32> to vector<1x1x256xf32>
    %c8 = arith.constant 8 : index
    %c0_12 = arith.constant 0 : index
    %51 = vector.load %arg2[%c8, %c0_12] : memref<9x256xf32, #tpu.memory_space<vmem>>, vector<1x256xf32>
    %52 = vector.shape_cast %51 : vector<1x256xf32> to vector<256xf32>
    %53 = vector.shape_cast %52 : vector<256xf32> to vector<1x1x256xf32>
    %54 = arith.mulf %50, %53 : vector<1x1x256xf32>
    %55 = arith.addf %49, %54 : vector<1x1x256xf32>
    %c0_13 = arith.constant 0 : index
    %c0_14 = arith.constant 0 : index
    %56 = vector.load %arg3[%c0_13, %c0_14] : memref<1x256xf32, #tpu.memory_space<vmem>>, vector<1x256xf32>
    %57 = vector.shape_cast %56 : vector<1x256xf32> to vector<256xf32>
    %58 = vector.shape_cast %57 : vector<256xf32> to vector<1x1x256xf32>
    %59 = arith.addf %55, %58 : vector<1x1x256xf32>
    %cst = arith.constant 0.000000e+00 : f32
    %cst_15 = arith.constant 6.000000e+00 : f32
    %60 = vector.broadcast %cst : f32 to vector<1x1x256xf32>
    %61 = arith.maximumf %60, %59 : vector<1x1x256xf32>
    %62 = vector.broadcast %cst_15 : f32 to vector<1x1x256xf32>
    %63 = arith.minimumf %62, %61 : vector<1x1x256xf32>
    %64 = arith.truncf %63 : vector<1x1x256xf32> to vector<1x1x256xbf16>
    %c0_16 = arith.constant 0 : index
    %c0_17 = arith.constant 0 : index
    %c0_18 = arith.constant 0 : index
    %c0_19 = arith.constant 0 : index
    %65 = vector.load %arg4[%c0_16, %c0_17, %c0_18, %c0_19] : memref<1x1x1x256xbf16, #tpu.memory_space<vmem>>, vector<1x1x1x256xbf16>
    %66 = vector.shape_cast %65 : vector<1x1x1x256xbf16> to vector<1x1x256xbf16>
    %67 = vector.shape_cast %64 : vector<1x1x256xbf16> to vector<1x1x1x256xbf16>
    tpu.vector_store %arg4[%c0_16, %c0_17, %c0_18, %c0_19], %67 {strides = array<i32>} : memref<1x1x1x256xbf16, #tpu.memory_space<vmem>>, vector<1x1x1x256xbf16>,
    return
  }
  func.func @transform_0(%arg0: i32) -> (i32, i32, i32, i32) {
    %c0_i32 = arith.constant 0 : i32
    %c0_i32_0 = arith.constant 0 : i32
    %c0_i32_1 = arith.constant 0 : i32
    %c0_i32_2 = arith.constant 0 : i32
    return %arg0, %c0_i32, %c0_i32_0, %c0_i32_1 : i32, i32, i32, i32
  }
  func.func @transform_1(%arg0: i32) -> (i32, i32) {
    %c0_i32 = arith.constant 0 : i32
    %c0_i32_0 = arith.constant 0 : i32
    %c0_i32_1 = arith.constant 0 : i32
    return %c0_i32, %c0_i32_0 : i32, i32
  }
  func.func @transform_2(%arg0: i32) -> (i32, i32) {
    %c0_i32 = arith.constant 0 : i32
    %c0_i32_0 = arith.constant 0 : i32
    %c0_i32_1 = arith.constant 0 : i32
    return %c0_i32, %c0_i32_0 : i32, i32
  }
  func.func @transform_3(%arg0: i32) -> (i32, i32, i32, i32) {
    %c0_i32 = arith.constant 0 : i32
    %c0_i32_0 = arith.constant 0 : i32
    %c0_i32_1 = arith.constant 0 : i32
    %c0_i32_2 = arith.constant 0 : i32
    return %arg0, %c0_i32, %c0_i32_0, %c0_i32_1 : i32, i32, i32, i32
  }
}

module attributes {stable_mosaic.version = 11 : i64} {
  func.func @_pw_relu6_kernel(%arg0: i32, %arg1: memref<8x128xbf16, #tpu.memory_space<vmem>>, %arg2: memref<128x384xbf16, #tpu.memory_space<vmem>>, %arg3: memref<1x384xf32, #tpu.memory_space<vmem>>, %arg4: memref<8x384xbf16, #tpu.memory_space<vmem>>) attributes {dimension_semantics = [#tpu.dimension_semantics<parallel>], iteration_bounds = array<i64: 1>, scalar_prefetch = 0 : i64, scratch_operands = 0 : i64, tpu.core_type = #tpu.core_type<tc>, window_params = [{transform_indices = @transform_0, window_bounds = array<i64: 8, 128>}, {pipeline_mode = #tpu.pipeline_mode<synchronous>, transform_indices = @transform_1, window_bounds = array<i64: 128, 384>}, {pipeline_mode = #tpu.pipeline_mode<synchronous>, transform_indices = @transform_2, window_bounds = array<i64: 1, 384>}, {transform_indices = @transform_3, window_bounds = array<i64: 8, 384>}]} {
    %c0 = arith.constant 0 : index
    %c0_0 = arith.constant 0 : index
    %0 = vector.load %arg1[%c0, %c0_0] : memref<8x128xbf16, #tpu.memory_space<vmem>>, vector<8x128xbf16>
    %c0_1 = arith.constant 0 : index
    %c0_2 = arith.constant 0 : index
    %1 = vector.load %arg2[%c0_1, %c0_2] : memref<128x384xbf16, #tpu.memory_space<vmem>>, vector<128x384xbf16>
    %cst = arith.constant dense<0.000000e+00> : vector<8x384xf32>
    %2 = tpu.matmul %0, %1, %cst {dimension_numbers = #tpu.dot_dimension_numbers<[1], [0], [0], [1], [0, 0, 1, 1], [], []>} : vector<8x128xbf16>, vector<128x384xbf16>, vector<8x384xf32> -> vector<8x384xf32>
    %c0_3 = arith.constant 0 : index
    %c0_4 = arith.constant 0 : index
    %3 = vector.load %arg3[%c0_3, %c0_4] : memref<1x384xf32, #tpu.memory_space<vmem>>, vector<1x384xf32>
    %4 = vector.broadcast %3 : vector<1x384xf32> to vector<8x384xf32>
    %5 = arith.addf %2, %4 : vector<8x384xf32>
    %cst_5 = arith.constant 0.000000e+00 : f32
    %cst_6 = arith.constant 6.000000e+00 : f32
    %6 = vector.broadcast %cst_5 : f32 to vector<8x384xf32>
    %7 = arith.maximumf %6, %5 : vector<8x384xf32>
    %8 = vector.broadcast %cst_6 : f32 to vector<8x384xf32>
    %9 = arith.minimumf %8, %7 : vector<8x384xf32>
    %10 = arith.truncf %9 : vector<8x384xf32> to vector<8x384xbf16>
    %c0_7 = arith.constant 0 : index
    %c0_8 = arith.constant 0 : index
    %11 = vector.load %arg4[%c0_7, %c0_8] : memref<8x384xbf16, #tpu.memory_space<vmem>>, vector<8x384xbf16>
    tpu.vector_store %arg4[%c0_7, %c0_8], %10 {strides = array<i32>} : memref<8x384xbf16, #tpu.memory_space<vmem>>, vector<8x384xbf16>,
    return
  }
  func.func @transform_0(%arg0: i32) -> (i32, i32) {
    %c0_i32 = arith.constant 0 : i32
    %c0_i32_0 = arith.constant 0 : i32
    return %arg0, %c0_i32 : i32, i32
  }
  func.func @transform_1(%arg0: i32) -> (i32, i32) {
    %c0_i32 = arith.constant 0 : i32
    %c0_i32_0 = arith.constant 0 : i32
    %c0_i32_1 = arith.constant 0 : i32
    return %c0_i32, %c0_i32_0 : i32, i32
  }
  func.func @transform_2(%arg0: i32) -> (i32, i32) {
    %c0_i32 = arith.constant 0 : i32
    %c0_i32_0 = arith.constant 0 : i32
    %c0_i32_1 = arith.constant 0 : i32
    return %c0_i32, %c0_i32_0 : i32, i32
  }
  func.func @transform_3(%arg0: i32) -> (i32, i32) {
    %c0_i32 = arith.constant 0 : i32
    %c0_i32_0 = arith.constant 0 : i32
    return %arg0, %c0_i32 : i32, i32
  }
}

module attributes {stable_mosaic.version = 11 : i64} {
  func.func @_dw_s1_kernel(%arg0: i32, %arg1: memref<1x3x3x384xbf16, #tpu.memory_space<vmem>>, %arg2: memref<9x384xf32, #tpu.memory_space<vmem>>, %arg3: memref<1x384xf32, #tpu.memory_space<vmem>>, %arg4: memref<1x1x1x384xbf16, #tpu.memory_space<vmem>>) attributes {dimension_semantics = [#tpu.dimension_semantics<parallel>], iteration_bounds = array<i64: 2>, scalar_prefetch = 0 : i64, scratch_operands = 0 : i64, tpu.core_type = #tpu.core_type<tc>, window_params = [{transform_indices = @transform_0, window_bounds = array<i64: 1, 3, 3, 384>}, {pipeline_mode = #tpu.pipeline_mode<synchronous>, transform_indices = @transform_1, window_bounds = array<i64: 9, 384>}, {pipeline_mode = #tpu.pipeline_mode<synchronous>, transform_indices = @transform_2, window_bounds = array<i64: 1, 384>}, {transform_indices = @transform_3, window_bounds = array<i64: 1, 1, 1, 384>}]} {
    %c0 = arith.constant 0 : index
    %c0_0 = arith.constant 0 : index
    %c0_1 = arith.constant 0 : index
    %c0_2 = arith.constant 0 : index
    %0 = vector.load %arg1[%c0, %c0_0, %c0_1, %c0_2] : memref<1x3x3x384xbf16, #tpu.memory_space<vmem>>, vector<1x3x3x384xbf16>
    %1 = vector.shape_cast %0 : vector<1x3x3x384xbf16> to vector<3x3x384xbf16>
    %2 = arith.extf %1 : vector<3x3x384xbf16> to vector<3x3x384xf32>
    %3 = vector.extract_strided_slice %2 {offsets = [0, 0, 0], sizes = [1, 1, 384], strides = [1, 1, 1]} : vector<3x3x384xf32> to vector<1x1x384xf32>
    %c0_3 = arith.constant 0 : index
    %c0_4 = arith.constant 0 : index
    %4 = vector.load %arg2[%c0_3, %c0_4] : memref<9x384xf32, #tpu.memory_space<vmem>>, vector<1x384xf32>
    %5 = vector.shape_cast %4 : vector<1x384xf32> to vector<384xf32>
    %6 = vector.shape_cast %5 : vector<384xf32> to vector<1x1x384xf32>
    %7 = arith.mulf %3, %6 : vector<1x1x384xf32>
    %8 = vector.extract_strided_slice %2 {offsets = [0, 1, 0], sizes = [1, 1, 384], strides = [1, 1, 1]} : vector<3x3x384xf32> to vector<1x1x384xf32>
    %c1 = arith.constant 1 : index
    %c0_5 = arith.constant 0 : index
    %9 = vector.load %arg2[%c1, %c0_5] : memref<9x384xf32, #tpu.memory_space<vmem>>, vector<1x384xf32>
    %10 = vector.shape_cast %9 : vector<1x384xf32> to vector<384xf32>
    %11 = vector.shape_cast %10 : vector<384xf32> to vector<1x1x384xf32>
    %12 = arith.mulf %8, %11 : vector<1x1x384xf32>
    %13 = arith.addf %7, %12 : vector<1x1x384xf32>
    %14 = vector.extract_strided_slice %2 {offsets = [0, 2, 0], sizes = [1, 1, 384], strides = [1, 1, 1]} : vector<3x3x384xf32> to vector<1x1x384xf32>
    %c2 = arith.constant 2 : index
    %c0_6 = arith.constant 0 : index
    %15 = vector.load %arg2[%c2, %c0_6] : memref<9x384xf32, #tpu.memory_space<vmem>>, vector<1x384xf32>
    %16 = vector.shape_cast %15 : vector<1x384xf32> to vector<384xf32>
    %17 = vector.shape_cast %16 : vector<384xf32> to vector<1x1x384xf32>
    %18 = arith.mulf %14, %17 : vector<1x1x384xf32>
    %19 = arith.addf %13, %18 : vector<1x1x384xf32>
    %20 = vector.extract_strided_slice %2 {offsets = [1, 0, 0], sizes = [1, 1, 384], strides = [1, 1, 1]} : vector<3x3x384xf32> to vector<1x1x384xf32>
    %c3 = arith.constant 3 : index
    %c0_7 = arith.constant 0 : index
    %21 = vector.load %arg2[%c3, %c0_7] : memref<9x384xf32, #tpu.memory_space<vmem>>, vector<1x384xf32>
    %22 = vector.shape_cast %21 : vector<1x384xf32> to vector<384xf32>
    %23 = vector.shape_cast %22 : vector<384xf32> to vector<1x1x384xf32>
    %24 = arith.mulf %20, %23 : vector<1x1x384xf32>
    %25 = arith.addf %19, %24 : vector<1x1x384xf32>
    %26 = vector.extract_strided_slice %2 {offsets = [1, 1, 0], sizes = [1, 1, 384], strides = [1, 1, 1]} : vector<3x3x384xf32> to vector<1x1x384xf32>
    %c4 = arith.constant 4 : index
    %c0_8 = arith.constant 0 : index
    %27 = vector.load %arg2[%c4, %c0_8] : memref<9x384xf32, #tpu.memory_space<vmem>>, vector<1x384xf32>
    %28 = vector.shape_cast %27 : vector<1x384xf32> to vector<384xf32>
    %29 = vector.shape_cast %28 : vector<384xf32> to vector<1x1x384xf32>
    %30 = arith.mulf %26, %29 : vector<1x1x384xf32>
    %31 = arith.addf %25, %30 : vector<1x1x384xf32>
    %32 = vector.extract_strided_slice %2 {offsets = [1, 2, 0], sizes = [1, 1, 384], strides = [1, 1, 1]} : vector<3x3x384xf32> to vector<1x1x384xf32>
    %c5 = arith.constant 5 : index
    %c0_9 = arith.constant 0 : index
    %33 = vector.load %arg2[%c5, %c0_9] : memref<9x384xf32, #tpu.memory_space<vmem>>, vector<1x384xf32>
    %34 = vector.shape_cast %33 : vector<1x384xf32> to vector<384xf32>
    %35 = vector.shape_cast %34 : vector<384xf32> to vector<1x1x384xf32>
    %36 = arith.mulf %32, %35 : vector<1x1x384xf32>
    %37 = arith.addf %31, %36 : vector<1x1x384xf32>
    %38 = vector.extract_strided_slice %2 {offsets = [2, 0, 0], sizes = [1, 1, 384], strides = [1, 1, 1]} : vector<3x3x384xf32> to vector<1x1x384xf32>
    %c6 = arith.constant 6 : index
    %c0_10 = arith.constant 0 : index
    %39 = vector.load %arg2[%c6, %c0_10] : memref<9x384xf32, #tpu.memory_space<vmem>>, vector<1x384xf32>
    %40 = vector.shape_cast %39 : vector<1x384xf32> to vector<384xf32>
    %41 = vector.shape_cast %40 : vector<384xf32> to vector<1x1x384xf32>
    %42 = arith.mulf %38, %41 : vector<1x1x384xf32>
    %43 = arith.addf %37, %42 : vector<1x1x384xf32>
    %44 = vector.extract_strided_slice %2 {offsets = [2, 1, 0], sizes = [1, 1, 384], strides = [1, 1, 1]} : vector<3x3x384xf32> to vector<1x1x384xf32>
    %c7 = arith.constant 7 : index
    %c0_11 = arith.constant 0 : index
    %45 = vector.load %arg2[%c7, %c0_11] : memref<9x384xf32, #tpu.memory_space<vmem>>, vector<1x384xf32>
    %46 = vector.shape_cast %45 : vector<1x384xf32> to vector<384xf32>
    %47 = vector.shape_cast %46 : vector<384xf32> to vector<1x1x384xf32>
    %48 = arith.mulf %44, %47 : vector<1x1x384xf32>
    %49 = arith.addf %43, %48 : vector<1x1x384xf32>
    %50 = vector.extract_strided_slice %2 {offsets = [2, 2, 0], sizes = [1, 1, 384], strides = [1, 1, 1]} : vector<3x3x384xf32> to vector<1x1x384xf32>
    %c8 = arith.constant 8 : index
    %c0_12 = arith.constant 0 : index
    %51 = vector.load %arg2[%c8, %c0_12] : memref<9x384xf32, #tpu.memory_space<vmem>>, vector<1x384xf32>
    %52 = vector.shape_cast %51 : vector<1x384xf32> to vector<384xf32>
    %53 = vector.shape_cast %52 : vector<384xf32> to vector<1x1x384xf32>
    %54 = arith.mulf %50, %53 : vector<1x1x384xf32>
    %55 = arith.addf %49, %54 : vector<1x1x384xf32>
    %c0_13 = arith.constant 0 : index
    %c0_14 = arith.constant 0 : index
    %56 = vector.load %arg3[%c0_13, %c0_14] : memref<1x384xf32, #tpu.memory_space<vmem>>, vector<1x384xf32>
    %57 = vector.shape_cast %56 : vector<1x384xf32> to vector<384xf32>
    %58 = vector.shape_cast %57 : vector<384xf32> to vector<1x1x384xf32>
    %59 = arith.addf %55, %58 : vector<1x1x384xf32>
    %cst = arith.constant 0.000000e+00 : f32
    %cst_15 = arith.constant 6.000000e+00 : f32
    %60 = vector.broadcast %cst : f32 to vector<1x1x384xf32>
    %61 = arith.maximumf %60, %59 : vector<1x1x384xf32>
    %62 = vector.broadcast %cst_15 : f32 to vector<1x1x384xf32>
    %63 = arith.minimumf %62, %61 : vector<1x1x384xf32>
    %64 = arith.truncf %63 : vector<1x1x384xf32> to vector<1x1x384xbf16>
    %c0_16 = arith.constant 0 : index
    %c0_17 = arith.constant 0 : index
    %c0_18 = arith.constant 0 : index
    %c0_19 = arith.constant 0 : index
    %65 = vector.load %arg4[%c0_16, %c0_17, %c0_18, %c0_19] : memref<1x1x1x384xbf16, #tpu.memory_space<vmem>>, vector<1x1x1x384xbf16>
    %66 = vector.shape_cast %65 : vector<1x1x1x384xbf16> to vector<1x1x384xbf16>
    %67 = vector.shape_cast %64 : vector<1x1x384xbf16> to vector<1x1x1x384xbf16>
    tpu.vector_store %arg4[%c0_16, %c0_17, %c0_18, %c0_19], %67 {strides = array<i32>} : memref<1x1x1x384xbf16, #tpu.memory_space<vmem>>, vector<1x1x1x384xbf16>,
    return
  }
  func.func @transform_0(%arg0: i32) -> (i32, i32, i32, i32) {
    %c0_i32 = arith.constant 0 : i32
    %c0_i32_0 = arith.constant 0 : i32
    %c0_i32_1 = arith.constant 0 : i32
    %c0_i32_2 = arith.constant 0 : i32
    return %arg0, %c0_i32, %c0_i32_0, %c0_i32_1 : i32, i32, i32, i32
  }
  func.func @transform_1(%arg0: i32) -> (i32, i32) {
    %c0_i32 = arith.constant 0 : i32
    %c0_i32_0 = arith.constant 0 : i32
    %c0_i32_1 = arith.constant 0 : i32
    return %c0_i32, %c0_i32_0 : i32, i32
  }
  func.func @transform_2(%arg0: i32) -> (i32, i32) {
    %c0_i32 = arith.constant 0 : i32
    %c0_i32_0 = arith.constant 0 : i32
    %c0_i32_1 = arith.constant 0 : i32
    return %c0_i32, %c0_i32_0 : i32, i32
  }
  func.func @transform_3(%arg0: i32) -> (i32, i32, i32, i32) {
    %c0_i32 = arith.constant 0 : i32
    %c0_i32_0 = arith.constant 0 : i32
    %c0_i32_1 = arith.constant 0 : i32
    %c0_i32_2 = arith.constant 0 : i32
    return %arg0, %c0_i32, %c0_i32_0, %c0_i32_1 : i32, i32, i32, i32
  }
}

module attributes {stable_mosaic.version = 11 : i64} {
  func.func @_pw_linear_res_kernel(%arg0: i32, %arg1: memref<8x384xbf16, #tpu.memory_space<vmem>>, %arg2: memref<384x128xbf16, #tpu.memory_space<vmem>>, %arg3: memref<1x128xf32, #tpu.memory_space<vmem>>, %arg4: memref<8x128xbf16, #tpu.memory_space<vmem>>, %arg5: memref<8x128xbf16, #tpu.memory_space<vmem>>) attributes {dimension_semantics = [#tpu.dimension_semantics<parallel>], iteration_bounds = array<i64: 1>, scalar_prefetch = 0 : i64, scratch_operands = 0 : i64, tpu.core_type = #tpu.core_type<tc>, window_params = [{transform_indices = @transform_0, window_bounds = array<i64: 8, 384>}, {pipeline_mode = #tpu.pipeline_mode<synchronous>, transform_indices = @transform_1, window_bounds = array<i64: 384, 128>}, {pipeline_mode = #tpu.pipeline_mode<synchronous>, transform_indices = @transform_2, window_bounds = array<i64: 1, 128>}, {transform_indices = @transform_3, window_bounds = array<i64: 8, 128>}, {transform_indices = @transform_4, window_bounds = array<i64: 8, 128>}]} {
    %c0 = arith.constant 0 : index
    %c0_0 = arith.constant 0 : index
    %0 = vector.load %arg1[%c0, %c0_0] : memref<8x384xbf16, #tpu.memory_space<vmem>>, vector<8x384xbf16>
    %c0_1 = arith.constant 0 : index
    %c0_2 = arith.constant 0 : index
    %1 = vector.load %arg2[%c0_1, %c0_2] : memref<384x128xbf16, #tpu.memory_space<vmem>>, vector<384x128xbf16>
    %cst = arith.constant dense<0.000000e+00> : vector<8x128xf32>
    %2 = tpu.matmul %0, %1, %cst {dimension_numbers = #tpu.dot_dimension_numbers<[1], [0], [0], [1], [0, 0, 1, 1], [], []>} : vector<8x384xbf16>, vector<384x128xbf16>, vector<8x128xf32> -> vector<8x128xf32>
    %c0_3 = arith.constant 0 : index
    %c0_4 = arith.constant 0 : index
    %3 = vector.load %arg3[%c0_3, %c0_4] : memref<1x128xf32, #tpu.memory_space<vmem>>, vector<1x128xf32>
    %4 = vector.broadcast %3 : vector<1x128xf32> to vector<8x128xf32>
    %5 = arith.addf %2, %4 : vector<8x128xf32>
    %c0_5 = arith.constant 0 : index
    %c0_6 = arith.constant 0 : index
    %6 = vector.load %arg4[%c0_5, %c0_6] : memref<8x128xbf16, #tpu.memory_space<vmem>>, vector<8x128xbf16>
    %7 = arith.extf %6 : vector<8x128xbf16> to vector<8x128xf32>
    %8 = arith.addf %5, %7 : vector<8x128xf32>
    %9 = arith.truncf %8 : vector<8x128xf32> to vector<8x128xbf16>
    %c0_7 = arith.constant 0 : index
    %c0_8 = arith.constant 0 : index
    %10 = vector.load %arg5[%c0_7, %c0_8] : memref<8x128xbf16, #tpu.memory_space<vmem>>, vector<8x128xbf16>
    tpu.vector_store %arg5[%c0_7, %c0_8], %9 {strides = array<i32>} : memref<8x128xbf16, #tpu.memory_space<vmem>>, vector<8x128xbf16>,
    return
  }
  func.func @transform_0(%arg0: i32) -> (i32, i32) {
    %c0_i32 = arith.constant 0 : i32
    %c0_i32_0 = arith.constant 0 : i32
    return %arg0, %c0_i32 : i32, i32
  }
  func.func @transform_1(%arg0: i32) -> (i32, i32) {
    %c0_i32 = arith.constant 0 : i32
    %c0_i32_0 = arith.constant 0 : i32
    %c0_i32_1 = arith.constant 0 : i32
    return %c0_i32, %c0_i32_0 : i32, i32
  }
  func.func @transform_2(%arg0: i32) -> (i32, i32) {
    %c0_i32 = arith.constant 0 : i32
    %c0_i32_0 = arith.constant 0 : i32
    %c0_i32_1 = arith.constant 0 : i32
    return %c0_i32, %c0_i32_0 : i32, i32
  }
  func.func @transform_3(%arg0: i32) -> (i32, i32) {
    %c0_i32 = arith.constant 0 : i32
    %c0_i32_0 = arith.constant 0 : i32
    return %arg0, %c0_i32 : i32, i32
  }
  func.func @transform_4(%arg0: i32) -> (i32, i32) {
    %c0_i32 = arith.constant 0 : i32
    %c0_i32_0 = arith.constant 0 : i32
    return %arg0, %c0_i32 : i32, i32
  }
}

module attributes {stable_mosaic.version = 11 : i64} {
  func.func @_pw_linear_kernel(%arg0: i32, %arg1: memref<8x384xbf16, #tpu.memory_space<vmem>>, %arg2: memref<384x128xbf16, #tpu.memory_space<vmem>>, %arg3: memref<1x128xf32, #tpu.memory_space<vmem>>, %arg4: memref<8x128xbf16, #tpu.memory_space<vmem>>) attributes {dimension_semantics = [#tpu.dimension_semantics<parallel>], iteration_bounds = array<i64: 1>, scalar_prefetch = 0 : i64, scratch_operands = 0 : i64, tpu.core_type = #tpu.core_type<tc>, window_params = [{transform_indices = @transform_0, window_bounds = array<i64: 8, 384>}, {pipeline_mode = #tpu.pipeline_mode<synchronous>, transform_indices = @transform_1, window_bounds = array<i64: 384, 128>}, {pipeline_mode = #tpu.pipeline_mode<synchronous>, transform_indices = @transform_2, window_bounds = array<i64: 1, 128>}, {transform_indices = @transform_3, window_bounds = array<i64: 8, 128>}]} {
    %c0 = arith.constant 0 : index
    %c0_0 = arith.constant 0 : index
    %0 = vector.load %arg1[%c0, %c0_0] : memref<8x384xbf16, #tpu.memory_space<vmem>>, vector<8x384xbf16>
    %c0_1 = arith.constant 0 : index
    %c0_2 = arith.constant 0 : index
    %1 = vector.load %arg2[%c0_1, %c0_2] : memref<384x128xbf16, #tpu.memory_space<vmem>>, vector<384x128xbf16>
    %cst = arith.constant dense<0.000000e+00> : vector<8x128xf32>
    %2 = tpu.matmul %0, %1, %cst {dimension_numbers = #tpu.dot_dimension_numbers<[1], [0], [0], [1], [0, 0, 1, 1], [], []>} : vector<8x384xbf16>, vector<384x128xbf16>, vector<8x128xf32> -> vector<8x128xf32>
    %c0_3 = arith.constant 0 : index
    %c0_4 = arith.constant 0 : index
    %3 = vector.load %arg3[%c0_3, %c0_4] : memref<1x128xf32, #tpu.memory_space<vmem>>, vector<1x128xf32>
    %4 = vector.broadcast %3 : vector<1x128xf32> to vector<8x128xf32>
    %5 = arith.addf %2, %4 : vector<8x128xf32>
    %6 = arith.truncf %5 : vector<8x128xf32> to vector<8x128xbf16>
    %c0_5 = arith.constant 0 : index
    %c0_6 = arith.constant 0 : index
    %7 = vector.load %arg4[%c0_5, %c0_6] : memref<8x128xbf16, #tpu.memory_space<vmem>>, vector<8x128xbf16>
    tpu.vector_store %arg4[%c0_5, %c0_6], %6 {strides = array<i32>} : memref<8x128xbf16, #tpu.memory_space<vmem>>, vector<8x128xbf16>,
    return
  }
  func.func @transform_0(%arg0: i32) -> (i32, i32) {
    %c0_i32 = arith.constant 0 : i32
    %c0_i32_0 = arith.constant 0 : i32
    return %arg0, %c0_i32 : i32, i32
  }
  func.func @transform_1(%arg0: i32) -> (i32, i32) {
    %c0_i32 = arith.constant 0 : i32
    %c0_i32_0 = arith.constant 0 : i32
    %c0_i32_1 = arith.constant 0 : i32
    return %c0_i32, %c0_i32_0 : i32, i32
  }
  func.func @transform_2(%arg0: i32) -> (i32, i32) {
    %c0_i32 = arith.constant 0 : i32
    %c0_i32_0 = arith.constant 0 : i32
    %c0_i32_1 = arith.constant 0 : i32
    return %c0_i32, %c0_i32_0 : i32, i32
  }
  func.func @transform_3(%arg0: i32) -> (i32, i32) {
    %c0_i32 = arith.constant 0 : i32
    %c0_i32_0 = arith.constant 0 : i32
    return %arg0, %c0_i32 : i32, i32
  }
}

module attributes {stable_mosaic.version = 11 : i64} {
  func.func @_pw_relu6_kernel(%arg0: i32, %arg1: memref<8x128xbf16, #tpu.memory_space<vmem>>, %arg2: memref<128x640xbf16, #tpu.memory_space<vmem>>, %arg3: memref<1x640xf32, #tpu.memory_space<vmem>>, %arg4: memref<8x640xbf16, #tpu.memory_space<vmem>>) attributes {dimension_semantics = [#tpu.dimension_semantics<parallel>], iteration_bounds = array<i64: 1>, scalar_prefetch = 0 : i64, scratch_operands = 0 : i64, tpu.core_type = #tpu.core_type<tc>, window_params = [{transform_indices = @transform_0, window_bounds = array<i64: 8, 128>}, {pipeline_mode = #tpu.pipeline_mode<synchronous>, transform_indices = @transform_1, window_bounds = array<i64: 128, 640>}, {pipeline_mode = #tpu.pipeline_mode<synchronous>, transform_indices = @transform_2, window_bounds = array<i64: 1, 640>}, {transform_indices = @transform_3, window_bounds = array<i64: 8, 640>}]} {
    %c0 = arith.constant 0 : index
    %c0_0 = arith.constant 0 : index
    %0 = vector.load %arg1[%c0, %c0_0] : memref<8x128xbf16, #tpu.memory_space<vmem>>, vector<8x128xbf16>
    %c0_1 = arith.constant 0 : index
    %c0_2 = arith.constant 0 : index
    %1 = vector.load %arg2[%c0_1, %c0_2] : memref<128x640xbf16, #tpu.memory_space<vmem>>, vector<128x640xbf16>
    %cst = arith.constant dense<0.000000e+00> : vector<8x640xf32>
    %2 = tpu.matmul %0, %1, %cst {dimension_numbers = #tpu.dot_dimension_numbers<[1], [0], [0], [1], [0, 0, 1, 1], [], []>} : vector<8x128xbf16>, vector<128x640xbf16>, vector<8x640xf32> -> vector<8x640xf32>
    %c0_3 = arith.constant 0 : index
    %c0_4 = arith.constant 0 : index
    %3 = vector.load %arg3[%c0_3, %c0_4] : memref<1x640xf32, #tpu.memory_space<vmem>>, vector<1x640xf32>
    %4 = vector.broadcast %3 : vector<1x640xf32> to vector<8x640xf32>
    %5 = arith.addf %2, %4 : vector<8x640xf32>
    %cst_5 = arith.constant 0.000000e+00 : f32
    %cst_6 = arith.constant 6.000000e+00 : f32
    %6 = vector.broadcast %cst_5 : f32 to vector<8x640xf32>
    %7 = arith.maximumf %6, %5 : vector<8x640xf32>
    %8 = vector.broadcast %cst_6 : f32 to vector<8x640xf32>
    %9 = arith.minimumf %8, %7 : vector<8x640xf32>
    %10 = arith.truncf %9 : vector<8x640xf32> to vector<8x640xbf16>
    %c0_7 = arith.constant 0 : index
    %c0_8 = arith.constant 0 : index
    %11 = vector.load %arg4[%c0_7, %c0_8] : memref<8x640xbf16, #tpu.memory_space<vmem>>, vector<8x640xbf16>
    tpu.vector_store %arg4[%c0_7, %c0_8], %10 {strides = array<i32>} : memref<8x640xbf16, #tpu.memory_space<vmem>>, vector<8x640xbf16>,
    return
  }
  func.func @transform_0(%arg0: i32) -> (i32, i32) {
    %c0_i32 = arith.constant 0 : i32
    %c0_i32_0 = arith.constant 0 : i32
    return %arg0, %c0_i32 : i32, i32
  }
  func.func @transform_1(%arg0: i32) -> (i32, i32) {
    %c0_i32 = arith.constant 0 : i32
    %c0_i32_0 = arith.constant 0 : i32
    %c0_i32_1 = arith.constant 0 : i32
    return %c0_i32, %c0_i32_0 : i32, i32
  }
  func.func @transform_2(%arg0: i32) -> (i32, i32) {
    %c0_i32 = arith.constant 0 : i32
    %c0_i32_0 = arith.constant 0 : i32
    %c0_i32_1 = arith.constant 0 : i32
    return %c0_i32, %c0_i32_0 : i32, i32
  }
  func.func @transform_3(%arg0: i32) -> (i32, i32) {
    %c0_i32 = arith.constant 0 : i32
    %c0_i32_0 = arith.constant 0 : i32
    return %arg0, %c0_i32 : i32, i32
  }
}

module attributes {stable_mosaic.version = 11 : i64} {
  func.func @_dw_s1_kernel(%arg0: i32, %arg1: memref<1x3x3x640xbf16, #tpu.memory_space<vmem>>, %arg2: memref<9x640xf32, #tpu.memory_space<vmem>>, %arg3: memref<1x640xf32, #tpu.memory_space<vmem>>, %arg4: memref<1x1x1x640xbf16, #tpu.memory_space<vmem>>) attributes {dimension_semantics = [#tpu.dimension_semantics<parallel>], iteration_bounds = array<i64: 2>, scalar_prefetch = 0 : i64, scratch_operands = 0 : i64, tpu.core_type = #tpu.core_type<tc>, window_params = [{transform_indices = @transform_0, window_bounds = array<i64: 1, 3, 3, 640>}, {pipeline_mode = #tpu.pipeline_mode<synchronous>, transform_indices = @transform_1, window_bounds = array<i64: 9, 640>}, {pipeline_mode = #tpu.pipeline_mode<synchronous>, transform_indices = @transform_2, window_bounds = array<i64: 1, 640>}, {transform_indices = @transform_3, window_bounds = array<i64: 1, 1, 1, 640>}]} {
    %c0 = arith.constant 0 : index
    %c0_0 = arith.constant 0 : index
    %c0_1 = arith.constant 0 : index
    %c0_2 = arith.constant 0 : index
    %0 = vector.load %arg1[%c0, %c0_0, %c0_1, %c0_2] : memref<1x3x3x640xbf16, #tpu.memory_space<vmem>>, vector<1x3x3x640xbf16>
    %1 = vector.shape_cast %0 : vector<1x3x3x640xbf16> to vector<3x3x640xbf16>
    %2 = arith.extf %1 : vector<3x3x640xbf16> to vector<3x3x640xf32>
    %3 = vector.extract_strided_slice %2 {offsets = [0, 0, 0], sizes = [1, 1, 640], strides = [1, 1, 1]} : vector<3x3x640xf32> to vector<1x1x640xf32>
    %c0_3 = arith.constant 0 : index
    %c0_4 = arith.constant 0 : index
    %4 = vector.load %arg2[%c0_3, %c0_4] : memref<9x640xf32, #tpu.memory_space<vmem>>, vector<1x640xf32>
    %5 = vector.shape_cast %4 : vector<1x640xf32> to vector<640xf32>
    %6 = vector.shape_cast %5 : vector<640xf32> to vector<1x1x640xf32>
    %7 = arith.mulf %3, %6 : vector<1x1x640xf32>
    %8 = vector.extract_strided_slice %2 {offsets = [0, 1, 0], sizes = [1, 1, 640], strides = [1, 1, 1]} : vector<3x3x640xf32> to vector<1x1x640xf32>
    %c1 = arith.constant 1 : index
    %c0_5 = arith.constant 0 : index
    %9 = vector.load %arg2[%c1, %c0_5] : memref<9x640xf32, #tpu.memory_space<vmem>>, vector<1x640xf32>
    %10 = vector.shape_cast %9 : vector<1x640xf32> to vector<640xf32>
    %11 = vector.shape_cast %10 : vector<640xf32> to vector<1x1x640xf32>
    %12 = arith.mulf %8, %11 : vector<1x1x640xf32>
    %13 = arith.addf %7, %12 : vector<1x1x640xf32>
    %14 = vector.extract_strided_slice %2 {offsets = [0, 2, 0], sizes = [1, 1, 640], strides = [1, 1, 1]} : vector<3x3x640xf32> to vector<1x1x640xf32>
    %c2 = arith.constant 2 : index
    %c0_6 = arith.constant 0 : index
    %15 = vector.load %arg2[%c2, %c0_6] : memref<9x640xf32, #tpu.memory_space<vmem>>, vector<1x640xf32>
    %16 = vector.shape_cast %15 : vector<1x640xf32> to vector<640xf32>
    %17 = vector.shape_cast %16 : vector<640xf32> to vector<1x1x640xf32>
    %18 = arith.mulf %14, %17 : vector<1x1x640xf32>
    %19 = arith.addf %13, %18 : vector<1x1x640xf32>
    %20 = vector.extract_strided_slice %2 {offsets = [1, 0, 0], sizes = [1, 1, 640], strides = [1, 1, 1]} : vector<3x3x640xf32> to vector<1x1x640xf32>
    %c3 = arith.constant 3 : index
    %c0_7 = arith.constant 0 : index
    %21 = vector.load %arg2[%c3, %c0_7] : memref<9x640xf32, #tpu.memory_space<vmem>>, vector<1x640xf32>
    %22 = vector.shape_cast %21 : vector<1x640xf32> to vector<640xf32>
    %23 = vector.shape_cast %22 : vector<640xf32> to vector<1x1x640xf32>
    %24 = arith.mulf %20, %23 : vector<1x1x640xf32>
    %25 = arith.addf %19, %24 : vector<1x1x640xf32>
    %26 = vector.extract_strided_slice %2 {offsets = [1, 1, 0], sizes = [1, 1, 640], strides = [1, 1, 1]} : vector<3x3x640xf32> to vector<1x1x640xf32>
    %c4 = arith.constant 4 : index
    %c0_8 = arith.constant 0 : index
    %27 = vector.load %arg2[%c4, %c0_8] : memref<9x640xf32, #tpu.memory_space<vmem>>, vector<1x640xf32>
    %28 = vector.shape_cast %27 : vector<1x640xf32> to vector<640xf32>
    %29 = vector.shape_cast %28 : vector<640xf32> to vector<1x1x640xf32>
    %30 = arith.mulf %26, %29 : vector<1x1x640xf32>
    %31 = arith.addf %25, %30 : vector<1x1x640xf32>
    %32 = vector.extract_strided_slice %2 {offsets = [1, 2, 0], sizes = [1, 1, 640], strides = [1, 1, 1]} : vector<3x3x640xf32> to vector<1x1x640xf32>
    %c5 = arith.constant 5 : index
    %c0_9 = arith.constant 0 : index
    %33 = vector.load %arg2[%c5, %c0_9] : memref<9x640xf32, #tpu.memory_space<vmem>>, vector<1x640xf32>
    %34 = vector.shape_cast %33 : vector<1x640xf32> to vector<640xf32>
    %35 = vector.shape_cast %34 : vector<640xf32> to vector<1x1x640xf32>
    %36 = arith.mulf %32, %35 : vector<1x1x640xf32>
    %37 = arith.addf %31, %36 : vector<1x1x640xf32>
    %38 = vector.extract_strided_slice %2 {offsets = [2, 0, 0], sizes = [1, 1, 640], strides = [1, 1, 1]} : vector<3x3x640xf32> to vector<1x1x640xf32>
    %c6 = arith.constant 6 : index
    %c0_10 = arith.constant 0 : index
    %39 = vector.load %arg2[%c6, %c0_10] : memref<9x640xf32, #tpu.memory_space<vmem>>, vector<1x640xf32>
    %40 = vector.shape_cast %39 : vector<1x640xf32> to vector<640xf32>
    %41 = vector.shape_cast %40 : vector<640xf32> to vector<1x1x640xf32>
    %42 = arith.mulf %38, %41 : vector<1x1x640xf32>
    %43 = arith.addf %37, %42 : vector<1x1x640xf32>
    %44 = vector.extract_strided_slice %2 {offsets = [2, 1, 0], sizes = [1, 1, 640], strides = [1, 1, 1]} : vector<3x3x640xf32> to vector<1x1x640xf32>
    %c7 = arith.constant 7 : index
    %c0_11 = arith.constant 0 : index
    %45 = vector.load %arg2[%c7, %c0_11] : memref<9x640xf32, #tpu.memory_space<vmem>>, vector<1x640xf32>
    %46 = vector.shape_cast %45 : vector<1x640xf32> to vector<640xf32>
    %47 = vector.shape_cast %46 : vector<640xf32> to vector<1x1x640xf32>
    %48 = arith.mulf %44, %47 : vector<1x1x640xf32>
    %49 = arith.addf %43, %48 : vector<1x1x640xf32>
    %50 = vector.extract_strided_slice %2 {offsets = [2, 2, 0], sizes = [1, 1, 640], strides = [1, 1, 1]} : vector<3x3x640xf32> to vector<1x1x640xf32>
    %c8 = arith.constant 8 : index
    %c0_12 = arith.constant 0 : index
    %51 = vector.load %arg2[%c8, %c0_12] : memref<9x640xf32, #tpu.memory_space<vmem>>, vector<1x640xf32>
    %52 = vector.shape_cast %51 : vector<1x640xf32> to vector<640xf32>
    %53 = vector.shape_cast %52 : vector<640xf32> to vector<1x1x640xf32>
    %54 = arith.mulf %50, %53 : vector<1x1x640xf32>
    %55 = arith.addf %49, %54 : vector<1x1x640xf32>
    %c0_13 = arith.constant 0 : index
    %c0_14 = arith.constant 0 : index
    %56 = vector.load %arg3[%c0_13, %c0_14] : memref<1x640xf32, #tpu.memory_space<vmem>>, vector<1x640xf32>
    %57 = vector.shape_cast %56 : vector<1x640xf32> to vector<640xf32>
    %58 = vector.shape_cast %57 : vector<640xf32> to vector<1x1x640xf32>
    %59 = arith.addf %55, %58 : vector<1x1x640xf32>
    %cst = arith.constant 0.000000e+00 : f32
    %cst_15 = arith.constant 6.000000e+00 : f32
    %60 = vector.broadcast %cst : f32 to vector<1x1x640xf32>
    %61 = arith.maximumf %60, %59 : vector<1x1x640xf32>
    %62 = vector.broadcast %cst_15 : f32 to vector<1x1x640xf32>
    %63 = arith.minimumf %62, %61 : vector<1x1x640xf32>
    %64 = arith.truncf %63 : vector<1x1x640xf32> to vector<1x1x640xbf16>
    %c0_16 = arith.constant 0 : index
    %c0_17 = arith.constant 0 : index
    %c0_18 = arith.constant 0 : index
    %c0_19 = arith.constant 0 : index
    %65 = vector.load %arg4[%c0_16, %c0_17, %c0_18, %c0_19] : memref<1x1x1x640xbf16, #tpu.memory_space<vmem>>, vector<1x1x1x640xbf16>
    %66 = vector.shape_cast %65 : vector<1x1x1x640xbf16> to vector<1x1x640xbf16>
    %67 = vector.shape_cast %64 : vector<1x1x640xbf16> to vector<1x1x1x640xbf16>
    tpu.vector_store %arg4[%c0_16, %c0_17, %c0_18, %c0_19], %67 {strides = array<i32>} : memref<1x1x1x640xbf16, #tpu.memory_space<vmem>>, vector<1x1x1x640xbf16>,
    return
  }
  func.func @transform_0(%arg0: i32) -> (i32, i32, i32, i32) {
    %c0_i32 = arith.constant 0 : i32
    %c0_i32_0 = arith.constant 0 : i32
    %c0_i32_1 = arith.constant 0 : i32
    %c0_i32_2 = arith.constant 0 : i32
    return %arg0, %c0_i32, %c0_i32_0, %c0_i32_1 : i32, i32, i32, i32
  }
  func.func @transform_1(%arg0: i32) -> (i32, i32) {
    %c0_i32 = arith.constant 0 : i32
    %c0_i32_0 = arith.constant 0 : i32
    %c0_i32_1 = arith.constant 0 : i32
    return %c0_i32, %c0_i32_0 : i32, i32
  }
  func.func @transform_2(%arg0: i32) -> (i32, i32) {
    %c0_i32 = arith.constant 0 : i32
    %c0_i32_0 = arith.constant 0 : i32
    %c0_i32_1 = arith.constant 0 : i32
    return %c0_i32, %c0_i32_0 : i32, i32
  }
  func.func @transform_3(%arg0: i32) -> (i32, i32, i32, i32) {
    %c0_i32 = arith.constant 0 : i32
    %c0_i32_0 = arith.constant 0 : i32
    %c0_i32_1 = arith.constant 0 : i32
    %c0_i32_2 = arith.constant 0 : i32
    return %arg0, %c0_i32, %c0_i32_0, %c0_i32_1 : i32, i32, i32, i32
  }
}

module attributes {stable_mosaic.version = 11 : i64} {
  func.func @_pw_linear_res_kernel(%arg0: i32, %arg1: memref<8x640xbf16, #tpu.memory_space<vmem>>, %arg2: memref<640x128xbf16, #tpu.memory_space<vmem>>, %arg3: memref<1x128xf32, #tpu.memory_space<vmem>>, %arg4: memref<8x128xbf16, #tpu.memory_space<vmem>>, %arg5: memref<8x128xbf16, #tpu.memory_space<vmem>>) attributes {dimension_semantics = [#tpu.dimension_semantics<parallel>], iteration_bounds = array<i64: 1>, scalar_prefetch = 0 : i64, scratch_operands = 0 : i64, tpu.core_type = #tpu.core_type<tc>, window_params = [{transform_indices = @transform_0, window_bounds = array<i64: 8, 640>}, {pipeline_mode = #tpu.pipeline_mode<synchronous>, transform_indices = @transform_1, window_bounds = array<i64: 640, 128>}, {pipeline_mode = #tpu.pipeline_mode<synchronous>, transform_indices = @transform_2, window_bounds = array<i64: 1, 128>}, {transform_indices = @transform_3, window_bounds = array<i64: 8, 128>}, {transform_indices = @transform_4, window_bounds = array<i64: 8, 128>}]} {
    %c0 = arith.constant 0 : index
    %c0_0 = arith.constant 0 : index
    %0 = vector.load %arg1[%c0, %c0_0] : memref<8x640xbf16, #tpu.memory_space<vmem>>, vector<8x640xbf16>
    %c0_1 = arith.constant 0 : index
    %c0_2 = arith.constant 0 : index
    %1 = vector.load %arg2[%c0_1, %c0_2] : memref<640x128xbf16, #tpu.memory_space<vmem>>, vector<640x128xbf16>
    %cst = arith.constant dense<0.000000e+00> : vector<8x128xf32>
    %2 = tpu.matmul %0, %1, %cst {dimension_numbers = #tpu.dot_dimension_numbers<[1], [0], [0], [1], [0, 0, 1, 1], [], []>} : vector<8x640xbf16>, vector<640x128xbf16>, vector<8x128xf32> -> vector<8x128xf32>
    %c0_3 = arith.constant 0 : index
    %c0_4 = arith.constant 0 : index
    %3 = vector.load %arg3[%c0_3, %c0_4] : memref<1x128xf32, #tpu.memory_space<vmem>>, vector<1x128xf32>
    %4 = vector.broadcast %3 : vector<1x128xf32> to vector<8x128xf32>
    %5 = arith.addf %2, %4 : vector<8x128xf32>
    %c0_5 = arith.constant 0 : index
    %c0_6 = arith.constant 0 : index
    %6 = vector.load %arg4[%c0_5, %c0_6] : memref<8x128xbf16, #tpu.memory_space<vmem>>, vector<8x128xbf16>
    %7 = arith.extf %6 : vector<8x128xbf16> to vector<8x128xf32>
    %8 = arith.addf %5, %7 : vector<8x128xf32>
    %9 = arith.truncf %8 : vector<8x128xf32> to vector<8x128xbf16>
    %c0_7 = arith.constant 0 : index
    %c0_8 = arith.constant 0 : index
    %10 = vector.load %arg5[%c0_7, %c0_8] : memref<8x128xbf16, #tpu.memory_space<vmem>>, vector<8x128xbf16>
    tpu.vector_store %arg5[%c0_7, %c0_8], %9 {strides = array<i32>} : memref<8x128xbf16, #tpu.memory_space<vmem>>, vector<8x128xbf16>,
    return
  }
  func.func @transform_0(%arg0: i32) -> (i32, i32) {
    %c0_i32 = arith.constant 0 : i32
    %c0_i32_0 = arith.constant 0 : i32
    return %arg0, %c0_i32 : i32, i32
  }
  func.func @transform_1(%arg0: i32) -> (i32, i32) {
    %c0_i32 = arith.constant 0 : i32
    %c0_i32_0 = arith.constant 0 : i32
    %c0_i32_1 = arith.constant 0 : i32
    return %c0_i32, %c0_i32_0 : i32, i32
  }
  func.func @transform_2(%arg0: i32) -> (i32, i32) {
    %c0_i32 = arith.constant 0 : i32
    %c0_i32_0 = arith.constant 0 : i32
    %c0_i32_1 = arith.constant 0 : i32
    return %c0_i32, %c0_i32_0 : i32, i32
  }
  func.func @transform_3(%arg0: i32) -> (i32, i32) {
    %c0_i32 = arith.constant 0 : i32
    %c0_i32_0 = arith.constant 0 : i32
    return %arg0, %c0_i32 : i32, i32
  }
  func.func @transform_4(%arg0: i32) -> (i32, i32) {
    %c0_i32 = arith.constant 0 : i32
    %c0_i32_0 = arith.constant 0 : i32
    return %arg0, %c0_i32 : i32, i32
  }
}

</mosaic_0001>

<bundles_post_ra>
// kernel: _lambda_.39
= control target key start
LH: loop header
LB: loop body
LE: loop exit
PB: predicated region body
PF: predicated region fallthrough
CT: control target
= control target key end

     0   :  { %vm94_vm0 = vcmask 261120   ;;  %s559_s1 = inlined_call_operand.vmem [shape: bf16[32,128], index: 1, kind: input, shape index: {}]   ;;  %s560_s0 = inlined_call_operand.vmem [shape: bf16[128,32], index: 0, kind: input, shape index: {}]   ;;  %s561_s2 = inlined_call_operand.vmem [shape: f32[1,128], index: 2, kind: input, shape index: {}]   ;;  %s562_s3 = inlined_call_operand.vmem [shape: bf16[128,128], index: 3, kind: output, shape index: {}]  }
   0x1   :  { %v464_v0 = vld [vmem:[%s559_s1] sm:$0xff]   ;;  %v465_v1 = vld [vmem:[%s559_s1 + $0x8] sm:$0xff]   ;;  %v470_v6 = vld [vmem:[%s560_s0 + $0x10] sm:$0xff]  }
   0x2   :  { %440 = vmatprep.subr.bf16.mxu0 %v464_v0  ;;  %460 = vmatprep.subr.bf16.mxu1 %v464_v0  ;;  %v466_v2 = vld [vmem:[%s560_s0] sm:$0xff]   ;;  %v468_v4 = vld [vmem:[%s560_s0 + $0x8] sm:$0xff]   ;;  %v471_v7 = vld [vmem:[%s560_s0 + $0x30] sm:$0xff]  }
   0x3   :  { %441 = vmatpush3.bf16.msra.mxu0 %v464_v0  ;;  %462 = vmatpush3.bf16.msra.mxu1 %v464_v0  ;;  %v467_v3 = vld [vmem:[%s560_s0 + $0x20] sm:$0xff]   ;;  %v469_v5 = vld [vmem:[%s560_s0 + $0x28] sm:$0xff]   ;;  %v472_v8 = vld [vmem:[%s560_s0 + $0x18] sm:$0xff]  }
   0x4   :  { %442 = vmatprep.subr.bf16.mxu0 %v465_v1  ;;  %461 = vmatprep.subr.bf16.mxu1 %v465_v1  ;;  %v473_v9 = vld [vmem:[%s560_s0 + $0x38] sm:$0xff]   ;;  %v332_v10 = vld [vmem:[%s561_s2] ss:$0 sm:$0xff] }
   0x5   :  { %444 = vmatprep.mubr.msk.bf16.mxu0 %vm94_vm0, %v466_v2  ;;  %452 = vmatprep.mubr.msk.bf16.mxu1 %vm94_vm0, %v467_v3 }
   0x7   :  { %443 = vmatpush3.bf16.msra.mxu0 %v465_v1  ;;  %463 = vmatpush3.bf16.msra.mxu1 %v465_v1 }
   0xa   :  { %445 = vmatmul.mubr.msk.bf16.vlgmr.msra.gmra.mrb[0].mxu0 %vm94_vm0, %v468_v4  ;;  %453 = vmatmul.mubr.msk.bf16.vlgmr.msra.gmra.mrb[0].mxu1 %vm94_vm0, %v469_v5 }
   0xb   :  { %448 = vmatprep.mubr.msk.bf16.mxu0 %vm94_vm0, %v470_v6  ;;  %456 = vmatprep.mubr.msk.bf16.mxu1 %vm94_vm0, %v471_v7 }
  0x12   :  { %449 = vmatmul.mubr.msk.bf16.gmra.mrb[4].mxu0 %vm94_vm0, %v472_v8  ;;  %457 = vmatmul.mubr.msk.bf16.gmra.mrb[4].mxu1 %vm94_vm0, %v473_v9 }
  0xdd   :  { %v446_v11 = vpop.f32.mrb[0].mxu0  ;;  %v454_v12 = vpop.f32.mrb[0].mxu1 }
  0xde   :  { %v162_v13 = vadd.f32 %v446_v11, %v332_v10  ;;  %v194_v14 = vadd.f32 %v454_v12, %v332_v10  ;;  %v153_v15 = vpop.f32.mrb[1].mxu0  ;;  %v185_v16 = vpop.f32.mrb[1].mxu1 }
  0xdf   :  { %v154_v17 = vadd.f32 %v332_v10, %v153_v15  ;;  %v186_v18 = vadd.f32 %v332_v10, %v185_v16  ;;  %v447_v19 = vpop.f32.mrb[2].mxu0  ;;  %v455_v20 = vpop.f32.mrb[2].mxu1 }
  0xe0   :  { %v218_v21 = vmax.f32 %v162_v13, 0.0  ;;  %v226_v22 = vmax.f32 %v194_v14, 0.0  ;;  %v165_v23 = vadd.f32 %v447_v19, %v332_v10  ;;  %v197_v24 = vadd.f32 %v455_v20, %v332_v10  ;;  %v156_v25 = vpop.f32.mrb[3].mxu0  ;;  %v188_v26 = vpop.f32.mrb[3].mxu1 }
  0xe1   :  { %v216_v27 = vmax.f32 %v154_v17, 0.0  ;;  %v224_v28 = vmax.f32 %v186_v18, 0.0  ;;  %v157_v29 = vadd.f32 %v332_v10, %v156_v25  ;;  %v189_v30 = vadd.f32 %v332_v10, %v188_v26 }
  0xe2   :  { %v219_v31 = vmax.f32 %v165_v23, 0.0  ;;  %v227_v32 = vmax.f32 %v197_v24, 0.0  ;;  %v234_v35 = vmin.f32 %v218_v21, 6.0  ;;  %v242_v36 = vmin.f32 %v226_v22, 6.0 }
  0xe3   :  { %v217_v33 = vmax.f32 %v157_v29, 0.0  ;;  %v225_v34 = vmax.f32 %v189_v30, 0.0  ;;  %v232_v39 = vmin.f32 %v216_v27, 6.0  ;;  %v240_v40 = vmin.f32 %v224_v28, 6.0 }
  0xe4   :  { %v235_v37 = vmin.f32 %v219_v31, 6.0  ;;  %v243_v38 = vmin.f32 %v227_v32, 6.0 }
  0xe5   :  { %v233_v41 = vmin.f32 %v217_v33, 6.0  ;;  %v241_v42 = vmin.f32 %v225_v34, 6.0  ;;  %v450_v43 = vpop.f32.mrb[4].mxu0  ;;  %v458_v44 = vpop.f32.mrb[4].mxu1 }
  0xe6   :  { %v391_v45 = vpack.c.bf16 %v235_v37, %v234_v35  ;;  %v411_v46 = vpack.c.bf16 %v243_v38, %v242_v36  ;;  %v178_v47 = vadd.f32 %v450_v43, %v332_v10  ;;  %v210_v48 = vadd.f32 %v458_v44, %v332_v10  ;;  %v169_v49 = vpop.f32.mrb[5].mxu0  ;;  %v201_v50 = vpop.f32.mrb[5].mxu1 }
  0xe7   :  { %v386_v51 = vpack.c.bf16 %v233_v41, %v232_v39  ;;  %v406_v52 = vpack.c.bf16 %v241_v42, %v240_v40  ;;  %v170_v53 = vadd.f32 %v332_v10, %v169_v49  ;;  %v202_v54 = vadd.f32 %v332_v10, %v201_v50  ;;  %v451_v55 = vpop.f32.mrb[6].mxu0  ;;  %v459_v56 = vpop.f32.mrb[6].mxu1 }
  0xe8   :  { %423 = vst [vmem:[%s562_s3 + $0x8] sm:$0xff] %v391_v45   ;;  %427 = vst [vmem:[%s562_s3 + $0x28] sm:$0xff] %v411_v46   ;;  %v222_v57 = vmax.f32 %v178_v47, 0.0  ;;  %v230_v58 = vmax.f32 %v210_v48, 0.0  ;;  %v181_v59 = vadd.f32 %v451_v55, %v332_v10  ;;  %v213_v60 = vadd.f32 %v459_v56, %v332_v10  ;;  %v172_v61 = vpop.f32.mrb[7].mxu0  ;;  %v204_v62 = vpop.f32.mrb[7].mxu1 }
  0xe9   :  { %387 = vst [vmem:[%s562_s3] sm:$0xff] %v386_v51   ;;  %426 = vst [vmem:[%s562_s3 + $0x20] sm:$0xff] %v406_v52   ;;  %v220_v63 = vmax.f32 %v170_v53, 0.0  ;;  %v228_v0 = vmax.f32 %v202_v54, 0.0  ;;  %v173_v1 = vadd.f32 %v332_v10, %v172_v61  ;;  %v205_v2 = vadd.f32 %v332_v10, %v204_v62 }
  0xea   :  { %v223_v3 = vmax.f32 %v181_v59, 0.0  ;;  %v231_v4 = vmax.f32 %v213_v60, 0.0  ;;  %v238_v7 = vmin.f32 %v222_v57, 6.0  ;;  %v246_v8 = vmin.f32 %v230_v58, 6.0 }
  0xeb   :  { %v221_v5 = vmax.f32 %v173_v1, 0.0  ;;  %v229_v6 = vmax.f32 %v205_v2, 0.0  ;;  %v236_v12 = vmin.f32 %v220_v63, 6.0  ;;  %v244_v13 = vmin.f32 %v228_v0, 6.0 }
  0xec   :  { %v239_v9 = vmin.f32 %v223_v3, 6.0  ;;  %v247_v11 = vmin.f32 %v231_v4, 6.0 }
  0xed   :  { %v237_v14 = vmin.f32 %v221_v5, 6.0  ;;  %v245_v15 = vmin.f32 %v229_v6, 6.0 }
  0xee   :  { %v401_v16 = vpack.c.bf16 %v239_v9, %v238_v7  ;;  %v421_v17 = vpack.c.bf16 %v247_v11, %v246_v8 }
  0xef   :  { %v396_v18 = vpack.c.bf16 %v237_v14, %v236_v12  ;;  %v416_v19 = vpack.c.bf16 %v245_v15, %v244_v13 }
  0xf0   :  { %425 = vst [vmem:[%s562_s3 + $0x18] sm:$0xff] %v401_v16   ;;  %429 = vst [vmem:[%s562_s3 + $0x38] sm:$0xff] %v421_v17  }
  0xf1   :  { %424 = vst [vmem:[%s562_s3 + $0x10] sm:$0xff] %v396_v18   ;;  %428 = vst [vmem:[%s562_s3 + $0x30] sm:$0xff] %v416_v19  }

// kernel: _lambda_.41
= control target key start
LH: loop header
LB: loop body
LE: loop exit
PB: predicated region body
PF: predicated region fallthrough
CT: control target
= control target key end

     0   :  { %s602_s1 = inlined_call_operand.vmem [shape: bf16[128,128], index: 1, kind: input, shape index: {}]   ;;  %s603_s0 = inlined_call_operand.vmem [shape: bf16[128,128], index: 0, kind: input, shape index: {}]   ;;  %s604_s2 = inlined_call_operand.vmem [shape: f32[1,128], index: 2, kind: input, shape index: {}]   ;;  %s605_s3 = inlined_call_operand.vmem [shape: bf16[128,128], index: 3, kind: output, shape index: {}]  }
   0x1   :  { %v491_v0 = vld [vmem:[%s602_s1] sm:$0xff]   ;;  %v492_v1 = vld [vmem:[%s602_s1 + $0x8] sm:$0xff]   ;;  %v493_v2 = vld [vmem:[%s602_s1 + $0x10] sm:$0xff]  }
   0x2   :  { %443 = vmatprep.subr.bf16.mxu0 %v491_v0  ;;  %475 = vmatprep.subr.bf16.mxu1 %v491_v0  ;;  %v494_v3 = vld [vmem:[%s602_s1 + $0x18] sm:$0xff]   ;;  %v499_v4 = vld [vmem:[%s603_s0] sm:$0xff]   ;;  %v496_v7 = vld [vmem:[%s602_s1 + $0x28] sm:$0xff]  }
   0x3   :  { %444 = vmatpush3.bf16.msra.mxu0 %v491_v0  ;;  %483 = vmatpush3.bf16.msra.mxu1 %v491_v0  ;;  %v500_v5 = vld [vmem:[%s603_s0 + $0x20] sm:$0xff]   ;;  %v497_v8 = vld [vmem:[%s602_s1 + $0x30] sm:$0xff]   ;;  %v498_v9 = vld [vmem:[%s602_s1 + $0x38] sm:$0xff]  }
   0x4   :  { %445 = vmatprep.subr.bf16.mxu0 %v492_v1  ;;  %476 = vmatprep.subr.bf16.mxu1 %v492_v1  ;;  %v495_v6 = vld [vmem:[%s602_s1 + $0x20] sm:$0xff]   ;;  %v501_v10 = vld [vmem:[%s603_s0 + $0x8] sm:$0xff]   ;;  %v503_v12 = vld [vmem:[%s603_s0 + $0x10] sm:$0xff]  }
   0x5   :  { %459 = vmatprep.mubr.bf16.mxu0 %v499_v4  ;;  %467 = vmatprep.mubr.bf16.mxu1 %v500_v5  ;;  %v502_v11 = vld [vmem:[%s603_s0 + $0x28] sm:$0xff]   ;;  %v504_v13 = vld [vmem:[%s603_s0 + $0x30] sm:$0xff]   ;;  %v505_v14 = vld [vmem:[%s603_s0 + $0x18] sm:$0xff]  }
   0x6   :  { %v506_v15 = vld [vmem:[%s603_s0 + $0x38] sm:$0xff]   ;;  %v331_v17 = vld [vmem:[%s604_s2] ss:$0 sm:$0xff] }
   0x7   :  { %446 = vmatpush3.bf16.msra.mxu0 %v492_v1  ;;  %484 = vmatpush3.bf16.msra.mxu1 %v492_v1 }
   0x8   :  { %447 = vmatprep.subr.bf16.mxu0 %v493_v2  ;;  %477 = vmatprep.subr.bf16.mxu1 %v493_v2 }
   0xb   :  { %448 = vmatpush3.bf16.msra.mxu0 %v493_v2  ;;  %485 = vmatpush3.bf16.msra.mxu1 %v493_v2 }
   0xc   :  { %449 = vmatprep.subr.bf16.mxu0 %v494_v3  ;;  %478 = vmatprep.subr.bf16.mxu1 %v494_v3 }
   0xf   :  { %450 = vmatpush3.bf16.msra.mxu0 %v494_v3  ;;  %486 = vmatpush3.bf16.msra.mxu1 %v494_v3 }
  0x10   :  { %451 = vmatprep.subr.bf16.mxu0 %v495_v6  ;;  %479 = vmatprep.subr.bf16.mxu1 %v495_v6 }
  0x13   :  { %452 = vmatpush3.bf16.msra.mxu0 %v495_v6  ;;  %487 = vmatpush3.bf16.msra.mxu1 %v495_v6 }
  0x14   :  { %453 = vmatprep.subr.bf16.mxu0 %v496_v7  ;;  %480 = vmatprep.subr.bf16.mxu1 %v496_v7 }
  0x17   :  { %454 = vmatpush3.bf16.msra.mxu0 %v496_v7  ;;  %488 = vmatpush3.bf16.msra.mxu1 %v496_v7 }
  0x18   :  { %455 = vmatprep.subr.bf16.mxu0 %v497_v8  ;;  %481 = vmatprep.subr.bf16.mxu1 %v497_v8 }
  0x1b   :  { %456 = vmatpush3.bf16.msra.mxu0 %v497_v8  ;;  %489 = vmatpush3.bf16.msra.mxu1 %v497_v8 }
  0x1c   :  { %457 = vmatprep.subr.bf16.mxu0 %v498_v9  ;;  %482 = vmatprep.subr.bf16.mxu1 %v498_v9 }
  0x1f   :  { %458 = vmatpush3.bf16.msra.mxu0 %v498_v9  ;;  %490 = vmatpush3.bf16.msra.mxu1 %v498_v9 }
  0x22   :  { %460 = vmatmul.mubr.bf16.vlgmr.msra.gmra.mrb[0].mxu0 %v501_v10  ;;  %468 = vmatmul.mubr.bf16.vlgmr.msra.gmra.mrb[0].mxu1 %v502_v11 }
  0x23   :  { %463 = vmatprep.mubr.bf16.mxu0 %v503_v12  ;;  %471 = vmatprep.mubr.bf16.mxu1 %v504_v13 }
  0x2a   :  { %464 = vmatmul.mubr.bf16.gmra.mrb[4].mxu0 %v505_v14  ;;  %472 = vmatmul.mubr.bf16.gmra.mrb[4].mxu1 %v506_v15 }
  0xf5   :  { %v461_v16 = vpop.f32.mrb[0].mxu0  ;;  %v469_v18 = vpop.f32.mrb[0].mxu1 }
  0xf6   :  { %v184_v19 = vpop.f32.mrb[1].mxu0  ;;  %v216_v20 = vpop.f32.mrb[1].mxu1  ;;  %v193_v23 = vadd.f32 %v461_v16, %v331_v17  ;;  %v225_v24 = vadd.f32 %v469_v18, %v331_v17 }
  0xf7   :  { %v462_v21 = vpop.f32.mrb[2].mxu0  ;;  %v470_v22 = vpop.f32.mrb[2].mxu1  ;;  %v185_v29 = vadd.f32 %v331_v17, %v184_v19  ;;  %v217_v30 = vadd.f32 %v331_v17, %v216_v20 }
  0xf8   :  { %v196_v25 = vadd.f32 %v462_v21, %v331_v17  ;;  %v228_v26 = vadd.f32 %v470_v22, %v331_v17  ;;  %v187_v27 = vpop.f32.mrb[3].mxu0  ;;  %v219_v28 = vpop.f32.mrb[3].mxu1 }
  0xf9   :  { %v188_v31 = vadd.f32 %v331_v17, %v187_v27  ;;  %v220_v32 = vadd.f32 %v331_v17, %v219_v28 }
  0xfa   :  { %v388_v33 = vpack.c.bf16 %v196_v25, %v193_v23  ;;  %v408_v34 = vpack.c.bf16 %v228_v26, %v225_v24 }
  0xfb   :  { %v383_v35 = vpack.c.bf16 %v188_v31, %v185_v29  ;;  %v403_v36 = vpack.c.bf16 %v220_v32, %v217_v30 }
  0xfc   :  { %420 = vst [vmem:[%s605_s3 + $0x8] sm:$0xff] %v388_v33   ;;  %424 = vst [vmem:[%s605_s3 + $0x28] sm:$0xff] %v408_v34  }
  0xfd   :  { %384 = vst [vmem:[%s605_s3] sm:$0xff] %v383_v35   ;;  %423 = vst [vmem:[%s605_s3 + $0x20] sm:$0xff] %v403_v36   ;;  %v465_v37 = vpop.f32.mrb[4].mxu0  ;;  %v473_v38 = vpop.f32.mrb[4].mxu1 }
  0xfe   :  { %v200_v39 = vpop.f32.mrb[5].mxu0  ;;  %v232_v40 = vpop.f32.mrb[5].mxu1  ;;  %v209_v43 = vadd.f32 %v465_v37, %v331_v17  ;;  %v241_v44 = vadd.f32 %v473_v38, %v331_v17 }
  0xff   :  { %v466_v41 = vpop.f32.mrb[6].mxu0  ;;  %v474_v42 = vpop.f32.mrb[6].mxu1  ;;  %v201_v49 = vadd.f32 %v331_v17, %v200_v39  ;;  %v233_v50 = vadd.f32 %v331_v17, %v232_v40 }
 0x100   :  { %v212_v45 = vadd.f32 %v466_v41, %v331_v17  ;;  %v244_v46 = vadd.f32 %v474_v42, %v331_v17  ;;  %v203_v47 = vpop.f32.mrb[7].mxu0  ;;  %v235_v48 = vpop.f32.mrb[7].mxu1 }
 0x101   :  { %v204_v51 = vadd.f32 %v331_v17, %v203_v47  ;;  %v236_v52 = vadd.f32 %v331_v17, %v235_v48 }
 0x102   :  { %v398_v53 = vpack.c.bf16 %v212_v45, %v209_v43  ;;  %v418_v54 = vpack.c.bf16 %v244_v46, %v241_v44 }
 0x103   :  { %v393_v55 = vpack.c.bf16 %v204_v51, %v201_v49  ;;  %v413_v56 = vpack.c.bf16 %v236_v52, %v233_v50 }
 0x104   :  { %422 = vst [vmem:[%s605_s3 + $0x18] sm:$0xff] %v398_v53   ;;  %426 = vst [vmem:[%s605_s3 + $0x38] sm:$0xff] %v418_v54  }
 0x105   :  { %421 = vst [vmem:[%s605_s3 + $0x10] sm:$0xff] %v393_v55   ;;  %425 = vst [vmem:[%s605_s3 + $0x30] sm:$0xff] %v413_v56  }

// kernel: _lambda_.40
= control target key start
LH: loop header
LB: loop body
LE: loop exit
PB: predicated region body
PF: predicated region fallthrough
CT: control target
= control target key end

     0   :  { %s913_s12 = smov 0   ;;  %s1178_s0 = inlined_call_operand.vmem [shape: bf16[2,10,10,128], index: 0, kind: input, shape index: {}]   ;;  %s1179_s1 = inlined_call_operand.vmem [shape: f32[9,128], index: 1, kind: input, shape index: {}]   ;;  %s1180_s2 = inlined_call_operand.vmem [shape: f32[1,128], index: 2, kind: input, shape index: {}]   ;;  %s1181_s3 = inlined_call_operand.vmem [shape: bf16[2,8,8,128], index: 3, kind: output, shape index: {}]  }
   0x1 LB: > { %s832_s13 = sadd.s32 4294967295, %s891_s12   ;;  %p836_p0 = scmp.ge.s32.totalorder %s891_s12, 1  ;;  %s891_s12 = sphi %s913_s12, %s13_s12  }
   0x2   : > { %p137_p1 = scmp.lt.s32.totalorder %s891_s12, 3 }
   0x4   : > { %p138_p2 = pnand %p836_p0, %p137_p1 }
   0x5   : > { %p161_p3 = scmp.lt.s32.totalorder (!%p138_p2), %s832_s13, 1  ;;  %v840_v10 = vld [vmem:[%s1179_s1] ss:$0 sm:$0xff] (!%p138_p2)  ;;  %vm261_vm0 = vcmask (!%p138_p2), 1046528   ;;  %v841_v36 = vld [vmem:[%s1179_s1 + $0x1] ss:$0 sm:$0xff] (!%p138_p2) }
   0x6   : > { %141 = sbr.rel (%p138_p2) target bundleno = 116 (0x74), region = 32  ;;  %vm339_vm1 = vcmask (!%p138_p2), 1045504  }
   0xd   : > { %s1183_s13 = smov (!%p161_p3, %s832_s13), 1 }
   0xe   : > { %s876_s14 = smul.u32 80, %s1183_s13  ;;  %s852_s11 = sshll.u32 %s1183_s13, 5 }
   0xf   : > { %s170_s16 = scalar_lea.vmem %s1181_s3, %s852_s11 }
  0x10   : > { %s165_s17 = scalar_lea.vmem %s1178_s0, %s876_s14 }
  0x11   : > { %v171_v0 = vld [vmem:[%s165_s17] ss:$8 sps:$4 sm:$0xff]   ;;  %v927_v1 = vld [vmem:[%s165_s17 + $0x4] sm:$0x1]  ;;  %v174_v2 = vld [vmem:[%s165_s17 + $0xc] sm:$0x1] }
  0x12   : > { %v175_v3 = vld [vmem:[%s165_s17 + $0x10] ss:$8 sps:$4 sm:$0xff]   ;;  %v176_v4 = vld [vmem:[%s165_s17 + $0x14] sm:$0x1]  ;;  %v178_v5 = vld [vmem:[%s165_s17 + $0x1c] sm:$0x1]  ;;  %v929_v6 = vunpack.c.l.bf16 %v171_v0  ;;  %v192_v7 = vunpack.c.l.bf16 %v927_v1  ;;  %v932_v8 = vunpack.c.h.bf16 %v171_v0  ;;  %v934_v9 = vunpack.c.l.bf16 %v174_v2 }
  0x13   : > { %v179_v11 = vld [vmem:[%s165_s17 + $0x20] ss:$8 sps:$4 sm:$0xff]   ;;  %v180_v12 = vld [vmem:[%s165_s17 + $0x24] sm:$0x1]  ;;  %v182_v13 = vld [vmem:[%s165_s17 + $0x2c] sm:$0x1]  ;;  %v939_v14 = vunpack.c.l.bf16 %v175_v3  ;;  %v941_v15 = vunpack.c.l.bf16 %v176_v4  ;;  %v943_v16 = vunpack.c.h.bf16 %v175_v3  ;;  %v945_v17 = vunpack.c.l.bf16 %v178_v5 }
  0x14   : > { %v183_v18 = vld [vmem:[%s165_s17 + $0x30] ss:$8 sps:$4 sm:$0xff]   ;;  %v184_v19 = vld [vmem:[%s165_s17 + $0x34] sm:$0x1]  ;;  %v186_v20 = vld [vmem:[%s165_s17 + $0x3c] sm:$0x1]  ;;  %v947_v21 = vunpack.c.l.bf16 %v179_v11  ;;  %v949_v22 = vunpack.c.l.bf16 %v180_v12  ;;  %v951_v23 = vunpack.c.h.bf16 %v179_v11  ;;  %v953_v24 = vunpack.c.l.bf16 %v182_v13 }
  0x15   : > { %v187_v25 = vld [vmem:[%s165_s17 + $0x40] ss:$8 sps:$4 sm:$0xff]   ;;  %v188_v26 = vld [vmem:[%s165_s17 + $0x44] sm:$0x1]  ;;  %v955_v27 = vld [vmem:[%s165_s17 + $0x4c] sm:$0x1]  ;;  %v957_v28 = vunpack.c.l.bf16 %v183_v18  ;;  %v959_v29 = vunpack.c.l.bf16 %v184_v19  ;;  %v961_v30 = vunpack.c.h.bf16 %v183_v18  ;;  %v963_v31 = vunpack.c.l.bf16 %v186_v20 }
  0x16   : > { %v965_v32 = vunpack.c.l.bf16 %v187_v25  ;;  %v967_v33 = vunpack.c.l.bf16 %v188_v26  ;;  %v969_v34 = vunpack.c.h.bf16 %v187_v25  ;;  %v210_v35 = vunpack.c.l.bf16 %v955_v27 }
  0x17   : > { %v216_v37 = vmul.f32 %v840_v10, %v929_v6  ;;  %v217_v38 = vmul.f32 %v840_v10, %v932_v8  ;;  %v218_v39 = vmul.f32 %v840_v10, %v939_v14  ;;  %v219_v40 = vmul.f32 %v840_v10, %v943_v16 }
  0x18   : > { %v220_v41 = vmul.f32 %v840_v10, %v947_v21  ;;  %v221_v42 = vmul.f32 %v840_v10, %v951_v23  ;;  %v222_v43 = vmul.f32 %v840_v10, %v957_v28  ;;  %v223_v44 = vmul.f32 %v840_v10, %v961_v30 }
  0x19   : > { %v229_v45 = vmul.f32 %v841_v36, %v929_v6  ;;  %v230_v46 = vmul.f32 %v841_v36, %v192_v7  ;;  %v231_v47 = vmul.f32 %v841_v36, %v932_v8  ;;  %v232_v48 = vmul.f32 %v841_v36, %v934_v9 }
  0x1a   : > { %v233_v49 = vmul.f32 %v841_v36, %v939_v14  ;;  %v234_v50 = vmul.f32 %v841_v36, %v941_v15  ;;  %v235_v51 = vmul.f32 %v841_v36, %v943_v16  ;;  %v236_v52 = vmul.f32 %v841_v36, %v945_v17 }
  0x1b   : > { %v237_v53 = vmul.f32 %v841_v36, %v947_v21  ;;  %v238_v54 = vmul.f32 %v841_v36, %v949_v22  ;;  %v239_v55 = vmul.f32 %v841_v36, %v951_v23  ;;  %v240_v56 = vmul.f32 %v841_v36, %v953_v24 }
  0x1c   : > { %v241_v57 = vmul.f32 %v841_v36, %v957_v28  ;;  %v242_v58 = vmul.f32 %v841_v36, %v959_v29  ;;  %v243_v59 = vmul.f32 %v841_v36, %v961_v30  ;;  %v244_v60 = vmul.f32 %v841_v36, %v963_v31 }
  0x1d   : > { %v262_v61 = vrot.slane %v229_v45, 1  ;;  %v263_v62 = vrot.slane %v230_v46, 1  ;;  %v265_v63 = vrot.slane %v231_v47, 1  ;;  %v266_v0 = vrot.slane %v232_v48, 1  ;;  %v842_v47 = vld [vmem:[%s1179_s1 + $0x2] ss:$0 sm:$0xff] }
  0x1e   : > { %v268_v2 = vrot.slane %v233_v49, 1  ;;  %v269_v3 = vrot.slane %v234_v50, 1  ;;  %v271_v4 = vrot.slane %v235_v51, 1  ;;  %v272_v5 = vrot.slane %v236_v52, 1 }
  0x1f   : > { %v264_v10 = vsel %vm261_vm0, %v262_v61, %v263_v62  ;;  %v267_v11 = vsel %vm261_vm0, %v265_v63, %v266_v0  ;;  %v274_v12 = vrot.slane %v237_v53, 1  ;;  %v275_v13 = vrot.slane %v238_v54, 1 }
  0x20   : > { %v270_v18 = vsel %vm261_vm0, %v268_v2, %v269_v3  ;;  %v273_v19 = vsel %vm261_vm0, %v271_v4, %v272_v5  ;;  %v277_v20 = vrot.slane %v239_v55, 1  ;;  %v278_v25 = vrot.slane %v240_v56, 1 }
  0x21   : > { %v276_v26 = vsel %vm261_vm0, %v274_v12, %v275_v13  ;;  %v280_v36 = vrot.slane %v241_v57, 1  ;;  %v281_v45 = vrot.slane %v242_v58, 1  ;;  %v283_v46 = vrot.slane %v243_v59, 1 }
  0x22   : > { %v279_v48 = vsel %vm261_vm0, %v277_v20, %v278_v25  ;;  %v284_v49 = vrot.slane %v244_v60, 1  ;;  %v294_v50 = vadd.f32 %v264_v10, %v216_v37  ;;  %v295_v51 = vadd.f32 %v267_v11, %v217_v38 }
  0x23   : > { %v282_v52 = vsel %vm261_vm0, %v280_v36, %v281_v45  ;;  %v296_v53 = vadd.f32 %v270_v18, %v218_v39  ;;  %v297_v54 = vadd.f32 %v273_v19, %v219_v40  ;;  %v298_v55 = vadd.f32 %v276_v26, %v220_v41 }
  0x24   : > { %v285_v56 = vsel %vm261_vm0, %v283_v46, %v284_v49  ;;  %v299_v61 = vadd.f32 %v279_v48, %v221_v42  ;;  %v300_v57 = vadd.f32 %v282_v52, %v222_v43  ;;  %v307_v58 = vmul.f32 %v842_v47, %v929_v6 }
  0x25   : > { %v301_v59 = vadd.f32 %v285_v56, %v223_v44  ;;  %v308_v62 = vmul.f32 %v842_v47, %v192_v7  ;;  %v309_v63 = vmul.f32 %v842_v47, %v932_v8  ;;  %v310_v37 = vmul.f32 %v842_v47, %v934_v9  ;;  %v843_v56 = vld [vmem:[%s1179_s1 + $0x3] ss:$0 sm:$0xff] }
  0x26   : > { %v311_v38 = vmul.f32 %v842_v47, %v939_v14  ;;  %v312_v39 = vmul.f32 %v842_v47, %v941_v15  ;;  %v313_v40 = vmul.f32 %v842_v47, %v943_v16  ;;  %v314_v41 = vmul.f32 %v842_v47, %v945_v17 }
  0x27   : > { %v315_v42 = vmul.f32 %v842_v47, %v947_v21  ;;  %v316_v6 = vmul.f32 %v842_v47, %v949_v22  ;;  %v317_v43 = vmul.f32 %v842_v47, %v951_v23  ;;  %v318_v1 = vmul.f32 %v842_v47, %v953_v24 }
  0x28   : > { %v319_v7 = vmul.f32 %v842_v47, %v957_v28  ;;  %v320_v44 = vmul.f32 %v842_v47, %v959_v29  ;;  %v321_v60 = vmul.f32 %v842_v47, %v961_v30  ;;  %v322_v0 = vmul.f32 %v842_v47, %v963_v31 }
  0x29   : > { %v340_v2 = vrot.slane %v307_v58, 2  ;;  %v341_v3 = vrot.slane %v308_v62, 2  ;;  %v343_v4 = vrot.slane %v309_v63, 2  ;;  %v344_v5 = vrot.slane %v310_v37, 2 }
  0x2a   : > { %v346_v10 = vrot.slane %v311_v38, 2  ;;  %v347_v11 = vrot.slane %v312_v39, 2  ;;  %v349_v12 = vrot.slane %v313_v40, 2  ;;  %v350_v13 = vrot.slane %v314_v41, 2 }
  0x2b   : > { %v342_v18 = vsel %vm339_vm1, %v340_v2, %v341_v3  ;;  %v345_v19 = vsel %vm339_vm1, %v343_v4, %v344_v5  ;;  %v352_v20 = vrot.slane %v315_v42, 2  ;;  %v353_v25 = vrot.slane %v316_v6, 2 }
  0x2c   : > { %v348_v26 = vsel %vm339_vm1, %v346_v10, %v347_v11  ;;  %v351_v36 = vsel %vm339_vm1, %v349_v12, %v350_v13  ;;  %v355_v45 = vrot.slane %v317_v43, 2  ;;  %v356_v46 = vrot.slane %v318_v1, 2 }
  0x2d   : > { %v354_v47 = vsel %vm339_vm1, %v352_v20, %v353_v25  ;;  %v358_v48 = vrot.slane %v319_v7, 2  ;;  %v359_v49 = vrot.slane %v320_v44, 2  ;;  %v361_v52 = vrot.slane %v321_v60, 2 }
  0x2e   : > { %v357_v58 = vsel %vm339_vm1, %v355_v45, %v356_v46  ;;  %v362_v62 = vrot.slane %v322_v0, 2  ;;  %v372_v63 = vadd.f32 %v342_v18, %v294_v50  ;;  %v373_v37 = vadd.f32 %v345_v19, %v295_v51 }
  0x2f   : > { %v360_v38 = vsel %vm339_vm1, %v358_v48, %v359_v49  ;;  %v374_v39 = vadd.f32 %v348_v26, %v296_v53  ;;  %v375_v40 = vadd.f32 %v351_v36, %v297_v54  ;;  %v376_v41 = vadd.f32 %v354_v47, %v298_v55  ;;  %v844_v55 = vld [vmem:[%s1179_s1 + $0x4] ss:$0 sm:$0xff] }
  0x30   : > { %v363_v42 = vsel %vm339_vm1, %v361_v52, %v362_v62  ;;  %v377_v6 = vadd.f32 %v357_v58, %v299_v61  ;;  %v378_v43 = vadd.f32 %v360_v38, %v300_v57  ;;  %v385_v1 = vmul.f32 %v843_v56, %v932_v8 }
  0x31   : > { %v379_v7 = vadd.f32 %v363_v42, %v301_v59  ;;  %v386_v44 = vmul.f32 %v843_v56, %v939_v14  ;;  %v387_v60 = vmul.f32 %v843_v56, %v943_v16  ;;  %v388_v0 = vmul.f32 %v843_v56, %v947_v21 }
  0x32   : > { %v389_v50 = vmul.f32 %v843_v56, %v951_v23  ;;  %v390_v51 = vmul.f32 %v843_v56, %v957_v28  ;;  %v391_v53 = vmul.f32 %v843_v56, %v961_v30  ;;  %v392_v54 = vmul.f32 %v843_v56, %v965_v32 }
  0x33   : > { %v393_v61 = vadd.f32 %v385_v1, %v372_v63  ;;  %v394_v57 = vadd.f32 %v386_v44, %v373_v37  ;;  %v395_v59 = vadd.f32 %v387_v60, %v374_v39  ;;  %v396_v2 = vadd.f32 %v388_v0, %v375_v40 }
  0x34   : > { %v397_v3 = vadd.f32 %v389_v50, %v376_v41  ;;  %v398_v4 = vadd.f32 %v390_v51, %v377_v6  ;;  %v399_v5 = vadd.f32 %v391_v53, %v378_v43  ;;  %v400_v10 = vadd.f32 %v392_v54, %v379_v7 }
  0x35   : > { %v406_v11 = vmul.f32 %v844_v55, %v932_v8  ;;  %v407_v12 = vmul.f32 %v844_v55, %v934_v9  ;;  %v408_v13 = vmul.f32 %v844_v55, %v939_v14  ;;  %v409_v18 = vmul.f32 %v844_v55, %v941_v15 }
  0x36   : > { %v410_v19 = vmul.f32 %v844_v55, %v943_v16  ;;  %v411_v20 = vmul.f32 %v844_v55, %v945_v17  ;;  %v412_v25 = vmul.f32 %v844_v55, %v947_v21  ;;  %v413_v26 = vmul.f32 %v844_v55, %v949_v22 }
  0x37   : > { %v414_v36 = vmul.f32 %v844_v55, %v951_v23  ;;  %v415_v45 = vmul.f32 %v844_v55, %v953_v24  ;;  %v416_v46 = vmul.f32 %v844_v55, %v957_v28  ;;  %v417_v47 = vmul.f32 %v844_v55, %v959_v29 }
  0x38   : > { %v418_v48 = vmul.f32 %v844_v55, %v961_v30  ;;  %v419_v49 = vmul.f32 %v844_v55, %v963_v31  ;;  %v420_v52 = vmul.f32 %v844_v55, %v965_v32  ;;  %v421_v56 = vmul.f32 %v844_v55, %v967_v33  ;;  %v845_v55 = vld [vmem:[%s1179_s1 + $0x5] ss:$0 sm:$0xff] }
  0x39   : > { %v438_v58 = vrot.slane %v406_v11, 1  ;;  %v439_v62 = vrot.slane %v407_v12, 1  ;;  %v441_v63 = vrot.slane %v408_v13, 1  ;;  %v442_v37 = vrot.slane %v409_v18, 1 }
  0x3a   : > { %v444_v38 = vrot.slane %v410_v19, 1  ;;  %v445_v39 = vrot.slane %v411_v20, 1  ;;  %v447_v40 = vrot.slane %v412_v25, 1  ;;  %v448_v41 = vrot.slane %v413_v26, 1 }
  0x3b   : > { %v440_v42 = vsel %vm261_vm0, %v438_v58, %v439_v62  ;;  %v443_v6 = vsel %vm261_vm0, %v441_v63, %v442_v37  ;;  %v450_v43 = vrot.slane %v414_v36, 1  ;;  %v451_v1 = vrot.slane %v415_v45, 1 }
  0x3c   : > { %v446_v7 = vsel %vm261_vm0, %v444_v38, %v445_v39  ;;  %v449_v44 = vsel %vm261_vm0, %v447_v40, %v448_v41  ;;  %v453_v60 = vrot.slane %v416_v46, 1  ;;  %v454_v0 = vrot.slane %v417_v47, 1 }
  0x3d   : > { %v452_v50 = vsel %vm261_vm0, %v450_v43, %v451_v1  ;;  %v456_v51 = vrot.slane %v418_v48, 1  ;;  %v457_v53 = vrot.slane %v419_v49, 1  ;;  %v459_v54 = vrot.slane %v420_v52, 1 }
  0x3e   : > { %v455_v11 = vsel %vm261_vm0, %v453_v60, %v454_v0  ;;  %v460_v12 = vrot.slane %v421_v56, 1  ;;  %v470_v13 = vadd.f32 %v440_v42, %v393_v61  ;;  %v471_v18 = vadd.f32 %v443_v6, %v394_v57 }
  0x3f   : > { %v458_v19 = vsel %vm261_vm0, %v456_v51, %v457_v53  ;;  %v472_v20 = vadd.f32 %v446_v7, %v395_v59  ;;  %v473_v25 = vadd.f32 %v449_v44, %v396_v2  ;;  %v474_v26 = vadd.f32 %v452_v50, %v397_v3 }
  0x40   : > { %v461_v36 = vsel %vm261_vm0, %v459_v54, %v460_v12  ;;  %v475_v45 = vadd.f32 %v455_v11, %v398_v4  ;;  %v476_v46 = vadd.f32 %v458_v19, %v399_v5  ;;  %v483_v47 = vmul.f32 %v845_v55, %v932_v8  ;;  %v846_v12 = vld [vmem:[%s1179_s1 + $0x6] ss:$0 sm:$0xff] }
  0x41   : > { %v477_v48 = vadd.f32 %v461_v36, %v400_v10  ;;  %v484_v49 = vmul.f32 %v845_v55, %v934_v9  ;;  %v485_v52 = vmul.f32 %v845_v55, %v939_v14  ;;  %v486_v56 = vmul.f32 %v845_v55, %v941_v15 }
  0x42   : > { %v487_v61 = vmul.f32 %v845_v55, %v943_v16  ;;  %v488_v57 = vmul.f32 %v845_v55, %v945_v17  ;;  %v489_v59 = vmul.f32 %v845_v55, %v947_v21  ;;  %v490_v2 = vmul.f32 %v845_v55, %v949_v22 }
  0x43   : > { %v491_v3 = vmul.f32 %v845_v55, %v951_v23  ;;  %v492_v4 = vmul.f32 %v845_v55, %v953_v24  ;;  %v493_v8 = vmul.f32 %v845_v55, %v957_v28  ;;  %v494_v9 = vmul.f32 %v845_v55, %v959_v29 }
  0x44   : > { %v495_v5 = vmul.f32 %v845_v55, %v961_v30  ;;  %v496_v10 = vmul.f32 %v845_v55, %v963_v31  ;;  %v497_v58 = vmul.f32 %v845_v55, %v965_v32  ;;  %v498_v62 = vmul.f32 %v845_v55, %v967_v33 }
  0x45   : > { %v515_v63 = vrot.slane %v483_v47, 2  ;;  %v516_v37 = vrot.slane %v484_v49, 2  ;;  %v518_v38 = vrot.slane %v485_v52, 2  ;;  %v519_v39 = vrot.slane %v486_v56, 2 }
  0x46   : > { %v521_v40 = vrot.slane %v487_v61, 2  ;;  %v522_v41 = vrot.slane %v488_v57, 2  ;;  %v524_v42 = vrot.slane %v489_v59, 2  ;;  %v525_v6 = vrot.slane %v490_v2, 2 }
  0x47   : > { %v517_v43 = vsel %vm339_vm1, %v515_v63, %v516_v37  ;;  %v520_v1 = vsel %vm339_vm1, %v518_v38, %v519_v39  ;;  %v527_v7 = vrot.slane %v491_v3, 2  ;;  %v528_v44 = vrot.slane %v492_v4, 2 }
  0x48   : > { %v523_v60 = vsel %vm339_vm1, %v521_v40, %v522_v41  ;;  %v526_v0 = vsel %vm339_vm1, %v524_v42, %v525_v6  ;;  %v530_v50 = vrot.slane %v493_v8, 2  ;;  %v531_v51 = vrot.slane %v494_v9, 2 }
  0x49   : > { %v529_v53 = vsel %vm339_vm1, %v527_v7, %v528_v44  ;;  %v533_v54 = vrot.slane %v495_v5, 2  ;;  %v534_v55 = vrot.slane %v496_v10, 2  ;;  %v536_v11 = vrot.slane %v497_v58, 2 }
  0x4a   : > { %v532_v19 = vsel %vm339_vm1, %v530_v50, %v531_v51  ;;  %v537_v36 = vrot.slane %v498_v62, 2  ;;  %v547_v47 = vadd.f32 %v517_v43, %v470_v13  ;;  %v548_v49 = vadd.f32 %v520_v1, %v471_v18 }
  0x4b   : > { %v535_v52 = vsel %vm339_vm1, %v533_v54, %v534_v55  ;;  %v549_v56 = vadd.f32 %v523_v60, %v472_v20  ;;  %v550_v61 = vadd.f32 %v526_v0, %v473_v25  ;;  %v551_v57 = vadd.f32 %v529_v53, %v474_v26  ;;  %v847_v26 = vld [vmem:[%s1179_s1 + $0x7] ss:$0 sm:$0xff] }
  0x4c   : > { %v538_v59 = vsel %vm339_vm1, %v536_v11, %v537_v36  ;;  %v552_v2 = vadd.f32 %v532_v19, %v475_v45  ;;  %v553_v3 = vadd.f32 %v535_v52, %v476_v46  ;;  %v560_v4 = vmul.f32 %v846_v12, %v939_v14 }
  0x4d   : > { %v554_v8 = vadd.f32 %v538_v59, %v477_v48  ;;  %v561_v9 = vmul.f32 %v846_v12, %v943_v16  ;;  %v562_v5 = vmul.f32 %v846_v12, %v947_v21  ;;  %v563_v10 = vmul.f32 %v846_v12, %v951_v23 }
  0x4e   : > { %v564_v13 = vmul.f32 %v846_v12, %v957_v28  ;;  %v565_v18 = vmul.f32 %v846_v12, %v961_v30  ;;  %v566_v20 = vmul.f32 %v846_v12, %v965_v32  ;;  %v567_v25 = vmul.f32 %v846_v12, %v969_v34 }
  0x4f   : > { %v568_v45 = vadd.f32 %v560_v4, %v547_v47  ;;  %v569_v46 = vadd.f32 %v561_v9, %v548_v49  ;;  %v570_v48 = vadd.f32 %v562_v5, %v549_v56  ;;  %v571_v58 = vadd.f32 %v563_v10, %v550_v61 }
  0x50   : > { %v572_v62 = vadd.f32 %v564_v13, %v551_v57  ;;  %v573_v63 = vadd.f32 %v565_v18, %v552_v2  ;;  %v574_v37 = vadd.f32 %v566_v20, %v553_v3  ;;  %v575_v38 = vadd.f32 %v567_v25, %v554_v8  ;;  %v848_v20 = vld [vmem:[%s1179_s1 + $0x8] ss:$0 sm:$0xff] }
  0x51   : > { %v581_v39 = vmul.f32 %v847_v26, %v939_v14  ;;  %v582_v40 = vmul.f32 %v847_v26, %v941_v15  ;;  %v583_v41 = vmul.f32 %v847_v26, %v943_v16  ;;  %v584_v42 = vmul.f32 %v847_v26, %v945_v17 }
  0x52   : > { %v585_v6 = vmul.f32 %v847_v26, %v947_v21  ;;  %v586_v43 = vmul.f32 %v847_v26, %v949_v22  ;;  %v587_v1 = vmul.f32 %v847_v26, %v951_v23  ;;  %v588_v7 = vmul.f32 %v847_v26, %v953_v24 }
  0x53   : > { %v589_v44 = vmul.f32 %v847_v26, %v957_v28  ;;  %v590_v60 = vmul.f32 %v847_v26, %v959_v29  ;;  %v591_v0 = vmul.f32 %v847_v26, %v961_v30  ;;  %v592_v50 = vmul.f32 %v847_v26, %v963_v31 }
  0x54   : > { %v593_v51 = vmul.f32 %v847_v26, %v965_v32  ;;  %v594_v53 = vmul.f32 %v847_v26, %v967_v33  ;;  %v595_v54 = vmul.f32 %v847_v26, %v969_v34  ;;  %v596_v55 = vmul.f32 %v847_v26, %v210_v35 }
  0x55   : > { %v613_v11 = vrot.slane %v581_v39, 1  ;;  %v614_v12 = vrot.slane %v582_v40, 1  ;;  %v616_v19 = vrot.slane %v583_v41, 1  ;;  %v617_v36 = vrot.slane %v584_v42, 1 }
  0x56   : > { %v619_v47 = vrot.slane %v585_v6, 1  ;;  %v620_v49 = vrot.slane %v586_v43, 1  ;;  %v622_v52 = vrot.slane %v587_v1, 1  ;;  %v623_v56 = vrot.slane %v588_v7, 1 }
  0x57   : > { %v615_v61 = vsel %vm261_vm0, %v613_v11, %v614_v12  ;;  %v618_v57 = vsel %vm261_vm0, %v616_v19, %v617_v36  ;;  %v625_v59 = vrot.slane %v589_v44, 1  ;;  %v626_v2 = vrot.slane %v590_v60, 1 }
  0x58   : > { %v621_v3 = vsel %vm261_vm0, %v619_v47, %v620_v49  ;;  %v624_v4 = vsel %vm261_vm0, %v622_v52, %v623_v56  ;;  %v628_v8 = vrot.slane %v591_v0, 1  ;;  %v629_v9 = vrot.slane %v592_v50, 1  ;;  %v849_v49 = vld [vmem:[%s1180_s2] ss:$0 sm:$0xff] }
  0x59   : > { %v627_v5 = vsel %vm261_vm0, %v625_v59, %v626_v2  ;;  %v631_v10 = vrot.slane %v593_v51, 1  ;;  %v632_v13 = vrot.slane %v594_v53, 1  ;;  %v634_v18 = vrot.slane %v595_v54, 1 }
  0x5a   : > { %v630_v25 = vsel %vm261_vm0, %v628_v8, %v629_v9  ;;  %v635_v26 = vrot.slane %v596_v55, 1  ;;  %v645_v39 = vadd.f32 %v615_v61, %v568_v45  ;;  %v646_v40 = vadd.f32 %v618_v57, %v569_v46 }
  0x5b   : > { %v633_v41 = vsel %vm261_vm0, %v631_v10, %v632_v13  ;;  %v647_v42 = vadd.f32 %v621_v3, %v570_v48  ;;  %v648_v6 = vadd.f32 %v624_v4, %v571_v58  ;;  %v649_v43 = vadd.f32 %v627_v5, %v572_v62 }
  0x5c   : > { %v636_v1 = vsel %vm261_vm0, %v634_v18, %v635_v26  ;;  %v650_v7 = vadd.f32 %v630_v25, %v573_v63  ;;  %v651_v44 = vadd.f32 %v633_v41, %v574_v37  ;;  %v658_v60 = vmul.f32 %v848_v20, %v939_v14 }
  0x5d   : > { %v652_v0 = vadd.f32 %v636_v1, %v575_v38  ;;  %v659_v50 = vmul.f32 %v848_v20, %v941_v15  ;;  %v660_v51 = vmul.f32 %v848_v20, %v943_v16  ;;  %v661_v53 = vmul.f32 %v848_v20, %v945_v17 }
  0x5e   : > { %v662_v45 = vmul.f32 %v848_v20, %v947_v21  ;;  %v663_v46 = vmul.f32 %v848_v20, %v949_v22  ;;  %v664_v48 = vmul.f32 %v848_v20, %v951_v23  ;;  %v665_v58 = vmul.f32 %v848_v20, %v953_v24 }
  0x5f   : > { %v666_v62 = vmul.f32 %v848_v20, %v957_v28  ;;  %v667_v63 = vmul.f32 %v848_v20, %v959_v29  ;;  %v668_v14 = vmul.f32 %v848_v20, %v961_v30  ;;  %v669_v15 = vmul.f32 %v848_v20, %v963_v31 }
  0x60   : > { %v670_v16 = vmul.f32 %v848_v20, %v965_v32  ;;  %v671_v17 = vmul.f32 %v848_v20, %v967_v33  ;;  %v672_v21 = vmul.f32 %v848_v20, %v969_v34  ;;  %v673_v22 = vmul.f32 %v848_v20, %v210_v35 }
  0x61   : > { %v690_v23 = vrot.slane %v658_v60, 2  ;;  %v691_v37 = vrot.slane %v659_v50, 2  ;;  %v693_v24 = vrot.slane %v660_v51, 2  ;;  %v694_v38 = vrot.slane %v661_v53, 2 }
  0x62   : > { %v696_v28 = vrot.slane %v662_v45, 2  ;;  %v697_v54 = vrot.slane %v663_v46, 2  ;;  %v699_v29 = vrot.slane %v664_v48, 2  ;;  %v700_v55 = vrot.slane %v665_v58, 2 }
  0x63   : > { %v692_v30 = vsel %vm339_vm1, %v690_v23, %v691_v37  ;;  %v695_v31 = vsel %vm339_vm1, %v693_v24, %v694_v38  ;;  %v702_v32 = vrot.slane %v666_v62, 2  ;;  %v703_v11 = vrot.slane %v667_v63, 2 }
  0x64   : > { %v698_v33 = vsel %vm339_vm1, %v696_v28, %v697_v54  ;;  %v701_v34 = vsel %vm339_vm1, %v699_v29, %v700_v55  ;;  %v705_v27 = vrot.slane %v668_v14, 2  ;;  %v706_v35 = vrot.slane %v669_v15, 2 }
  0x65   : > { %v704_v12 = vsel %vm339_vm1, %v702_v32, %v703_v11  ;;  %v708_v19 = vrot.slane %v670_v16, 2  ;;  %v709_v36 = vrot.slane %v671_v17, 2  ;;  %v711_v47 = vrot.slane %v672_v21, 2 }
  0x66   : > { %v707_v52 = vsel %vm339_vm1, %v705_v27, %v706_v35  ;;  %v712_v56 = vrot.slane %v673_v22, 2  ;;  %v722_v61 = vadd.f32 %v692_v30, %v645_v39  ;;  %v723_v57 = vadd.f32 %v695_v31, %v646_v40 }
  0x67   : > { %v710_v59 = vsel %vm339_vm1, %v708_v19, %v709_v36  ;;  %v724_v2 = vadd.f32 %v698_v33, %v647_v42  ;;  %v725_v3 = vadd.f32 %v701_v34, %v648_v6  ;;  %v726_v4 = vadd.f32 %v704_v12, %v649_v43 }
  0x68   : > { %v713_v8 = vsel %vm339_vm1, %v711_v47, %v712_v56  ;;  %v727_v9 = vadd.f32 %v707_v52, %v650_v7  ;;  %v728_v5 = vadd.f32 %v710_v59, %v651_v44  ;;  %v737_v10 = vadd.f32 %v849_v49, %v722_v61 }
  0x69   : > { %v729_v13 = vadd.f32 %v713_v8, %v652_v0  ;;  %v738_v18 = vadd.f32 %v849_v49, %v723_v57  ;;  %v739_v20 = vadd.f32 %v849_v49, %v724_v2  ;;  %v740_v25 = vadd.f32 %v849_v49, %v725_v3 }
  0x6a   : > { %v741_v26 = vadd.f32 %v849_v49, %v726_v4  ;;  %v742_v41 = vadd.f32 %v849_v49, %v727_v9  ;;  %v743_v1 = vadd.f32 %v849_v49, %v728_v5  ;;  %v745_v39 = vmax.f32 %v737_v10, 0.0 }
  0x6b   : > { %v744_v40 = vadd.f32 %v849_v49, %v729_v13  ;;  %v746_v60 = vmax.f32 %v738_v18, 0.0  ;;  %v747_v50 = vmax.f32 %v739_v20, 0.0  ;;  %v748_v42 = vmax.f32 %v740_v25, 0.0 }
  0x6c   : > { %v749_v6 = vmax.f32 %v741_v26, 0.0  ;;  %v750_v43 = vmax.f32 %v742_v41, 0.0  ;;  %v751_v51 = vmax.f32 %v743_v1, 0.0  ;;  %v753_v53 = vmin.f32 %v745_v39, 6.0 }
  0x6d   : > { %v752_v7 = vmax.f32 %v744_v40, 0.0  ;;  %v754_v44 = vmin.f32 %v746_v60, 6.0  ;;  %v755_v45 = vmin.f32 %v747_v50, 6.0  ;;  %v756_v0 = vmin.f32 %v748_v42, 6.0 }
  0x6e   : > { %v757_v46 = vmin.f32 %v749_v6, 6.0  ;;  %v758_v48 = vmin.f32 %v750_v43, 6.0  ;;  %v759_v58 = vmin.f32 %v751_v51, 6.0 }
  0x6f   : > { %v760_v62 = vmin.f32 %v752_v7, 6.0  ;;  %v856_v63 = vpack.c.bf16 %v754_v44, %v753_v53  ;;  %v861_v14 = vpack.c.bf16 %v756_v0, %v755_v45 }
  0x70   : > { %v866_v15 = vpack.c.bf16 %v758_v48, %v757_v46 }
  0x71   : > { %857 = vst [vmem:[%s170_s16] sm:$0xff] %v856_v63   ;;  %873 = vst [vmem:[%s170_s16 + $0x8] sm:$0xff] %v861_v14   ;;  %v871_v16 = vpack.c.bf16 %v760_v62, %v759_v58 }
  0x72   : > { %874 = vst [vmem:[%s170_s16 + $0x10] sm:$0xff] %v866_v15  }
  0x73   : > { %875 = vst [vmem:[%s170_s16 + $0x18] sm:$0xff] %v871_v16  }
  0x74 PF: > { %s13_s12 = sadd.s32 1, %s891_s12  }
  0x75   : > { %p10_p4 = scmp.ge.s32.totalorder %s13_s12, 4  }
  0x77   :  { %12 = sbr.rel (!%p10_p4) target bundleno = 1 (0x1), region = 62 }

// kernel: _lambda_.42
= control target key start
LH: loop header
LB: loop body
LE: loop exit
PB: predicated region body
PF: predicated region fallthrough
CT: control target
= control target key end

     0   :  { %s634_s1 = inlined_call_operand.vmem [shape: bf16[128,128], index: 1, kind: input, shape index: {}]   ;;  %s635_s0 = inlined_call_operand.vmem [shape: bf16[128,128], index: 0, kind: input, shape index: {}]   ;;  %s636_s2 = inlined_call_operand.vmem [shape: f32[1,128], index: 2, kind: input, shape index: {}]   ;;  %s637_s3 = inlined_call_operand.vmem [shape: bf16[128,128], index: 3, kind: output, shape index: {}]  }
   0x1   :  { %v523_v0 = vld [vmem:[%s634_s1] sm:$0xff]   ;;  %v524_v1 = vld [vmem:[%s634_s1 + $0x8] sm:$0xff]   ;;  %v525_v2 = vld [vmem:[%s634_s1 + $0x10] sm:$0xff]  }
   0x2   :  { %475 = vmatprep.subr.bf16.mxu0 %v523_v0  ;;  %507 = vmatprep.subr.bf16.mxu1 %v523_v0  ;;  %v526_v3 = vld [vmem:[%s634_s1 + $0x18] sm:$0xff]   ;;  %v531_v4 = vld [vmem:[%s635_s0] sm:$0xff]   ;;  %v528_v7 = vld [vmem:[%s634_s1 + $0x28] sm:$0xff]  }
   0x3   :  { %476 = vmatpush3.bf16.msra.mxu0 %v523_v0  ;;  %515 = vmatpush3.bf16.msra.mxu1 %v523_v0  ;;  %v532_v5 = vld [vmem:[%s635_s0 + $0x20] sm:$0xff]   ;;  %v529_v8 = vld [vmem:[%s634_s1 + $0x30] sm:$0xff]   ;;  %v530_v9 = vld [vmem:[%s634_s1 + $0x38] sm:$0xff]  }
   0x4   :  { %477 = vmatprep.subr.bf16.mxu0 %v524_v1  ;;  %508 = vmatprep.subr.bf16.mxu1 %v524_v1  ;;  %v527_v6 = vld [vmem:[%s634_s1 + $0x20] sm:$0xff]   ;;  %v533_v10 = vld [vmem:[%s635_s0 + $0x8] sm:$0xff]   ;;  %v535_v12 = vld [vmem:[%s635_s0 + $0x10] sm:$0xff]  }
   0x5   :  { %491 = vmatprep.mubr.bf16.mxu0 %v531_v4  ;;  %499 = vmatprep.mubr.bf16.mxu1 %v532_v5  ;;  %v534_v11 = vld [vmem:[%s635_s0 + $0x28] sm:$0xff]   ;;  %v536_v13 = vld [vmem:[%s635_s0 + $0x30] sm:$0xff]   ;;  %v537_v14 = vld [vmem:[%s635_s0 + $0x18] sm:$0xff]  }
   0x6   :  { %v538_v15 = vld [vmem:[%s635_s0 + $0x38] sm:$0xff]   ;;  %v363_v16 = vld [vmem:[%s636_s2] ss:$0 sm:$0xff] }
   0x7   :  { %478 = vmatpush3.bf16.msra.mxu0 %v524_v1  ;;  %516 = vmatpush3.bf16.msra.mxu1 %v524_v1 }
   0x8   :  { %479 = vmatprep.subr.bf16.mxu0 %v525_v2  ;;  %509 = vmatprep.subr.bf16.mxu1 %v525_v2 }
   0xb   :  { %480 = vmatpush3.bf16.msra.mxu0 %v525_v2  ;;  %517 = vmatpush3.bf16.msra.mxu1 %v525_v2 }
   0xc   :  { %481 = vmatprep.subr.bf16.mxu0 %v526_v3  ;;  %510 = vmatprep.subr.bf16.mxu1 %v526_v3 }
   0xf   :  { %482 = vmatpush3.bf16.msra.mxu0 %v526_v3  ;;  %518 = vmatpush3.bf16.msra.mxu1 %v526_v3 }
  0x10   :  { %483 = vmatprep.subr.bf16.mxu0 %v527_v6  ;;  %511 = vmatprep.subr.bf16.mxu1 %v527_v6 }
  0x13   :  { %484 = vmatpush3.bf16.msra.mxu0 %v527_v6  ;;  %519 = vmatpush3.bf16.msra.mxu1 %v527_v6 }
  0x14   :  { %485 = vmatprep.subr.bf16.mxu0 %v528_v7  ;;  %512 = vmatprep.subr.bf16.mxu1 %v528_v7 }
  0x17   :  { %486 = vmatpush3.bf16.msra.mxu0 %v528_v7  ;;  %520 = vmatpush3.bf16.msra.mxu1 %v528_v7 }
  0x18   :  { %487 = vmatprep.subr.bf16.mxu0 %v529_v8  ;;  %513 = vmatprep.subr.bf16.mxu1 %v529_v8 }
  0x1b   :  { %488 = vmatpush3.bf16.msra.mxu0 %v529_v8  ;;  %521 = vmatpush3.bf16.msra.mxu1 %v529_v8 }
  0x1c   :  { %489 = vmatprep.subr.bf16.mxu0 %v530_v9  ;;  %514 = vmatprep.subr.bf16.mxu1 %v530_v9 }
  0x1f   :  { %490 = vmatpush3.bf16.msra.mxu0 %v530_v9  ;;  %522 = vmatpush3.bf16.msra.mxu1 %v530_v9 }
  0x22   :  { %492 = vmatmul.mubr.bf16.vlgmr.msra.gmra.mrb[0].mxu0 %v533_v10  ;;  %500 = vmatmul.mubr.bf16.vlgmr.msra.gmra.mrb[0].mxu1 %v534_v11 }
  0x23   :  { %495 = vmatprep.mubr.bf16.mxu0 %v535_v12  ;;  %503 = vmatprep.mubr.bf16.mxu1 %v536_v13 }
  0x2a   :  { %496 = vmatmul.mubr.bf16.gmra.mrb[4].mxu0 %v537_v14  ;;  %504 = vmatmul.mubr.bf16.gmra.mrb[4].mxu1 %v538_v15 }
  0xf5   :  { %v493_v17 = vpop.f32.mrb[0].mxu0  ;;  %v501_v18 = vpop.f32.mrb[0].mxu1 }
  0xf6   :  { %v193_v19 = vadd.f32 %v493_v17, %v363_v16  ;;  %v225_v20 = vadd.f32 %v501_v18, %v363_v16  ;;  %v184_v21 = vpop.f32.mrb[1].mxu0  ;;  %v216_v22 = vpop.f32.mrb[1].mxu1 }
  0xf7   :  { %v185_v23 = vadd.f32 %v363_v16, %v184_v21  ;;  %v217_v24 = vadd.f32 %v363_v16, %v216_v22  ;;  %v494_v25 = vpop.f32.mrb[2].mxu0  ;;  %v502_v26 = vpop.f32.mrb[2].mxu1 }
  0xf8   :  { %v249_v27 = vmax.f32 %v193_v19, 0.0  ;;  %v257_v28 = vmax.f32 %v225_v20, 0.0  ;;  %v196_v29 = vadd.f32 %v494_v25, %v363_v16  ;;  %v228_v30 = vadd.f32 %v502_v26, %v363_v16  ;;  %v187_v31 = vpop.f32.mrb[3].mxu0  ;;  %v219_v32 = vpop.f32.mrb[3].mxu1 }
  0xf9   :  { %v247_v33 = vmax.f32 %v185_v23, 0.0  ;;  %v255_v34 = vmax.f32 %v217_v24, 0.0  ;;  %v188_v35 = vadd.f32 %v363_v16, %v187_v31  ;;  %v220_v36 = vadd.f32 %v363_v16, %v219_v32 }
  0xfa   :  { %v250_v37 = vmax.f32 %v196_v29, 0.0  ;;  %v258_v38 = vmax.f32 %v228_v30, 0.0  ;;  %v265_v41 = vmin.f32 %v249_v27, 6.0  ;;  %v273_v42 = vmin.f32 %v257_v28, 6.0 }
  0xfb   :  { %v248_v39 = vmax.f32 %v188_v35, 0.0  ;;  %v256_v40 = vmax.f32 %v220_v36, 0.0  ;;  %v263_v45 = vmin.f32 %v247_v33, 6.0  ;;  %v271_v46 = vmin.f32 %v255_v34, 6.0 }
  0xfc   :  { %v266_v43 = vmin.f32 %v250_v37, 6.0  ;;  %v274_v44 = vmin.f32 %v258_v38, 6.0 }
  0xfd   :  { %v264_v47 = vmin.f32 %v248_v39, 6.0  ;;  %v272_v48 = vmin.f32 %v256_v40, 6.0  ;;  %v497_v49 = vpop.f32.mrb[4].mxu0  ;;  %v505_v50 = vpop.f32.mrb[4].mxu1 }
  0xfe   :  { %v420_v51 = vpack.c.bf16 %v266_v43, %v265_v41  ;;  %v440_v52 = vpack.c.bf16 %v274_v44, %v273_v42  ;;  %v209_v53 = vadd.f32 %v497_v49, %v363_v16  ;;  %v241_v54 = vadd.f32 %v505_v50, %v363_v16  ;;  %v200_v55 = vpop.f32.mrb[5].mxu0  ;;  %v232_v56 = vpop.f32.mrb[5].mxu1 }
  0xff   :  { %v415_v57 = vpack.c.bf16 %v264_v47, %v263_v45  ;;  %v435_v58 = vpack.c.bf16 %v272_v48, %v271_v46  ;;  %v201_v59 = vadd.f32 %v363_v16, %v200_v55  ;;  %v233_v60 = vadd.f32 %v363_v16, %v232_v56  ;;  %v498_v61 = vpop.f32.mrb[6].mxu0  ;;  %v506_v62 = vpop.f32.mrb[6].mxu1 }
 0x100   :  { %452 = vst [vmem:[%s637_s3 + $0x8] sm:$0xff] %v420_v51   ;;  %456 = vst [vmem:[%s637_s3 + $0x28] sm:$0xff] %v440_v52   ;;  %v253_v63 = vmax.f32 %v209_v53, 0.0  ;;  %v261_v0 = vmax.f32 %v241_v54, 0.0  ;;  %v212_v1 = vadd.f32 %v498_v61, %v363_v16  ;;  %v244_v2 = vadd.f32 %v506_v62, %v363_v16  ;;  %v203_v3 = vpop.f32.mrb[7].mxu0  ;;  %v235_v4 = vpop.f32.mrb[7].mxu1 }
 0x101   :  { %416 = vst [vmem:[%s637_s3] sm:$0xff] %v415_v57   ;;  %455 = vst [vmem:[%s637_s3 + $0x20] sm:$0xff] %v435_v58   ;;  %v251_v5 = vmax.f32 %v201_v59, 0.0  ;;  %v259_v6 = vmax.f32 %v233_v60, 0.0  ;;  %v204_v7 = vadd.f32 %v363_v16, %v203_v3  ;;  %v236_v8 = vadd.f32 %v363_v16, %v235_v4 }
 0x102   :  { %v254_v9 = vmax.f32 %v212_v1, 0.0  ;;  %v262_v10 = vmax.f32 %v244_v2, 0.0  ;;  %v269_v13 = vmin.f32 %v253_v63, 6.0  ;;  %v277_v14 = vmin.f32 %v261_v0, 6.0 }
 0x103   :  { %v252_v11 = vmax.f32 %v204_v7, 0.0  ;;  %v260_v12 = vmax.f32 %v236_v8, 0.0  ;;  %v267_v18 = vmin.f32 %v251_v5, 6.0  ;;  %v275_v19 = vmin.f32 %v259_v6, 6.0 }
 0x104   :  { %v270_v15 = vmin.f32 %v254_v9, 6.0  ;;  %v278_v17 = vmin.f32 %v262_v10, 6.0 }
 0x105   :  { %v268_v20 = vmin.f32 %v252_v11, 6.0  ;;  %v276_v21 = vmin.f32 %v260_v12, 6.0 }
 0x106   :  { %v430_v22 = vpack.c.bf16 %v270_v15, %v269_v13  ;;  %v450_v23 = vpack.c.bf16 %v278_v17, %v277_v14 }
 0x107   :  { %v425_v24 = vpack.c.bf16 %v268_v20, %v267_v18  ;;  %v445_v25 = vpack.c.bf16 %v276_v21, %v275_v19 }
 0x108   :  { %454 = vst [vmem:[%s637_s3 + $0x18] sm:$0xff] %v430_v22   ;;  %458 = vst [vmem:[%s637_s3 + $0x38] sm:$0xff] %v450_v23  }
 0x109   :  { %453 = vst [vmem:[%s637_s3 + $0x10] sm:$0xff] %v425_v24   ;;  %457 = vst [vmem:[%s637_s3 + $0x30] sm:$0xff] %v445_v25  }

// kernel: _lambda_.43
= control target key start
LH: loop header
LB: loop body
LE: loop exit
PB: predicated region body
PF: predicated region fallthrough
CT: control target
= control target key end

     0   :  { %s487_s12 = smov 0   ;;  %s603_s0 = inlined_call_operand.vmem [shape: bf16[2,5,5,512], index: 0, kind: input, shape index: {}]   ;;  %s604_s1 = inlined_call_operand.vmem [shape: f32[9,128], index: 1, kind: input, shape index: {}]   ;;  %s605_s2 = inlined_call_operand.vmem [shape: f32[1,128], index: 2, kind: input, shape index: {}]   ;;  %s606_s3 = inlined_call_operand.vmem [shape: bf16[2,4,4,128], index: 3, kind: output, shape index: {}]  }
   0x1 LB: > { %s429_s13 = sadd.s32 4294967295, %s465_s12   ;;  %p433_p0 = scmp.ge.s32.totalorder %s465_s12, 1  ;;  %s465_s12 = sphi %s487_s12, %s13_s12  }
   0x2   : > { %p137_p1 = scmp.lt.s32.totalorder %s465_s12, 3 }
   0x4   : > { %p138_p2 = pnand %p433_p0, %p137_p1 }
   0x5   : > { %p161_p3 = scmp.lt.s32.totalorder (!%p138_p2), %s429_s13, 1  ;;  %v506_v0 = vld [vmem:[%s604_s1] ss:$0 sm:$0xff] (!%p138_p2)  ;;  %v511_v1 = vld [vmem:[%s604_s1 + $0x1] ss:$0 sm:$0xff] (!%p138_p2) }
   0x6   : > { %141 = sbr.rel (%p138_p2) target bundleno = 61 (0x3d), region = 32  ;;  %v516_v2 = vld [vmem:[%s604_s1 + $0x2] ss:$0 sm:$0xff] (!%p138_p2)  ;;  %v524_v9 = vld [vmem:[%s604_s1 + $0x5] ss:$0 sm:$0xff] (!%p138_p2) }
   0x7   : > { %v529_v13 = vld [vmem:[%s604_s1 + $0x3] ss:$0 sm:$0xff] (!%p138_p2)  ;;  %v538_v18 = vld [vmem:[%s604_s1 + $0x4] ss:$0 sm:$0xff] (!%p138_p2)  ;;  %v548_v26 = vld [vmem:[%s604_s1 + $0x6] ss:$0 sm:$0xff] (!%p138_p2) }
   0x8   : > { %v554_v33 = vld [vmem:[%s604_s1 + $0x7] ss:$0 sm:$0xff] (!%p138_p2)  ;;  %v559_v34 = vld [vmem:[%s604_s1 + $0x8] ss:$0 sm:$0xff] (!%p138_p2) }
   0xd   : > { %s608_s13 = smov (!%p161_p3, %s429_s13), 1 }
   0xe   : > { %s450_s14 = smul.u32 80, %s608_s13  ;;  %s449_s11 = sshll.u32 %s608_s13, 3 }
   0xf   : > { %s170_s16 = scalar_lea.vmem %s606_s3, %s449_s11 }
  0x10   : > { %s501_s17 = scalar_lea.vmem %s603_s0, %s450_s14 }
  0x11   : > { %v171_v3 = vld [vmem:[%s501_s17] sm:$0x77]  ;;  %v172_v4 = vld [vmem:[%s501_s17 + $0x8] sm:$0x77]  ;;  %v173_v5 = vld [vmem:[%s501_s17 + $0x10] sm:$0x77] }
  0x12   : > { %v180_v6 = vunpack.c.l.bf16 %v171_v3  ;;  %v181_v7 = vunpack.c.h.bf16 %v171_v3  ;;  %v182_v8 = vunpack.c.l.bf16 %v172_v4  ;;  %v183_v10 = vunpack.c.h.bf16 %v172_v4  ;;  %v174_v14 = vld [vmem:[%s501_s17 + $0x18] sm:$0x77]  ;;  %v175_v19 = vld [vmem:[%s501_s17 + $0x20] sm:$0x77]  ;;  %v176_v37 = vld [vmem:[%s501_s17 + $0x28] sm:$0x77] }
  0x13   : > { %v184_v11 = vunpack.c.l.bf16 %v173_v5  ;;  %v185_v12 = vunpack.c.h.bf16 %v173_v5  ;;  %v186_v27 = vunpack.c.l.bf16 %v174_v14  ;;  %v187_v29 = vunpack.c.h.bf16 %v174_v14  ;;  %v177_v46 = vld [vmem:[%s501_s17 + $0x30] sm:$0x77] }
  0x14   : > { %v203_v15 = vmul.f32 %v506_v0, %v180_v6  ;;  %v212_v16 = vmul.f32 %v511_v1, %v181_v7  ;;  %v225_v17 = vmul.f32 %v516_v2, %v180_v6  ;;  %v276_v22 = vmul.f32 %v524_v9, %v182_v8  ;;  %v178_v6 = vld [vmem:[%s501_s17 + $0x38] sm:$0x77] }
  0x15   : > { %v204_v20 = vmul.f32 %v506_v0, %v184_v11  ;;  %v213_v21 = vmul.f32 %v511_v1, %v185_v12  ;;  %v250_v25 = vmul.f32 %v529_v13, %v182_v8  ;;  %v263_v28 = vmul.f32 %v538_v18, %v183_v10 }
  0x16   : > { %v216_v23 = vadd.f32 %v212_v16, %v203_v15  ;;  %v233_v24 = vrot.slane %v225_v17, 1  ;;  %v188_v30 = vunpack.c.l.bf16 %v175_v19  ;;  %v189_v35 = vunpack.c.h.bf16 %v175_v19 }
  0x17   : > { %v217_v31 = vadd.f32 %v213_v21, %v204_v20  ;;  %v226_v36 = vmul.f32 %v516_v2, %v184_v11  ;;  %v284_v38 = vrot.slane %v276_v22, 1  ;;  %v301_v39 = vmul.f32 %v548_v26, %v184_v11 }
  0x18   : > { %v241_v32 = vadd.f32 %v233_v24, %v216_v23  ;;  %v205_v40 = vmul.f32 %v506_v0, %v188_v30  ;;  %v277_v41 = vmul.f32 %v524_v9, %v186_v27  ;;  %v214_v43 = vmul.f32 %v511_v1, %v189_v35 }
  0x19   : > { %v234_v44 = vrot.slane %v226_v36, 1  ;;  %v251_v45 = vmul.f32 %v529_v13, %v186_v27  ;;  %v314_v47 = vmul.f32 %v554_v33, %v185_v12  ;;  %v327_v48 = vmul.f32 %v559_v34, %v184_v11 }
  0x1a   : > { %v254_v42 = vadd.f32 %v250_v25, %v241_v32  ;;  %v264_v49 = vmul.f32 %v538_v18, %v187_v29  ;;  %v190_v50 = vunpack.c.l.bf16 %v176_v37  ;;  %v218_v52 = vadd.f32 %v214_v43, %v205_v40  ;;  %v179_v25 = vld [vmem:[%s501_s17 + $0x40] sm:$0x77] }
  0x1b   : > { %v242_v53 = vadd.f32 %v234_v44, %v217_v31  ;;  %v285_v54 = vrot.slane %v277_v41, 1  ;;  %v191_v55 = vunpack.c.h.bf16 %v176_v37  ;;  %v192_v56 = vunpack.c.l.bf16 %v177_v46 }
  0x1c   : > { %v267_v51 = vadd.f32 %v263_v28, %v254_v42  ;;  %v193_v57 = vunpack.c.h.bf16 %v177_v46  ;;  %v227_v58 = vmul.f32 %v516_v2, %v188_v30  ;;  %v328_v61 = vmul.f32 %v559_v34, %v188_v30 }
  0x1d   : > { %v255_v60 = vadd.f32 %v251_v45, %v242_v53  ;;  %v252_v62 = vmul.f32 %v529_v13, %v190_v50  ;;  %v206_v63 = vmul.f32 %v506_v0, %v192_v56  ;;  %v278_v5 = vmul.f32 %v524_v9, %v190_v50 }
  0x1e   : > { %v292_v59 = vadd.f32 %v284_v38, %v267_v51  ;;  %v215_v3 = vmul.f32 %v511_v1, %v193_v57  ;;  %v235_v4 = vrot.slane %v227_v58, 1  ;;  %v335_v8 = vrot.slane %v327_v48, 1  ;;  %v446_v1 = vld [vmem:[%s605_s2] ss:$0 sm:$0xff] }
  0x1f   : > { %v268_v10 = vadd.f32 %v264_v49, %v255_v60  ;;  %v302_v11 = vmul.f32 %v548_v26, %v188_v30  ;;  %v265_v14 = vmul.f32 %v538_v18, %v191_v55  ;;  %v315_v17 = vmul.f32 %v554_v33, %v189_v35 }
  0x20   : > { %v305_v7 = vadd.f32 %v301_v39, %v292_v59  ;;  %v243_v12 = vadd.f32 %v235_v4, %v218_v52  ;;  %v194_v0 = vunpack.c.l.bf16 %v178_v6  ;;  %v336_v19 = vrot.slane %v328_v61, 1 }
  0x21   : > { %v293_v16 = vadd.f32 %v285_v54, %v268_v10  ;;  %v219_v20 = vadd.f32 %v215_v3, %v206_v63  ;;  %v286_v22 = vrot.slane %v278_v5, 1  ;;  %v195_v27 = vunpack.c.h.bf16 %v178_v6 }
  0x22   : > { %v318_v15 = vadd.f32 %v314_v47, %v305_v7  ;;  %v256_v21 = vadd.f32 %v252_v62, %v243_v12  ;;  %v228_v28 = vmul.f32 %v516_v2, %v192_v56  ;;  %v303_v30 = vmul.f32 %v548_v26, %v192_v56 }
  0x23   : > { %v306_v24 = vadd.f32 %v302_v11, %v293_v16  ;;  %v329_v31 = vmul.f32 %v559_v34, %v192_v56  ;;  %v253_v32 = vmul.f32 %v529_v13, %v194_v0  ;;  %v279_v38 = vmul.f32 %v524_v9, %v194_v0 }
  0x24   : > { %v343_v23 = vadd.f32 %v335_v8, %v318_v15  ;;  %v269_v29 = vadd.f32 %v265_v14, %v256_v21  ;;  %v236_v37 = vrot.slane %v228_v28, 1  ;;  %v316_v40 = vmul.f32 %v554_v33, %v193_v57 }
  0x25   : > { %v319_v36 = vadd.f32 %v315_v17, %v306_v24  ;;  %v196_v41 = vunpack.c.l.bf16 %v179_v25  ;;  %v266_v44 = vmul.f32 %v538_v18, %v195_v27  ;;  %v337_v46 = vrot.slane %v329_v31, 1 }
  0x26   : > { %v354_v35 = vadd.f32 %v446_v1, %v343_v23  ;;  %v294_v39 = vadd.f32 %v286_v22, %v269_v29  ;;  %v244_v2 = vadd.f32 %v236_v37, %v219_v20  ;;  %v197_v47 = vunpack.c.h.bf16 %v179_v25 }
  0x27   : > { %v344_v43 = vadd.f32 %v336_v19, %v319_v36  ;;  %v287_v50 = vrot.slane %v279_v38, 1  ;;  %v304_v51 = vmul.f32 %v548_v26, %v196_v41  ;;  %v330_v55 = vmul.f32 %v559_v34, %v196_v41 }
  0x28   : > { %v358_v42 = vmax.f32 %v354_v35, 0.0  ;;  %v307_v45 = vadd.f32 %v303_v30, %v294_v39  ;;  %v257_v49 = vadd.f32 %v253_v32, %v244_v2  ;;  %v317_v58 = vmul.f32 %v554_v33, %v197_v47 }
  0x29   : > { %v355_v13 = vadd.f32 %v446_v1, %v344_v43  ;;  %v338_v62 = vrot.slane %v330_v55, 1 }
  0x2a   : > { %v362_v48 = vmin.f32 %v358_v42, 6.0  ;;  %v320_v9 = vadd.f32 %v316_v40, %v307_v45  ;;  %v270_v54 = vadd.f32 %v266_v44, %v257_v49 }
  0x2b   : > { %v359_v53 = vmax.f32 %v355_v13, 0.0 }
  0x2c   : > { %v366_v52 = vpack.c.bf16 %v362_v48, %v362_v48  ;;  %v345_v18 = vadd.f32 %v337_v46, %v320_v9  ;;  %v295_v57 = vadd.f32 %v287_v50, %v270_v54 }
  0x2d   : > { %v363_v56 = vmin.f32 %v359_v53, 6.0 }
  0x2e   : > { %370 = vst [vmem:[%s170_s16] sm:$0x3] %v366_v52  ;;  %v356_v59 = vadd.f32 %v446_v1, %v345_v18  ;;  %v308_v61 = vadd.f32 %v304_v51, %v295_v57 }
  0x2f   : > { %v367_v60 = vpack.c.bf16 %v363_v56, %v363_v56 }
  0x30   : > { %v360_v63 = vmax.f32 %v356_v59, 0.0  ;;  %v321_v3 = vadd.f32 %v317_v58, %v308_v61 }
  0x31   : > { %371 = vst [vmem:[%s170_s16 + $0x2] sm:$0x3] %v367_v60 }
  0x32   : > { %v364_v4 = vmin.f32 %v360_v63, 6.0  ;;  %v346_v26 = vadd.f32 %v338_v62, %v321_v3 }
  0x34   : > { %v368_v5 = vpack.c.bf16 %v364_v4, %v364_v4  ;;  %v357_v6 = vadd.f32 %v446_v1, %v346_v26 }
  0x36   : > { %372 = vst [vmem:[%s170_s16 + $0x4] sm:$0x3] %v368_v5  ;;  %v361_v7 = vmax.f32 %v357_v6, 0.0 }
  0x38   : > { %v365_v34 = vmin.f32 %v361_v7, 6.0 }
  0x3a   : > { %v369_v8 = vpack.c.bf16 %v365_v34, %v365_v34 }
  0x3c   : > { %373 = vst [vmem:[%s170_s16 + $0x6] sm:$0x3] %v369_v8 }
  0x3d PF: > { %s13_s12 = sadd.s32 1, %s465_s12  }
  0x3e   : > { %p10_p4 = scmp.ge.s32.totalorder %s13_s12, 4  }
  0x40   :  { %12 = sbr.rel (!%p10_p4) target bundleno = 1 (0x1), region = 62 }

// kernel: _lambda_.44
= control target key start
LH: loop header
LB: loop body
LE: loop exit
PB: predicated region body
PF: predicated region fallthrough
CT: control target
= control target key end

     0   :  { %s304_s1 = inlined_call_operand.vmem [shape: bf16[128,128], index: 1, kind: input, shape index: {}]   ;;  %s305_s0 = inlined_call_operand.vmem [shape: bf16[32,128], index: 0, kind: input, shape index: {}]   ;;  %s306_s2 = inlined_call_operand.vmem [shape: f32[1,128], index: 2, kind: input, shape index: {}]   ;;  %s307_s3 = inlined_call_operand.vmem [shape: bf16[32,128], index: 3, kind: output, shape index: {}]  }
   0x1   :  { %v235_v0 = vld [vmem:[%s304_s1] sm:$0xff]   ;;  %v236_v1 = vld [vmem:[%s304_s1 + $0x8] sm:$0xff]   ;;  %v237_v2 = vld [vmem:[%s304_s1 + $0x10] sm:$0xff]  }
   0x2   :  { %215 = vmatprep.subr.bf16.mxu0 %v235_v0  ;;  %v238_v3 = vld [vmem:[%s304_s1 + $0x18] sm:$0xff]   ;;  %v243_v4 = vld [vmem:[%s305_s0] sm:$0xff]   ;;  %v240_v6 = vld [vmem:[%s304_s1 + $0x28] sm:$0xff]  }
   0x3   :  { %216 = vmatpush3.bf16.msra.mxu0 %v235_v0  ;;  %231 = vmatprep.mubr.bf16.mxu0 %v243_v4  ;;  %v239_v5 = vld [vmem:[%s304_s1 + $0x20] sm:$0xff]   ;;  %v241_v7 = vld [vmem:[%s304_s1 + $0x30] sm:$0xff]   ;;  %v242_v8 = vld [vmem:[%s304_s1 + $0x38] sm:$0xff]  }
   0x4   :  { %217 = vmatprep.subr.bf16.mxu0 %v236_v1  ;;  %v244_v9 = vld [vmem:[%s305_s0 + $0x8] sm:$0xff]   ;;  %v175_v11 = vld [vmem:[%s306_s2] ss:$0 sm:$0xff] }
   0x7   :  { %218 = vmatpush3.bf16.msra.mxu0 %v236_v1 }
   0x8   :  { %219 = vmatprep.subr.bf16.mxu0 %v237_v2 }
   0xb   :  { %220 = vmatpush3.bf16.msra.mxu0 %v237_v2 }
   0xc   :  { %221 = vmatprep.subr.bf16.mxu0 %v238_v3 }
   0xf   :  { %222 = vmatpush3.bf16.msra.mxu0 %v238_v3 }
  0x10   :  { %223 = vmatprep.subr.bf16.mxu0 %v239_v5 }
  0x13   :  { %224 = vmatpush3.bf16.msra.mxu0 %v239_v5 }
  0x14   :  { %225 = vmatprep.subr.bf16.mxu0 %v240_v6 }
  0x17   :  { %226 = vmatpush3.bf16.msra.mxu0 %v240_v6 }
  0x18   :  { %227 = vmatprep.subr.bf16.mxu0 %v241_v7 }
  0x1b   :  { %228 = vmatpush3.bf16.msra.mxu0 %v241_v7 }
  0x1c   :  { %229 = vmatprep.subr.bf16.mxu0 %v242_v8 }
  0x1f   :  { %230 = vmatpush3.bf16.msra.mxu0 %v242_v8 }
  0x22   :  { %232 = vmatmul.mubr.bf16.vlgmr.msra.gmra.mrb[0].mxu0 %v244_v9 }
  0xf5   :  { %v233_v10 = vpop.f32.mrb[0].mxu0 }
  0xf6   :  { %v136_v12 = vpop.f32.mrb[1].mxu0  ;;  %v145_v14 = vadd.f32 %v233_v10, %v175_v11 }
  0xf7   :  { %v234_v13 = vpop.f32.mrb[2].mxu0  ;;  %v137_v17 = vadd.f32 %v175_v11, %v136_v12 }
  0xf8   :  { %v148_v15 = vadd.f32 %v234_v13, %v175_v11  ;;  %v139_v16 = vpop.f32.mrb[3].mxu0 }
  0xf9   :  { %v140_v18 = vadd.f32 %v175_v11, %v139_v16 }
  0xfa   :  { %v202_v19 = vpack.c.bf16 %v148_v15, %v145_v14 }
  0xfb   :  { %v197_v20 = vpack.c.bf16 %v140_v18, %v137_v17 }
  0xfc   :  { %204 = vst [vmem:[%s307_s3 + $0x8] sm:$0xff] %v202_v19  }
  0xfd   :  { %198 = vst [vmem:[%s307_s3] sm:$0xff] %v197_v20  }

// kernel: _lambda_.45
= control target key start
LH: loop header
LB: loop body
LE: loop exit
PB: predicated region body
PF: predicated region fallthrough
CT: control target
= control target key end

     0   :  { %v309_v1 = vmov 0   ;;  %v37_v19 = vlaneseq  ;;  %s399_s1 = inlined_call_operand.vmem [shape: bf16[128,256], index: 1, kind: input, shape index: {}]   ;;  %s400_s0 = inlined_call_operand.vmem [shape: bf16[32,128], index: 0, kind: input, shape index: {}]   ;;  %s401_s2 = inlined_call_operand.vmem [shape: f32[1,256], index: 2, kind: input, shape index: {}]   ;;  %s402_s3 = inlined_call_operand.vmem [shape: bf16[32,256], index: 3, kind: output, shape index: {}]  }
   0x1   :  { %v283_v0 = vld [vmem:[%s399_s1 + $0x4] ss:$8 sps:$4 sm:$0xff]   ;;  %171 = vmatprep.mubr.bf16.mxu0 %v309_v1  ;;  %181 = vmatprep.mubr.bf16.mxu1 %v309_v1  ;;  %v285_v2 = vld [vmem:[%s399_s1] ss:$8 sps:$4 sm:$0xff]   ;;  %v286_v3 = vld [vmem:[%s399_s1 + $0x14] ss:$8 sps:$4 sm:$0xff]  }
   0x2   :  { %139 = vmatprep.subr.bf16.mxu0 %v283_v0  ;;  %266 = vmatprep.subr.bf16.mxu1 %v283_v0  ;;  %v288_v4 = vld [vmem:[%s399_s1 + $0x10] ss:$8 sps:$4 sm:$0xff]   ;;  %v289_v5 = vld [vmem:[%s399_s1 + $0x24] ss:$8 sps:$4 sm:$0xff]   ;;  %v291_v6 = vld [vmem:[%s399_s1 + $0x20] ss:$8 sps:$4 sm:$0xff]  }
   0x3   :  { %140 = vmatpush1.bf16.msra.mxu0 %v285_v2  ;;  %274 = vmatpush1.bf16.msra.mxu1 %v285_v2  ;;  %v292_v7 = vld [vmem:[%s399_s1 + $0x34] ss:$8 sps:$4 sm:$0xff]   ;;  %v294_v8 = vld [vmem:[%s399_s1 + $0x30] ss:$8 sps:$4 sm:$0xff]   ;;  %v295_v9 = vld [vmem:[%s399_s1 + $0x44] ss:$8 sps:$4 sm:$0xff]  }
   0x4   :  { %141 = vmatprep.subr.bf16.mxu0 %v286_v3  ;;  %267 = vmatprep.subr.bf16.mxu1 %v286_v3  ;;  %v297_v10 = vld [vmem:[%s399_s1 + $0x40] ss:$8 sps:$4 sm:$0xff]   ;;  %v298_v11 = vld [vmem:[%s399_s1 + $0x54] ss:$8 sps:$4 sm:$0xff]   ;;  %v300_v12 = vld [vmem:[%s399_s1 + $0x50] ss:$8 sps:$4 sm:$0xff]  }
   0x5   :  { %v301_v13 = vld [vmem:[%s399_s1 + $0x64] ss:$8 sps:$4 sm:$0xff]   ;;  %v303_v14 = vld [vmem:[%s399_s1 + $0x60] ss:$8 sps:$4 sm:$0xff]   ;;  %v304_v15 = vld [vmem:[%s399_s1 + $0x74] ss:$8 sps:$4 sm:$0xff]  }
   0x6   :  { %v306_v16 = vld [vmem:[%s399_s1 + $0x70] ss:$8 sps:$4 sm:$0xff]   ;;  %v307_v17 = vld [vmem:[%s400_s0] sm:$0xff]   ;;  %v308_v18 = vld [vmem:[%s400_s0 + $0x8] sm:$0xff]   ;;  %v38_v20 = vshrl.u32 %v37_v19, 7 }
   0x7   :  { %142 = vmatpush1.bf16.msra.mxu0 %v288_v4  ;;  %275 = vmatpush1.bf16.msra.mxu1 %v288_v4  ;;  %v35_v22 = vld [vmem:[%s401_s2] sm:$0x3] }
   0x8   :  { %143 = vmatprep.subr.bf16.mxu0 %v289_v5  ;;  %268 = vmatprep.subr.bf16.mxu1 %v289_v5  ;;  %v39_v21 = vsub.s32 0, %v38_v20  ;;  %v43_v23 = vsub.s32 1, %v38_v20 }
   0xa   :  { %v40_v24 = vrot.slane %v35_v22, %v39_v21  ;;  %v44_v25 = vrot.slane %v35_v22, %v43_v23 }
   0xb   :  { %144 = vmatpush1.bf16.msra.mxu0 %v291_v6  ;;  %276 = vmatpush1.bf16.msra.mxu1 %v291_v6 }
   0xc   :  { %145 = vmatprep.subr.bf16.mxu0 %v292_v7  ;;  %269 = vmatprep.subr.bf16.mxu1 %v292_v7 }
   0xf   :  { %146 = vmatpush1.bf16.msra.mxu0 %v294_v8  ;;  %277 = vmatpush1.bf16.msra.mxu1 %v294_v8 }
  0x10   :  { %147 = vmatprep.subr.bf16.mxu0 %v295_v9  ;;  %270 = vmatprep.subr.bf16.mxu1 %v295_v9 }
  0x13   :  { %148 = vmatpush1.bf16.msra.mxu0 %v297_v10  ;;  %278 = vmatpush1.bf16.msra.mxu1 %v297_v10 }
  0x14   :  { %149 = vmatprep.subr.bf16.mxu0 %v298_v11  ;;  %271 = vmatprep.subr.bf16.mxu1 %v298_v11 }
  0x17   :  { %150 = vmatpush1.bf16.msra.mxu0 %v300_v12  ;;  %279 = vmatpush1.bf16.msra.mxu1 %v300_v12 }
  0x18   :  { %151 = vmatprep.subr.bf16.mxu0 %v301_v13  ;;  %272 = vmatprep.subr.bf16.mxu1 %v301_v13 }
  0x1b   :  { %152 = vmatpush1.bf16.msra.mxu0 %v303_v14  ;;  %280 = vmatpush1.bf16.msra.mxu1 %v303_v14 }
  0x1c   :  { %153 = vmatprep.subr.bf16.mxu0 %v304_v15  ;;  %273 = vmatprep.subr.bf16.mxu1 %v304_v15 }
  0x1f   :  { %154 = vmatpush1.bf16.msra.mxu0 %v306_v16  ;;  %281 = vmatpush1.bf16.msra.mxu1 %v306_v16 }
  0x22   :  { %172 = vmatmul.mubr.bf16.vlgmr.msra.gmra.mrb[0].mxu0 %v307_v17  ;;  %182 = vmatmul.mubr.bf16.vlgmr.msra.gmra.mrb[0].mxu1 %v308_v18 }
  0xf5   :  { %v173_v26 = vpop.f32.mrb[0].mxu0  ;;  %v183_v27 = vpop.f32.mrb[0].mxu1 }
  0xf6   :  { %v174_v28 = vadd.f32 %v173_v26, %v40_v24  ;;  %v184_v29 = vadd.f32 %v183_v27, %v40_v24  ;;  %v175_v30 = vpop.f32.mrb[1].mxu0  ;;  %v185_v31 = vpop.f32.mrb[1].mxu1 }
  0xf7   :  { %v176_v32 = vadd.f32 %v175_v30, %v44_v25  ;;  %v186_v33 = vadd.f32 %v185_v31, %v44_v25  ;;  %v177_v34 = vpop.f32.mrb[2].mxu0  ;;  %v187_v35 = vpop.f32.mrb[2].mxu1 }
  0xf8   :  { %v192_v36 = vmax.f32 %v174_v28, 0.0  ;;  %v196_v37 = vmax.f32 %v184_v29, 0.0  ;;  %v178_v38 = vadd.f32 %v177_v34, %v40_v24  ;;  %v188_v39 = vadd.f32 %v187_v35, %v40_v24  ;;  %v179_v40 = vpop.f32.mrb[3].mxu0  ;;  %v189_v41 = vpop.f32.mrb[3].mxu1 }
  0xf9   :  { %v193_v42 = vmax.f32 %v176_v32, 0.0  ;;  %v197_v43 = vmax.f32 %v186_v33, 0.0  ;;  %v180_v44 = vadd.f32 %v179_v40, %v44_v25  ;;  %v190_v45 = vadd.f32 %v189_v41, %v44_v25 }
  0xfa   :  { %v200_v46 = vmin.f32 %v192_v36, 6.0  ;;  %v204_v47 = vmin.f32 %v196_v37, 6.0  ;;  %v194_v48 = vmax.f32 %v178_v38, 0.0  ;;  %v198_v49 = vmax.f32 %v188_v39, 0.0 }
  0xfb   :  { %v201_v50 = vmin.f32 %v193_v42, 6.0  ;;  %v205_v51 = vmin.f32 %v197_v43, 6.0  ;;  %v195_v52 = vmax.f32 %v180_v44, 0.0  ;;  %v199_v53 = vmax.f32 %v190_v45, 0.0 }
  0xfc   :  { %v202_v54 = vmin.f32 %v194_v48, 6.0  ;;  %v206_v55 = vmin.f32 %v198_v49, 6.0 }
  0xfd   :  { %v262_v56 = vpack.c.bf16 %v201_v50, %v200_v46  ;;  %v264_v57 = vpack.c.bf16 %v205_v51, %v204_v47  ;;  %v203_v58 = vmin.f32 %v195_v52, 6.0  ;;  %v207_v59 = vmin.f32 %v199_v53, 6.0 }
  0xff   :  { %232 = vst [vmem:[%s402_s3] sm:$0xff] %v262_v56  ;;  %234 = vst [vmem:[%s402_s3 + $0x10] sm:$0xff] %v264_v57  ;;  %v263_v60 = vpack.c.bf16 %v203_v58, %v202_v54  ;;  %v265_v61 = vpack.c.bf16 %v207_v59, %v206_v55 }
 0x101   :  { %233 = vst [vmem:[%s402_s3 + $0x8] sm:$0xff] %v263_v60  ;;  %235 = vst [vmem:[%s402_s3 + $0x18] sm:$0xff] %v265_v61 }

// kernel: _lambda_.46
= control target key start
LH: loop header
LB: loop body
LE: loop exit
PB: predicated region body
PF: predicated region fallthrough
CT: control target
= control target key end

     0   :  { %s796_s12 = smov 0   ;;  %s981_s0 = inlined_call_operand.vmem [shape: bf16[2,6,6,256], index: 0, kind: input, shape index: {}]   ;;  %s982_s1 = inlined_call_operand.vmem [shape: f32[9,256], index: 1, kind: input, shape index: {}]   ;;  %s983_s2 = inlined_call_operand.vmem [shape: f32[1,256], index: 2, kind: input, shape index: {}]   ;;  %s984_s3 = inlined_call_operand.vmem [shape: bf16[2,4,4,256], index: 3, kind: output, shape index: {}]  }
   0x1 LB: > { %s732_s13 = sadd.s32 4294967295, %s774_s12   ;;  %p736_p0 = scmp.ge.s32.totalorder %s774_s12, 1  ;;  %s774_s12 = sphi %s796_s12, %s13_s12  }
   0x2   : > { %p137_p1 = scmp.lt.s32.totalorder %s774_s12, 3 }
   0x4   : > { %p138_p2 = pnand %p736_p0, %p137_p1 }
   0x5   : > { %p161_p3 = scmp.lt.s32.totalorder (!%p138_p2), %s732_s13, 1  ;;  %v191_v0 = vlaneseq (!%p138_p2)  ;;  %v189_v1 = vld [vmem:[%s982_s1] ss:$8 sm:$0x3] (!%p138_p2) }
   0x6   : > { %141 = sbr.rel (%p138_p2) target bundleno = 82 (0x52), region = 32  ;;  %v740_v3 = vld [vmem:[%s982_s1 + $0x1] ss:$8 sm:$0x3] (!%p138_p2) }
   0x7   : > { %v192_v2 = vshrl.u32 (!%p138_p2), %v191_v0, 7  ;;  %v741_v4 = vld [vmem:[%s982_s1 + $0x2] ss:$8 sm:$0x3] (!%p138_p2) }
   0x8   : > { %v742_v7 = vld [vmem:[%s982_s1 + $0x3] ss:$8 sm:$0x3] (!%p138_p2) }
   0x9   : > { %v816_v5 = vsub.s32 (!%p138_p2), 0, %v192_v2  ;;  %v818_v6 = vsub.s32 (!%p138_p2), 1, %v192_v2 }
   0xb   : > { %v194_v8 = vrot.slane (!%p138_p2), %v189_v1, %v816_v5  ;;  %v198_v9 = vrot.slane (!%p138_p2), %v189_v1, %v818_v6  ;;  %v215_v10 = vrot.slane (!%p138_p2), %v740_v3, %v816_v5  ;;  %v219_v11 = vrot.slane (!%p138_p2), %v740_v3, %v818_v6 }
   0xc   : > { %v268_v15 = vrot.slane (!%p138_p2), %v741_v4, %v816_v5  ;;  %v272_v16 = vrot.slane (!%p138_p2), %v741_v4, %v818_v6  ;;  %v833_v17 = vrot.slane (!%p138_p2), %v742_v7, %v816_v5  ;;  %v836_v18 = vrot.slane (!%p138_p2), %v742_v7, %v818_v6 }
   0xd   : > { %s986_s13 = smov (!%p161_p3, %s732_s13), 1 }
   0xe   : > { %s759_s20 = smul.u32 48, %s986_s13  ;;  %s758_s11 = sshll.u32 %s986_s13, 4 }
   0xf   : > { %s170_s16 = scalar_lea.vmem %s984_s3, %s758_s11 }
  0x10   : > { %s165_s25 = scalar_lea.vmem %s981_s0, %s759_s20 }
  0x11   : > { %v171_v12 = vld [vmem:[%s165_s25] sm:$0x77]  ;;  %v172_v13 = vld [vmem:[%s165_s25 + $0x8] sm:$0x77]  ;;  %v173_v14 = vld [vmem:[%s165_s25 + $0x10] sm:$0x77] }
  0x12   : > { %v174_v19 = vld [vmem:[%s165_s25 + $0x18] sm:$0x77]  ;;  %v175_v20 = vld [vmem:[%s165_s25 + $0x20] sm:$0x77]  ;;  %v176_v21 = vld [vmem:[%s165_s25 + $0x28] sm:$0x77]  ;;  %v177_v22 = vunpack.c.l.bf16 %v171_v12  ;;  %v178_v23 = vunpack.c.h.bf16 %v171_v12  ;;  %v838_v24 = vunpack.c.l.bf16 %v172_v13  ;;  %v840_v25 = vunpack.c.h.bf16 %v172_v13 }
  0x13   : > { %v842_v26 = vunpack.c.l.bf16 %v173_v14  ;;  %v844_v27 = vunpack.c.h.bf16 %v173_v14  ;;  %v846_v28 = vunpack.c.l.bf16 %v174_v19  ;;  %v848_v29 = vunpack.c.h.bf16 %v174_v19 }
  0x14   : > { %v850_v30 = vunpack.c.l.bf16 %v175_v20  ;;  %v852_v31 = vunpack.c.h.bf16 %v175_v20  ;;  %v854_v32 = vunpack.c.l.bf16 %v176_v21  ;;  %v856_v33 = vunpack.c.h.bf16 %v176_v21 }
  0x15   : > { %v201_v34 = vmul.f32 %v194_v8, %v177_v22  ;;  %v202_v35 = vmul.f32 %v198_v9, %v178_v23  ;;  %v203_v36 = vmul.f32 %v194_v8, %v838_v24  ;;  %v204_v37 = vmul.f32 %v198_v9, %v840_v25 }
  0x16   : > { %v205_v38 = vmul.f32 %v194_v8, %v842_v26  ;;  %v206_v39 = vmul.f32 %v198_v9, %v844_v27  ;;  %v207_v40 = vmul.f32 %v194_v8, %v846_v28  ;;  %v208_v41 = vmul.f32 %v198_v9, %v848_v29 }
  0x17   : > { %v222_v42 = vmul.f32 %v215_v10, %v177_v22  ;;  %v223_v43 = vmul.f32 %v219_v11, %v178_v23  ;;  %v224_v44 = vmul.f32 %v215_v10, %v838_v24  ;;  %v225_v45 = vmul.f32 %v219_v11, %v840_v25 }
  0x18   : > { %v226_v46 = vmul.f32 %v215_v10, %v842_v26  ;;  %v227_v47 = vmul.f32 %v219_v11, %v844_v27  ;;  %v228_v48 = vmul.f32 %v215_v10, %v846_v28  ;;  %v229_v49 = vmul.f32 %v219_v11, %v848_v29 }
  0x19   : > { %v238_v50 = vrot.slane %v222_v42, 1  ;;  %v239_v51 = vrot.slane %v223_v43, 1  ;;  %v240_v52 = vrot.slane %v224_v44, 1  ;;  %v241_v53 = vrot.slane %v225_v45, 1 }
  0x1a   : > { %v242_v54 = vrot.slane %v226_v46, 1  ;;  %v243_v55 = vrot.slane %v227_v47, 1  ;;  %v244_v56 = vrot.slane %v228_v48, 1  ;;  %v245_v57 = vrot.slane %v229_v49, 1 }
  0x1b   : > { %v254_v58 = vadd.f32 %v238_v50, %v201_v34  ;;  %v255_v59 = vadd.f32 %v239_v51, %v202_v35  ;;  %v256_v60 = vadd.f32 %v240_v52, %v203_v36  ;;  %v257_v61 = vadd.f32 %v241_v53, %v204_v37  ;;  %v743_v48 = vld [vmem:[%s982_s1 + $0x4] ss:$8 sm:$0x3]  ;;  %v744_v49 = vld [vmem:[%s982_s1 + $0x5] ss:$8 sm:$0x3] }
  0x1c   : > { %v258_v62 = vadd.f32 %v242_v54, %v205_v38  ;;  %v259_v63 = vadd.f32 %v243_v55, %v206_v39  ;;  %v260_v0 = vadd.f32 %v244_v56, %v207_v40  ;;  %v261_v1 = vadd.f32 %v245_v57, %v208_v41  ;;  %v745_v54 = vld [vmem:[%s982_s1 + $0x6] ss:$8 sm:$0x3] }
  0x1d   : > { %v275_v2 = vmul.f32 %v268_v15, %v177_v22  ;;  %v276_v3 = vmul.f32 %v272_v16, %v178_v23  ;;  %v277_v4 = vmul.f32 %v268_v15, %v838_v24  ;;  %v278_v7 = vmul.f32 %v272_v16, %v840_v25 }
  0x1e   : > { %v279_v8 = vmul.f32 %v268_v15, %v842_v26  ;;  %v280_v9 = vmul.f32 %v272_v16, %v844_v27  ;;  %v281_v10 = vmul.f32 %v268_v15, %v846_v28  ;;  %v282_v11 = vmul.f32 %v272_v16, %v848_v29 }
  0x1f   : > { %v291_v12 = vrot.slane %v275_v2, 2  ;;  %v292_v13 = vrot.slane %v276_v3, 2  ;;  %v293_v14 = vrot.slane %v277_v4, 2  ;;  %v294_v19 = vrot.slane %v278_v7, 2 }
  0x20   : > { %v295_v20 = vrot.slane %v279_v8, 2  ;;  %v296_v21 = vrot.slane %v280_v9, 2  ;;  %v297_v22 = vrot.slane %v281_v10, 2  ;;  %v298_v23 = vrot.slane %v282_v11, 2 }
  0x21   : > { %v307_v34 = vadd.f32 %v291_v12, %v254_v58  ;;  %v308_v35 = vadd.f32 %v292_v13, %v255_v59  ;;  %v309_v36 = vadd.f32 %v293_v14, %v256_v60  ;;  %v310_v37 = vadd.f32 %v294_v19, %v257_v61 }
  0x22   : > { %v311_v38 = vadd.f32 %v295_v20, %v258_v62  ;;  %v312_v39 = vadd.f32 %v296_v21, %v259_v63  ;;  %v313_v40 = vadd.f32 %v297_v22, %v260_v0  ;;  %v314_v41 = vadd.f32 %v298_v23, %v261_v1 }
  0x23   : > { %v328_v15 = vmul.f32 %v833_v17, %v838_v24  ;;  %v329_v16 = vmul.f32 %v836_v18, %v840_v25  ;;  %v330_v42 = vmul.f32 %v833_v17, %v842_v26  ;;  %v331_v43 = vmul.f32 %v836_v18, %v844_v27 }
  0x24   : > { %v332_v44 = vmul.f32 %v833_v17, %v846_v28  ;;  %v333_v45 = vmul.f32 %v836_v18, %v848_v29  ;;  %v334_v46 = vmul.f32 %v833_v17, %v850_v30  ;;  %v335_v47 = vmul.f32 %v836_v18, %v852_v31  ;;  %v746_v17 = vld [vmem:[%s982_s1 + $0x7] ss:$8 sm:$0x3] }
  0x25   : > { %v336_v50 = vadd.f32 %v328_v15, %v307_v34  ;;  %v337_v51 = vadd.f32 %v329_v16, %v308_v35  ;;  %v338_v52 = vadd.f32 %v330_v42, %v309_v36  ;;  %v339_v53 = vadd.f32 %v331_v43, %v310_v37 }
  0x26   : > { %v340_v18 = vadd.f32 %v332_v44, %v311_v38  ;;  %v341_v55 = vadd.f32 %v333_v45, %v312_v39  ;;  %v342_v56 = vadd.f32 %v334_v46, %v313_v40  ;;  %v343_v57 = vadd.f32 %v335_v47, %v314_v41 }
  0x27   : > { %v350_v58 = vrot.slane %v743_v48, %v816_v5  ;;  %v354_v59 = vrot.slane %v743_v48, %v818_v6  ;;  %v403_v60 = vrot.slane %v744_v49, %v816_v5  ;;  %v407_v61 = vrot.slane %v744_v49, %v818_v6 }
  0x28   : > { %v456_v62 = vrot.slane %v745_v54, %v816_v5  ;;  %v460_v63 = vrot.slane %v745_v54, %v818_v6  ;;  %v911_v0 = vrot.slane %v746_v17, %v816_v5  ;;  %v914_v1 = vrot.slane %v746_v17, %v818_v6 }
  0x29   : > { %v357_v2 = vmul.f32 %v350_v58, %v838_v24  ;;  %v358_v3 = vmul.f32 %v354_v59, %v840_v25  ;;  %v359_v4 = vmul.f32 %v350_v58, %v842_v26  ;;  %v360_v7 = vmul.f32 %v354_v59, %v844_v27 }
  0x2a   : > { %v361_v8 = vmul.f32 %v350_v58, %v846_v28  ;;  %v362_v9 = vmul.f32 %v354_v59, %v848_v29  ;;  %v363_v10 = vmul.f32 %v350_v58, %v850_v30  ;;  %v364_v11 = vmul.f32 %v354_v59, %v852_v31 }
  0x2b   : > { %v373_v12 = vrot.slane %v357_v2, 1  ;;  %v374_v13 = vrot.slane %v358_v3, 1  ;;  %v375_v14 = vrot.slane %v359_v4, 1  ;;  %v376_v19 = vrot.slane %v360_v7, 1 }
  0x2c   : > { %v377_v20 = vrot.slane %v361_v8, 1  ;;  %v378_v21 = vrot.slane %v362_v9, 1  ;;  %v379_v22 = vrot.slane %v363_v10, 1  ;;  %v380_v23 = vrot.slane %v364_v11, 1 }
  0x2d   : > { %v389_v34 = vadd.f32 %v373_v12, %v336_v50  ;;  %v390_v35 = vadd.f32 %v374_v13, %v337_v51  ;;  %v391_v36 = vadd.f32 %v375_v14, %v338_v52  ;;  %v392_v37 = vadd.f32 %v376_v19, %v339_v53 }
  0x2e   : > { %v393_v38 = vadd.f32 %v377_v20, %v340_v18  ;;  %v394_v39 = vadd.f32 %v378_v21, %v341_v55  ;;  %v395_v40 = vadd.f32 %v379_v22, %v342_v56  ;;  %v396_v41 = vadd.f32 %v380_v23, %v343_v57 }
  0x2f   : > { %v410_v15 = vmul.f32 %v403_v60, %v838_v24  ;;  %v411_v16 = vmul.f32 %v407_v61, %v840_v25  ;;  %v412_v42 = vmul.f32 %v403_v60, %v842_v26  ;;  %v413_v43 = vmul.f32 %v407_v61, %v844_v27 }
  0x30   : > { %v414_v44 = vmul.f32 %v403_v60, %v846_v28  ;;  %v415_v45 = vmul.f32 %v407_v61, %v848_v29  ;;  %v416_v46 = vmul.f32 %v403_v60, %v850_v30  ;;  %v417_v47 = vmul.f32 %v407_v61, %v852_v31 }
  0x31   : > { %v426_v48 = vrot.slane %v410_v15, 2  ;;  %v427_v49 = vrot.slane %v411_v16, 2  ;;  %v428_v50 = vrot.slane %v412_v42, 2  ;;  %v429_v51 = vrot.slane %v413_v43, 2 }
  0x32   : > { %v430_v52 = vrot.slane %v414_v44, 2  ;;  %v431_v24 = vrot.slane %v415_v45, 2  ;;  %v432_v53 = vrot.slane %v416_v46, 2  ;;  %v433_v25 = vrot.slane %v417_v47, 2  ;;  %v585_v45 = vld [vmem:[%s983_s2] sm:$0x3] }
  0x33   : > { %v442_v54 = vadd.f32 %v426_v48, %v389_v34  ;;  %v443_v17 = vadd.f32 %v427_v49, %v390_v35  ;;  %v444_v18 = vadd.f32 %v428_v50, %v391_v36  ;;  %v445_v55 = vadd.f32 %v429_v51, %v392_v37 }
  0x34   : > { %v446_v56 = vadd.f32 %v430_v52, %v393_v38  ;;  %v447_v57 = vadd.f32 %v431_v24, %v394_v39  ;;  %v448_v58 = vadd.f32 %v432_v53, %v395_v40  ;;  %v449_v59 = vadd.f32 %v433_v25, %v396_v41  ;;  %v747_v38 = vld [vmem:[%s982_s1 + $0x10] ss:$8 sm:$0x3] }
  0x35   : > { %v463_v60 = vmul.f32 %v456_v62, %v842_v26  ;;  %v464_v61 = vmul.f32 %v460_v63, %v844_v27  ;;  %v465_v2 = vmul.f32 %v456_v62, %v846_v28  ;;  %v466_v3 = vmul.f32 %v460_v63, %v848_v29 }
  0x36   : > { %v467_v4 = vmul.f32 %v456_v62, %v850_v30  ;;  %v468_v7 = vmul.f32 %v460_v63, %v852_v31  ;;  %v469_v8 = vmul.f32 %v456_v62, %v854_v32  ;;  %v470_v9 = vmul.f32 %v460_v63, %v856_v33 }
  0x37   : > { %v471_v10 = vadd.f32 %v463_v60, %v442_v54  ;;  %v472_v11 = vadd.f32 %v464_v61, %v443_v17  ;;  %v473_v12 = vadd.f32 %v465_v2, %v444_v18  ;;  %v474_v13 = vadd.f32 %v466_v3, %v445_v55 }
  0x38   : > { %v475_v14 = vadd.f32 %v467_v4, %v446_v56  ;;  %v476_v19 = vadd.f32 %v468_v7, %v447_v57  ;;  %v477_v20 = vadd.f32 %v469_v8, %v448_v58  ;;  %v478_v21 = vadd.f32 %v470_v9, %v449_v59 }
  0x39   : > { %v492_v22 = vmul.f32 %v911_v0, %v842_v26  ;;  %v493_v23 = vmul.f32 %v914_v1, %v844_v27  ;;  %v494_v34 = vmul.f32 %v911_v0, %v846_v28  ;;  %v495_v62 = vmul.f32 %v914_v1, %v848_v29 }
  0x3a   : > { %v496_v63 = vmul.f32 %v911_v0, %v850_v30  ;;  %v497_v35 = vmul.f32 %v914_v1, %v852_v31  ;;  %v498_v36 = vmul.f32 %v911_v0, %v854_v32  ;;  %v499_v37 = vmul.f32 %v914_v1, %v856_v33 }
  0x3b   : > { %v508_v39 = vrot.slane %v492_v22, 1  ;;  %v509_v40 = vrot.slane %v493_v23, 1  ;;  %v510_v41 = vrot.slane %v494_v34, 1  ;;  %v511_v15 = vrot.slane %v495_v62, 1 }
  0x3c   : > { %v512_v16 = vrot.slane %v496_v63, 1  ;;  %v513_v42 = vrot.slane %v497_v35, 1  ;;  %v514_v43 = vrot.slane %v498_v36, 1  ;;  %v515_v44 = vrot.slane %v499_v37, 1 }
  0x3d   : > { %v524_v0 = vadd.f32 %v508_v39, %v471_v10  ;;  %v525_v46 = vadd.f32 %v509_v40, %v472_v11  ;;  %v526_v47 = vadd.f32 %v510_v41, %v473_v12  ;;  %v527_v1 = vadd.f32 %v511_v15, %v474_v13 }
  0x3e   : > { %v528_v48 = vadd.f32 %v512_v16, %v475_v14  ;;  %v529_v49 = vadd.f32 %v513_v42, %v476_v19  ;;  %v538_v50 = vrot.slane %v747_v38, %v816_v5  ;;  %v542_v51 = vrot.slane %v747_v38, %v818_v6 }
  0x3f   : > { %v530_v52 = vadd.f32 %v514_v43, %v477_v20  ;;  %v531_v24 = vadd.f32 %v515_v44, %v478_v21  ;;  %v590_v53 = vrot.slane %v585_v45, %v816_v5  ;;  %v594_v25 = vrot.slane %v585_v45, %v818_v6 }
  0x40   : > { %v545_v54 = vmul.f32 %v538_v50, %v842_v26  ;;  %v546_v17 = vmul.f32 %v542_v51, %v844_v27  ;;  %v547_v18 = vmul.f32 %v538_v50, %v846_v28  ;;  %v548_v55 = vmul.f32 %v542_v51, %v848_v29 }
  0x41   : > { %v549_v56 = vmul.f32 %v538_v50, %v850_v30  ;;  %v550_v57 = vmul.f32 %v542_v51, %v852_v31  ;;  %v551_v58 = vmul.f32 %v538_v50, %v854_v32  ;;  %v552_v59 = vmul.f32 %v542_v51, %v856_v33 }
  0x42   : > { %v561_v60 = vrot.slane %v545_v54, 2  ;;  %v562_v5 = vrot.slane %v546_v17, 2  ;;  %v563_v61 = vrot.slane %v547_v18, 2  ;;  %v564_v6 = vrot.slane %v548_v55, 2 }
  0x43   : > { %v565_v2 = vrot.slane %v549_v56, 2  ;;  %v566_v26 = vrot.slane %v550_v57, 2  ;;  %v567_v3 = vrot.slane %v551_v58, 2  ;;  %v568_v27 = vrot.slane %v552_v59, 2 }
  0x44   : > { %v577_v4 = vadd.f32 %v561_v60, %v524_v0  ;;  %v578_v28 = vadd.f32 %v562_v5, %v525_v46  ;;  %v579_v29 = vadd.f32 %v563_v61, %v526_v47  ;;  %v580_v7 = vadd.f32 %v564_v6, %v527_v1 }
  0x45   : > { %v581_v30 = vadd.f32 %v565_v2, %v528_v48  ;;  %v582_v8 = vadd.f32 %v566_v26, %v529_v49  ;;  %v583_v31 = vadd.f32 %v567_v3, %v530_v52  ;;  %v584_v9 = vadd.f32 %v568_v27, %v531_v24 }
  0x46   : > { %v597_v32 = vadd.f32 %v590_v53, %v577_v4  ;;  %v598_v10 = vadd.f32 %v594_v25, %v578_v28  ;;  %v599_v33 = vadd.f32 %v590_v53, %v579_v29  ;;  %v600_v11 = vadd.f32 %v594_v25, %v580_v7 }
  0x47   : > { %v601_v12 = vadd.f32 %v590_v53, %v581_v30  ;;  %v602_v13 = vadd.f32 %v594_v25, %v582_v8  ;;  %v603_v14 = vadd.f32 %v590_v53, %v583_v31  ;;  %v604_v19 = vadd.f32 %v594_v25, %v584_v9 }
  0x48   : > { %v605_v20 = vmax.f32 %v597_v32, 0.0  ;;  %v606_v21 = vmax.f32 %v598_v10, 0.0  ;;  %v607_v22 = vmax.f32 %v599_v33, 0.0  ;;  %v608_v23 = vmax.f32 %v600_v11, 0.0 }
  0x49   : > { %v609_v34 = vmax.f32 %v601_v12, 0.0  ;;  %v610_v62 = vmax.f32 %v602_v13, 0.0  ;;  %v611_v63 = vmax.f32 %v603_v14, 0.0  ;;  %v612_v35 = vmax.f32 %v604_v19, 0.0 }
  0x4a   : > { %v613_v36 = vmin.f32 %v605_v20, 6.0  ;;  %v614_v37 = vmin.f32 %v606_v21, 6.0  ;;  %v615_v38 = vmin.f32 %v607_v22, 6.0  ;;  %v616_v39 = vmin.f32 %v608_v23, 6.0 }
  0x4b   : > { %v617_v40 = vmin.f32 %v609_v34, 6.0  ;;  %v618_v41 = vmin.f32 %v610_v62, 6.0  ;;  %v619_v15 = vmin.f32 %v611_v63, 6.0  ;;  %v620_v16 = vmin.f32 %v612_v35, 6.0 }
  0x4c   : > { %v748_v42 = vpack.c.bf16 %v614_v37, %v613_v36  ;;  %v749_v43 = vpack.c.bf16 %v616_v39, %v615_v38 }
  0x4d   : > { %v750_v44 = vpack.c.bf16 %v618_v41, %v617_v40  ;;  %v751_v45 = vpack.c.bf16 %v620_v16, %v619_v15 }
  0x4e   : > { %752 = vst.sshfl [vmem:[%s170_s16] sm:$0x33 pattern:$0x76325410] %v748_v42 }
  0x4f   : > { %753 = vst.sshfl [vmem:[%s170_s16 + $0x4] sm:$0x33 pattern:$0x76325410] %v749_v43 }
  0x50   : > { %754 = vst.sshfl [vmem:[%s170_s16 + $0x8] sm:$0x33 pattern:$0x76325410] %v750_v44 }
  0x51   : > { %755 = vst.sshfl [vmem:[%s170_s16 + $0xc] sm:$0x33 pattern:$0x76325410] %v751_v45 }
  0x52 PF: > { %s13_s12 = sadd.s32 1, %s774_s12  }
  0x53   : > { %p10_p4 = scmp.ge.s32.totalorder %s13_s12, 4  }
  0x55   :  { %12 = sbr.rel (!%p10_p4) target bundleno = 1 (0x1), region = 70 }

// kernel: _lambda_.47
= control target key start
LH: loop header
LB: loop body
LE: loop exit
PB: predicated region body
PF: predicated region fallthrough
CT: control target
= control target key end

     0   :  { %s477_s1 = inlined_call_operand.vmem [shape: bf16[256,128], index: 1, kind: input, shape index: {}]   ;;  %s478_s0 = inlined_call_operand.vmem [shape: bf16[32,256], index: 0, kind: input, shape index: {}]   ;;  %s479_s3 = inlined_call_operand.vmem [shape: bf16[32,128], index: 3, kind: input, shape index: {}]   ;;  %s480_s2 = inlined_call_operand.vmem [shape: f32[1,128], index: 2, kind: input, shape index: {}]   ;;  %s481_s4 = inlined_call_operand.vmem [shape: bf16[32,128], index: 4, kind: output, shape index: {}]  }
   0x1   :  { %v355_v0 = vld [vmem:[%s477_s1 + $0x40] sm:$0xff]   ;;  %v357_v2 = vld [vmem:[%s477_s1 + $0x48] sm:$0xff]   ;;  %v359_v4 = vld [vmem:[%s477_s1 + $0x50] sm:$0xff]  }
   0x2   :  { %v356_v1 = vld [vmem:[%s477_s1] sm:$0xff]   ;;  %311 = vmatprep.subr.bf16.mxu0 %v355_v0  ;;  %339 = vmatprep.subr.bf16.mxu1 %v355_v0  ;;  %v358_v3 = vld [vmem:[%s477_s1 + $0x8] sm:$0xff]   ;;  %v360_v5 = vld [vmem:[%s477_s1 + $0x10] sm:$0xff]  }
   0x3   :  { %312 = vmatpush3.bf16.msra.mxu0 %v356_v1  ;;  %347 = vmatpush3.bf16.msra.mxu1 %v356_v1  ;;  %v361_v6 = vld [vmem:[%s477_s1 + $0x58] sm:$0xff]   ;;  %v363_v8 = vld [vmem:[%s477_s1 + $0x60] sm:$0xff]   ;;  %v365_v10 = vld [vmem:[%s477_s1 + $0x68] sm:$0xff]  }
   0x4   :  { %313 = vmatprep.subr.bf16.mxu0 %v357_v2  ;;  %340 = vmatprep.subr.bf16.mxu1 %v357_v2  ;;  %v362_v7 = vld [vmem:[%s477_s1 + $0x18] sm:$0xff]   ;;  %v364_v9 = vld [vmem:[%s477_s1 + $0x20] sm:$0xff]   ;;  %v366_v13 = vld [vmem:[%s477_s1 + $0x28] sm:$0xff]  }
   0x5   :  { %v373_v11 = vld [vmem:[%s478_s0 + $0x4] ss:$8 sps:$4 sm:$0xff]   ;;  %v376_v12 = vld [vmem:[%s478_s0 + $0x14] ss:$8 sps:$4 sm:$0xff]   ;;  %v371_v18 = vld [vmem:[%s478_s0] ss:$8 sps:$4 sm:$0xff]  }
   0x6   :  { %v367_v14 = vld [vmem:[%s477_s1 + $0x70] sm:$0xff]   ;;  %209 = vmatprep.mubr.bf16.mxu0 %v373_v11  ;;  %217 = vmatprep.mubr.bf16.mxu1 %v376_v12  ;;  %v369_v16 = vld [vmem:[%s477_s1 + $0x78] sm:$0xff]   ;;  %v292_v22 = vld [vmem:[%s479_s3] sm:$0xff]  }
   0x7   :  { %314 = vmatpush3.bf16.msra.mxu0 %v358_v3  ;;  %348 = vmatpush3.bf16.msra.mxu1 %v358_v3  ;;  %v368_v15 = vld [vmem:[%s477_s1 + $0x30] sm:$0xff]   ;;  %v370_v17 = vld [vmem:[%s477_s1 + $0x38] sm:$0xff]   ;;  %v309_v23 = vld [vmem:[%s479_s3 + $0x8] sm:$0xff]   ;;  %v293_v31 = vunpack.c.l.bf16 %v292_v22  ;;  %v294_v34 = vunpack.c.h.bf16 %v292_v22 }
   0x8   :  { %315 = vmatprep.subr.bf16.mxu0 %v359_v4  ;;  %341 = vmatprep.subr.bf16.mxu1 %v359_v4  ;;  %v374_v19 = vld [vmem:[%s478_s0 + $0x10] ss:$8 sps:$4 sm:$0xff]   ;;  %v262_v24 = vld [vmem:[%s480_s2] ss:$0 sm:$0xff]  ;;  %v297_v32 = vunpack.c.l.bf16 %v309_v23  ;;  %v298_v36 = vunpack.c.h.bf16 %v309_v23 }
   0xb   :  { %316 = vmatpush3.bf16.msra.mxu0 %v360_v5  ;;  %349 = vmatpush3.bf16.msra.mxu1 %v360_v5 }
   0xc   :  { %317 = vmatprep.subr.bf16.mxu0 %v361_v6  ;;  %342 = vmatprep.subr.bf16.mxu1 %v361_v6 }
   0xf   :  { %318 = vmatpush3.bf16.msra.mxu0 %v362_v7  ;;  %350 = vmatpush3.bf16.msra.mxu1 %v362_v7 }
  0x10   :  { %319 = vmatprep.subr.bf16.mxu0 %v363_v8  ;;  %343 = vmatprep.subr.bf16.mxu1 %v363_v8 }
  0x13   :  { %320 = vmatpush3.bf16.msra.mxu0 %v364_v9  ;;  %351 = vmatpush3.bf16.msra.mxu1 %v364_v9 }
  0x14   :  { %321 = vmatprep.subr.bf16.mxu0 %v365_v10  ;;  %344 = vmatprep.subr.bf16.mxu1 %v365_v10 }
  0x17   :  { %322 = vmatpush3.bf16.msra.mxu0 %v366_v13  ;;  %352 = vmatpush3.bf16.msra.mxu1 %v366_v13 }
  0x18   :  { %323 = vmatprep.subr.bf16.mxu0 %v367_v14  ;;  %345 = vmatprep.subr.bf16.mxu1 %v367_v14 }
  0x1b   :  { %324 = vmatpush3.bf16.msra.mxu0 %v368_v15  ;;  %353 = vmatpush3.bf16.msra.mxu1 %v368_v15 }
  0x1c   :  { %325 = vmatprep.subr.bf16.mxu0 %v369_v16  ;;  %346 = vmatprep.subr.bf16.mxu1 %v369_v16 }
  0x1f   :  { %326 = vmatpush3.bf16.msra.mxu0 %v370_v17  ;;  %354 = vmatpush3.bf16.msra.mxu1 %v370_v17 }
  0x22   :  { %210 = vmatmul.mubr.bf16.vlgmr.msra.gmra.mrb[0].mxu0 %v371_v18  ;;  %218 = vmatmul.mubr.bf16.vlgmr.msra.gmra.mrb[0].mxu1 %v374_v19 }
  0xf5   :  { %v327_v20 = vpop.f32.mrb[0].mxu0  ;;  %v333_v21 = vpop.f32.mrb[0].mxu1 }
  0xf6   :  { %v328_v25 = vpop.f32.mrb[1].mxu0  ;;  %v334_v26 = vpop.f32.mrb[1].mxu1 }
  0xf7   :  { %v329_v27 = vadd.f32 %v328_v25, %v327_v20  ;;  %v335_v28 = vadd.f32 %v334_v26, %v333_v21  ;;  %v330_v29 = vpop.f32.mrb[2].mxu0  ;;  %v336_v30 = vpop.f32.mrb[2].mxu1 }
  0xf8   :  { %v331_v33 = vpop.f32.mrb[3].mxu0  ;;  %v337_v35 = vpop.f32.mrb[3].mxu1 }
  0xf9   :  { %v212_v37 = vadd.f32 %v329_v27, %v262_v24  ;;  %v220_v38 = vadd.f32 %v335_v28, %v262_v24  ;;  %v332_v39 = vadd.f32 %v331_v33, %v330_v29  ;;  %v338_v40 = vadd.f32 %v337_v35, %v336_v30 }
  0xfb   :  { %v215_v41 = vadd.f32 %v332_v39, %v262_v24  ;;  %v223_v42 = vadd.f32 %v338_v40, %v262_v24  ;;  %v234_v43 = vadd.f32 %v293_v31, %v212_v37  ;;  %v236_v44 = vadd.f32 %v297_v32, %v220_v38 }
  0xfd   :  { %v235_v45 = vadd.f32 %v294_v34, %v215_v41  ;;  %v237_v46 = vadd.f32 %v298_v36, %v223_v42 }
  0xff   :  { %v302_v47 = vpack.c.bf16 %v235_v45, %v234_v43  ;;  %v307_v48 = vpack.c.bf16 %v237_v46, %v236_v44 }
 0x101   :  { %303 = vst [vmem:[%s481_s4] sm:$0xff] %v302_v47   ;;  %310 = vst [vmem:[%s481_s4 + $0x8] sm:$0xff] %v307_v48  }

// kernel: _lambda_.49
= control target key start
LH: loop header
LB: loop body
LE: loop exit
PB: predicated region body
PF: predicated region fallthrough
CT: control target
= control target key end

     0   :  { %s546_s12 = smov 0   ;;  %s641_s0 = inlined_call_operand.vmem [shape: bf16[2,3,3,1024], index: 0, kind: input, shape index: {}]   ;;  %s642_s1 = inlined_call_operand.vmem [shape: f32[9,256], index: 1, kind: input, shape index: {}]   ;;  %s643_s2 = inlined_call_operand.vmem [shape: f32[1,256], index: 2, kind: input, shape index: {}]   ;;  %s644_s3 = inlined_call_operand.vmem [shape: bf16[2,2,2,256], index: 3, kind: output, shape index: {}]  }
   0x1 LB: > { %s480_s13 = sadd.s32 4294967295, %s523_s12   ;;  %p484_p0 = scmp.ge.s32.totalorder %s523_s12, 1  ;;  %s523_s12 = sphi %s546_s12, %s13_s12  }
   0x2   : > { %p137_p1 = scmp.lt.s32.totalorder %s523_s12, 3 }
   0x4   : > { %p138_p2 = pnand %p484_p0, %p137_p1 }
   0x5   : > { %p160_p3 = scmp.lt.s32.totalorder (!%p138_p2), %s480_s13, 1  ;;  %v186_v0 = vlaneseq (!%p138_p2)  ;;  %v184_v1 = vld [vmem:[%s642_s1] ss:$8 sm:$0x3] (!%p138_p2) }
   0x6   : > { %141 = sbr.rel (%p138_p2) target bundleno = 53 (0x35), region = 32  ;;  %v487_v3 = vld [vmem:[%s642_s1 + $0x1] ss:$8 sm:$0x3] (!%p138_p2) }
   0x7   : > { %v559_v2 = vshrl.u32 (!%p138_p2), %v186_v0, 7  ;;  %v488_v4 = vld [vmem:[%s642_s1 + $0x2] ss:$8 sm:$0x3] (!%p138_p2) }
   0x8   : > { %v491_v7 = vld [vmem:[%s642_s1 + $0x3] ss:$8 sm:$0x3] (!%p138_p2)  ;;  %v492_v22 = vld [vmem:[%s642_s1 + $0x4] ss:$8 sm:$0x3] (!%p138_p2) }
   0x9   : > { %v569_v5 = vsub.s32 (!%p138_p2), 0, %v559_v2  ;;  %v572_v6 = vsub.s32 (!%p138_p2), 1, %v559_v2  ;;  %v493_v33 = vld [vmem:[%s642_s1 + $0x5] ss:$8 sm:$0x3] (!%p138_p2) }
   0xa   : > { %v496_v38 = vld [vmem:[%s642_s1 + $0x6] ss:$8 sm:$0x3] (!%p138_p2)  ;;  %v497_v43 = vld [vmem:[%s642_s1 + $0x7] ss:$8 sm:$0x3] (!%p138_p2) }
   0xb   : > { %v189_v8 = vrot.slane (!%p138_p2), %v184_v1, %v569_v5  ;;  %v193_v9 = vrot.slane (!%p138_p2), %v184_v1, %v572_v6  ;;  %v204_v10 = vrot.slane (!%p138_p2), %v487_v3, %v569_v5  ;;  %v208_v11 = vrot.slane (!%p138_p2), %v487_v3, %v572_v6  ;;  %v498_v48 = vld [vmem:[%s642_s1 + $0x10] ss:$8 sm:$0x3] (!%p138_p2) }
   0xc   : > { %v221_v15 = vrot.slane (!%p138_p2), %v488_v4, %v569_v5  ;;  %v225_v16 = vrot.slane (!%p138_p2), %v488_v4, %v572_v6  ;;  %v247_v17 = vrot.slane (!%p138_p2), %v491_v7, %v569_v5  ;;  %v251_v18 = vrot.slane (!%p138_p2), %v491_v7, %v572_v6 }
   0xd   : > { %s646_s13 = smov (!%p160_p3, %s480_s13), 1  ;;  %v194_v27 = vcombine.low %v189_v8, %v193_v9  ;;  %v209_v28 = vcombine.low %v204_v10, %v208_v11  ;;  %v264_v31 = vrot.slane %v492_v22, %v569_v5  ;;  %v268_v32 = vrot.slane %v492_v22, %v572_v6 }
   0xe   : > { %s507_s20 = smul.u32 48, %s646_s13  ;;  %v226_v29 = vcombine.low %v221_v15, %v225_v16  ;;  %v252_v30 = vcombine.low %v247_v17, %v251_v18  ;;  %v281_v46 = vrot.slane %v493_v33, %v569_v5  ;;  %v285_v47 = vrot.slane %v493_v33, %v572_v6  ;;  %v361_v17 = vld [vmem:[%s643_s2] sm:$0x3]  ;;  %s486_s11 = sshll.u32 %s646_s13, 2 }
   0xf   : > { %v269_v45 = vcombine.low %v264_v31, %v268_v32  ;;  %v307_v55 = vrot.slane %v496_v38, %v569_v5  ;;  %v311_v56 = vrot.slane %v496_v38, %v572_v6  ;;  %v324_v57 = vrot.slane %v497_v43, %v569_v5  ;;  %s168_s16 = scalar_lea.vmem %s644_s3, %s486_s11 }
  0x10   : > { %s580_s25 = scalar_lea.vmem %s641_s0, %s507_s20  ;;  %v227_v41 = vrot.slane %v226_v29, 7  ;;  %v286_v54 = vcombine.low %v281_v46, %v285_v47  ;;  %v328_v60 = vrot.slane %v497_v43, %v572_v6  ;;  %v341_v61 = vrot.slane %v498_v48, %v569_v5 }
  0x11   : > { %v169_v12 = vld [vmem:[%s580_s25] sm:$0xff]  ;;  %v170_v13 = vld [vmem:[%s580_s25 + $0x8] sm:$0xff]  ;;  %v589_v14 = vld [vmem:[%s580_s25 + $0x10] sm:$0xff]  ;;  %v345_v1 = vrot.slane %v498_v48, %v572_v6  ;;  %v312_v8 = vcombine.low %v307_v55, %v311_v56 }
  0x12   : > { %v172_v19 = vld [vmem:[%s580_s25 + $0x18] sm:$0xff]  ;;  %v174_v20 = vunpack.c.l.bf16 %v169_v12  ;;  %v175_v21 = vunpack.c.h.bf16 %v169_v12  ;;  %v176_v23 = vunpack.c.l.bf16 %v170_v13  ;;  %v178_v24 = vunpack.c.l.bf16 %v589_v14  ;;  %v173_v49 = vld [vmem:[%s580_s25 + $0x20] sm:$0xff] }
  0x13   : > { %v179_v25 = vunpack.c.h.bf16 %v589_v14  ;;  %v180_v26 = vunpack.c.l.bf16 %v172_v19  ;;  %v177_v39 = vunpack.c.h.bf16 %v170_v13  ;;  %v181_v40 = vunpack.c.h.bf16 %v172_v19 }
  0x14   : > { %v196_v34 = vmul.f32 %v194_v27, %v174_v20  ;;  %v197_v35 = vmul.f32 %v194_v27, %v178_v24  ;;  %v211_v36 = vmul.f32 %v209_v28, %v175_v21  ;;  %v254_v42 = vmul.f32 %v252_v30, %v176_v23 }
  0x15   : > { %v212_v37 = vmul.f32 %v209_v28, %v179_v25  ;;  %v255_v44 = vmul.f32 %v252_v30, %v180_v26  ;;  %v229_v52 = vmul.f32 %v227_v41, %v174_v20  ;;  %v230_v53 = vmul.f32 %v227_v41, %v178_v24 }
  0x16   : > { %v213_v50 = vadd.f32 %v211_v36, %v196_v34  ;;  %v182_v62 = vunpack.c.l.bf16 %v173_v49  ;;  %v271_v63 = vmul.f32 %v269_v45, %v177_v39  ;;  %v287_v0 = vrot.slane %v286_v54, 7 }
  0x17   : > { %v214_v51 = vadd.f32 %v212_v37, %v197_v35  ;;  %v489_v58 = vrot.slane %v229_v52, 9  ;;  %v490_v59 = vrot.slane %v230_v53, 9  ;;  %v272_v7 = vmul.f32 %v269_v45, %v181_v40 }
  0x18   : > { %v289_v9 = vmul.f32 %v287_v0, %v176_v23  ;;  %v290_v10 = vmul.f32 %v287_v0, %v180_v26  ;;  %v346_v11 = vcombine.low %v341_v61, %v345_v1  ;;  %v183_v12 = vunpack.c.h.bf16 %v173_v49 }
  0x19   : > { %v239_v3 = vadd.f32 %v489_v58, %v213_v50  ;;  %v240_v4 = vadd.f32 %v490_v59, %v214_v51  ;;  %v329_v16 = vcombine.low %v324_v57, %v328_v60  ;;  %v314_v22 = vmul.f32 %v312_v8, %v178_v24 }
  0x1a   : > { %v494_v18 = vrot.slane %v289_v9, 9  ;;  %v495_v19 = vrot.slane %v290_v10, 9  ;;  %v347_v20 = vrot.slane %v346_v11, 7  ;;  %v315_v28 = vmul.f32 %v312_v8, %v182_v62 }
  0x1b   : > { %v256_v13 = vadd.f32 %v254_v42, %v239_v3  ;;  %v257_v15 = vadd.f32 %v255_v44, %v240_v4  ;;  %v366_v23 = vrot.slane %v361_v17, %v569_v5  ;;  %v370_v26 = vrot.slane %v361_v17, %v572_v6 }
  0x1c   : > { %v349_v29 = vmul.f32 %v347_v20, %v178_v24  ;;  %v350_v30 = vmul.f32 %v347_v20, %v182_v62  ;;  %v331_v32 = vmul.f32 %v329_v16, %v179_v25  ;;  %v332_v34 = vmul.f32 %v329_v16, %v183_v12 }
  0x1d   : > { %v273_v21 = vadd.f32 %v271_v63, %v256_v13  ;;  %v274_v27 = vadd.f32 %v272_v7, %v257_v15  ;;  %v371_v40 = vcombine.low %v366_v23, %v370_v26  ;;  %v525_v42 = vmov 1966171168  }
  0x1e   : > { %v499_v36 = vrot.slane %v349_v29, 9  ;;  %v500_v38 = vrot.slane %v350_v30, 9  ;;  %v395_v5 = vunpack.c.l.s4 %v525_v42 }
  0x1f   : > { %v299_v31 = vadd.f32 %v494_v18, %v273_v21  ;;  %v300_v33 = vadd.f32 %v495_v19, %v274_v27 }
  0x20   : > { %v396_v46 = vunpack.c.0.s8 %v395_v5 }
  0x21   : > { %v316_v35 = vadd.f32 %v314_v22, %v299_v31  ;;  %v317_v37 = vadd.f32 %v315_v28, %v300_v33 }
  0x22   : > { %v399_v49 = vsub.s32 %v396_v46, %v559_v2 }
  0x23   : > { %v333_v39 = vadd.f32 %v331_v32, %v316_v35  ;;  %v334_v41 = vadd.f32 %v332_v34, %v317_v37 }
  0x25   : > { %v359_v24 = vadd.f32 %v499_v36, %v333_v39  ;;  %v360_v43 = vadd.f32 %v500_v38, %v334_v41 }
  0x27   : > { %v373_v6 = vadd.f32 %v371_v40, %v359_v24  ;;  %v374_v44 = vadd.f32 %v371_v40, %v360_v43 }
  0x29   : > { %v375_v45 = vmax.f32 %v373_v6, 0.0  ;;  %v376_v14 = vmax.f32 %v374_v44, 0.0 }
  0x2b   : > { %v377_v25 = vmin.f32 %v375_v45, 6.0  ;;  %v378_v47 = vmin.f32 %v376_v14, 6.0 }
  0x2d   : > { %v381_v48 = vcombine.high %v377_v25, %v377_v25  ;;  %v382_v50 = vcombine.high %v378_v47, %v378_v47 }
  0x2f   : > { %v501_v51 = vpack.c.bf16 %v381_v48, %v377_v25  ;;  %v502_v52 = vpack.c.bf16 %v382_v50, %v378_v47 }
  0x31   : > { %v400_v53 = vrot.slane %v501_v51, %v399_v49  ;;  %v415_v54 = vrot.slane %v502_v52, %v399_v49 }
  0x33   : > { %503 = vst.sshfl [vmem:[%s168_s16] sm:$0x5 pattern:$0x73625140] %v400_v53 }
  0x34   : > { %504 = vst.sshfl [vmem:[%s168_s16 + $0x2] sm:$0x5 pattern:$0x73625140] %v415_v54 }
  0x35 PF: > { %s13_s12 = sadd.s32 1, %s523_s12  }
  0x36   : > { %p10_p4 = scmp.ge.s32.totalorder %s13_s12, 4  }
  0x38   :  { %12 = sbr.rel (!%p10_p4) target bundleno = 1 (0x1), region = 70 }

// kernel: _lambda_.51
= control target key start
LH: loop header
LB: loop body
LE: loop exit
PB: predicated region body
PF: predicated region fallthrough
CT: control target
= control target key end

     0   :  { %v225_v1 = vmov 0   ;;  %v34_v18 = vlaneseq  ;;  %s303_s1 = inlined_call_operand.vmem [shape: bf16[128,256], index: 1, kind: input, shape index: {}]   ;;  %s304_s0 = inlined_call_operand.vmem [shape: bf16[8,128], index: 0, kind: input, shape index: {}]   ;;  %s305_s2 = inlined_call_operand.vmem [shape: f32[1,256], index: 2, kind: input, shape index: {}]   ;;  %s306_s3 = inlined_call_operand.vmem [shape: bf16[8,256], index: 3, kind: output, shape index: {}]  }
   0x1   :  { %v201_v0 = vld [vmem:[%s303_s1 + $0x4] ss:$8 sps:$4 sm:$0xff]   ;;  %156 = vmatprep.mubr.bf16.mxu0 %v225_v1  ;;  %v203_v2 = vld [vmem:[%s303_s1] ss:$8 sps:$4 sm:$0xff]   ;;  %v204_v3 = vld [vmem:[%s303_s1 + $0x14] ss:$8 sps:$4 sm:$0xff]  }
   0x2   :  { %124 = vmatprep.subr.bf16.mxu0 %v201_v0  ;;  %v206_v4 = vld [vmem:[%s303_s1 + $0x10] ss:$8 sps:$4 sm:$0xff]   ;;  %v207_v5 = vld [vmem:[%s303_s1 + $0x24] ss:$8 sps:$4 sm:$0xff]   ;;  %v209_v6 = vld [vmem:[%s303_s1 + $0x20] ss:$8 sps:$4 sm:$0xff]  }
   0x3   :  { %125 = vmatpush1.bf16.msra.mxu0 %v203_v2  ;;  %v210_v7 = vld [vmem:[%s303_s1 + $0x34] ss:$8 sps:$4 sm:$0xff]   ;;  %v212_v8 = vld [vmem:[%s303_s1 + $0x30] ss:$8 sps:$4 sm:$0xff]   ;;  %v213_v9 = vld [vmem:[%s303_s1 + $0x44] ss:$8 sps:$4 sm:$0xff]  }
   0x4   :  { %126 = vmatprep.subr.bf16.mxu0 %v204_v3  ;;  %v215_v10 = vld [vmem:[%s303_s1 + $0x40] ss:$8 sps:$4 sm:$0xff]   ;;  %v216_v11 = vld [vmem:[%s303_s1 + $0x54] ss:$8 sps:$4 sm:$0xff]   ;;  %v218_v12 = vld [vmem:[%s303_s1 + $0x50] ss:$8 sps:$4 sm:$0xff]  }
   0x5   :  { %v219_v13 = vld [vmem:[%s303_s1 + $0x64] ss:$8 sps:$4 sm:$0xff]   ;;  %v221_v14 = vld [vmem:[%s303_s1 + $0x60] ss:$8 sps:$4 sm:$0xff]   ;;  %v222_v15 = vld [vmem:[%s303_s1 + $0x74] ss:$8 sps:$4 sm:$0xff]  }
   0x6   :  { %v224_v16 = vld [vmem:[%s303_s1 + $0x70] ss:$8 sps:$4 sm:$0xff]   ;;  %v15_v17 = vld [vmem:[%s304_s0] sm:$0xf]  ;;  %v35_v19 = vshrl.u32 %v34_v18, 7 }
   0x7   :  { %127 = vmatpush1.bf16.msra.mxu0 %v206_v4  ;;  %v32_v21 = vld [vmem:[%s305_s2] sm:$0x3] }
   0x8   :  { %128 = vmatprep.subr.bf16.mxu0 %v207_v5  ;;  %v36_v20 = vsub.s32 0, %v35_v19  ;;  %v40_v22 = vsub.s32 1, %v35_v19 }
   0xa   :  { %v37_v23 = vrot.slane %v32_v21, %v36_v20  ;;  %v41_v24 = vrot.slane %v32_v21, %v40_v22 }
   0xb   :  { %129 = vmatpush1.bf16.msra.mxu0 %v209_v6 }
   0xc   :  { %130 = vmatprep.subr.bf16.mxu0 %v210_v7 }
   0xf   :  { %131 = vmatpush1.bf16.msra.mxu0 %v212_v8 }
  0x10   :  { %132 = vmatprep.subr.bf16.mxu0 %v213_v9 }
  0x13   :  { %133 = vmatpush1.bf16.msra.mxu0 %v215_v10 }
  0x14   :  { %134 = vmatprep.subr.bf16.mxu0 %v216_v11 }
  0x17   :  { %135 = vmatpush1.bf16.msra.mxu0 %v218_v12 }
  0x18   :  { %136 = vmatprep.subr.bf16.mxu0 %v219_v13 }
  0x1b   :  { %137 = vmatpush1.bf16.msra.mxu0 %v221_v14 }
  0x1c   :  { %138 = vmatprep.subr.bf16.mxu0 %v222_v15 }
  0x1f   :  { %139 = vmatpush1.bf16.msra.mxu0 %v224_v16 }
  0x22   :  { %157 = vmatmul.mubr.bf16.vlgmr.msra.gmra.mrb[0].mxu0 %v15_v17 }
  0xf5   :  { %v158_v25 = vpop.f32.mrb[0].mxu0 }
  0xf6   :  { %v159_v26 = vadd.f32 %v158_v25, %v37_v23  ;;  %v160_v27 = vpop.f32.mrb[1].mxu0 }
  0xf7   :  { %v161_v28 = vadd.f32 %v160_v27, %v41_v24  ;;  %v162_v29 = vpop.f32.mrb[2].mxu0 }
  0xf8   :  { %v165_v30 = vmax.f32 %v159_v26, 0.0  ;;  %v163_v31 = vpop.f32.mrb[3].mxu0 }
  0xf9   :  { %v166_v32 = vmax.f32 %v161_v28, 0.0 }
  0xfa   :  { %v167_v33 = vmin.f32 %v165_v30, 6.0 }
  0xfb   :  { %v168_v34 = vmin.f32 %v166_v32, 6.0 }
  0xfd   :  { %v199_v35 = vpack.c.bf16 %v168_v34, %v167_v33 }
  0xff   :  { %177 = vst [vmem:[%s306_s3] sm:$0xff] %v199_v35 }

// kernel: _lambda_.50
= control target key start
LH: loop header
LB: loop body
LE: loop exit
PB: predicated region body
PF: predicated region fallthrough
CT: control target
= control target key end

     0   :  { %s340_s1 = inlined_call_operand.vmem [shape: bf16[256,128], index: 1, kind: input, shape index: {}]   ;;  %s341_s0 = inlined_call_operand.vmem [shape: bf16[8,256], index: 0, kind: input, shape index: {}]   ;;  %s342_s2 = inlined_call_operand.vmem [shape: f32[1,128], index: 2, kind: input, shape index: {}]   ;;  %s343_s3 = inlined_call_operand.vmem [shape: bf16[8,128], index: 3, kind: output, shape index: {}]  }
   0x1   :  { %v245_v0 = vld [vmem:[%s340_s1 + $0x40] sm:$0xff]   ;;  %v247_v2 = vld [vmem:[%s340_s1 + $0x48] sm:$0xff]   ;;  %v249_v4 = vld [vmem:[%s340_s1 + $0x50] sm:$0xff]  }
   0x2   :  { %v246_v1 = vld [vmem:[%s340_s1] sm:$0xff]   ;;  %223 = vmatprep.subr.bf16.mxu0 %v245_v0  ;;  %v248_v3 = vld [vmem:[%s340_s1 + $0x8] sm:$0xff]   ;;  %v250_v5 = vld [vmem:[%s340_s1 + $0x10] sm:$0xff]  }
   0x3   :  { %224 = vmatpush3.bf16.msra.mxu0 %v246_v1  ;;  %v251_v6 = vld [vmem:[%s340_s1 + $0x58] sm:$0xff]   ;;  %v253_v8 = vld [vmem:[%s340_s1 + $0x60] sm:$0xff]   ;;  %v255_v10 = vld [vmem:[%s340_s1 + $0x68] sm:$0xff]  }
   0x4   :  { %225 = vmatprep.subr.bf16.mxu0 %v247_v2  ;;  %v252_v7 = vld [vmem:[%s340_s1 + $0x18] sm:$0xff]   ;;  %v254_v9 = vld [vmem:[%s340_s1 + $0x20] sm:$0xff]   ;;  %v256_v13 = vld [vmem:[%s340_s1 + $0x28] sm:$0xff]  }
   0x5   :  { %v15_v11 = vld [vmem:[%s341_s0] sm:$0xff]  ;;  %v257_v14 = vld [vmem:[%s340_s1 + $0x70] sm:$0xff]   ;;  %v259_v16 = vld [vmem:[%s340_s1 + $0x78] sm:$0xff]  }
   0x6   :  { %v206_v12 = vcombine.high %v15_v11, %v15_v11  ;;  %v258_v15 = vld [vmem:[%s340_s1 + $0x30] sm:$0xff]   ;;  %v260_v17 = vld [vmem:[%s340_s1 + $0x38] sm:$0xff]   ;;  %v205_v18 = vcombine.low %v15_v11, %v15_v11  ;;  %v204_v20 = vld [vmem:[%s342_s2] ss:$0 sm:$0xff] }
   0x7   :  { %226 = vmatpush3.bf16.msra.mxu0 %v248_v3 }
   0x8   :  { %227 = vmatprep.subr.bf16.mxu0 %v249_v4  ;;  %190 = vmatprep.mubr.bf16.mxu0 %v206_v12 }
   0xb   :  { %228 = vmatpush3.bf16.msra.mxu0 %v250_v5 }
   0xc   :  { %229 = vmatprep.subr.bf16.mxu0 %v251_v6 }
   0xf   :  { %230 = vmatpush3.bf16.msra.mxu0 %v252_v7 }
  0x10   :  { %231 = vmatprep.subr.bf16.mxu0 %v253_v8 }
  0x13   :  { %232 = vmatpush3.bf16.msra.mxu0 %v254_v9 }
  0x14   :  { %233 = vmatprep.subr.bf16.mxu0 %v255_v10 }
  0x17   :  { %234 = vmatpush3.bf16.msra.mxu0 %v256_v13 }
  0x18   :  { %235 = vmatprep.subr.bf16.mxu0 %v257_v14 }
  0x1b   :  { %236 = vmatpush3.bf16.msra.mxu0 %v258_v15 }
  0x1c   :  { %237 = vmatprep.subr.bf16.mxu0 %v259_v16 }
  0x1f   :  { %238 = vmatpush3.bf16.msra.mxu0 %v260_v17 }
  0x22   :  { %191 = vmatmul.mubr.bf16.vlgmr.msra.gmra.mrb[0].mxu0 %v205_v18 }
  0xf5   :  { %v239_v19 = vpop.f32.mrb[0].mxu0 }
  0xf6   :  { %v240_v21 = vpop.f32.mrb[1].mxu0 }
  0xf7   :  { %v241_v22 = vadd.f32 %v240_v21, %v239_v19  ;;  %v242_v23 = vpop.f32.mrb[2].mxu0 }
  0xf8   :  { %v243_v24 = vpop.f32.mrb[3].mxu0 }
  0xf9   :  { %v193_v25 = vadd.f32 %v241_v22, %v204_v20 }
  0xfb   :  { %v198_v26 = vpack.c.bf16 %v193_v25, %v193_v25 }
  0xfd   :  { %199 = vst [vmem:[%s343_s3] sm:$0xf] %v198_v26 }

// kernel: _lambda_.52
= control target key start
LH: loop header
LB: loop body
LE: loop exit
PB: predicated region body
PF: predicated region fallthrough
CT: control target
= control target key end

     0   :  { %s582_s12 = smov 0   ;;  %s662_s0 = inlined_call_operand.vmem [shape: bf16[2,4,4,256], index: 0, kind: input, shape index: {}]   ;;  %s663_s1 = inlined_call_operand.vmem [shape: f32[9,256], index: 1, kind: input, shape index: {}]   ;;  %s664_s2 = inlined_call_operand.vmem [shape: f32[1,256], index: 2, kind: input, shape index: {}]   ;;  %s665_s3 = inlined_call_operand.vmem [shape: bf16[2,2,2,256], index: 3, kind: output, shape index: {}]  }
   0x1 LB: > { %s500_s13 = sadd.s32 4294967295, %s559_s12   ;;  %p504_p0 = scmp.ge.s32.totalorder %s559_s12, 1  ;;  %s559_s12 = sphi %s582_s12, %s13_s12  }
   0x2   : > { %p137_p1 = scmp.lt.s32.totalorder %s559_s12, 3 }
   0x4   : > { %p138_p2 = pnand %p504_p0, %p137_p1 }
   0x5   : > { %p160_p3 = scmp.lt.s32.totalorder (!%p138_p2), %s500_s13, 1  ;;  %v179_v0 = vlaneseq (!%p138_p2)  ;;  %v177_v2 = vld [vmem:[%s663_s1] ss:$8 sm:$0x3] (!%p138_p2) }
   0x6   : > { %141 = sbr.rel (%p138_p2) target bundleno = 53 (0x35), region = 32  ;;  %v508_v3 = vld [vmem:[%s663_s1 + $0x1] ss:$8 sm:$0x3] (!%p138_p2) }
   0x7   : > { %v592_v1 = vshrl.u32 (!%p138_p2), %v179_v0, 7  ;;  %v511_v6 = vld [vmem:[%s663_s1 + $0x2] ss:$8 sm:$0x3] (!%p138_p2) }
   0x8   : > { %v514_v7 = vld [vmem:[%s663_s1 + $0x3] ss:$8 sm:$0x3] (!%p138_p2)  ;;  %v515_v13 = vld [vmem:[%s663_s1 + $0x4] ss:$8 sm:$0x3] (!%p138_p2) }
   0x9   : > { %v602_v4 = vsub.s32 (!%p138_p2), 0, %v592_v1  ;;  %v605_v5 = vsub.s32 (!%p138_p2), 1, %v592_v1  ;;  %v518_v21 = vld [vmem:[%s663_s1 + $0x5] ss:$8 sm:$0x3] (!%p138_p2) }
   0xa   : > { %v521_v30 = vld [vmem:[%s663_s1 + $0x6] ss:$8 sm:$0x3] (!%p138_p2)  ;;  %v522_v39 = vld [vmem:[%s663_s1 + $0x7] ss:$8 sm:$0x3] (!%p138_p2) }
   0xb   : > { %v182_v9 = vrot.slane (!%p138_p2), %v177_v2, %v602_v4  ;;  %v186_v10 = vrot.slane (!%p138_p2), %v177_v2, %v605_v5  ;;  %v197_v11 = vrot.slane (!%p138_p2), %v508_v3, %v602_v4  ;;  %v201_v12 = vrot.slane (!%p138_p2), %v508_v3, %v605_v5  ;;  %v525_v52 = vld [vmem:[%s663_s1 + $0x10] ss:$8 sm:$0x3] (!%p138_p2) }
   0xc   : > { %v223_v19 = vrot.slane (!%p138_p2), %v511_v6, %v602_v4  ;;  %v227_v20 = vrot.slane (!%p138_p2), %v511_v6, %v605_v5  ;;  %v249_v22 = vrot.slane (!%p138_p2), %v514_v7, %v602_v4  ;;  %v253_v23 = vrot.slane (!%p138_p2), %v514_v7, %v605_v5 }
   0xd   : > { %s667_s13 = smov (!%p160_p3, %s500_s13), 1  ;;  %v187_v17 = vcombine.low %v182_v9, %v186_v10  ;;  %v202_v18 = vcombine.low %v197_v11, %v201_v12  ;;  %v266_v24 = vrot.slane %v515_v13, %v602_v4  ;;  %v270_v25 = vrot.slane %v515_v13, %v605_v5 }
   0xe   : > { %s534_s18 = sshll.u32 %s667_s13, 4  ;;  %v228_v29 = vcombine.low %v223_v19, %v227_v20  ;;  %v254_v31 = vcombine.low %v249_v22, %v253_v23  ;;  %v292_v33 = vrot.slane %v518_v21, %v602_v4  ;;  %v296_v34 = vrot.slane %v518_v21, %v605_v5  ;;  %s507_s11 = sshll.u32 %s667_s13, 2 }
   0xf   : > { %s164_s21 = scalar_lea.vmem %s662_s0, %s534_s18  ;;  %v203_v28 = vrot.slane %v202_v18, 7  ;;  %v271_v32 = vcombine.low %v266_v24, %v270_v25  ;;  %v318_v42 = vrot.slane %v521_v30, %v602_v4  ;;  %v322_v43 = vrot.slane %v521_v30, %v605_v5  ;;  %s168_s16 = scalar_lea.vmem %s665_s3, %s507_s11 }
  0x10   : > { %v536_v8 = vld [vmem:[%s164_s21] sm:$0xff]   ;;  %v543_v16 = vld [vmem:[%s164_s21 + $0x8] sm:$0xff]   ;;  %v229_v38 = vrot.slane %v228_v29, 6  ;;  %v297_v41 = vcombine.low %v292_v33, %v296_v34  ;;  %v335_v51 = vrot.slane %v522_v39, %v602_v4  ;;  %v339_v62 = vrot.slane %v522_v39, %v605_v5 }
  0x11   : > { %v537_v14 = vunpack.c.l.bf16 %v536_v8  ;;  %v538_v15 = vunpack.c.h.bf16 %v536_v8  ;;  %v541_v26 = vunpack.c.l.bf16 %v543_v16  ;;  %v272_v40 = vrot.slane %v271_v32, 7  ;;  %v381_v8 = vld [vmem:[%s664_s2] sm:$0x3] }
  0x12   : > { %v298_v50 = vrot.slane %v297_v41, 6  ;;  %v323_v59 = vcombine.low %v318_v42, %v322_v43  ;;  %v361_v63 = vrot.slane %v525_v52, %v602_v4  ;;  %v542_v0 = vunpack.c.h.bf16 %v543_v16 }
  0x13   : > { %v189_v27 = vmul.f32 %v537_v14, %v187_v17  ;;  %v190_v35 = vmul.f32 %v538_v15, %v187_v17  ;;  %v205_v36 = vmul.f32 %v537_v14, %v203_v28  ;;  %v206_v37 = vmul.f32 %v538_v15, %v203_v28 }
  0x14   : > { %v231_v46 = vmul.f32 %v537_v14, %v229_v38  ;;  %v232_v47 = vmul.f32 %v538_v15, %v229_v38  ;;  %v256_v48 = vmul.f32 %v538_v15, %v254_v31  ;;  %v274_v49 = vmul.f32 %v538_v15, %v272_v40 }
  0x15   : > { %v509_v44 = vrot.slane %v205_v36, 9  ;;  %v510_v45 = vrot.slane %v206_v37, 9  ;;  %v300_v58 = vmul.f32 %v538_v15, %v298_v50  ;;  %v365_v2 = vrot.slane %v525_v52, %v605_v5 }
  0x16   : > { %v512_v55 = vrot.slane %v231_v46, 10  ;;  %v513_v56 = vrot.slane %v232_v47, 10  ;;  %v516_v57 = vrot.slane %v274_v49, 9  ;;  %v340_v7 = vcombine.low %v335_v51, %v339_v62 }
  0x17   : > { %v215_v53 = vadd.f32 %v509_v44, %v189_v27  ;;  %v216_v54 = vadd.f32 %v510_v45, %v190_v35  ;;  %v519_v6 = vrot.slane %v300_v58, 10  ;;  %v257_v9 = vmul.f32 %v541_v26, %v254_v31 }
  0x18   : > { %v366_v10 = vcombine.low %v361_v63, %v365_v2  ;;  %v275_v11 = vmul.f32 %v541_v26, %v272_v40  ;;  %v301_v12 = vmul.f32 %v541_v26, %v298_v50  ;;  %v325_v14 = vmul.f32 %v541_v26, %v323_v59 }
  0x19   : > { %v241_v60 = vadd.f32 %v512_v55, %v215_v53  ;;  %v242_v61 = vadd.f32 %v513_v56, %v216_v54  ;;  %v341_v15 = vrot.slane %v340_v7, 7  ;;  %v386_v16 = vrot.slane %v381_v8, %v602_v4 }
  0x1a   : > { %v367_v18 = vrot.slane %v366_v10, 6  ;;  %v517_v19 = vrot.slane %v275_v11, 9  ;;  %v520_v20 = vrot.slane %v301_v12, 10  ;;  %v390_v24 = vrot.slane %v381_v8, %v605_v5 }
  0x1b   : > { %v258_v3 = vadd.f32 %v256_v48, %v241_v60  ;;  %v259_v17 = vadd.f32 %v257_v9, %v242_v61  ;;  %v343_v22 = vmul.f32 %v541_v26, %v341_v15  ;;  %v344_v23 = vmul.f32 %v542_v0, %v341_v15 }
  0x1c   : > { %v326_v25 = vmul.f32 %v542_v0, %v323_v59  ;;  %v369_v27 = vmul.f32 %v541_v26, %v367_v18  ;;  %v370_v29 = vmul.f32 %v542_v0, %v367_v18  ;;  %v391_v36 = vcombine.low %v386_v16, %v390_v24 }
  0x1d   : > { %v284_v13 = vadd.f32 %v516_v57, %v258_v3  ;;  %v285_v28 = vadd.f32 %v517_v19, %v259_v17  ;;  %v523_v31 = vrot.slane %v343_v22, 9  ;;  %v524_v32 = vrot.slane %v344_v23, 9 }
  0x1e   : > { %v526_v33 = vrot.slane %v369_v27, 10  ;;  %v527_v37 = vrot.slane %v370_v29, 10  ;;  %v561_v39 = vmov 1966171168  }
  0x1f   : > { %v310_v21 = vadd.f32 %v519_v6, %v284_v13  ;;  %v311_v34 = vadd.f32 %v520_v20, %v285_v28  ;;  %v415_v40 = vunpack.c.l.s4 %v561_v39 }
  0x21   : > { %v327_v30 = vadd.f32 %v325_v14, %v310_v21  ;;  %v328_v4 = vadd.f32 %v326_v25, %v311_v34  ;;  %v416_v26 = vunpack.c.0.s8 %v415_v40 }
  0x23   : > { %v353_v35 = vadd.f32 %v523_v31, %v327_v30  ;;  %v354_v41 = vadd.f32 %v524_v32, %v328_v4  ;;  %v419_v48 = vsub.s32 %v416_v26, %v592_v1 }
  0x25   : > { %v379_v38 = vadd.f32 %v526_v33, %v353_v35  ;;  %v380_v5 = vadd.f32 %v527_v37, %v354_v41 }
  0x27   : > { %v393_v42 = vadd.f32 %v391_v36, %v379_v38  ;;  %v394_v44 = vadd.f32 %v391_v36, %v380_v5 }
  0x29   : > { %v395_v43 = vmax.f32 %v393_v42, 0.0  ;;  %v396_v46 = vmax.f32 %v394_v44, 0.0 }
  0x2b   : > { %v397_v45 = vmin.f32 %v395_v43, 6.0  ;;  %v398_v49 = vmin.f32 %v396_v46, 6.0 }
  0x2d   : > { %v401_v47 = vcombine.high %v397_v45, %v397_v45  ;;  %v402_v51 = vcombine.high %v398_v49, %v398_v49 }
  0x2f   : > { %v528_v50 = vpack.c.bf16 %v401_v47, %v397_v45  ;;  %v529_v53 = vpack.c.bf16 %v402_v51, %v398_v49 }
  0x31   : > { %v420_v52 = vrot.slane %v528_v50, %v419_v48  ;;  %v435_v54 = vrot.slane %v529_v53, %v419_v48 }
  0x33   : > { %530 = vst.sshfl [vmem:[%s168_s16] sm:$0x5 pattern:$0x73625140] %v420_v52 }
  0x34   : > { %531 = vst.sshfl [vmem:[%s168_s16 + $0x2] sm:$0x5 pattern:$0x73625140] %v435_v54 }
  0x35 PF: > { %s13_s12 = sadd.s32 1, %s559_s12  }
  0x36   : > { %p10_p4 = scmp.ge.s32.totalorder %s13_s12, 4  }
  0x38   :  { %12 = sbr.rel (!%p10_p4) target bundleno = 1 (0x1), region = 70 }

// kernel: _lambda_.53
= control target key start
LH: loop header
LB: loop body
LE: loop exit
PB: predicated region body
PF: predicated region fallthrough
CT: control target
= control target key end

     0   :  { %s354_s1 = inlined_call_operand.vmem [shape: bf16[256,128], index: 1, kind: input, shape index: {}]   ;;  %s355_s0 = inlined_call_operand.vmem [shape: bf16[8,256], index: 0, kind: input, shape index: {}]   ;;  %s356_s3 = inlined_call_operand.vmem [shape: bf16[8,128], index: 3, kind: input, shape index: {}]   ;;  %s357_s2 = inlined_call_operand.vmem [shape: f32[1,128], index: 2, kind: input, shape index: {}]   ;;  %s358_s4 = inlined_call_operand.vmem [shape: bf16[8,128], index: 4, kind: output, shape index: {}]  }
   0x1   :  { %v251_v0 = vld [vmem:[%s354_s1 + $0x40] sm:$0xff]   ;;  %v253_v2 = vld [vmem:[%s354_s1 + $0x48] sm:$0xff]   ;;  %v255_v4 = vld [vmem:[%s354_s1 + $0x50] sm:$0xff]  }
   0x2   :  { %v252_v1 = vld [vmem:[%s354_s1] sm:$0xff]   ;;  %229 = vmatprep.subr.bf16.mxu0 %v251_v0  ;;  %v254_v3 = vld [vmem:[%s354_s1 + $0x8] sm:$0xff]   ;;  %v256_v5 = vld [vmem:[%s354_s1 + $0x10] sm:$0xff]  }
   0x3   :  { %230 = vmatpush3.bf16.msra.mxu0 %v252_v1  ;;  %v257_v6 = vld [vmem:[%s354_s1 + $0x58] sm:$0xff]   ;;  %v259_v8 = vld [vmem:[%s354_s1 + $0x60] sm:$0xff]   ;;  %v261_v10 = vld [vmem:[%s354_s1 + $0x68] sm:$0xff]  }
   0x4   :  { %231 = vmatprep.subr.bf16.mxu0 %v253_v2  ;;  %v258_v7 = vld [vmem:[%s354_s1 + $0x18] sm:$0xff]   ;;  %v260_v9 = vld [vmem:[%s354_s1 + $0x20] sm:$0xff]   ;;  %v262_v13 = vld [vmem:[%s354_s1 + $0x28] sm:$0xff]  }
   0x5   :  { %v18_v11 = vld [vmem:[%s355_s0] sm:$0xff]  ;;  %v263_v14 = vld [vmem:[%s354_s1 + $0x70] sm:$0xff]   ;;  %v265_v16 = vld [vmem:[%s354_s1 + $0x78] sm:$0xff]  }
   0x6   :  { %v212_v12 = vcombine.high %v18_v11, %v18_v11  ;;  %v264_v15 = vld [vmem:[%s354_s1 + $0x30] sm:$0xff]   ;;  %v266_v17 = vld [vmem:[%s354_s1 + $0x38] sm:$0xff]   ;;  %v211_v18 = vcombine.low %v18_v11, %v18_v11  ;;  %v201_v19 = vld [vmem:[%s356_s3] sm:$0xf] }
   0x7   :  { %232 = vmatpush3.bf16.msra.mxu0 %v254_v3  ;;  %v210_v21 = vld [vmem:[%s357_s2] ss:$0 sm:$0xff]  ;;  %v202_v24 = vunpack.c.l.bf16 %v201_v19 }
   0x8   :  { %233 = vmatprep.subr.bf16.mxu0 %v255_v4  ;;  %193 = vmatprep.mubr.bf16.mxu0 %v212_v12 }
   0xb   :  { %234 = vmatpush3.bf16.msra.mxu0 %v256_v5 }
   0xc   :  { %235 = vmatprep.subr.bf16.mxu0 %v257_v6 }
   0xf   :  { %236 = vmatpush3.bf16.msra.mxu0 %v258_v7 }
  0x10   :  { %237 = vmatprep.subr.bf16.mxu0 %v259_v8 }
  0x13   :  { %238 = vmatpush3.bf16.msra.mxu0 %v260_v9 }
  0x14   :  { %239 = vmatprep.subr.bf16.mxu0 %v261_v10 }
  0x17   :  { %240 = vmatpush3.bf16.msra.mxu0 %v262_v13 }
  0x18   :  { %241 = vmatprep.subr.bf16.mxu0 %v263_v14 }
  0x1b   :  { %242 = vmatpush3.bf16.msra.mxu0 %v264_v15 }
  0x1c   :  { %243 = vmatprep.subr.bf16.mxu0 %v265_v16 }
  0x1f   :  { %244 = vmatpush3.bf16.msra.mxu0 %v266_v17 }
  0x22   :  { %194 = vmatmul.mubr.bf16.vlgmr.msra.gmra.mrb[0].mxu0 %v211_v18 }
  0xf5   :  { %v245_v20 = vpop.f32.mrb[0].mxu0 }
  0xf6   :  { %v246_v22 = vpop.f32.mrb[1].mxu0 }
  0xf7   :  { %v247_v23 = vadd.f32 %v246_v22, %v245_v20  ;;  %v248_v25 = vpop.f32.mrb[2].mxu0 }
  0xf8   :  { %v249_v26 = vpop.f32.mrb[3].mxu0 }
  0xf9   :  { %v196_v27 = vadd.f32 %v247_v23, %v210_v21 }
  0xfb   :  { %v203_v28 = vadd.f32 %v202_v24, %v196_v27 }
  0xfd   :  { %v204_v29 = vpack.c.bf16 %v203_v28, %v203_v28 }
  0xff   :  { %205 = vst [vmem:[%s358_s4] sm:$0xf] %v204_v29 }

// kernel: _lambda_.58
= control target key start
LH: loop header
LB: loop body
LE: loop exit
PB: predicated region body
PF: predicated region fallthrough
CT: control target
= control target key end

     0   :  { %s475_s12 = smov 0   ;;  %s532_s0 = inlined_call_operand.vmem [shape: bf16[2,2,2,1024], index: 0, kind: input, shape index: {}]   ;;  %s533_s1 = inlined_call_operand.vmem [shape: f32[9,256], index: 1, kind: input, shape index: {}]   ;;  %s534_s2 = inlined_call_operand.vmem [shape: f32[1,256], index: 2, kind: input, shape index: {}]   ;;  %s535_s3 = inlined_call_operand.vmem [shape: bf16[2,1,1,256], index: 3, kind: output, shape index: {}]  }
   0x1 LB: > { %s414_s13 = sadd.s32 4294967295, %s451_s12   ;;  %p418_p0 = scmp.ge.s32.totalorder %s451_s12, 1  ;;  %s451_s12 = sphi %s475_s12, %s13_s12  }
   0x2   : > { %p136_p1 = scmp.lt.s32.totalorder %s451_s12, 3 }
   0x4   : > { %p137_p2 = pnand %p418_p0, %p136_p1 }
   0x5   : > { %p158_p3 = scmp.lt.s32.totalorder (!%p137_p2), %s414_s13, 1  ;;  %v176_v0 = vlaneseq (!%p137_p2)  ;;  %v453_v1 = vmov (!%p137_p2), 857870592   ;;  %v171_v4 = vld [vmem:[%s533_s1] ss:$8 sm:$0x3] (!%p137_p2) }
   0x6   : > { %140 = sbr.rel (%p137_p2) target bundleno = 55 (0x37), region = 32  ;;  %v174_v2 = vunpack.c.l.s4 (!%p137_p2), %v453_v1  ;;  %v421_v6 = vld [vmem:[%s533_s1 + $0x1] ss:$8 sm:$0x3] (!%p137_p2)  ;;  %v454_v54 = vmov (!%p137_p2), 1966171168  }
   0x7   : > { %v485_v3 = vshrl.u32 (!%p137_p2), %v176_v0, 7  ;;  %v422_v8 = vld [vmem:[%s533_s1 + $0x2] ss:$8 sm:$0x3] (!%p137_p2)  ;;  %v307_v48 = vld [vmem:[%s534_s2] sm:$0x3] (!%p137_p2)  ;;  %v337_v55 = vunpack.c.l.s4 (!%p137_p2), %v454_v54 }
   0x8   : > { %v175_v5 = vunpack.c.0.s8 (!%p137_p2), %v174_v2  ;;  %v424_v9 = vld [vmem:[%s533_s1 + $0x3] ss:$8 sm:$0x3] (!%p137_p2)  ;;  %v426_v11 = vld [vmem:[%s533_s1 + $0x5] ss:$8 sm:$0x3] (!%p137_p2) }
   0x9   : > { %v425_v17 = vld [vmem:[%s533_s1 + $0x4] ss:$8 sm:$0x3] (!%p137_p2)  ;;  %v428_v27 = vld [vmem:[%s533_s1 + $0x6] ss:$8 sm:$0x3] (!%p137_p2)  ;;  %v338_v60 = vunpack.c.0.s8 (!%p137_p2), %v337_v55 }
   0xa   : > { %v178_v7 = vsub.s32 (!%p137_p2), %v175_v5, %v485_v3  ;;  %v430_v29 = vld [vmem:[%s533_s1 + $0x10] ss:$8 sm:$0x3] (!%p137_p2)  ;;  %v429_v34 = vld [vmem:[%s533_s1 + $0x7] ss:$8 sm:$0x3] (!%p137_p2) }
   0xb   : > { %v323_v58 = vsub.s32 (!%p137_p2), 0, %v485_v3  ;;  %v327_v59 = vsub.s32 (!%p137_p2), 2, %v485_v3  ;;  %vm351_vm0 = vcmask (!%p137_p2), 1040384   ;;  %vm352_vm1 = vsmask.f32 (!%p137_p2), 256 }
   0xc   : > { %v179_v14 = vrot.slane (!%p137_p2), %v171_v4, %v178_v7  ;;  %v194_v15 = vrot.slane (!%p137_p2), %v421_v6, %v178_v7  ;;  %v207_v16 = vrot.slane (!%p137_p2), %v422_v8, %v178_v7  ;;  %v224_v20 = vrot.slane (!%p137_p2), %v424_v9, %v178_v7  ;;  %vm353_vm4 = vmand (!%p137_p2), %vm351_vm0, %vm352_vm1 }
   0xd   : > { %s537_s13 = smov (!%p158_p3, %s414_s13), 1  ;;  %v253_v21 = vrot.slane %v426_v11, %v178_v7  ;;  %v240_v26 = vrot.slane %v425_v17, %v178_v7  ;;  %v270_v37 = vrot.slane %v428_v27, %v178_v7  ;;  %v299_v38 = vrot.slane %v430_v29, %v178_v7 }
   0xe   : > { %s419_s16 = sshll.u32 %s537_s13, 4  ;;  %v286_v42 = vrot.slane %v429_v34, %v178_v7  ;;  %v315_v52 = vrot.slane %v307_v48, %v178_v7  ;;  %s420_s11 = sshll.u32 %s537_s13, 1  ;;  %vm354_vm2 = vcmask 1041409   ;;  %vm355_vm3 = vsmask.f32 1280 }
   0xf   : > { %s161_s21 = scalar_lea.vmem %s532_s0, %s419_s16  ;;  %v341_v0 = vsub.s32 %v338_v60, %v485_v3  ;;  %s165_s16 = scalar_lea.vmem %s535_s3, %s420_s11  ;;  %vm356_vm5 = vmand %vm354_vm2, %vm355_vm3 }
  0x10   : > { %v166_v10 = vld [vmem:[%s161_s21] sm:$0xff]  ;;  %v167_v22 = vld [vmem:[%s161_s21 + $0x8] sm:$0xf]  ;;  %vm357_vm6 = vmor %vm356_vm5, %vm353_vm4 }
  0x11   : > { %v168_v12 = vunpack.c.l.bf16 %v166_v10  ;;  %v169_v13 = vunpack.c.h.bf16 %v166_v10  ;;  %v170_v30 = vunpack.c.l.bf16 %v167_v22  ;;  %v358_v4 = vld [vmem:[%s165_s16] sm:$0x3] }
  0x13   : > { %v181_v18 = vmul.f32 %v179_v14, %v168_v12  ;;  %v185_v19 = vrot.slane %v168_v12, 4  ;;  %v209_v23 = vmul.f32 %v207_v16, %v168_v12  ;;  %v231_v25 = vrot.slane %v169_v13, 4 }
  0x14   : > { %v226_v32 = vmul.f32 %v224_v20, %v169_v13  ;;  %v255_v33 = vmul.f32 %v253_v21, %v169_v13  ;;  %v277_v41 = vrot.slane %v170_v30, 4  ;;  %v272_v44 = vmul.f32 %v270_v37, %v170_v30 }
  0x15   : > { %v196_v24 = vmul.f32 %v194_v15, %v185_v19  ;;  %v423_v28 = vrot.slane %v209_v23, 9  ;;  %v242_v36 = vmul.f32 %v240_v26, %v231_v25  ;;  %v301_v45 = vmul.f32 %v299_v38, %v170_v30 }
  0x16   : > { %v427_v40 = vrot.slane %v255_v33, 9  ;;  %v288_v47 = vmul.f32 %v286_v42, %v277_v41 }
  0x17   : > { %v197_v31 = vadd.f32 %v196_v24, %v181_v18  ;;  %v431_v50 = vrot.slane %v301_v45, 9 }
  0x19   : > { %v214_v35 = vadd.f32 %v423_v28, %v197_v31 }
  0x1b   : > { %v227_v39 = vadd.f32 %v226_v32, %v214_v35 }
  0x1d   : > { %v243_v43 = vadd.f32 %v242_v36, %v227_v39 }
  0x1f   : > { %v260_v46 = vadd.f32 %v427_v40, %v243_v43 }
  0x21   : > { %v273_v49 = vadd.f32 %v272_v44, %v260_v46 }
  0x23   : > { %v289_v51 = vadd.f32 %v288_v47, %v273_v49 }
  0x25   : > { %v306_v53 = vadd.f32 %v431_v50, %v289_v51 }
  0x27   : > { %v317_v56 = vadd.f32 %v315_v52, %v306_v53 }
  0x29   : > { %v318_v57 = vmax.f32 %v317_v56, 0.0 }
  0x2b   : > { %v319_v61 = vmin.f32 %v318_v57, 6.0 }
  0x2d   : > { %v324_v62 = vrot.slane %v319_v61, %v323_v58  ;;  %v328_v63 = vrot.slane %v319_v61, %v327_v59 }
  0x2f   : > { %v432_v1 = vpack.c.bf16 %v328_v63, %v324_v62 }
  0x31   : > { %v342_v2 = vrot.slane %v432_v1, %v341_v0 }
  0x33   : > { %v349_v5 = vrot.slane %v342_v2, %v341_v0 }
  0x35   : > { %v359_v6 = vsel %vm357_vm6, %v349_v5, %v358_v4 }
  0x36   : > { %360 = vst [vmem:[%s165_s16] sm:$0x3] %v359_v6 }
  0x37 PF: > { %s13_s12 = sadd.s32 1, %s451_s12  }
  0x38   : > { %p10_p4 = scmp.ge.s32.totalorder %s13_s12, 4  }
  0x3a   :  { %12 = sbr.rel (!%p10_p4) target bundleno = 1 (0x1), region = 70 }

// kernel: _lambda_.60
= control target key start
LH: loop header
LB: loop body
LE: loop exit
PB: predicated region body
PF: predicated region fallthrough
CT: control target
= control target key end

     0   :  { %v391_v0 = vmov 0.0   ;;  %vm392_vm0 = vmmov 0   ;;  %v393_v3 = vmov 0   ;;  %v50_v27 = vlaneseq  ;;  %s498_s1 = inlined_call_operand.vmem [shape: bf16[128,384], index: 1, kind: input, shape index: {}]   ;;  %s499_s0 = inlined_call_operand.vmem [shape: bf16[8,128], index: 0, kind: input, shape index: {}]   ;;  %s500_s2 = inlined_call_operand.vmem [shape: f32[1,384], index: 2, kind: input, shape index: {}]   ;;  %s501_s3 = inlined_call_operand.vmem [shape: bf16[8,384], index: 3, kind: output, shape index: {}]  }
   0x1   :  { %336 = vmatprep.subr.bf16.mxu1 %v391_v0  ;;  %v359_v1 = vld [vmem:[%s498_s1 + $0x4] ss:$12 sps:$4 sm:$0xff]   ;;  %352 = vmatprep.mubr.msk.bf16.mxu1 %vm392_vm0, %v391_v0  ;;  %v361_v2 = vld [vmem:[%s498_s1 + $0x8] ss:$12 sps:$4 sm:$0xff]   ;;  %v362_v4 = vld [vmem:[%s498_s1] ss:$12 sps:$4 sm:$0xff]  }
   0x2   :  { %225 = vmatprep.mubr.bf16.mxu0 %v393_v3  ;;  %193 = vmatprep.subr.bf16.mxu0 %v359_v1  ;;  %v363_v5 = vld [vmem:[%s498_s1 + $0x1c] ss:$12 sps:$4 sm:$0xff]   ;;  %v365_v6 = vld [vmem:[%s498_s1 + $0x20] ss:$12 sps:$4 sm:$0xff]   ;;  %v366_v7 = vld [vmem:[%s498_s1 + $0x18] ss:$12 sps:$4 sm:$0xff]  }
   0x3   :  { %337 = vmatpush3.bf16.msra.mxu1 %v361_v2  ;;  %194 = vmatpush1.bf16.msra.mxu0 %v362_v4  ;;  %v367_v8 = vld [vmem:[%s498_s1 + $0x34] ss:$12 sps:$4 sm:$0xff]   ;;  %v369_v9 = vld [vmem:[%s498_s1 + $0x38] ss:$12 sps:$4 sm:$0xff]   ;;  %v370_v10 = vld [vmem:[%s498_s1 + $0x30] ss:$12 sps:$4 sm:$0xff]  }
   0x4   :  { %338 = vmatprep.subr.bf16.mxu1 %v391_v0  ;;  %195 = vmatprep.subr.bf16.mxu0 %v363_v5  ;;  %v371_v11 = vld [vmem:[%s498_s1 + $0x4c] ss:$12 sps:$4 sm:$0xff]   ;;  %v373_v12 = vld [vmem:[%s498_s1 + $0x50] ss:$12 sps:$4 sm:$0xff]   ;;  %v374_v13 = vld [vmem:[%s498_s1 + $0x48] ss:$12 sps:$4 sm:$0xff]  }
   0x5   :  { %v375_v14 = vld [vmem:[%s498_s1 + $0x64] ss:$12 sps:$4 sm:$0xff]   ;;  %v377_v15 = vld [vmem:[%s498_s1 + $0x68] ss:$12 sps:$4 sm:$0xff]   ;;  %v378_v16 = vld [vmem:[%s498_s1 + $0x60] ss:$12 sps:$4 sm:$0xff]  }
   0x6   :  { %v379_v17 = vld [vmem:[%s498_s1 + $0x7c] ss:$12 sps:$4 sm:$0xff]   ;;  %v381_v18 = vld [vmem:[%s498_s1 + $0x80] ss:$12 sps:$4 sm:$0xff]   ;;  %v382_v19 = vld [vmem:[%s498_s1 + $0x78] ss:$12 sps:$4 sm:$0xff]  }
   0x7   :  { %339 = vmatpush3.bf16.msra.mxu1 %v365_v6  ;;  %196 = vmatpush1.bf16.msra.mxu0 %v366_v7  ;;  %v383_v20 = vld [vmem:[%s498_s1 + $0x94] ss:$12 sps:$4 sm:$0xff]   ;;  %v385_v21 = vld [vmem:[%s498_s1 + $0x98] ss:$12 sps:$4 sm:$0xff]   ;;  %v386_v22 = vld [vmem:[%s498_s1 + $0x90] ss:$12 sps:$4 sm:$0xff]  }
   0x8   :  { %340 = vmatprep.subr.bf16.mxu1 %v391_v0  ;;  %197 = vmatprep.subr.bf16.mxu0 %v367_v8  ;;  %v387_v23 = vld [vmem:[%s498_s1 + $0xac] ss:$12 sps:$4 sm:$0xff]   ;;  %v389_v24 = vld [vmem:[%s498_s1 + $0xb0] ss:$12 sps:$4 sm:$0xff]   ;;  %v390_v25 = vld [vmem:[%s498_s1 + $0xa8] ss:$12 sps:$4 sm:$0xff]  }
   0x9   :  { %v15_v26 = vld [vmem:[%s499_s0] sm:$0xf]  ;;  %v51_v28 = vshrl.u32 %v50_v27, 7 }
   0xa   :  { %v48_v30 = vld [vmem:[%s500_s2] sm:$0x7] }
   0xb   :  { %341 = vmatpush3.bf16.msra.mxu1 %v369_v9  ;;  %198 = vmatpush1.bf16.msra.mxu0 %v370_v10  ;;  %v60_v29 = vsub.s32 2, %v51_v28  ;;  %v52_v31 = vsub.s32 0, %v51_v28  ;;  %v56_v32 = vsub.s32 1, %v51_v28 }
   0xc   :  { %342 = vmatprep.subr.bf16.mxu1 %v391_v0  ;;  %199 = vmatprep.subr.bf16.mxu0 %v371_v11 }
   0xd   :  { %v61_v33 = vrot.slane %v48_v30, %v60_v29  ;;  %v53_v34 = vrot.slane %v48_v30, %v52_v31  ;;  %v57_v35 = vrot.slane %v48_v30, %v56_v32 }
   0xf   :  { %343 = vmatpush3.bf16.msra.mxu1 %v373_v12  ;;  %200 = vmatpush1.bf16.msra.mxu0 %v374_v13 }
  0x10   :  { %344 = vmatprep.subr.bf16.mxu1 %v391_v0  ;;  %201 = vmatprep.subr.bf16.mxu0 %v375_v14 }
  0x13   :  { %345 = vmatpush3.bf16.msra.mxu1 %v377_v15  ;;  %202 = vmatpush1.bf16.msra.mxu0 %v378_v16 }
  0x14   :  { %346 = vmatprep.subr.bf16.mxu1 %v391_v0  ;;  %203 = vmatprep.subr.bf16.mxu0 %v379_v17 }
  0x17   :  { %347 = vmatpush3.bf16.msra.mxu1 %v381_v18  ;;  %204 = vmatpush1.bf16.msra.mxu0 %v382_v19 }
  0x18   :  { %348 = vmatprep.subr.bf16.mxu1 %v391_v0  ;;  %205 = vmatprep.subr.bf16.mxu0 %v383_v20 }
  0x1b   :  { %349 = vmatpush3.bf16.msra.mxu1 %v385_v21  ;;  %206 = vmatpush1.bf16.msra.mxu0 %v386_v22 }
  0x1c   :  { %350 = vmatprep.subr.bf16.mxu1 %v391_v0  ;;  %207 = vmatprep.subr.bf16.mxu0 %v387_v23 }
  0x1f   :  { %351 = vmatpush3.bf16.msra.mxu1 %v389_v24  ;;  %208 = vmatpush1.bf16.msra.mxu0 %v390_v25 }
  0x22   :  { %353 = vmatmul.mubr.bf16.vlgmr.msra.gmra.mrb[0].mxu1 %v15_v26  ;;  %226 = vmatmul.mubr.bf16.vlgmr.msra.gmra.mrb[0].mxu0 %v15_v26 }
  0xf5   :  { %v268_v36 = vpop.f32.mrb[0].mxu1  ;;  %v227_v38 = vpop.f32.mrb[0].mxu0 }
  0xf6   :  { %v269_v37 = vadd.f32 %v268_v36, %v61_v33  ;;  %v354_v39 = vpop.f32.mrb[1].mxu1  ;;  %v228_v40 = vadd.f32 %v227_v38, %v53_v34  ;;  %v229_v41 = vpop.f32.mrb[1].mxu0 }
  0xf7   :  { %v271_v42 = vpop.f32.mrb[2].mxu1  ;;  %v230_v44 = vadd.f32 %v229_v41, %v57_v35  ;;  %v231_v45 = vpop.f32.mrb[2].mxu0 }
  0xf8   :  { %v276_v43 = vmax.f32 %v269_v37, 0.0  ;;  %v355_v46 = vpop.f32.mrb[3].mxu1  ;;  %v274_v47 = vmax.f32 %v228_v40, 0.0  ;;  %v232_v48 = vpop.f32.mrb[3].mxu0 }
  0xf9   :  { %v275_v50 = vmax.f32 %v230_v44, 0.0 }
  0xfa   :  { %v279_v49 = vmin.f32 %v276_v43, 6.0  ;;  %v277_v51 = vmin.f32 %v274_v47, 6.0 }
  0xfb   :  { %v278_v53 = vmin.f32 %v275_v50, 6.0 }
  0xfc   :  { %v326_v52 = vpack.c.bf16 %v279_v49, %v279_v49 }
  0xfd   :  { %v325_v54 = vpack.c.bf16 %v278_v53, %v277_v51 }
  0xfe   :  { %294 = vst [vmem:[%s501_s3 + $0x8] sm:$0xf] %v326_v52 }
  0xff   :  { %293 = vst [vmem:[%s501_s3] sm:$0xff] %v325_v54 }

// kernel: _lambda_.61
= control target key start
LH: loop header
LB: loop body
LE: loop exit
PB: predicated region body
PF: predicated region fallthrough
CT: control target
= control target key end

     0   :  { %s641_s12 = smov 0   ;;  %s729_s0 = inlined_call_operand.vmem [shape: bf16[2,3,3,384], index: 0, kind: input, shape index: {}]   ;;  %s730_s1 = inlined_call_operand.vmem [shape: f32[9,384], index: 1, kind: input, shape index: {}]   ;;  %s731_s2 = inlined_call_operand.vmem [shape: f32[1,384], index: 2, kind: input, shape index: {}]   ;;  %s732_s3 = inlined_call_operand.vmem [shape: bf16[2,1,1,384], index: 3, kind: output, shape index: {}]  }
   0x1 LB: > { %s568_s13 = sadd.s32 4294967295, %s616_s12   ;;  %p572_p0 = scmp.ge.s32.totalorder %s616_s12, 1  ;;  %s616_s12 = sphi %s641_s12, %s13_s12  }
   0x2   : > { %p137_p1 = scmp.lt.s32.totalorder %s616_s12, 3 }
   0x4   : > { %p138_p2 = pnand %p572_p0, %p137_p1 }
   0x5   : > { %p160_p3 = scmp.lt.s32.totalorder (!%p138_p2), %s568_s13, 1  ;;  %v183_v0 = vlaneseq (!%p138_p2)  ;;  %v618_v1 = vmov (!%p138_p2), 286326784   ;;  %v178_v3 = vld [vmem:[%s730_s1] ss:$8 sm:$0x7] (!%p138_p2)  ;;  %vm501_vm0 = vcmask (!%p138_p2), 1040384  }
   0x6   : > { %141 = sbr.rel (%p138_p2) target bundleno = 59 (0x3b), region = 32  ;;  %v181_v2 = vunpack.c.l.s4 (!%p138_p2), %v618_v1  ;;  %v619_v5 = vmov (!%p138_p2), 858989090   ;;  %v574_v8 = vld [vmem:[%s730_s1 + $0x1] ss:$8 sm:$0x7] (!%p138_p2) }
   0x7   : > { %v654_v4 = vshrl.u32 (!%p138_p2), %v183_v0, 7  ;;  %v188_v6 = vunpack.c.l.s4 (!%p138_p2), %v619_v5  ;;  %v577_v9 = vld [vmem:[%s730_s1 + $0x2] ss:$8 sm:$0x7] (!%p138_p2)  ;;  %vm502_vm1 = vsmask.f32 (!%p138_p2), 256 }
   0x8   : > { %v182_v7 = vunpack.c.0.s8 (!%p138_p2), %v181_v2  ;;  %v580_v11 = vld [vmem:[%s730_s1 + $0x3] ss:$8 sm:$0x7] (!%p138_p2)  ;;  %v581_v29 = vld [vmem:[%s730_s1 + $0x4] ss:$8 sm:$0x7] (!%p138_p2)  ;;  %vm716_vm4 = vmand (!%p138_p2), %vm501_vm0, %vm502_vm1 }
   0x9   : > { %v189_v10 = vunpack.c.0.s8 (!%p138_p2), %v188_v6  ;;  %v584_v34 = vld [vmem:[%s730_s1 + $0x5] ss:$8 sm:$0x7] (!%p138_p2)  ;;  %v587_v43 = vld [vmem:[%s730_s1 + $0x6] ss:$8 sm:$0x7] (!%p138_p2) }
   0xa   : > { %v667_v12 = vsub.s32 (!%p138_p2), %v182_v7, %v654_v4  ;;  %v588_v56 = vld [vmem:[%s730_s1 + $0x7] ss:$8 sm:$0x7] (!%p138_p2)  ;;  %v591_v61 = vld [vmem:[%s730_s1 + $0x18] ss:$8 sm:$0x7] (!%p138_p2) }
   0xb   : > { %v673_v13 = vsub.s32 (!%p138_p2), %v189_v10, %v654_v4  ;;  %vm504_vm2 = vcmask (!%p138_p2), 1041409   ;;  %vm505_vm3 = vsmask.f32 (!%p138_p2), 1280  ;;  %vm508_vm6 = vcmask (!%p138_p2), 1042434  }
   0xc   : > { %v186_v17 = vrot.slane (!%p138_p2), %v178_v3, %v667_v12  ;;  %v207_v18 = vrot.slane (!%p138_p2), %v574_v8, %v667_v12  ;;  %v238_v19 = vrot.slane (!%p138_p2), %v577_v9, %v667_v12  ;;  %v269_v20 = vrot.slane (!%p138_p2), %v580_v11, %v667_v12  ;;  %vm506_vm5 = vmand (!%p138_p2), %vm504_vm2, %vm505_vm3 }
   0xd   : > { %s736_s13 = smov (!%p160_p3, %s568_s13), 1  ;;  %v193_v27 = vrot.slane %v178_v3, %v673_v13  ;;  %v214_v28 = vrot.slane %v574_v8, %v673_v13  ;;  %v245_v32 = vrot.slane %v577_v9, %v673_v13  ;;  %v276_v37 = vrot.slane %v580_v11, %v673_v13  ;;  %vm507_vm8 = vmor %vm506_vm5, %vm716_vm4 }
   0xe   : > { %s597_s20 = smul.u32 18, %s736_s13  ;;  %v292_v42 = vrot.slane %v581_v29, %v667_v12  ;;  %v299_v46 = vrot.slane %v581_v29, %v673_v13  ;;  %v323_v47 = vrot.slane %v584_v34, %v667_v12  ;;  %v330_v51 = vrot.slane %v584_v34, %v673_v13 }
   0xf   : > { %v354_v55 = vrot.slane %v587_v43, %v667_v12  ;;  %v361_v60 = vrot.slane %v587_v43, %v673_v13  ;;  %v377_v3 = vrot.slane %v588_v56, %v667_v12  ;;  %v384_v6 = vrot.slane %v588_v56, %v673_v13  ;;  %s598_s11 = smul.u32 3, %s736_s13 }
  0x10   : > { %s164_s25 = scalar_lea.vmem %s729_s0, %s597_s20  ;;  %v408_v7 = vrot.slane %v591_v61, %v667_v12  ;;  %v415_v8 = vrot.slane %v591_v61, %v673_v13  ;;  %vm509_vm7 = vsmask.f32 2304 }
  0x11   : > { %v169_v14 = vld [vmem:[%s164_s25] sm:$0x3f]  ;;  %v170_v15 = vld [vmem:[%s164_s25 + $0x6] sm:$0x3f]  ;;  %v171_v16 = vld [vmem:[%s164_s25 + $0xc] sm:$0x3f]  ;;  %s168_s16 = scalar_lea.vmem %s732_s3, %s598_s11 }
  0x12   : > { %v172_v21 = vunpack.c.l.bf16 %v169_v14  ;;  %v173_v22 = vunpack.c.h.bf16 %v169_v14  ;;  %v174_v23 = vunpack.c.l.bf16 %v170_v15  ;;  %v175_v24 = vunpack.c.h.bf16 %v170_v15  ;;  %vm510_vm9 = vmand %vm508_vm6, %vm509_vm7 }
  0x13   : > { %v176_v25 = vunpack.c.l.bf16 %v171_v16  ;;  %v177_v26 = vunpack.c.h.bf16 %v171_v16  ;;  %vm511_vm10 = vmor %vm510_vm9, %vm507_vm8 }
  0x14   : > { %v196_v30 = vmul.f32 %v186_v17, %v172_v21  ;;  %v217_v31 = vmul.f32 %v207_v18, %v172_v21  ;;  %v248_v33 = vmul.f32 %v238_v19, %v172_v21  ;;  %v197_v35 = vmul.f32 %v193_v27, %v173_v22 }
  0x15   : > { %v218_v36 = vmul.f32 %v214_v28, %v173_v22  ;;  %v279_v38 = vmul.f32 %v269_v20, %v174_v23  ;;  %v249_v40 = vmul.f32 %v245_v32, %v173_v22  ;;  %v280_v45 = vmul.f32 %v276_v37, %v175_v24 }
  0x16   : > { %v575_v39 = vrot.slane %v217_v31, 9  ;;  %v578_v41 = vrot.slane %v248_v33, 10  ;;  %v302_v50 = vmul.f32 %v292_v42, %v174_v23  ;;  %v303_v53 = vmul.f32 %v299_v46, %v175_v24 }
  0x17   : > { %v576_v44 = vrot.slane %v218_v36, 9  ;;  %v579_v49 = vrot.slane %v249_v40, 10  ;;  %v333_v54 = vmul.f32 %v323_v47, %v174_v23  ;;  %v334_v59 = vmul.f32 %v330_v51, %v175_v24  ;;  %v430_v23 = vld [vmem:[%s731_s2] sm:$0x7] }
  0x18   : > { %v227_v48 = vadd.f32 %v575_v39, %v196_v30  ;;  %v582_v58 = vrot.slane %v302_v50, 9  ;;  %v583_v63 = vrot.slane %v303_v53, 9  ;;  %v364_v10 = vmul.f32 %v354_v55, %v176_v25 }
  0x19   : > { %v228_v52 = vadd.f32 %v576_v44, %v197_v35  ;;  %v585_v1 = vrot.slane %v333_v54, 10  ;;  %v586_v2 = vrot.slane %v334_v59, 10  ;;  %v365_v11 = vmul.f32 %v361_v60, %v177_v26 }
  0x1a   : > { %v258_v57 = vadd.f32 %v578_v41, %v227_v48  ;;  %v387_v14 = vmul.f32 %v377_v3, %v176_v25  ;;  %v388_v16 = vmul.f32 %v384_v6, %v177_v26  ;;  %v418_v17 = vmul.f32 %v408_v7, %v176_v25 }
  0x1b   : > { %v259_v62 = vadd.f32 %v579_v49, %v228_v52  ;;  %v419_v18 = vmul.f32 %v415_v8, %v177_v26  ;;  %v438_v31 = vrot.slane %v430_v23, %v667_v12  ;;  %v445_v33 = vrot.slane %v430_v23, %v673_v13  ;;  %v512_v52 = vld [vmem:[%s168_s16] sm:$0x7] }
  0x1c   : > { %v281_v0 = vadd.f32 %v279_v38, %v258_v57  ;;  %v589_v20 = vrot.slane %v387_v14, 9  ;;  %v590_v22 = vrot.slane %v388_v16, 9  ;;  %v592_v27 = vrot.slane %v418_v17, 10 }
  0x1d   : > { %v282_v5 = vadd.f32 %v280_v45, %v259_v62  ;;  %v593_v29 = vrot.slane %v419_v18, 10  ;;  %v620_v26 = vmov 1966171168   ;;  %v458_v39 = vsub.s32 0, %v654_v4 }
  0x1e   : > { %v312_v9 = vadd.f32 %v582_v58, %v281_v0  ;;  %v479_v34 = vunpack.c.l.s4 %v620_v26  ;;  %v462_v40 = vsub.s32 4, %v654_v4 }
  0x1f   : > { %v313_v15 = vadd.f32 %v583_v63, %v282_v5 }
  0x20   : > { %v343_v19 = vadd.f32 %v585_v1, %v312_v9  ;;  %v480_v41 = vunpack.c.0.s8 %v479_v34 }
  0x21   : > { %v344_v21 = vadd.f32 %v586_v2, %v313_v15 }
  0x22   : > { %v366_v24 = vadd.f32 %v364_v10, %v343_v19  ;;  %v483_v45 = vsub.s32 %v480_v41, %v654_v4 }
  0x23   : > { %v367_v28 = vadd.f32 %v365_v11, %v344_v21 }
  0x24   : > { %v397_v30 = vadd.f32 %v589_v20, %v366_v24 }
  0x25   : > { %v398_v32 = vadd.f32 %v590_v22, %v367_v28 }
  0x26   : > { %v428_v25 = vadd.f32 %v592_v27, %v397_v30 }
  0x27   : > { %v429_v35 = vadd.f32 %v593_v29, %v398_v32 }
  0x28   : > { %v448_v36 = vadd.f32 %v438_v31, %v428_v25 }
  0x29   : > { %v449_v37 = vadd.f32 %v445_v33, %v429_v35 }
  0x2a   : > { %v450_v38 = vmax.f32 %v448_v36, 0.0 }
  0x2b   : > { %v451_v42 = vmax.f32 %v449_v37, 0.0 }
  0x2c   : > { %v452_v12 = vmin.f32 %v450_v38, 6.0 }
  0x2d   : > { %v453_v13 = vmin.f32 %v451_v42, 6.0 }
  0x2e   : > { %v459_v43 = vrot.slane %v452_v12, %v458_v39  ;;  %v463_v44 = vrot.slane %v452_v12, %v462_v40 }
  0x2f   : > { %v467_v47 = vrot.slane %v453_v13, %v458_v39 }
  0x30   : > { %v594_v48 = vpack.c.bf16 %v463_v44, %v459_v43 }
  0x31   : > { %v473_v49 = vpack.c.bf16 %v467_v47, %v467_v47 }
  0x32   : > { %v484_v50 = vrot.slane %v594_v48, %v483_v45 }
  0x33   : > { %v491_v4 = vrot.slane %v473_v49, %v483_v45 }
  0x35   : > { %v492_v51 = vcombine.low %v484_v50, %v491_v4 }
  0x37   : > { %v499_v53 = vrot.slane %v492_v51, %v483_v45 }
  0x39   : > { %v513_v54 = vsel %vm511_vm10, %v499_v53, %v512_v52 }
  0x3a   : > { %514 = vst [vmem:[%s168_s16] sm:$0x7] %v513_v54 }
  0x3b PF: > { %s13_s12 = sadd.s32 1, %s616_s12  }
  0x3c   : > { %p10_p4 = scmp.ge.s32.totalorder %s13_s12, 4  }
  0x3e   :  { %12 = sbr.rel (!%p10_p4) target bundleno = 1 (0x1), region = 70 }

// kernel: _lambda_.62
= control target key start
LH: loop header
LB: loop body
LE: loop exit
PB: predicated region body
PF: predicated region fallthrough
CT: control target
= control target key end

     0   :  { %v427_v1 = vmov 0.0   ;;  %vm428_vm0 = vmmov 0   ;;  %s541_s1 = inlined_call_operand.vmem [shape: bf16[384,128], index: 1, kind: input, shape index: {}]   ;;  %s542_s0 = inlined_call_operand.vmem [shape: bf16[8,384], index: 0, kind: input, shape index: {}]   ;;  %s543_s2 = inlined_call_operand.vmem [shape: f32[1,128], index: 2, kind: input, shape index: {}]   ;;  %s544_s3 = inlined_call_operand.vmem [shape: bf16[8,128], index: 3, kind: input, shape index: {}]   ;;  %s545_s4 = inlined_call_operand.vmem [shape: bf16[8,128], index: 4, kind: output, shape index: {}]  }
   0x1   :  { %v400_v0 = vld [vmem:[%s541_s1 + $0x40] sm:$0xff]   ;;  %378 = vmatprep.subr.bf16.mxu1 %v427_v1  ;;  %394 = vmatprep.mubr.msk.bf16.mxu1 %vm428_vm0, %v427_v1  ;;  %v403_v4 = vld [vmem:[%s541_s1 + $0x48] sm:$0xff]   ;;  %v406_v7 = vld [vmem:[%s541_s1 + $0x50] sm:$0xff]  }
   0x2   :  { %v401_v2 = vld [vmem:[%s541_s1] sm:$0xff]   ;;  %347 = vmatprep.subr.bf16.mxu0 %v400_v0  ;;  %v404_v5 = vld [vmem:[%s541_s1 + $0x8] sm:$0xff]   ;;  %v407_v8 = vld [vmem:[%s541_s1 + $0x10] sm:$0xff]  }
   0x3   :  { %v402_v3 = vld [vmem:[%s541_s1 + $0x80] sm:$0xff]   ;;  %348 = vmatpush3.bf16.msra.mxu0 %v401_v2  ;;  %v405_v6 = vld [vmem:[%s541_s1 + $0x88] sm:$0xff]   ;;  %v408_v9 = vld [vmem:[%s541_s1 + $0x90] sm:$0xff]  }
   0x4   :  { %379 = vmatpush3.bf16.msra.mxu1 %v402_v3  ;;  %349 = vmatprep.subr.bf16.mxu0 %v403_v4  ;;  %v409_v10 = vld [vmem:[%s541_s1 + $0x58] sm:$0xff]   ;;  %v412_v13 = vld [vmem:[%s541_s1 + $0x60] sm:$0xff]   ;;  %v415_v16 = vld [vmem:[%s541_s1 + $0x68] sm:$0xff]  }
   0x5   :  { %380 = vmatprep.subr.bf16.mxu1 %v427_v1  ;;  %v410_v11 = vld [vmem:[%s541_s1 + $0x18] sm:$0xff]   ;;  %v413_v14 = vld [vmem:[%s541_s1 + $0x20] sm:$0xff]   ;;  %v416_v17 = vld [vmem:[%s541_s1 + $0x28] sm:$0xff]  }
   0x6   :  { %v411_v12 = vld [vmem:[%s541_s1 + $0x98] sm:$0xff]   ;;  %v414_v15 = vld [vmem:[%s541_s1 + $0xa0] sm:$0xff]   ;;  %v417_v18 = vld [vmem:[%s541_s1 + $0xa8] sm:$0xff]  }
   0x7   :  { %350 = vmatpush3.bf16.msra.mxu0 %v404_v5  ;;  %v418_v19 = vld [vmem:[%s541_s1 + $0x70] sm:$0xff]   ;;  %v18_v22 = vld [vmem:[%s542_s0] sm:$0xff]  ;;  %v421_v23 = vld [vmem:[%s541_s1 + $0x78] sm:$0xff]  }
   0x8   :  { %381 = vmatpush3.bf16.msra.mxu1 %v405_v6  ;;  %351 = vmatprep.subr.bf16.mxu0 %v406_v7  ;;  %v419_v20 = vld [vmem:[%s541_s1 + $0x30] sm:$0xff]   ;;  %v321_v24 = vcombine.high %v18_v22, %v18_v22  ;;  %v422_v25 = vld [vmem:[%s541_s1 + $0x38] sm:$0xff]   ;;  %v320_v27 = vcombine.low %v18_v22, %v18_v22  ;;  %v425_v28 = vld [vmem:[%s542_s0 + $0x8] ss:$0 sps:$4 sm:$0xff]  }
   0x9   :  { %382 = vmatprep.subr.bf16.mxu1 %v427_v1  ;;  %v420_v21 = vld [vmem:[%s541_s1 + $0xb0] sm:$0xff]   ;;  %v426_v26 = vld [vmem:[%s541_s1 + $0xb8] sm:$0xff]   ;;  %v319_v31 = vld [vmem:[%s543_s2] ss:$0 sm:$0xff] }
   0xa   :  { %262 = vmatprep.mubr.bf16.mxu0 %v321_v24  ;;  %v310_v33 = vld [vmem:[%s544_s3] sm:$0xf] }
   0xb   :  { %352 = vmatpush3.bf16.msra.mxu0 %v407_v8  ;;  %v311_v40 = vunpack.c.l.bf16 %v310_v33 }
   0xc   :  { %383 = vmatpush3.bf16.msra.mxu1 %v408_v9  ;;  %353 = vmatprep.subr.bf16.mxu0 %v409_v10 }
   0xd   :  { %384 = vmatprep.subr.bf16.mxu1 %v427_v1 }
   0xf   :  { %354 = vmatpush3.bf16.msra.mxu0 %v410_v11 }
  0x10   :  { %385 = vmatpush3.bf16.msra.mxu1 %v411_v12  ;;  %355 = vmatprep.subr.bf16.mxu0 %v412_v13 }
  0x11   :  { %386 = vmatprep.subr.bf16.mxu1 %v427_v1 }
  0x13   :  { %356 = vmatpush3.bf16.msra.mxu0 %v413_v14 }
  0x14   :  { %387 = vmatpush3.bf16.msra.mxu1 %v414_v15  ;;  %357 = vmatprep.subr.bf16.mxu0 %v415_v16 }
  0x15   :  { %388 = vmatprep.subr.bf16.mxu1 %v427_v1 }
  0x17   :  { %358 = vmatpush3.bf16.msra.mxu0 %v416_v17 }
  0x18   :  { %389 = vmatpush3.bf16.msra.mxu1 %v417_v18  ;;  %359 = vmatprep.subr.bf16.mxu0 %v418_v19 }
  0x19   :  { %390 = vmatprep.subr.bf16.mxu1 %v427_v1 }
  0x1b   :  { %360 = vmatpush3.bf16.msra.mxu0 %v419_v20 }
  0x1c   :  { %391 = vmatpush3.bf16.msra.mxu1 %v420_v21  ;;  %361 = vmatprep.subr.bf16.mxu0 %v421_v23 }
  0x1d   :  { %392 = vmatprep.subr.bf16.mxu1 %v427_v1 }
  0x1f   :  { %362 = vmatpush3.bf16.msra.mxu0 %v422_v25 }
  0x20   :  { %393 = vmatpush3.bf16.msra.mxu1 %v426_v26 }
  0x22   :  { %263 = vmatmul.mubr.bf16.vlgmr.msra.gmra.mrb[0].mxu0 %v320_v27 }
  0x23   :  { %395 = vmatmul.mubr.bf16.vlgmr.msra.gmra.mrb[0].mxu1 %v425_v28 }
  0xf5   :  { %v363_v29 = vpop.f32.mrb[0].mxu0 }
  0xf6   :  { %v364_v30 = vpop.f32.mrb[1].mxu0  ;;  %v304_v32 = vpop.f32.mrb[0].mxu1 }
  0xf7   :  { %v365_v34 = vadd.f32 %v364_v30, %v363_v29  ;;  %v366_v35 = vpop.f32.mrb[2].mxu0  ;;  %v396_v36 = vpop.f32.mrb[1].mxu1 }
  0xf8   :  { %v367_v37 = vpop.f32.mrb[3].mxu0  ;;  %v307_v38 = vpop.f32.mrb[2].mxu1 }
  0xf9   :  { %v265_v39 = vadd.f32 %v365_v34, %v319_v31  ;;  %v397_v41 = vpop.f32.mrb[3].mxu1 }
  0xfb   :  { %v305_v42 = vadd.f32 %v304_v32, %v265_v39 }
  0xfd   :  { %v312_v43 = vadd.f32 %v311_v40, %v305_v42 }
  0xff   :  { %v313_v44 = vpack.c.bf16 %v312_v43, %v312_v43 }
 0x101   :  { %314 = vst [vmem:[%s545_s4] sm:$0xf] %v313_v44 }

// kernel: _lambda_.71
= control target key start
LH: loop header
LB: loop body
LE: loop exit
PB: predicated region body
PF: predicated region fallthrough
CT: control target
= control target key end

     0   :  { %v421_v1 = vmov 0.0   ;;  %vm422_vm0 = vmmov 0   ;;  %s527_s1 = inlined_call_operand.vmem [shape: bf16[384,128], index: 1, kind: input, shape index: {}]   ;;  %s528_s0 = inlined_call_operand.vmem [shape: bf16[8,384], index: 0, kind: input, shape index: {}]   ;;  %s529_s2 = inlined_call_operand.vmem [shape: f32[1,128], index: 2, kind: input, shape index: {}]   ;;  %s530_s3 = inlined_call_operand.vmem [shape: bf16[8,128], index: 3, kind: output, shape index: {}]  }
   0x1   :  { %v394_v0 = vld [vmem:[%s527_s1 + $0x40] sm:$0xff]   ;;  %372 = vmatprep.subr.bf16.mxu1 %v421_v1  ;;  %388 = vmatprep.mubr.msk.bf16.mxu1 %vm422_vm0, %v421_v1  ;;  %v397_v4 = vld [vmem:[%s527_s1 + $0x48] sm:$0xff]   ;;  %v400_v7 = vld [vmem:[%s527_s1 + $0x50] sm:$0xff]  }
   0x2   :  { %v395_v2 = vld [vmem:[%s527_s1] sm:$0xff]   ;;  %341 = vmatprep.subr.bf16.mxu0 %v394_v0  ;;  %v398_v5 = vld [vmem:[%s527_s1 + $0x8] sm:$0xff]   ;;  %v401_v8 = vld [vmem:[%s527_s1 + $0x10] sm:$0xff]  }
   0x3   :  { %v396_v3 = vld [vmem:[%s527_s1 + $0x80] sm:$0xff]   ;;  %342 = vmatpush3.bf16.msra.mxu0 %v395_v2  ;;  %v399_v6 = vld [vmem:[%s527_s1 + $0x88] sm:$0xff]   ;;  %v402_v9 = vld [vmem:[%s527_s1 + $0x90] sm:$0xff]  }
   0x4   :  { %373 = vmatpush3.bf16.msra.mxu1 %v396_v3  ;;  %343 = vmatprep.subr.bf16.mxu0 %v397_v4  ;;  %v403_v10 = vld [vmem:[%s527_s1 + $0x58] sm:$0xff]   ;;  %v406_v13 = vld [vmem:[%s527_s1 + $0x60] sm:$0xff]   ;;  %v409_v16 = vld [vmem:[%s527_s1 + $0x68] sm:$0xff]  }
   0x5   :  { %374 = vmatprep.subr.bf16.mxu1 %v421_v1  ;;  %v404_v11 = vld [vmem:[%s527_s1 + $0x18] sm:$0xff]   ;;  %v407_v14 = vld [vmem:[%s527_s1 + $0x20] sm:$0xff]   ;;  %v410_v17 = vld [vmem:[%s527_s1 + $0x28] sm:$0xff]  }
   0x6   :  { %v405_v12 = vld [vmem:[%s527_s1 + $0x98] sm:$0xff]   ;;  %v408_v15 = vld [vmem:[%s527_s1 + $0xa0] sm:$0xff]   ;;  %v411_v18 = vld [vmem:[%s527_s1 + $0xa8] sm:$0xff]  }
   0x7   :  { %344 = vmatpush3.bf16.msra.mxu0 %v398_v5  ;;  %v412_v19 = vld [vmem:[%s527_s1 + $0x70] sm:$0xff]   ;;  %v15_v22 = vld [vmem:[%s528_s0] sm:$0xff]  ;;  %v415_v23 = vld [vmem:[%s527_s1 + $0x78] sm:$0xff]  }
   0x8   :  { %375 = vmatpush3.bf16.msra.mxu1 %v399_v6  ;;  %345 = vmatprep.subr.bf16.mxu0 %v400_v7  ;;  %v413_v20 = vld [vmem:[%s527_s1 + $0x30] sm:$0xff]   ;;  %v315_v24 = vcombine.high %v15_v22, %v15_v22  ;;  %v416_v25 = vld [vmem:[%s527_s1 + $0x38] sm:$0xff]   ;;  %v314_v27 = vcombine.low %v15_v22, %v15_v22  ;;  %v419_v28 = vld [vmem:[%s528_s0 + $0x8] ss:$0 sps:$4 sm:$0xff]  }
   0x9   :  { %376 = vmatprep.subr.bf16.mxu1 %v421_v1  ;;  %v414_v21 = vld [vmem:[%s527_s1 + $0xb0] sm:$0xff]   ;;  %v420_v26 = vld [vmem:[%s527_s1 + $0xb8] sm:$0xff]   ;;  %v313_v31 = vld [vmem:[%s529_s2] ss:$0 sm:$0xff] }
   0xa   :  { %259 = vmatprep.mubr.bf16.mxu0 %v315_v24 }
   0xb   :  { %346 = vmatpush3.bf16.msra.mxu0 %v401_v8 }
   0xc   :  { %377 = vmatpush3.bf16.msra.mxu1 %v402_v9  ;;  %347 = vmatprep.subr.bf16.mxu0 %v403_v10 }
   0xd   :  { %378 = vmatprep.subr.bf16.mxu1 %v421_v1 }
   0xf   :  { %348 = vmatpush3.bf16.msra.mxu0 %v404_v11 }
  0x10   :  { %379 = vmatpush3.bf16.msra.mxu1 %v405_v12  ;;  %349 = vmatprep.subr.bf16.mxu0 %v406_v13 }
  0x11   :  { %380 = vmatprep.subr.bf16.mxu1 %v421_v1 }
  0x13   :  { %350 = vmatpush3.bf16.msra.mxu0 %v407_v14 }
  0x14   :  { %381 = vmatpush3.bf16.msra.mxu1 %v408_v15  ;;  %351 = vmatprep.subr.bf16.mxu0 %v409_v16 }
  0x15   :  { %382 = vmatprep.subr.bf16.mxu1 %v421_v1 }
  0x17   :  { %352 = vmatpush3.bf16.msra.mxu0 %v410_v17 }
  0x18   :  { %383 = vmatpush3.bf16.msra.mxu1 %v411_v18  ;;  %353 = vmatprep.subr.bf16.mxu0 %v412_v19 }
  0x19   :  { %384 = vmatprep.subr.bf16.mxu1 %v421_v1 }
  0x1b   :  { %354 = vmatpush3.bf16.msra.mxu0 %v413_v20 }
  0x1c   :  { %385 = vmatpush3.bf16.msra.mxu1 %v414_v21  ;;  %355 = vmatprep.subr.bf16.mxu0 %v415_v23 }
  0x1d   :  { %386 = vmatprep.subr.bf16.mxu1 %v421_v1 }
  0x1f   :  { %356 = vmatpush3.bf16.msra.mxu0 %v416_v25 }
  0x20   :  { %387 = vmatpush3.bf16.msra.mxu1 %v420_v26 }
  0x22   :  { %260 = vmatmul.mubr.bf16.vlgmr.msra.gmra.mrb[0].mxu0 %v314_v27 }
  0x23   :  { %389 = vmatmul.mubr.bf16.vlgmr.msra.gmra.mrb[0].mxu1 %v419_v28 }
  0xf5   :  { %v357_v29 = vpop.f32.mrb[0].mxu0 }
  0xf6   :  { %v358_v30 = vpop.f32.mrb[1].mxu0  ;;  %v301_v32 = vpop.f32.mrb[0].mxu1 }
  0xf7   :  { %v359_v33 = vadd.f32 %v358_v30, %v357_v29  ;;  %v360_v34 = vpop.f32.mrb[2].mxu0  ;;  %v390_v35 = vpop.f32.mrb[1].mxu1 }
  0xf8   :  { %v361_v36 = vpop.f32.mrb[3].mxu0  ;;  %v304_v37 = vpop.f32.mrb[2].mxu1 }
  0xf9   :  { %v262_v38 = vadd.f32 %v359_v33, %v313_v31  ;;  %v391_v39 = vpop.f32.mrb[3].mxu1 }
  0xfb   :  { %v302_v40 = vadd.f32 %v301_v32, %v262_v38 }
  0xfd   :  { %v307_v41 = vpack.c.bf16 %v302_v40, %v302_v40 }
  0xff   :  { %308 = vst [vmem:[%s530_s3] sm:$0xf] %v307_v41 }

// kernel: _lambda_.72
= control target key start
LH: loop header
LB: loop body
LE: loop exit
PB: predicated region body
PF: predicated region fallthrough
CT: control target
= control target key end

     0   :  { %v593_v1 = vmov 0   ;;  %v594_v32 = vmov 0.0   ;;  %vm595_vm0 = vmmov 0   ;;  %v66_v43 = vlaneseq  ;;  %s751_s1 = inlined_call_operand.vmem [shape: bf16[128,640], index: 1, kind: input, shape index: {}]   ;;  %s752_s0 = inlined_call_operand.vmem [shape: bf16[8,128], index: 0, kind: input, shape index: {}]   ;;  %s753_s2 = inlined_call_operand.vmem [shape: f32[1,640], index: 2, kind: input, shape index: {}]   ;;  %s754_s3 = inlined_call_operand.vmem [shape: bf16[8,640], index: 3, kind: output, shape index: {}]  }
   0x1   :  { %v537_v0 = vld [vmem:[%s751_s1 + $0x4] ss:$20 sps:$4 sm:$0xff]   ;;  %331 = vmatprep.mubr.bf16.mxu0 %v593_v1  ;;  %372 = vmatprep.mubr.bf16.mxu1 %v593_v1  ;;  %v539_v2 = vld [vmem:[%s751_s1] ss:$20 sps:$4 sm:$0xff]   ;;  %v542_v4 = vld [vmem:[%s751_s1 + $0x28] ss:$20 sps:$4 sm:$0xff]  }
   0x2   :  { %299 = vmatprep.subr.bf16.mxu0 %v537_v0  ;;  %v540_v3 = vld [vmem:[%s751_s1 + $0x2c] ss:$20 sps:$4 sm:$0xff]   ;;  %v543_v5 = vld [vmem:[%s751_s1 + $0x54] ss:$20 sps:$4 sm:$0xff]   ;;  %v545_v6 = vld [vmem:[%s751_s1 + $0x50] ss:$20 sps:$4 sm:$0xff]  }
   0x3   :  { %300 = vmatpush1.bf16.msra.mxu0 %v539_v2  ;;  %v546_v7 = vld [vmem:[%s751_s1 + $0x7c] ss:$20 sps:$4 sm:$0xff]   ;;  %v548_v8 = vld [vmem:[%s751_s1 + $0x78] ss:$20 sps:$4 sm:$0xff]   ;;  %v564_v12 = vld [vmem:[%s751_s1 + $0x34] ss:$20 sps:$4 sm:$0xff]  }
   0x4   :  { %301 = vmatprep.subr.bf16.mxu0 %v540_v3  ;;  %v560_v9 = vld [vmem:[%s751_s1 + $0xc] ss:$20 sps:$4 sm:$0xff]   ;;  %v563_v10 = vld [vmem:[%s751_s1 + $0x8] ss:$20 sps:$4 sm:$0xff]   ;;  %v549_v11 = vld [vmem:[%s751_s1 + $0xa4] ss:$20 sps:$4 sm:$0xff]  }
   0x5   :  { %340 = vmatprep.subr.bf16.mxu1 %v560_v9  ;;  %v566_v13 = vld [vmem:[%s751_s1 + $0x30] ss:$20 sps:$4 sm:$0xff]   ;;  %v551_v14 = vld [vmem:[%s751_s1 + $0xa0] ss:$20 sps:$4 sm:$0xff]   ;;  %v554_v17 = vld [vmem:[%s751_s1 + $0xc8] ss:$20 sps:$4 sm:$0xff]  }
   0x6   :  { %341 = vmatpush1.bf16.msra.mxu1 %v563_v10  ;;  %v568_v15 = vld [vmem:[%s751_s1 + $0x5c] ss:$20 sps:$4 sm:$0xff]   ;;  %v552_v16 = vld [vmem:[%s751_s1 + $0xcc] ss:$20 sps:$4 sm:$0xff]   ;;  %v572_v19 = vld [vmem:[%s751_s1 + $0x84] ss:$20 sps:$4 sm:$0xff]  }
   0x7   :  { %302 = vmatpush1.bf16.msra.mxu0 %v542_v4  ;;  %342 = vmatprep.subr.bf16.mxu1 %v564_v12  ;;  %v570_v18 = vld [vmem:[%s751_s1 + $0x58] ss:$20 sps:$4 sm:$0xff]   ;;  %v555_v20 = vld [vmem:[%s751_s1 + $0xf4] ss:$20 sps:$4 sm:$0xff]   ;;  %v557_v21 = vld [vmem:[%s751_s1 + $0xf0] ss:$20 sps:$4 sm:$0xff]  }
   0x8   :  { %303 = vmatprep.subr.bf16.mxu0 %v543_v5  ;;  %v574_v22 = vld [vmem:[%s751_s1 + $0x80] ss:$20 sps:$4 sm:$0xff]   ;;  %v558_v24 = vld [vmem:[%s751_s1 + $0x11c] ss:$20 sps:$4 sm:$0xff]   ;;  %v562_v26 = vld [vmem:[%s751_s1 + $0x118] ss:$20 sps:$4 sm:$0xff]  }
   0x9   :  { %v576_v23 = vld [vmem:[%s751_s1 + $0xac] ss:$20 sps:$4 sm:$0xff]   ;;  %v578_v25 = vld [vmem:[%s751_s1 + $0xa8] ss:$20 sps:$4 sm:$0xff]   ;;  %v582_v28 = vld [vmem:[%s751_s1 + $0xd0] ss:$20 sps:$4 sm:$0xff]  }
   0xa   :  { %343 = vmatpush1.bf16.msra.mxu1 %v566_v13  ;;  %v580_v27 = vld [vmem:[%s751_s1 + $0xd4] ss:$20 sps:$4 sm:$0xff]   ;;  %v15_v29 = vld [vmem:[%s752_s0] sm:$0xf]  ;;  %v567_v30 = vld [vmem:[%s751_s1 + $0x10] ss:$20 sps:$4 sm:$0xff]  }
   0xb   :  { %304 = vmatpush1.bf16.msra.mxu0 %v545_v6  ;;  %344 = vmatprep.subr.bf16.mxu1 %v568_v15  ;;  %v584_v31 = vld [vmem:[%s751_s1 + $0xfc] ss:$20 sps:$4 sm:$0xff]   ;;  %v586_v33 = vld [vmem:[%s751_s1 + $0xf8] ss:$20 sps:$4 sm:$0xff]   ;;  %v590_v36 = vld [vmem:[%s751_s1 + $0x120] ss:$20 sps:$4 sm:$0xff]  }
   0xc   :  { %305 = vmatprep.subr.bf16.mxu0 %v546_v7  ;;  %v571_v34 = vld [vmem:[%s751_s1 + $0x38] ss:$20 sps:$4 sm:$0xff]   ;;  %v575_v37 = vld [vmem:[%s751_s1 + $0x60] ss:$20 sps:$4 sm:$0xff]   ;;  %v579_v38 = vld [vmem:[%s751_s1 + $0x88] ss:$20 sps:$4 sm:$0xff]  }
   0xd   :  { %v588_v35 = vld [vmem:[%s751_s1 + $0x124] ss:$20 sps:$4 sm:$0xff]   ;;  %v591_v41 = vld [vmem:[%s751_s1 + $0x100] ss:$20 sps:$4 sm:$0xff]   ;;  %v592_v42 = vld [vmem:[%s751_s1 + $0x128] ss:$20 sps:$4 sm:$0xff]  }
   0xe   :  { %345 = vmatpush1.bf16.msra.mxu1 %v570_v18  ;;  %v583_v39 = vld [vmem:[%s751_s1 + $0xb0] ss:$20 sps:$4 sm:$0xff]   ;;  %v587_v40 = vld [vmem:[%s751_s1 + $0xd8] ss:$20 sps:$4 sm:$0xff]   ;;  %v67_v44 = vshrl.u32 %v66_v43, 7 }
   0xf   :  { %306 = vmatpush1.bf16.msra.mxu0 %v548_v8  ;;  %346 = vmatprep.subr.bf16.mxu1 %v572_v19  ;;  %v64_v46 = vld [vmem:[%s753_s2] sm:$0x1f] }
  0x10   :  { %307 = vmatprep.subr.bf16.mxu0 %v549_v11  ;;  %v68_v45 = vsub.s32 0, %v67_v44  ;;  %v72_v47 = vsub.s32 1, %v67_v44  ;;  %v76_v58 = vsub.s32 2, %v67_v44  ;;  %v80_v60 = vsub.s32 3, %v67_v44 }
  0x11   :  { %v84_v12 = vsub.s32 4, %v67_v44 }
  0x12   :  { %347 = vmatpush1.bf16.msra.mxu1 %v574_v22  ;;  %v69_v48 = vrot.slane %v64_v46, %v68_v45  ;;  %v73_v49 = vrot.slane %v64_v46, %v72_v47  ;;  %v77_v63 = vrot.slane %v64_v46, %v76_v58  ;;  %v81_v0 = vrot.slane %v64_v46, %v80_v60 }
  0x13   :  { %308 = vmatpush1.bf16.msra.mxu0 %v551_v14  ;;  %348 = vmatprep.subr.bf16.mxu1 %v576_v23  ;;  %v85_v13 = vrot.slane %v64_v46, %v84_v12 }
  0x14   :  { %309 = vmatprep.subr.bf16.mxu0 %v552_v16 }
  0x16   :  { %349 = vmatpush1.bf16.msra.mxu1 %v578_v25 }
  0x17   :  { %310 = vmatpush1.bf16.msra.mxu0 %v554_v17  ;;  %350 = vmatprep.subr.bf16.mxu1 %v580_v27 }
  0x18   :  { %311 = vmatprep.subr.bf16.mxu0 %v555_v20 }
  0x1a   :  { %351 = vmatpush1.bf16.msra.mxu1 %v582_v28 }
  0x1b   :  { %312 = vmatpush1.bf16.msra.mxu0 %v557_v21  ;;  %352 = vmatprep.subr.bf16.mxu1 %v584_v31 }
  0x1c   :  { %313 = vmatprep.subr.bf16.mxu0 %v558_v24 }
  0x1e   :  { %353 = vmatpush1.bf16.msra.mxu1 %v586_v33 }
  0x1f   :  { %314 = vmatpush1.bf16.msra.mxu0 %v562_v26  ;;  %354 = vmatprep.subr.bf16.mxu1 %v588_v35 }
  0x20   :  { %514 = vmatprep.subr.bf16.mxu0 %v594_v32 }
  0x22   :  { %332 = vmatmul.mubr.bf16.vlgmr.msra.gmra.mrb[0].mxu0 %v15_v29  ;;  %355 = vmatpush1.bf16.msra.mxu1 %v590_v36 }
  0x23   :  { %515 = vmatpush3.bf16.msra.mxu0 %v567_v30  ;;  %530 = vmatprep.mubr.msk.bf16.mxu0 %vm595_vm0, %v594_v32 }
  0x24   :  { %516 = vmatprep.subr.bf16.mxu0 %v594_v32 }
  0x25   :  { %373 = vmatmul.mubr.bf16.vlgmr.msra.gmra.mrb[0].mxu1 %v15_v29 }
  0x27   :  { %517 = vmatpush3.bf16.msra.mxu0 %v571_v34 }
  0x28   :  { %518 = vmatprep.subr.bf16.mxu0 %v594_v32 }
  0x2b   :  { %519 = vmatpush3.bf16.msra.mxu0 %v575_v37 }
  0x2c   :  { %520 = vmatprep.subr.bf16.mxu0 %v594_v32 }
  0x2f   :  { %521 = vmatpush3.bf16.msra.mxu0 %v579_v38 }
  0x30   :  { %522 = vmatprep.subr.bf16.mxu0 %v594_v32 }
  0x33   :  { %523 = vmatpush3.bf16.msra.mxu0 %v583_v39 }
  0x34   :  { %524 = vmatprep.subr.bf16.mxu0 %v594_v32 }
  0x37   :  { %525 = vmatpush3.bf16.msra.mxu0 %v587_v40 }
  0x38   :  { %526 = vmatprep.subr.bf16.mxu0 %v594_v32 }
  0x3b   :  { %527 = vmatpush3.bf16.msra.mxu0 %v591_v41 }
  0x3c   :  { %528 = vmatprep.subr.bf16.mxu0 %v594_v32 }
  0x3f   :  { %529 = vmatpush3.bf16.msra.mxu0 %v592_v42 }
  0x42   :  { %531 = vmatmul.mubr.bf16.vlgmr.msra.gmra.mrb[4].mxu0 %v15_v29 }
  0xf5   :  { %v333_v50 = vpop.f32.mrb[0].mxu0 }
  0xf6   :  { %v334_v51 = vadd.f32 %v333_v50, %v69_v48  ;;  %v335_v52 = vpop.f32.mrb[1].mxu0 }
  0xf7   :  { %v336_v53 = vadd.f32 %v335_v52, %v73_v49  ;;  %v337_v54 = vpop.f32.mrb[2].mxu0 }
  0xf8   :  { %v421_v55 = vmax.f32 %v334_v51, 0.0  ;;  %v338_v56 = vpop.f32.mrb[3].mxu0  ;;  %v374_v1 = vpop.f32.mrb[0].mxu1 }
  0xf9   :  { %v422_v57 = vmax.f32 %v336_v53, 0.0  ;;  %v375_v2 = vadd.f32 %v374_v1, %v77_v63  ;;  %v376_v3 = vpop.f32.mrb[1].mxu1 }
  0xfa   :  { %v426_v59 = vmin.f32 %v421_v55, 6.0  ;;  %v377_v4 = vadd.f32 %v376_v3, %v81_v0  ;;  %v378_v5 = vpop.f32.mrb[2].mxu1 }
  0xfb   :  { %v427_v61 = vmin.f32 %v422_v57, 6.0  ;;  %v423_v6 = vmax.f32 %v375_v2, 0.0  ;;  %v379_v7 = vpop.f32.mrb[3].mxu1 }
  0xfc   :  { %v424_v8 = vmax.f32 %v377_v4, 0.0 }
  0xfd   :  { %v502_v62 = vpack.c.bf16 %v427_v61, %v426_v59  ;;  %v428_v9 = vmin.f32 %v423_v6, 6.0 }
  0xfe   :  { %v429_v10 = vmin.f32 %v424_v8, 6.0 }
  0xff   :  { %452 = vst [vmem:[%s754_s3] sm:$0xff] %v502_v62 }
 0x100   :  { %v503_v11 = vpack.c.bf16 %v429_v10, %v428_v9 }
 0x102   :  { %453 = vst [vmem:[%s754_s3 + $0x8] sm:$0xff] %v503_v11 }
 0x115   :  { %v415_v14 = vpop.f32.mrb[4].mxu0 }
 0x116   :  { %v416_v15 = vadd.f32 %v415_v14, %v85_v13  ;;  %v532_v16 = vpop.f32.mrb[5].mxu0 }
 0x117   :  { %v418_v17 = vpop.f32.mrb[6].mxu0 }
 0x118   :  { %v425_v18 = vmax.f32 %v416_v15, 0.0  ;;  %v533_v19 = vpop.f32.mrb[7].mxu0 }
 0x11a   :  { %v430_v20 = vmin.f32 %v425_v18, 6.0 }
 0x11c   :  { %v504_v21 = vpack.c.bf16 %v430_v20, %v430_v20 }
 0x11e   :  { %454 = vst [vmem:[%s754_s3 + $0x10] sm:$0xf] %v504_v21 }

// kernel: _lambda_.73
= control target key start
LH: loop header
LB: loop body
LE: loop exit
PB: predicated region body
PF: predicated region fallthrough
CT: control target
= control target key end

     0   :  { %s845_s12 = smov 0   ;;  %s1017_s0 = inlined_call_operand.vmem [shape: bf16[2,3,3,640], index: 0, kind: input, shape index: {}]   ;;  %s1018_s1 = inlined_call_operand.vmem [shape: f32[9,640], index: 1, kind: input, shape index: {}]   ;;  %s1019_s2 = inlined_call_operand.vmem [shape: f32[1,640], index: 2, kind: input, shape index: {}]   ;;  %s1020_s3 = inlined_call_operand.vmem [shape: bf16[2,1,1,640], index: 3, kind: output, shape index: {}]  }
   0x1 LB: > { %s755_s13 = sadd.s32 4294967295, %s819_s12   ;;  %p759_p0 = scmp.ge.s32.totalorder %s819_s12, 1  ;;  %s819_s12 = sphi %s845_s12, %s13_s12  }
   0x2   : > { %p137_p1 = scmp.lt.s32.totalorder %s819_s12, 3 }
   0x4   : > { %p138_p2 = pnand %p759_p0, %p137_p1 }
   0x5   : > { %p160_p3 = scmp.lt.s32.totalorder (!%p138_p2), %s755_s13, 1  ;;  %v184_v0 = vld [vmem:[%s1018_s1] ss:$8 sm:$0xf] (!%p138_p2)  ;;  %v191_v1 = vlaneseq (!%p138_p2)  ;;  %v821_v3 = vmov (!%p138_p2), 286326784   ;;  %vm680_vm0 = vcmask (!%p138_p2), 1040384  }
   0x6   : > { %141 = sbr.rel (%p138_p2) target bundleno = 66 (0x42), region = 32  ;;  %v185_v2 = vld [vmem:[%s1018_s1] ss:$8 sm:$0x10] (!%p138_p2)  ;;  %v189_v4 = vunpack.c.l.s4 (!%p138_p2), %v821_v3  ;;  %v822_v6 = vmov (!%p138_p2), 858989090  }
   0x7   : > { %v861_v5 = vshrl.u32 (!%p138_p2), %v191_v1, 7  ;;  %v196_v7 = vunpack.c.l.s4 (!%p138_p2), %v822_v6  ;;  %v186_v8 = vor.u32 (!%p138_p2), %v185_v2, %v184_v0  ;;  %v823_v10 = vmov (!%p138_p2), 1431651396   ;;  %v761_v12 = vld [vmem:[%s1018_s1 + $0x1] ss:$8 sm:$0xf] (!%p138_p2) }
   0x8   : > { %v190_v9 = vunpack.c.0.s8 (!%p138_p2), %v189_v4  ;;  %v203_v11 = vunpack.c.l.s4 (!%p138_p2), %v823_v10  ;;  %v762_v13 = vld [vmem:[%s1018_s1 + $0x1] ss:$8 sm:$0x10] (!%p138_p2)  ;;  %v766_v16 = vld [vmem:[%s1018_s1 + $0x2] ss:$8 sm:$0xf] (!%p138_p2) }
   0x9   : > { %v197_v14 = vunpack.c.0.s8 (!%p138_p2), %v196_v7  ;;  %v218_v15 = vor.u32 (!%p138_p2), %v762_v13, %v761_v12  ;;  %v767_v19 = vld [vmem:[%s1018_s1 + $0x2] ss:$8 sm:$0x10] (!%p138_p2)  ;;  %v771_v22 = vld [vmem:[%s1018_s1 + $0x3] ss:$8 sm:$0xf] (!%p138_p2) }
   0xa   : > { %v874_v17 = vsub.s32 (!%p138_p2), %v190_v9, %v861_v5  ;;  %v204_v18 = vunpack.c.0.s8 (!%p138_p2), %v203_v11  ;;  %v265_v21 = vor.u32 (!%p138_p2), %v767_v19, %v766_v16  ;;  %v772_v23 = vld [vmem:[%s1018_s1 + $0x3] ss:$8 sm:$0x10] (!%p138_p2)  ;;  %v773_v58 = vld [vmem:[%s1018_s1 + $0x4] ss:$8 sm:$0xf] (!%p138_p2) }
   0xb   : > { %v883_v20 = vsub.s32 (!%p138_p2), %v197_v14, %v861_v5  ;;  %v312_v30 = vor.u32 (!%p138_p2), %v772_v23, %v771_v22  ;;  %v774_v59 = vld [vmem:[%s1018_s1 + $0x4] ss:$8 sm:$0x10] (!%p138_p2)  ;;  %v778_v60 = vld [vmem:[%s1018_s1 + $0x5] ss:$8 sm:$0xf] (!%p138_p2) }
   0xc   : > { %v194_v27 = vrot.slane (!%p138_p2), %v186_v8, %v874_v17  ;;  %v893_v28 = vsub.s32 (!%p138_p2), %v204_v18, %v861_v5  ;;  %v226_v29 = vrot.slane (!%p138_p2), %v218_v15, %v874_v17  ;;  %v273_v49 = vrot.slane (!%p138_p2), %v265_v21, %v874_v17  ;;  %v779_v61 = vld [vmem:[%s1018_s1 + $0x5] ss:$8 sm:$0x10] (!%p138_p2)  ;;  %v783_v2 = vld [vmem:[%s1018_s1 + $0x6] ss:$8 sm:$0xf] (!%p138_p2) }
   0xd   : > { %s1028_s13 = smov (!%p160_p3, %s755_s13), 1  ;;  %v201_v43 = vrot.slane %v186_v8, %v883_v20  ;;  %v233_v46 = vrot.slane %v218_v15, %v883_v20  ;;  %v280_v52 = vrot.slane %v265_v21, %v883_v20  ;;  %v320_v0 = vrot.slane %v312_v30, %v874_v17  ;;  %v784_v3 = vld [vmem:[%s1018_s1 + $0x6] ss:$8 sm:$0x10] }
   0xe   : > { %s799_s22 = smul.u32 30, %s1028_s13  ;;  %v208_v44 = vrot.slane %v186_v8, %v893_v28  ;;  %v240_v47 = vrot.slane %v218_v15, %v893_v28  ;;  %v287_v53 = vrot.slane %v265_v21, %v893_v28  ;;  %v327_v1 = vrot.slane %v312_v30, %v883_v20  ;;  %v785_v9 = vld [vmem:[%s1018_s1 + $0x7] ss:$8 sm:$0xf] }
   0xf   : > { %v334_v12 = vrot.slane %v312_v30, %v893_v28  ;;  %v786_v14 = vld [vmem:[%s1018_s1 + $0x7] ss:$8 sm:$0x10]  ;;  %v347_v22 = vor.u32 %v774_v59, %v773_v58  ;;  %v394_v23 = vor.u32 %v779_v61, %v778_v60  ;;  %vm683_vm1 = vcmask 1041409   ;;  %s800_s4 = smul.u32 5, %s1028_s13 }
  0x10   : > { %s164_s29 = scalar_lea.vmem %s1017_s0, %s799_s22  ;;  %vm681_vm2 = vsmask.f32 256  ;;  %vm684_vm3 = vsmask.f32 1280  ;;  %vm687_vm6 = vcmask 1042434   ;;  %vm691_vm10 = vcmask 1043459  }
  0x11   : > { %v169_v24 = vld [vmem:[%s164_s29] sm:$0xff]  ;;  %v170_v25 = vld [vmem:[%s164_s29 + $0x8] sm:$0x3]  ;;  %v171_v26 = vld [vmem:[%s164_s29 + $0xa] sm:$0xff]  ;;  %v355_v30 = vrot.slane %v347_v22, %v874_v17  ;;  %vm688_vm7 = vsmask.f32 2304  ;;  %s168_s7 = scalar_lea.vmem %s1020_s3, %s800_s4 }
  0x12   : > { %v172_v31 = vld [vmem:[%s164_s29 + $0x12] sm:$0x3]  ;;  %v173_v32 = vld [vmem:[%s164_s29 + $0x14] sm:$0xff]  ;;  %v174_v33 = vld [vmem:[%s164_s29 + $0x1c] sm:$0x3]  ;;  %v175_v34 = vunpack.c.l.bf16 %v169_v24  ;;  %v176_v35 = vunpack.c.h.bf16 %v169_v24  ;;  %v177_v36 = vunpack.c.l.bf16 %v170_v25  ;;  %v896_v37 = vunpack.c.l.bf16 %v171_v26 }
  0x13   : > { %v898_v38 = vunpack.c.h.bf16 %v171_v26  ;;  %v900_v39 = vunpack.c.l.bf16 %v172_v31  ;;  %v902_v40 = vunpack.c.l.bf16 %v173_v32  ;;  %v904_v41 = vunpack.c.h.bf16 %v173_v32  ;;  %vm988_vm4 = vmand %vm680_vm0, %vm681_vm2 }
  0x14   : > { %v906_v42 = vunpack.c.l.bf16 %v174_v33  ;;  %v212_v45 = vmul.f32 %v194_v27, %v175_v34  ;;  %v244_v48 = vmul.f32 %v226_v29, %v175_v34  ;;  %v213_v50 = vmul.f32 %v201_v43, %v176_v35  ;;  %vm995_vm5 = vmand %vm683_vm1, %vm684_vm3 }
  0x15   : > { %v214_v51 = vmul.f32 %v208_v44, %v177_v36  ;;  %v245_v54 = vmul.f32 %v233_v46, %v176_v35  ;;  %v246_v55 = vmul.f32 %v240_v47, %v177_v36  ;;  %v291_v57 = vmul.f32 %v273_v49, %v175_v34  ;;  %vm686_vm8 = vmor %vm995_vm5, %vm988_vm4 }
  0x16   : > { %v763_v56 = vrot.slane %v244_v48, 9  ;;  %v292_v62 = vmul.f32 %v280_v52, %v176_v35  ;;  %v293_v63 = vmul.f32 %v287_v53, %v177_v36  ;;  %v338_v13 = vmul.f32 %v320_v0, %v896_v37  ;;  %v790_v52 = vld [vmem:[%s1018_s1 + $0x28] ss:$8 sm:$0xf]  ;;  %vm689_vm9 = vmand %vm687_vm6, %vm688_vm7 }
  0x17   : > { %v764_v4 = vrot.slane %v245_v54, 9  ;;  %v765_v6 = vrot.slane %v246_v55, 9  ;;  %v768_v8 = vrot.slane %v291_v57, 10  ;;  %v339_v19 = vmul.f32 %v327_v1, %v898_v38  ;;  %vm1004_vm12 = vmor %vm689_vm9, %vm686_vm8 }
  0x18   : > { %v259_v7 = vadd.f32 %v763_v56, %v212_v45  ;;  %v769_v10 = vrot.slane %v292_v62, 10  ;;  %v770_v11 = vrot.slane %v293_v63, 10  ;;  %v340_v21 = vmul.f32 %v334_v12, %v900_v39 }
  0x19   : > { %v260_v15 = vadd.f32 %v764_v4, %v213_v50  ;;  %v261_v16 = vadd.f32 %v765_v6, %v214_v51  ;;  %v441_v24 = vor.u32 %v784_v3, %v783_v2  ;;  %v476_v29 = vor.u32 %v786_v14, %v785_v9 }
  0x1a   : > { %v306_v18 = vadd.f32 %v768_v8, %v259_v7  ;;  %v362_v31 = vrot.slane %v347_v22, %v883_v20  ;;  %v369_v32 = vrot.slane %v347_v22, %v893_v28  ;;  %v402_v33 = vrot.slane %v394_v23, %v874_v17 }
  0x1b   : > { %v307_v25 = vadd.f32 %v769_v10, %v260_v15  ;;  %v308_v26 = vadd.f32 %v770_v11, %v261_v16  ;;  %v409_v36 = vrot.slane %v394_v23, %v883_v20  ;;  %v416_v43 = vrot.slane %v394_v23, %v893_v28 }
  0x1c   : > { %v341_v27 = vadd.f32 %v338_v13, %v306_v18  ;;  %v373_v44 = vmul.f32 %v355_v30, %v896_v37  ;;  %v374_v45 = vmul.f32 %v362_v31, %v898_v38  ;;  %v375_v46 = vmul.f32 %v369_v32, %v900_v39 }
  0x1d   : > { %v342_v34 = vadd.f32 %v339_v19, %v307_v25  ;;  %v343_v35 = vadd.f32 %v340_v21, %v308_v26  ;;  %v420_v47 = vmul.f32 %v402_v33, %v896_v37  ;;  %v421_v48 = vmul.f32 %v409_v36, %v898_v38  ;;  %v567_v21 = vld [vmem:[%s1019_s2] sm:$0x1f] }
  0x1e   : > { %v422_v49 = vmul.f32 %v416_v43, %v900_v39  ;;  %v449_v50 = vrot.slane %v441_v24, %v874_v17  ;;  %v456_v51 = vrot.slane %v441_v24, %v883_v20  ;;  %v775_v53 = vrot.slane %v373_v44, 9  ;;  %v791_v39 = vld [vmem:[%s1018_s1 + $0x28] ss:$8 sm:$0x10] }
  0x1f   : > { %v776_v54 = vrot.slane %v374_v45, 9  ;;  %v777_v55 = vrot.slane %v375_v46, 9  ;;  %v780_v56 = vrot.slane %v420_v47, 10  ;;  %v781_v57 = vrot.slane %v421_v48, 10 }
  0x20   : > { %v782_v58 = vrot.slane %v422_v49, 10  ;;  %v463_v37 = vrot.slane %v441_v24, %v893_v28  ;;  %v467_v38 = vmul.f32 %v449_v50, %v902_v40  ;;  %v388_v59 = vadd.f32 %v775_v53, %v341_v27 }
  0x21   : > { %v389_v60 = vadd.f32 %v776_v54, %v342_v34  ;;  %v390_v61 = vadd.f32 %v777_v55, %v343_v35  ;;  %v468_v62 = vmul.f32 %v456_v51, %v904_v41  ;;  %v484_v0 = vrot.slane %v476_v29, %v874_v17 }
  0x22   : > { %v469_v63 = vmul.f32 %v463_v37, %v906_v42  ;;  %v491_v1 = vrot.slane %v476_v29, %v883_v20  ;;  %v498_v2 = vrot.slane %v476_v29, %v893_v28  ;;  %v435_v3 = vadd.f32 %v780_v56, %v388_v59 }
  0x23   : > { %v436_v4 = vadd.f32 %v781_v57, %v389_v60  ;;  %v437_v6 = vadd.f32 %v782_v58, %v390_v61  ;;  %v523_v7 = vor.u32 %v791_v39, %v790_v52  ;;  %v502_v8 = vmul.f32 %v484_v0, %v902_v40 }
  0x24   : > { %v503_v9 = vmul.f32 %v491_v1, %v904_v41  ;;  %v504_v10 = vmul.f32 %v498_v2, %v906_v42  ;;  %v470_v11 = vadd.f32 %v467_v38, %v435_v3  ;;  %v575_v31 = vrot.slane %v567_v21, %v874_v17  ;;  %v699_v3 = vld [vmem:[%s168_s7] sm:$0x1f] }
  0x25   : > { %v471_v12 = vadd.f32 %v468_v62, %v436_v4  ;;  %v472_v13 = vadd.f32 %v469_v63, %v437_v6  ;;  %v531_v14 = vrot.slane %v523_v7, %v874_v17  ;;  %v787_v15 = vrot.slane %v502_v8, 9 }
  0x26   : > { %v788_v16 = vrot.slane %v503_v9, 9  ;;  %v789_v18 = vrot.slane %v504_v10, 9  ;;  %v538_v19 = vrot.slane %v523_v7, %v883_v20  ;;  %v545_v22 = vrot.slane %v523_v7, %v893_v28 }
  0x27   : > { %v549_v23 = vmul.f32 %v531_v14, %v902_v40  ;;  %v517_v24 = vadd.f32 %v787_v15, %v470_v11  ;;  %v582_v33 = vrot.slane %v567_v21, %v883_v20  ;;  %v824_v34 = vmov 1966171168  }
  0x28   : > { %v518_v25 = vadd.f32 %v788_v16, %v471_v12  ;;  %v550_v26 = vmul.f32 %v538_v19, %v904_v41  ;;  %v519_v27 = vadd.f32 %v789_v18, %v472_v13  ;;  %v551_v29 = vmul.f32 %v545_v22, %v906_v42 }
  0x29   : > { %v792_v30 = vrot.slane %v549_v23, 10  ;;  %v643_v35 = vunpack.c.l.s4 %v824_v34  ;;  %v589_v43 = vrot.slane %v567_v21, %v893_v28  ;;  %v607_v46 = vsub.s32 0, %v861_v5 }
  0x2a   : > { %v793_v32 = vrot.slane %v550_v26, 10  ;;  %v794_v36 = vrot.slane %v551_v29, 10  ;;  %v611_v20 = vsub.s32 4, %v861_v5  ;;  %vm692_vm11 = vsmask.f32 3328 }
  0x2b   : > { %v564_v40 = vadd.f32 %v792_v30, %v517_v24  ;;  %v644_v47 = vunpack.c.0.s8 %v643_v35  ;;  %vm693_vm13 = vmand %vm691_vm10, %vm692_vm11  ;;  %vm695_vm14 = vcmask 1044484   ;;  %vm696_vm15 = vsmask.f32 4352 }
  0x2c   : > { %v565_v44 = vadd.f32 %v793_v32, %v518_v25  ;;  %v566_v41 = vadd.f32 %v794_v36, %v519_v27  ;;  %vm694_vm0 = vmor %vm693_vm13, %vm1004_vm12 }
  0x2d   : > { %v593_v45 = vadd.f32 %v575_v31, %v564_v40  ;;  %v647_v54 = vsub.s32 %v644_v47, %v861_v5  ;;  %vm697_vm1 = vmand %vm695_vm14, %vm696_vm15 }
  0x2e   : > { %v594_v17 = vadd.f32 %v582_v33, %v565_v44  ;;  %v595_v28 = vadd.f32 %v589_v43, %v566_v41  ;;  %vm698_vm2 = vmor %vm697_vm1, %vm694_vm0 }
  0x2f   : > { %v596_v49 = vmax.f32 %v593_v45, 0.0 }
  0x30   : > { %v597_v50 = vmax.f32 %v594_v17, 0.0  ;;  %v598_v51 = vmax.f32 %v595_v28, 0.0 }
  0x31   : > { %v599_v52 = vmin.f32 %v596_v49, 6.0 }
  0x32   : > { %v600_v53 = vmin.f32 %v597_v50, 6.0  ;;  %v601_v55 = vmin.f32 %v598_v51, 6.0 }
  0x33   : > { %v608_v56 = vrot.slane %v599_v52, %v607_v46  ;;  %v612_v57 = vrot.slane %v599_v52, %v611_v20 }
  0x34   : > { %v616_v58 = vrot.slane %v600_v53, %v607_v46  ;;  %v620_v37 = vrot.slane %v600_v53, %v611_v20  ;;  %v624_v38 = vrot.slane %v601_v55, %v607_v46 }
  0x35   : > { %v795_v39 = vpack.c.bf16 %v612_v57, %v608_v56 }
  0x36   : > { %v796_v60 = vpack.c.bf16 %v620_v37, %v616_v58  ;;  %v634_v61 = vpack.c.bf16 %v624_v38, %v624_v38 }
  0x37   : > { %v648_v62 = vrot.slane %v795_v39, %v647_v54 }
  0x38   : > { %v655_v5 = vrot.slane %v796_v60, %v647_v54  ;;  %v662_v63 = vrot.slane %v634_v61, %v647_v54 }
  0x3a   : > { %v663_v0 = vcombine.low %v648_v62, %v655_v5  ;;  %v677_v1 = vrot.slane %v662_v63, %v647_v54 }
  0x3c   : > { %v670_v2 = vrot.slane %v663_v0, %v647_v54 }
  0x3e   : > { %v678_v4 = vcombine.low %v670_v2, %v677_v1 }
  0x40   : > { %v700_v6 = vsel %vm698_vm2, %v678_v4, %v699_v3 }
  0x41   : > { %701 = vst [vmem:[%s168_s7] sm:$0x1f] %v700_v6 }
  0x42 PF: > { %s13_s12 = sadd.s32 1, %s819_s12  }
  0x43   : > { %p10_p4 = scmp.ge.s32.totalorder %s13_s12, 4  }
  0x45   :  { %12 = sbr.rel (!%p10_p4) target bundleno = 1 (0x1), region = 70 }

// kernel: _lambda_.74
= control target key start
LH: loop header
LB: loop body
LE: loop exit
PB: predicated region body
PF: predicated region fallthrough
CT: control target
= control target key end

     0   :  { %v661_v35 = vmov 0.0   ;;  %vm662_vm0 = vmmov 0   ;;  %s826_s1 = inlined_call_operand.vmem [shape: bf16[640,128], index: 1, kind: input, shape index: {}]   ;;  %s827_s0 = inlined_call_operand.vmem [shape: bf16[8,640], index: 0, kind: input, shape index: {}]   ;;  %s828_s2 = inlined_call_operand.vmem [shape: f32[1,128], index: 2, kind: input, shape index: {}]   ;;  %s829_s3 = inlined_call_operand.vmem [shape: bf16[8,128], index: 3, kind: input, shape index: {}]   ;;  %s830_s4 = inlined_call_operand.vmem [shape: bf16[8,128], index: 4, kind: output, shape index: {}]  }
   0x1   :  { %v616_v0 = vld [vmem:[%s826_s1 + $0x40] sm:$0xff]   ;;  %v620_v4 = vld [vmem:[%s826_s1 + $0x48] sm:$0xff]   ;;  %v624_v8 = vld [vmem:[%s826_s1 + $0x50] sm:$0xff]  }
   0x2   :  { %v617_v1 = vld [vmem:[%s826_s1] sm:$0xff]   ;;  %541 = vmatprep.subr.bf16.mxu0 %v616_v0  ;;  %v621_v5 = vld [vmem:[%s826_s1 + $0x8] sm:$0xff]   ;;  %v625_v9 = vld [vmem:[%s826_s1 + $0x10] sm:$0xff]  }
   0x3   :  { %v618_v2 = vld [vmem:[%s826_s1 + $0xc0] sm:$0xff]   ;;  %542 = vmatpush3.bf16.msra.mxu0 %v617_v1  ;;  %v622_v6 = vld [vmem:[%s826_s1 + $0xc8] sm:$0xff]   ;;  %v626_v10 = vld [vmem:[%s826_s1 + $0xd0] sm:$0xff]  }
   0x4   :  { %v619_v3 = vld [vmem:[%s826_s1 + $0x80] sm:$0xff]   ;;  %563 = vmatprep.subr.bf16.mxu1 %v618_v2  ;;  %543 = vmatprep.subr.bf16.mxu0 %v620_v4  ;;  %v623_v7 = vld [vmem:[%s826_s1 + $0x88] sm:$0xff]   ;;  %v627_v11 = vld [vmem:[%s826_s1 + $0x90] sm:$0xff]  }
   0x5   :  { %564 = vmatpush3.bf16.msra.mxu1 %v619_v3  ;;  %v628_v12 = vld [vmem:[%s826_s1 + $0x58] sm:$0xff]   ;;  %v632_v16 = vld [vmem:[%s826_s1 + $0x60] sm:$0xff]   ;;  %v636_v20 = vld [vmem:[%s826_s1 + $0x68] sm:$0xff]  }
   0x6   :  { %565 = vmatprep.subr.bf16.mxu1 %v622_v6  ;;  %v629_v13 = vld [vmem:[%s826_s1 + $0x18] sm:$0xff]   ;;  %v633_v17 = vld [vmem:[%s826_s1 + $0x20] sm:$0xff]   ;;  %v637_v21 = vld [vmem:[%s826_s1 + $0x28] sm:$0xff]  }
   0x7   :  { %544 = vmatpush3.bf16.msra.mxu0 %v621_v5  ;;  %v630_v14 = vld [vmem:[%s826_s1 + $0xd8] sm:$0xff]   ;;  %v634_v18 = vld [vmem:[%s826_s1 + $0xe0] sm:$0xff]   ;;  %v638_v22 = vld [vmem:[%s826_s1 + $0xe8] sm:$0xff]  }
   0x8   :  { %545 = vmatprep.subr.bf16.mxu0 %v624_v8  ;;  %v631_v15 = vld [vmem:[%s826_s1 + $0x98] sm:$0xff]   ;;  %v635_v19 = vld [vmem:[%s826_s1 + $0xa0] sm:$0xff]   ;;  %v639_v23 = vld [vmem:[%s826_s1 + $0xa8] sm:$0xff]  }
   0x9   :  { %566 = vmatpush3.bf16.msra.mxu1 %v623_v7  ;;  %v640_v24 = vld [vmem:[%s826_s1 + $0x70] sm:$0xff]   ;;  %v644_v28 = vld [vmem:[%s826_s1 + $0x78] sm:$0xff]   ;;  %v18_v31 = vld [vmem:[%s827_s0] sm:$0xff] }
   0xa   :  { %567 = vmatprep.subr.bf16.mxu1 %v626_v10  ;;  %v641_v25 = vld [vmem:[%s826_s1 + $0x30] sm:$0xff]   ;;  %v645_v29 = vld [vmem:[%s826_s1 + $0x38] sm:$0xff]   ;;  %v496_v32 = vcombine.low %v18_v31, %v18_v31  ;;  %v497_v33 = vcombine.high %v18_v31, %v18_v31  ;;  %v19_v36 = vld [vmem:[%s827_s0 + $0x8] sm:$0xff] }
   0xb   :  { %546 = vmatpush3.bf16.msra.mxu0 %v625_v9  ;;  %v642_v26 = vld [vmem:[%s826_s1 + $0xf0] sm:$0xff]   ;;  %v646_v30 = vld [vmem:[%s826_s1 + $0xf8] sm:$0xff]   ;;  %v498_v37 = vcombine.low %v19_v36, %v19_v36  ;;  %v499_v38 = vcombine.high %v19_v36, %v19_v36  ;;  %v653_v39 = vld [vmem:[%s826_s1 + $0x100] sm:$0xff]  }
   0xc   :  { %547 = vmatprep.subr.bf16.mxu0 %v628_v12  ;;  %v643_v27 = vld [vmem:[%s826_s1 + $0xb0] sm:$0xff]   ;;  %v650_v34 = vld [vmem:[%s826_s1 + $0xb8] sm:$0xff]   ;;  %398 = vmatprep.mubr.bf16.mxu0 %v497_v33  ;;  %v654_v40 = vld [vmem:[%s826_s1 + $0x108] sm:$0xff]  }
   0xd   :  { %568 = vmatpush3.bf16.msra.mxu1 %v627_v11  ;;  %438 = vmatprep.mubr.bf16.mxu1 %v499_v38  ;;  %v655_v41 = vld [vmem:[%s826_s1 + $0x110] sm:$0xff]   ;;  %v656_v42 = vld [vmem:[%s826_s1 + $0x118] sm:$0xff]   ;;  %v657_v43 = vld [vmem:[%s826_s1 + $0x120] sm:$0xff]  }
   0xe   :  { %569 = vmatprep.subr.bf16.mxu1 %v630_v14  ;;  %v658_v44 = vld [vmem:[%s826_s1 + $0x128] sm:$0xff]   ;;  %v659_v45 = vld [vmem:[%s826_s1 + $0x130] sm:$0xff]   ;;  %v660_v46 = vld [vmem:[%s826_s1 + $0x138] sm:$0xff]  }
   0xf   :  { %548 = vmatpush3.bf16.msra.mxu0 %v629_v13  ;;  %v649_v47 = vld [vmem:[%s827_s0 + $0x10] ss:$0 sps:$4 sm:$0xff]   ;;  %v495_v49 = vld [vmem:[%s828_s2] ss:$0 sm:$0xff] }
  0x10   :  { %549 = vmatprep.subr.bf16.mxu0 %v632_v16  ;;  %v486_v61 = vld [vmem:[%s829_s3] sm:$0xf] }
  0x11   :  { %570 = vmatpush3.bf16.msra.mxu1 %v631_v15  ;;  %v487_v62 = vunpack.c.l.bf16 %v486_v61 }
  0x12   :  { %571 = vmatprep.subr.bf16.mxu1 %v634_v18 }
  0x13   :  { %550 = vmatpush3.bf16.msra.mxu0 %v633_v17 }
  0x14   :  { %551 = vmatprep.subr.bf16.mxu0 %v636_v20 }
  0x15   :  { %572 = vmatpush3.bf16.msra.mxu1 %v635_v19 }
  0x16   :  { %573 = vmatprep.subr.bf16.mxu1 %v638_v22 }
  0x17   :  { %552 = vmatpush3.bf16.msra.mxu0 %v637_v21 }
  0x18   :  { %553 = vmatprep.subr.bf16.mxu0 %v640_v24 }
  0x19   :  { %574 = vmatpush3.bf16.msra.mxu1 %v639_v23 }
  0x1a   :  { %575 = vmatprep.subr.bf16.mxu1 %v642_v26 }
  0x1b   :  { %554 = vmatpush3.bf16.msra.mxu0 %v641_v25 }
  0x1c   :  { %555 = vmatprep.subr.bf16.mxu0 %v644_v28 }
  0x1d   :  { %576 = vmatpush3.bf16.msra.mxu1 %v643_v27 }
  0x1e   :  { %577 = vmatprep.subr.bf16.mxu1 %v646_v30 }
  0x1f   :  { %556 = vmatpush3.bf16.msra.mxu0 %v645_v29 }
  0x20   :  { %594 = vmatprep.subr.bf16.mxu0 %v661_v35 }
  0x21   :  { %578 = vmatpush3.bf16.msra.mxu1 %v650_v34 }
  0x22   :  { %399 = vmatmul.mubr.bf16.vlgmr.msra.gmra.mrb[0].mxu0 %v496_v32 }
  0x23   :  { %595 = vmatpush3.bf16.msra.mxu0 %v653_v39  ;;  %610 = vmatprep.mubr.msk.bf16.mxu0 %vm662_vm0, %v661_v35 }
  0x24   :  { %439 = vmatmul.mubr.bf16.vlgmr.msra.gmra.mrb[0].mxu1 %v498_v37  ;;  %596 = vmatprep.subr.bf16.mxu0 %v661_v35 }
  0x27   :  { %597 = vmatpush3.bf16.msra.mxu0 %v654_v40 }
  0x28   :  { %598 = vmatprep.subr.bf16.mxu0 %v661_v35 }
  0x2b   :  { %599 = vmatpush3.bf16.msra.mxu0 %v655_v41 }
  0x2c   :  { %600 = vmatprep.subr.bf16.mxu0 %v661_v35 }
  0x2f   :  { %601 = vmatpush3.bf16.msra.mxu0 %v656_v42 }
  0x30   :  { %602 = vmatprep.subr.bf16.mxu0 %v661_v35 }
  0x33   :  { %603 = vmatpush3.bf16.msra.mxu0 %v657_v43 }
  0x34   :  { %604 = vmatprep.subr.bf16.mxu0 %v661_v35 }
  0x37   :  { %605 = vmatpush3.bf16.msra.mxu0 %v658_v44 }
  0x38   :  { %606 = vmatprep.subr.bf16.mxu0 %v661_v35 }
  0x3b   :  { %607 = vmatpush3.bf16.msra.mxu0 %v659_v45 }
  0x3c   :  { %608 = vmatprep.subr.bf16.mxu0 %v661_v35 }
  0x3f   :  { %609 = vmatpush3.bf16.msra.mxu0 %v660_v46 }
  0x42   :  { %611 = vmatmul.mubr.bf16.vlgmr.msra.gmra.mrb[4].mxu0 %v649_v47 }
  0xf5   :  { %v557_v48 = vpop.f32.mrb[0].mxu0 }
  0xf6   :  { %v558_v50 = vpop.f32.mrb[1].mxu0 }
  0xf7   :  { %v559_v51 = vadd.f32 %v558_v50, %v557_v48  ;;  %v560_v52 = vpop.f32.mrb[2].mxu0  ;;  %v579_v53 = vpop.f32.mrb[0].mxu1 }
  0xf8   :  { %v561_v54 = vpop.f32.mrb[3].mxu0  ;;  %v580_v55 = vpop.f32.mrb[1].mxu1 }
  0xf9   :  { %v401_v56 = vadd.f32 %v559_v51, %v495_v49  ;;  %v581_v57 = vadd.f32 %v580_v55, %v579_v53  ;;  %v582_v58 = vpop.f32.mrb[2].mxu1 }
  0xfa   :  { %v583_v59 = vpop.f32.mrb[3].mxu1 }
  0xfb   :  { %v441_v60 = vadd.f32 %v581_v57, %v401_v56 }
 0x115   :  { %v480_v63 = vpop.f32.mrb[4].mxu0 }
 0x116   :  { %v481_v0 = vadd.f32 %v480_v63, %v441_v60  ;;  %v612_v1 = vpop.f32.mrb[5].mxu0 }
 0x117   :  { %v483_v2 = vpop.f32.mrb[6].mxu0 }
 0x118   :  { %v488_v3 = vadd.f32 %v487_v62, %v481_v0  ;;  %v613_v4 = vpop.f32.mrb[7].mxu0 }
 0x11a   :  { %v489_v5 = vpack.c.bf16 %v488_v3, %v488_v3 }
 0x11c   :  { %490 = vst [vmem:[%s830_s4] sm:$0xf] %v489_v5 }

</bundles_post_ra>
